<compile_context>
chip_gen: v6e
topology: v6e:2x2x1
jax: 0.10.0
libtpu: 0.0.40
codegen_flags: <defaults>
</compile_context>

<pallas_src>
import math
from functools import partial

import numpy as np

import jax
import jax.numpy as jnp
from jax import lax
from jax.experimental import pallas as pl
from jax.experimental.pallas import tpu as pltpu


def _round_up(x, m):
    return (x + m - 1) // m * m


# ----------------------------------------------------------------------------
# In-kernel helpers (trace-time Python over values; no scratch, no zeroing)
# ----------------------------------------------------------------------------

def _shift_zero(v, s):
    """u[:, p] = v[:, p + s], zero outside [0, L).  s is a static Python int."""
    if s == 0:
        return v
    c, l = v.shape
    z = jnp.zeros((c, abs(s)), v.dtype)
    if s > 0:
        return jnp.concatenate([v[:, s:], z], axis=1)
    return jnp.concatenate([z, v[:, :l + s]], axis=1)


def _tap_accumulate(z, c, h, w, masks):
    """3x3 'shift-accumulate' conv epilogue.

    z: (9*c, h*w) f32 = packed_weights @ input, rows grouped tap-major.
    Returns (c, h*w) f32 = sum over the 9 taps of the shifted, column-masked blocks.
    """
    mask_xm, mask_xp = masks
    acc = None
    t = 0
    for dy in (-1, 0, 1):
        for dx in (-1, 0, 1):
            v = _shift_zero(z[t * c:(t + 1) * c, :], dy * w + dx)
            if dx == 1:
                v = jnp.where(mask_xp, v, 0.0)
            elif dx == -1:
                v = jnp.where(mask_xm, v, 0.0)
            acc = v if acc is None else acc + v
            t += 1
    return acc


def _double_conv(streams, p, c, h, w, masks):
    """(3x3 conv + ReLU) x2 on bf16 streams; returns a (c, h*w) bf16 activation."""
    z = None
    for w_ref, s in zip(p["w1"], streams):
        zi = jnp.dot(w_ref[...], s, preferred_element_type=jnp.float32)
        z = zi if z is None else z + zi
    hid = jnp.maximum(_tap_accumulate(z, c, h, w, masks) + p["b1"][...], 0.0)
    hid = hid.astype(jnp.bfloat16)
    z2 = jnp.dot(p["w2"][...], hid, preferred_element_type=jnp.float32)
    out = jnp.maximum(_tap_accumulate(z2, c, h, w, masks) + p["b2"][...], 0.0)
    return out.astype(jnp.bfloat16)


def _maxpool2x2(a, d_ref, w_pooled):
    """2x2/stride-2 max pool (C, 4*hw) -> (C, hw): shifted maxes + 0/1 gather matmul."""
    wf = 2 * w_pooled
    af = a.astype(jnp.float32)
    m = jnp.maximum(jnp.maximum(af, _shift_zero(af, 1)),
                    jnp.maximum(_shift_zero(af, wf), _shift_zero(af, wf + 1)))
    return jnp.dot(m.astype(jnp.bfloat16), d_ref[...],
                   preferred_element_type=jnp.float32).astype(jnp.bfloat16)


def _unet_apply(P, streams, H, W, ud_refs, get_masks, prev):
    """One UNet: inc -> down* -> up* -> 1x1 outc [+ residual].  Returns (out_pad, H*W) f32."""
    depth = len(P["down"]) + 1
    widths = [P["inc"]["b1"].shape[0]] + [d["b1"].shape[0] for d in P["down"]]

    h, w = H, W
    a = _double_conv(streams, P["inc"], widths[0], h, w, get_masks(h, w))

    skips = []
    for j in range(depth - 1):
        skips.append((a, h, w))
        h, w = h // 2, w // 2
        pooled = _maxpool2x2(a, ud_refs[j][1], w)
        a = _double_conv([pooled], P["down"][j], widths[j + 1], h, w, get_masks(h, w))

    for j in reversed(range(depth - 1)):
        skip, sh, sw = skips[j]
        up = jnp.dot(a, ud_refs[j][0][...],
                     preferred_element_type=jnp.float32).astype(jnp.bfloat16)
        a = _double_conv([skip, up], P["up"][j], widths[j], sh, sw, get_masks(sh, sw))

    y = jnp.dot(P["outc"]["w"][...], a,
                preferred_element_type=jnp.float32) + P["outc"]["b"][...]
    if prev is not None:
        y = y + prev.astype(jnp.float32)
    return y


def _make_forward_kernel(treedef, n_stages, n_levels, n_leaves, H, W, out_ch):
    def kernel(*refs):
        it = iter(refs)
        x_ref = next(it)
        ud_refs = [(next(it), next(it)) for _ in range(n_levels)]
        w_refs = [next(it) for _ in range(n_leaves)]
        out_refs = [next(it) for _ in range(n_stages)]
        unets = jax.tree_util.tree_unflatten(treedef, w_refs)

        x = x_ref[0]                                    # (cin_pad, H*W) bf16

        mask_cache = {}

        def get_masks(h, w):
            if (h, w) not in mask_cache:
                col = lax.broadcasted_iota(jnp.int32, (1, h * w), 1) % w
                mask_cache[(h, w)] = (col != 0, col != (w - 1))
            return mask_cache[(h, w)]

        prev = None
        for si, P in enumerate(unets):
            streams = [x] if prev is None else [x, prev]
            y = _unet_apply(P, streams, H, W, ud_refs, get_masks, prev)
            yb = y.astype(jnp.bfloat16)                 # rows >= out_ch stay exactly 0
            out_refs[si][0] = yb[:out_ch, :]
            prev = yb

    return kernel


# ----------------------------------------------------------------------------
# Wrapper-side constants and the fused forward (one pallas_call)
# ----------------------------------------------------------------------------

def _upsample_matrix(h, w):
    """(h*w//4, h*w) 0/1 nearest-2x upsample gather matrix (exact in bf16)."""
    hl, wl = h // 2, w // 2
    p = np.arange(h * w)
    q = (p // w // 2) * wl + (p % w) // 2
    u = np.zeros((hl * wl, h * w), np.float32)
    u[q, p] = 1.0
    return u


def _pool_select_matrix(h, w):
    """(4*h*w, h*w) 0/1 matrix selecting the top-left of each 2x2 window of (2h, 2w)."""
    ws = 2 * w
    q = np.arange(h * w)
    p0 = (q // w) * 2 * ws + (q % w) * 2
    d = np.zeros((4 * h * w, h * w), np.float32)
    d[p0, q] = 1.0
    return d


def score_residue_u_inspection_forward(packed, x_nchw, out_channels):
    """ScoreResidueUInspection.forward: list of per-stage (N, out_ch, H, W) outputs
    (no sigmoid in the Inspection variant)."""
    n, cin, h, w = x_nchw.shape
    hw = h * w
    cin_pad = _round_up(cin, 8)
    xf = jnp.pad(x_nchw.reshape(n, cin, hw).astype(jnp.bfloat16),
                 ((0, 0), (0, cin_pad - cin), (0, 0)))

    unets = [packed["base"]] + list(packed["res"])
    n_stages = len(unets)
    max_depth = max(len(u["down"]) + 1 for u in unets)
    assert h % (2 ** (max_depth - 1)) == 0 and w % (2 ** (max_depth - 1)) == 0

    # 0/1 up/down-sample gather matrices per resolution transition (trace-time consts).
    ud_mats = []
    hh, ww = h, w
    for _ in range(max_depth - 1):
        hh, ww = hh // 2, ww // 2
        ud_mats.append((jnp.asarray(_upsample_matrix(2 * hh, 2 * ww), jnp.bfloat16),
                        jnp.asarray(_pool_select_matrix(hh, ww), jnp.bfloat16)))

    leaves, treedef = jax.tree_util.tree_flatten(unets)

    inputs = [xf]
    in_specs = [pl.BlockSpec((1, cin_pad, hw), lambda nn: (nn, 0, 0))]
    for u_mat, d_mat in ud_mats:
        inputs += [u_mat, d_mat]
        in_specs += [pl.BlockSpec(u_mat.shape, lambda nn: (0, 0)),
                     pl.BlockSpec(d_mat.shape, lambda nn: (0, 0))]
    for leaf in leaves:
        inputs.append(leaf)
        in_specs.append(pl.BlockSpec(leaf.shape, lambda nn: (0, 0)))

    out_shape = tuple(jax.ShapeDtypeStruct((n, out_channels, hw), jnp.bfloat16)
                      for _ in range(n_stages))
    out_specs = tuple(pl.BlockSpec((1, out_channels, hw), lambda nn: (nn, 0, 0))
                      for _ in range(n_stages))

    kernel = _make_forward_kernel(treedef, n_stages, len(ud_mats), len(leaves),
                                  h, w, out_channels)
    outs = pl.pallas_call(
        kernel,
        out_shape=out_shape,
        grid=(n,),
        in_specs=in_specs,
        out_specs=out_specs,
        compiler_params=pltpu.CompilerParams(
            dimension_semantics=("parallel",)),   # v7x: the two TCs split the batch
    )(*inputs)
    return [o.astype(jnp.float32).reshape(n, out_channels, h, w) for o in outs]


# ----------------------------------------------------------------------------
# Init-time weight packing (hoisted out of the jitted forward)
# ----------------------------------------------------------------------------

def _pack_w3x3(w_oihw, cin_pad):
    """(O, I, 3, 3) -> (9*O, cin_pad) bf16, rows grouped tap-major ((ky, kx), o)."""
    o, i = w_oihw.shape[0], w_oihw.shape[1]
    w2d = jnp.transpose(w_oihw.astype(jnp.float32), (2, 3, 0, 1)).reshape(9 * o, i)
    return jnp.pad(w2d, ((0, 0), (0, cin_pad - i))).astype(jnp.bfloat16)


def _pack_dconv(p, stream_cins):
    c = p["w1"].shape[0]
    slabs, off = [], 0
    for ci in stream_cins:
        slabs.append(_pack_w3x3(p["w1"][:, off:off + ci], _round_up(ci, 8)))
        off += ci
    return {"w1": slabs,
            "b1": p["b1"].astype(jnp.float32),
            "w2": _pack_w3x3(p["w2"], _round_up(c, 8)),
            "b2": p["b2"].astype(jnp.float32)}


def _pack_unet(raw, in_stream_cins):
    depth = len(raw["down"]) + 1
    widths = [raw["inc"]["w2"].shape[0]] + [d["w2"].shape[0] for d in raw["down"]]
    out_ch = raw["outc"]["w"].shape[0]
    out_pad = _round_up(out_ch, 8)
    # Pad the 1x1 out conv to out_pad rows (zeros) so the residual stream is a
    # native (out_pad, HW) value with the padded rows exactly zero end-to-end.
    wo = jnp.zeros((out_pad, widths[0]), jnp.float32).at[:out_ch].set(
        raw["outc"]["w"].astype(jnp.float32))
    bo = jnp.zeros((out_pad, 1), jnp.float32).at[:out_ch].set(
        raw["outc"]["b"].astype(jnp.float32))
    return {
        "inc": _pack_dconv(raw["inc"], in_stream_cins),
        "down": [_pack_dconv(raw["down"][j], [widths[j]]) for j in range(depth - 1)],
        "up": [_pack_dconv(raw["up"][j], [widths[j], widths[j + 1]])
               for j in range(depth - 1)],
        "outc": {"w": wo.astype(jnp.bfloat16), "b": bo},
    }


def pack_params(raw, in_channels, out_channels):
    return {
        "base": _pack_unet(raw["base"], [in_channels]),
        "res": [_pack_unet(rp, [in_channels, out_channels]) for rp in raw["res"]],
    }


# ----------------------------------------------------------------------------
# Parameter init (deterministic, synthetic; canonical OIHW layouts, bf16 weights)
# ----------------------------------------------------------------------------

def _init_conv3x3(key, cin, cout):
    k1, k2 = jax.random.split(key)
    w = (jax.random.normal(k1, (cout, cin, 3, 3), jnp.float32)
         * math.sqrt(2.0 / (9 * cin))).astype(jnp.bfloat16)
    b = jax.random.normal(k2, (cout, 1), jnp.float32) * 0.01
    return w, b


def _init_unet(key, in_ch, out_ch, depth, init_width):
    widths = [init_width * (2 ** i) for i in range(depth)]
    keys = iter(jax.random.split(key, 64))

    def dconv(cin, cmid):
        w1, b1 = _init_conv3x3(next(keys), cin, cmid)
        w2, b2 = _init_conv3x3(next(keys), cmid, cmid)
        return {"w1": w1, "b1": b1, "w2": w2, "b2": b2}

    params = {
        "inc": dconv(in_ch, widths[0]),
        "down": [dconv(widths[j], widths[j + 1]) for j in range(depth - 1)],
        "up": [dconv(widths[j] + widths[j + 1], widths[j]) for j in range(depth - 1)],
    }
    ko1, ko2 = jax.random.split(next(keys))
    wo = (jax.random.normal(ko1, (out_ch, widths[0]), jnp.float32)
          * math.sqrt(1.0 / widths[0])).astype(jnp.bfloat16)
    bo = jax.random.normal(ko2, (out_ch, 1), jnp.float32) * 0.01
    params["outc"] = {"w": wo, "b": bo}
    return params


def init_score_residue_u(key, *, in_channels, out_channels, residue_blocks,
                         base_depth, base_init_width,
                         residue_depth, residue_init_width):
    kb, *krs = jax.random.split(key, residue_blocks + 1)
    return {
        "base": _init_unet(kb, in_channels, out_channels, base_depth, base_init_width),
        "res": [_init_unet(krs[i], in_channels + out_channels, out_channels,
                           residue_depth, residue_init_width)
                for i in range(residue_blocks)],
    }


# ----------------------------------------------------------------------------
# Pure-JAX (XLA) reference of the same math, for in-script validation
# ----------------------------------------------------------------------------

def _ref_conv3x3(x, w_bf16, b, relu=True):
    y = lax.conv_general_dilated(
        x.astype(jnp.bfloat16), w_bf16, (1, 1), ((1, 1), (1, 1)),
        dimension_numbers=("NCHW", "OIHW", "NCHW"),
        preferred_element_type=jnp.float32)
    y = y + b.reshape(1, -1, 1, 1)
    return jnp.maximum(y, 0.0) if relu else y


def _ref_dconv(p, x):
    x = _ref_conv3x3(x, p["w1"], p["b1"])
    x = _ref_conv3x3(x, p["w2"], p["b2"])
    return x


def _ref_unet(params, x, prev=None):
    q = lambda a: a.astype(jnp.bfloat16).astype(jnp.float32)
    depth = len(params["down"]) + 1
    h = q(_ref_dconv(params["inc"], x))
    skips = []
    for j in range(depth - 1):
        skips.append(h)
        hp = lax.reduce_window(h, -jnp.inf, lax.max,
                               (1, 1, 2, 2), (1, 1, 2, 2), "VALID")
        h = q(_ref_dconv(params["down"][j], hp))
    for j in reversed(range(depth - 1)):
        up = jnp.repeat(jnp.repeat(h, 2, axis=2), 2, axis=3)
        h = q(_ref_dconv(params["up"][j], jnp.concatenate([skips[j], up], axis=1)))
    y = (jnp.einsum("oc,nchw->nohw", params["outc"]["w"].astype(jnp.float32), h)
         + params["outc"]["b"].reshape(1, -1, 1, 1))
    if prev is not None:
        y = y + prev
    return q(y)


def reference_forward(params, x_nchw):
    q = lambda a: a.astype(jnp.bfloat16).astype(jnp.float32)
    x = q(x_nchw.astype(jnp.float32))
    y = _ref_unet(params["base"], x)
    outs = [y]
    for rp in params["res"]:
        y = _ref_unet(rp, jnp.concatenate([x, y], axis=1), prev=y)
        outs.append(y)
    return outs


# ----------------------------------------------------------------------------
# Main
# ----------------------------------------------------------------------------

if __name__ == "__main__":
    key = jax.random.PRNGKey(0)
    k_param, k_input = jax.random.split(key)

    in_channels = 1
    out_channels = 3
    residue_blocks = 2
    base_depth = 2
    base_init_width = 8
    residue_depth = 2
    residue_init_width = 8
    N, H, W = 2, 16, 16

    raw_params = init_score_residue_u(
        k_param,
        in_channels=in_channels, out_channels=out_channels,
        residue_blocks=residue_blocks,
        base_depth=base_depth, base_init_width=base_init_width,
        residue_depth=residue_depth, residue_init_width=residue_init_width)
    packed = pack_params(raw_params, in_channels, out_channels)  # hoisted packing

    # Input in the PyTorch NCHW convention.
    x = jax.random.normal(k_input, (N, in_channels, H, W), jnp.float32)

    fwd = jax.jit(partial(score_residue_u_inspection_forward,
                          out_channels=out_channels))
    outputs = fwd(packed, x)
    outputs = [jax.block_until_ready(o) for o in outputs]

    assert len(outputs) == residue_blocks + 1
    for o in outputs:
        assert o.shape == (N, out_channels, H, W)
        assert bool(jnp.all(jnp.isfinite(o)))

    # Validate the fused Pallas pipeline against a pure-JAX reference of the same
    # math (bf16 matmul operands / f32 accumulation, same quantization boundaries,
    # nearest upsample, 2x2 max pool, residual adds).
    refs = reference_forward(raw_params, x)
    for o, r in zip(outputs, refs):
        np.testing.assert_allclose(np.asarray(o), np.asarray(r),
                                   rtol=5e-2, atol=5e-2)

    print("KERNEL_OK")
</pallas_src>

<mosaic_0001>
module attributes {stable_mosaic.version = 11 : i64} {
  func.func @kernel(%arg0: i32, %arg1: memref<1x8x256xbf16, #tpu.memory_space<vmem>>, %arg2: memref<64x256xbf16, #tpu.memory_space<vmem>>, %arg3: memref<256x64xbf16, #tpu.memory_space<vmem>>, %arg4: memref<16x1xf32, #tpu.memory_space<vmem>>, %arg5: memref<16x1xf32, #tpu.memory_space<vmem>>, %arg6: memref<144x8xbf16, #tpu.memory_space<vmem>>, %arg7: memref<144x16xbf16, #tpu.memory_space<vmem>>, %arg8: memref<8x1xf32, #tpu.memory_space<vmem>>, %arg9: memref<8x1xf32, #tpu.memory_space<vmem>>, %arg10: memref<72x8xbf16, #tpu.memory_space<vmem>>, %arg11: memref<72x8xbf16, #tpu.memory_space<vmem>>, %arg12: memref<8x1xf32, #tpu.memory_space<vmem>>, %arg13: memref<8x8xbf16, #tpu.memory_space<vmem>>, %arg14: memref<8x1xf32, #tpu.memory_space<vmem>>, %arg15: memref<8x1xf32, #tpu.memory_space<vmem>>, %arg16: memref<72x8xbf16, #tpu.memory_space<vmem>>, %arg17: memref<72x16xbf16, #tpu.memory_space<vmem>>, %arg18: memref<72x8xbf16, #tpu.memory_space<vmem>>, %arg19: memref<16x1xf32, #tpu.memory_space<vmem>>, %arg20: memref<16x1xf32, #tpu.memory_space<vmem>>, %arg21: memref<144x8xbf16, #tpu.memory_space<vmem>>, %arg22: memref<144x16xbf16, #tpu.memory_space<vmem>>, %arg23: memref<8x1xf32, #tpu.memory_space<vmem>>, %arg24: memref<8x1xf32, #tpu.memory_space<vmem>>, %arg25: memref<72x8xbf16, #tpu.memory_space<vmem>>, %arg26: memref<72x8xbf16, #tpu.memory_space<vmem>>, %arg27: memref<72x8xbf16, #tpu.memory_space<vmem>>, %arg28: memref<8x1xf32, #tpu.memory_space<vmem>>, %arg29: memref<8x8xbf16, #tpu.memory_space<vmem>>, %arg30: memref<8x1xf32, #tpu.memory_space<vmem>>, %arg31: memref<8x1xf32, #tpu.memory_space<vmem>>, %arg32: memref<72x8xbf16, #tpu.memory_space<vmem>>, %arg33: memref<72x16xbf16, #tpu.memory_space<vmem>>, %arg34: memref<72x8xbf16, #tpu.memory_space<vmem>>, %arg35: memref<16x1xf32, #tpu.memory_space<vmem>>, %arg36: memref<16x1xf32, #tpu.memory_space<vmem>>, %arg37: memref<144x8xbf16, #tpu.memory_space<vmem>>, %arg38: memref<144x16xbf16, #tpu.memory_space<vmem>>, %arg39: memref<8x1xf32, #tpu.memory_space<vmem>>, %arg40: memref<8x1xf32, #tpu.memory_space<vmem>>, %arg41: memref<72x8xbf16, #tpu.memory_space<vmem>>, %arg42: memref<72x8xbf16, #tpu.memory_space<vmem>>, %arg43: memref<72x8xbf16, #tpu.memory_space<vmem>>, %arg44: memref<8x1xf32, #tpu.memory_space<vmem>>, %arg45: memref<8x8xbf16, #tpu.memory_space<vmem>>, %arg46: memref<8x1xf32, #tpu.memory_space<vmem>>, %arg47: memref<8x1xf32, #tpu.memory_space<vmem>>, %arg48: memref<72x8xbf16, #tpu.memory_space<vmem>>, %arg49: memref<72x16xbf16, #tpu.memory_space<vmem>>, %arg50: memref<72x8xbf16, #tpu.memory_space<vmem>>, %arg51: memref<1x3x256xbf16, #tpu.memory_space<vmem>>, %arg52: memref<1x3x256xbf16, #tpu.memory_space<vmem>>, %arg53: memref<1x3x256xbf16, #tpu.memory_space<vmem>>) attributes {dimension_semantics = [#tpu.dimension_semantics<parallel>], iteration_bounds = array<i64: 2>, scalar_prefetch = 0 : i64, scratch_operands = 0 : i64, tpu.core_type = #tpu.core_type<tc>, window_params = [{transform_indices = @transform_0, window_bounds = array<i64: 1, 8, 256>}, {pipeline_mode = #tpu.pipeline_mode<synchronous>, transform_indices = @transform_1, window_bounds = array<i64: 64, 256>}, {pipeline_mode = #tpu.pipeline_mode<synchronous>, transform_indices = @transform_2, window_bounds = array<i64: 256, 64>}, {pipeline_mode = #tpu.pipeline_mode<synchronous>, transform_indices = @transform_3, window_bounds = array<i64: 16, 1>}, {pipeline_mode = #tpu.pipeline_mode<synchronous>, transform_indices = @transform_4, window_bounds = array<i64: 16, 1>}, {pipeline_mode = #tpu.pipeline_mode<synchronous>, transform_indices = @transform_5, window_bounds = array<i64: 144, 8>}, {pipeline_mode = #tpu.pipeline_mode<synchronous>, transform_indices = @transform_6, window_bounds = array<i64: 144, 16>}, {pipeline_mode = #tpu.pipeline_mode<synchronous>, transform_indices = @transform_7, window_bounds = array<i64: 8, 1>}, {pipeline_mode = #tpu.pipeline_mode<synchronous>, transform_indices = @transform_8, window_bounds = array<i64: 8, 1>}, {pipeline_mode = #tpu.pipeline_mode<synchronous>, transform_indices = @transform_9, window_bounds = array<i64: 72, 8>}, {pipeline_mode = #tpu.pipeline_mode<synchronous>, transform_indices = @transform_10, window_bounds = array<i64: 72, 8>}, {pipeline_mode = #tpu.pipeline_mode<synchronous>, transform_indices = @transform_11, window_bounds = array<i64: 8, 1>}, {pipeline_mode = #tpu.pipeline_mode<synchronous>, transform_indices = @transform_12, window_bounds = array<i64: 8, 8>}, {pipeline_mode = #tpu.pipeline_mode<synchronous>, transform_indices = @transform_13, window_bounds = array<i64: 8, 1>}, {pipeline_mode = #tpu.pipeline_mode<synchronous>, transform_indices = @transform_14, window_bounds = array<i64: 8, 1>}, {pipeline_mode = #tpu.pipeline_mode<synchronous>, transform_indices = @transform_15, window_bounds = array<i64: 72, 8>}, {pipeline_mode = #tpu.pipeline_mode<synchronous>, transform_indices = @transform_16, window_bounds = array<i64: 72, 16>}, {pipeline_mode = #tpu.pipeline_mode<synchronous>, transform_indices = @transform_17, window_bounds = array<i64: 72, 8>}, {pipeline_mode = #tpu.pipeline_mode<synchronous>, transform_indices = @transform_18, window_bounds = array<i64: 16, 1>}, {pipeline_mode = #tpu.pipeline_mode<synchronous>, transform_indices = @transform_19, window_bounds = array<i64: 16, 1>}, {pipeline_mode = #tpu.pipeline_mode<synchronous>, transform_indices = @transform_20, window_bounds = array<i64: 144, 8>}, {pipeline_mode = #tpu.pipeline_mode<synchronous>, transform_indices = @transform_21, window_bounds = array<i64: 144, 16>}, {pipeline_mode = #tpu.pipeline_mode<synchronous>, transform_indices = @transform_22, window_bounds = array<i64: 8, 1>}, {pipeline_mode = #tpu.pipeline_mode<synchronous>, transform_indices = @transform_23, window_bounds = array<i64: 8, 1>}, {pipeline_mode = #tpu.pipeline_mode<synchronous>, transform_indices = @transform_24, window_bounds = array<i64: 72, 8>}, {pipeline_mode = #tpu.pipeline_mode<synchronous>, transform_indices = @transform_25, window_bounds = array<i64: 72, 8>}, {pipeline_mode = #tpu.pipeline_mode<synchronous>, transform_indices = @transform_26, window_bounds = array<i64: 72, 8>}, {pipeline_mode = #tpu.pipeline_mode<synchronous>, transform_indices = @transform_27, window_bounds = array<i64: 8, 1>}, {pipeline_mode = #tpu.pipeline_mode<synchronous>, transform_indices = @transform_28, window_bounds = array<i64: 8, 8>}, {pipeline_mode = #tpu.pipeline_mode<synchronous>, transform_indices = @transform_29, window_bounds = array<i64: 8, 1>}, {pipeline_mode = #tpu.pipeline_mode<synchronous>, transform_indices = @transform_30, window_bounds = array<i64: 8, 1>}, {pipeline_mode = #tpu.pipeline_mode<synchronous>, transform_indices = @transform_31, window_bounds = array<i64: 72, 8>}, {pipeline_mode = #tpu.pipeline_mode<synchronous>, transform_indices = @transform_32, window_bounds = array<i64: 72, 16>}, {pipeline_mode = #tpu.pipeline_mode<synchronous>, transform_indices = @transform_33, window_bounds = array<i64: 72, 8>}, {pipeline_mode = #tpu.pipeline_mode<synchronous>, transform_indices = @transform_34, window_bounds = array<i64: 16, 1>}, {pipeline_mode = #tpu.pipeline_mode<synchronous>, transform_indices = @transform_35, window_bounds = array<i64: 16, 1>}, {pipeline_mode = #tpu.pipeline_mode<synchronous>, transform_indices = @transform_36, window_bounds = array<i64: 144, 8>}, {pipeline_mode = #tpu.pipeline_mode<synchronous>, transform_indices = @transform_37, window_bounds = array<i64: 144, 16>}, {pipeline_mode = #tpu.pipeline_mode<synchronous>, transform_indices = @transform_38, window_bounds = array<i64: 8, 1>}, {pipeline_mode = #tpu.pipeline_mode<synchronous>, transform_indices = @transform_39, window_bounds = array<i64: 8, 1>}, {pipeline_mode = #tpu.pipeline_mode<synchronous>, transform_indices = @transform_40, window_bounds = array<i64: 72, 8>}, {pipeline_mode = #tpu.pipeline_mode<synchronous>, transform_indices = @transform_41, window_bounds = array<i64: 72, 8>}, {pipeline_mode = #tpu.pipeline_mode<synchronous>, transform_indices = @transform_42, window_bounds = array<i64: 72, 8>}, {pipeline_mode = #tpu.pipeline_mode<synchronous>, transform_indices = @transform_43, window_bounds = array<i64: 8, 1>}, {pipeline_mode = #tpu.pipeline_mode<synchronous>, transform_indices = @transform_44, window_bounds = array<i64: 8, 8>}, {pipeline_mode = #tpu.pipeline_mode<synchronous>, transform_indices = @transform_45, window_bounds = array<i64: 8, 1>}, {pipeline_mode = #tpu.pipeline_mode<synchronous>, transform_indices = @transform_46, window_bounds = array<i64: 8, 1>}, {pipeline_mode = #tpu.pipeline_mode<synchronous>, transform_indices = @transform_47, window_bounds = array<i64: 72, 8>}, {pipeline_mode = #tpu.pipeline_mode<synchronous>, transform_indices = @transform_48, window_bounds = array<i64: 72, 16>}, {pipeline_mode = #tpu.pipeline_mode<synchronous>, transform_indices = @transform_49, window_bounds = array<i64: 72, 8>}, {transform_indices = @transform_50, window_bounds = array<i64: 1, 3, 256>}, {transform_indices = @transform_51, window_bounds = array<i64: 1, 3, 256>}, {transform_indices = @transform_52, window_bounds = array<i64: 1, 3, 256>}]} {
    %c0 = arith.constant 0 : index
    %c0_0 = arith.constant 0 : index
    %c0_1 = arith.constant 0 : index
    %0 = vector.load %arg1[%c0, %c0_0, %c0_1] : memref<1x8x256xbf16, #tpu.memory_space<vmem>>, vector<1x8x256xbf16>
    %1 = vector.shape_cast %0 : vector<1x8x256xbf16> to vector<8x256xbf16>
    %2 = tpu.iota {dimensions = array<i32: 1>} : vector<1x256xi32>
    %c16_i32 = arith.constant 16 : i32
    %c0_i32 = arith.constant 0 : i32
    %3 = arith.cmpi eq, %c16_i32, %c0_i32 : i32
    %c1_i32 = arith.constant 1 : i32
    %4 = arith.select %3, %c1_i32, %c16_i32 : i32
    %5 = vector.broadcast %4 : i32 to vector<1x256xi32>
    %6 = arith.remsi %2, %5 : vector<1x256xi32>
    %c0_i32_2 = arith.constant 0 : i32
    %7 = vector.broadcast %c0_i32_2 : i32 to vector<1x256xi32>
    %8 = arith.cmpi ne, %6, %7 : vector<1x256xi32>
    %c0_i32_3 = arith.constant 0 : i32
    %9 = vector.broadcast %c0_i32_3 : i32 to vector<1x256xi32>
    %10 = arith.cmpi slt, %6, %9 : vector<1x256xi32>
    %c0_i32_4 = arith.constant 0 : i32
    %11 = arith.cmpi slt, %4, %c0_i32_4 : i32
    %12 = vector.broadcast %11 : i1 to vector<1x256xi1>
    %13 = vector.broadcast %12 : vector<1x256xi1> to vector<1x256xi1>
    %14 = arith.xori %10, %13 : vector<1x256xi1>
    %15 = arith.andi %14, %8 : vector<1x256xi1>
    %16 = vector.broadcast %4 : i32 to vector<1x256xi32>
    %17 = arith.addi %6, %16 : vector<1x256xi32>
    %18 = arith.select %15, %17, %6 : vector<1x256xi1>, vector<1x256xi32>
    %c0_i32_5 = arith.constant 0 : i32
    %19 = vector.broadcast %c0_i32_5 : i32 to vector<1x256xi32>
    %20 = arith.cmpi ne, %18, %19 : vector<1x256xi32>
    %c15_i32 = arith.constant 15 : i32
    %21 = vector.broadcast %c15_i32 : i32 to vector<1x256xi32>
    %22 = arith.cmpi ne, %18, %21 : vector<1x256xi32>
    %c0_6 = arith.constant 0 : index
    %c0_7 = arith.constant 0 : index
    %23 = vector.load %arg10[%c0_6, %c0_7] : memref<72x8xbf16, #tpu.memory_space<vmem>>, vector<72x8xbf16>
    %cst = arith.constant dense<0.000000e+00> : vector<72x256xf32>
    %24 = tpu.matmul %23, %1, %cst {dimension_numbers = #tpu.dot_dimension_numbers<[1], [0], [0], [1], [0, 0, 1, 1], [], []>} : vector<72x8xbf16>, vector<8x256xbf16>, vector<72x256xf32> -> vector<72x256xf32>
    %25 = vector.extract_strided_slice %24 {offsets = [0, 0], sizes = [8, 256], strides = [1, 1]} : vector<72x256xf32> to vector<8x256xf32>
    %cst_8 = arith.constant 0.000000e+00 : f32
    %26 = vector.broadcast %cst_8 : f32 to vector<8x17xf32>
    %27 = vector.extract_strided_slice %25 {offsets = [0, 0], sizes = [8, 239], strides = [1, 1]} : vector<8x256xf32> to vector<8x239xf32>
    %28 = tpu.concatenate %26, %27 in 1 : vector<8x17xf32>, vector<8x239xf32> -> vector<8x256xf32>
    %cst_9 = arith.constant 0.000000e+00 : f32
    %29 = vector.shape_cast %20 : vector<1x256xi1> to vector<1x256xi1>
    %30 = vector.broadcast %29 : vector<1x256xi1> to vector<8x256xi1>
    %31 = vector.broadcast %cst_9 : f32 to vector<8x256xf32>
    %32 = arith.select %30, %28, %31 : vector<8x256xi1>, vector<8x256xf32>
    %33 = vector.extract_strided_slice %24 {offsets = [8, 0], sizes = [8, 256], strides = [1, 1]} : vector<72x256xf32> to vector<8x256xf32>
    %cst_10 = arith.constant 0.000000e+00 : f32
    %34 = vector.broadcast %cst_10 : f32 to vector<8x16xf32>
    %35 = vector.extract_strided_slice %33 {offsets = [0, 0], sizes = [8, 240], strides = [1, 1]} : vector<8x256xf32> to vector<8x240xf32>
    %36 = tpu.concatenate %34, %35 in 1 : vector<8x16xf32>, vector<8x240xf32> -> vector<8x256xf32>
    %37 = arith.addf %32, %36 : vector<8x256xf32>
    %38 = vector.extract_strided_slice %24 {offsets = [16, 0], sizes = [8, 256], strides = [1, 1]} : vector<72x256xf32> to vector<8x256xf32>
    %cst_11 = arith.constant 0.000000e+00 : f32
    %39 = vector.broadcast %cst_11 : f32 to vector<8x15xf32>
    %40 = vector.extract_strided_slice %38 {offsets = [0, 0], sizes = [8, 241], strides = [1, 1]} : vector<8x256xf32> to vector<8x241xf32>
    %41 = tpu.concatenate %39, %40 in 1 : vector<8x15xf32>, vector<8x241xf32> -> vector<8x256xf32>
    %cst_12 = arith.constant 0.000000e+00 : f32
    %42 = vector.shape_cast %22 : vector<1x256xi1> to vector<1x256xi1>
    %43 = vector.broadcast %42 : vector<1x256xi1> to vector<8x256xi1>
    %44 = vector.broadcast %cst_12 : f32 to vector<8x256xf32>
    %45 = arith.select %43, %41, %44 : vector<8x256xi1>, vector<8x256xf32>
    %46 = arith.addf %37, %45 : vector<8x256xf32>
    %47 = vector.extract_strided_slice %24 {offsets = [24, 0], sizes = [8, 256], strides = [1, 1]} : vector<72x256xf32> to vector<8x256xf32>
    %cst_13 = arith.constant 0.000000e+00 : f32
    %48 = vector.broadcast %cst_13 : f32 to vector<8x1xf32>
    %49 = vector.extract_strided_slice %47 {offsets = [0, 0], sizes = [8, 255], strides = [1, 1]} : vector<8x256xf32> to vector<8x255xf32>
    %50 = tpu.concatenate %48, %49 in 1 : vector<8x1xf32>, vector<8x255xf32> -> vector<8x256xf32>
    %cst_14 = arith.constant 0.000000e+00 : f32
    %51 = vector.shape_cast %20 : vector<1x256xi1> to vector<1x256xi1>
    %52 = vector.broadcast %51 : vector<1x256xi1> to vector<8x256xi1>
    %53 = vector.broadcast %cst_14 : f32 to vector<8x256xf32>
    %54 = arith.select %52, %50, %53 : vector<8x256xi1>, vector<8x256xf32>
    %55 = arith.addf %46, %54 : vector<8x256xf32>
    %56 = vector.extract_strided_slice %24 {offsets = [32, 0], sizes = [8, 256], strides = [1, 1]} : vector<72x256xf32> to vector<8x256xf32>
    %57 = arith.addf %55, %56 : vector<8x256xf32>
    %58 = vector.extract_strided_slice %24 {offsets = [40, 0], sizes = [8, 256], strides = [1, 1]} : vector<72x256xf32> to vector<8x256xf32>
    %cst_15 = arith.constant 0.000000e+00 : f32
    %59 = vector.broadcast %cst_15 : f32 to vector<8x1xf32>
    %60 = vector.extract_strided_slice %58 {offsets = [0, 1], sizes = [8, 255], strides = [1, 1]} : vector<8x256xf32> to vector<8x255xf32>
    %61 = tpu.concatenate %60, %59 in 1 : vector<8x255xf32>, vector<8x1xf32> -> vector<8x256xf32>
    %cst_16 = arith.constant 0.000000e+00 : f32
    %62 = vector.shape_cast %22 : vector<1x256xi1> to vector<1x256xi1>
    %63 = vector.broadcast %62 : vector<1x256xi1> to vector<8x256xi1>
    %64 = vector.broadcast %cst_16 : f32 to vector<8x256xf32>
    %65 = arith.select %63, %61, %64 : vector<8x256xi1>, vector<8x256xf32>
    %66 = arith.addf %57, %65 : vector<8x256xf32>
    %67 = vector.extract_strided_slice %24 {offsets = [48, 0], sizes = [8, 256], strides = [1, 1]} : vector<72x256xf32> to vector<8x256xf32>
    %cst_17 = arith.constant 0.000000e+00 : f32
    %68 = vector.broadcast %cst_17 : f32 to vector<8x15xf32>
    %69 = vector.extract_strided_slice %67 {offsets = [0, 15], sizes = [8, 241], strides = [1, 1]} : vector<8x256xf32> to vector<8x241xf32>
    %70 = tpu.concatenate %69, %68 in 1 : vector<8x241xf32>, vector<8x15xf32> -> vector<8x256xf32>
    %cst_18 = arith.constant 0.000000e+00 : f32
    %71 = vector.shape_cast %20 : vector<1x256xi1> to vector<1x256xi1>
    %72 = vector.broadcast %71 : vector<1x256xi1> to vector<8x256xi1>
    %73 = vector.broadcast %cst_18 : f32 to vector<8x256xf32>
    %74 = arith.select %72, %70, %73 : vector<8x256xi1>, vector<8x256xf32>
    %75 = arith.addf %66, %74 : vector<8x256xf32>
    %76 = vector.extract_strided_slice %24 {offsets = [56, 0], sizes = [8, 256], strides = [1, 1]} : vector<72x256xf32> to vector<8x256xf32>
    %cst_19 = arith.constant 0.000000e+00 : f32
    %77 = vector.broadcast %cst_19 : f32 to vector<8x16xf32>
    %78 = vector.extract_strided_slice %76 {offsets = [0, 16], sizes = [8, 240], strides = [1, 1]} : vector<8x256xf32> to vector<8x240xf32>
    %79 = tpu.concatenate %78, %77 in 1 : vector<8x240xf32>, vector<8x16xf32> -> vector<8x256xf32>
    %80 = arith.addf %75, %79 : vector<8x256xf32>
    %81 = vector.extract_strided_slice %24 {offsets = [64, 0], sizes = [8, 256], strides = [1, 1]} : vector<72x256xf32> to vector<8x256xf32>
    %cst_20 = arith.constant 0.000000e+00 : f32
    %82 = vector.broadcast %cst_20 : f32 to vector<8x17xf32>
    %83 = vector.extract_strided_slice %81 {offsets = [0, 17], sizes = [8, 239], strides = [1, 1]} : vector<8x256xf32> to vector<8x239xf32>
    %84 = tpu.concatenate %83, %82 in 1 : vector<8x239xf32>, vector<8x17xf32> -> vector<8x256xf32>
    %cst_21 = arith.constant 0.000000e+00 : f32
    %85 = vector.shape_cast %22 : vector<1x256xi1> to vector<1x256xi1>
    %86 = vector.broadcast %85 : vector<1x256xi1> to vector<8x256xi1>
    %87 = vector.broadcast %cst_21 : f32 to vector<8x256xf32>
    %88 = arith.select %86, %84, %87 : vector<8x256xi1>, vector<8x256xf32>
    %89 = arith.addf %80, %88 : vector<8x256xf32>
    %c0_22 = arith.constant 0 : index
    %c0_23 = arith.constant 0 : index
    %90 = vector.load %arg8[%c0_22, %c0_23] : memref<8x1xf32, #tpu.memory_space<vmem>>, vector<8x1xf32>
    %91 = vector.broadcast %90 : vector<8x1xf32> to vector<8x256xf32>
    %92 = arith.addf %89, %91 : vector<8x256xf32>
    %cst_24 = arith.constant 0.000000e+00 : f32
    %93 = vector.broadcast %cst_24 : f32 to vector<8x256xf32>
    %94 = arith.maximumf %92, %93 : vector<8x256xf32>
    %95 = arith.truncf %94 : vector<8x256xf32> to vector<8x256xbf16>
    %c0_25 = arith.constant 0 : index
    %c0_26 = arith.constant 0 : index
    %96 = vector.load %arg11[%c0_25, %c0_26] : memref<72x8xbf16, #tpu.memory_space<vmem>>, vector<72x8xbf16>
    %cst_27 = arith.constant dense<0.000000e+00> : vector<72x256xf32>
    %97 = tpu.matmul %96, %95, %cst_27 {dimension_numbers = #tpu.dot_dimension_numbers<[1], [0], [0], [1], [0, 0, 1, 1], [], []>} : vector<72x8xbf16>, vector<8x256xbf16>, vector<72x256xf32> -> vector<72x256xf32>
    %98 = vector.extract_strided_slice %97 {offsets = [0, 0], sizes = [8, 256], strides = [1, 1]} : vector<72x256xf32> to vector<8x256xf32>
    %cst_28 = arith.constant 0.000000e+00 : f32
    %99 = vector.broadcast %cst_28 : f32 to vector<8x17xf32>
    %100 = vector.extract_strided_slice %98 {offsets = [0, 0], sizes = [8, 239], strides = [1, 1]} : vector<8x256xf32> to vector<8x239xf32>
    %101 = tpu.concatenate %99, %100 in 1 : vector<8x17xf32>, vector<8x239xf32> -> vector<8x256xf32>
    %cst_29 = arith.constant 0.000000e+00 : f32
    %102 = vector.shape_cast %20 : vector<1x256xi1> to vector<1x256xi1>
    %103 = vector.broadcast %102 : vector<1x256xi1> to vector<8x256xi1>
    %104 = vector.broadcast %cst_29 : f32 to vector<8x256xf32>
    %105 = arith.select %103, %101, %104 : vector<8x256xi1>, vector<8x256xf32>
    %106 = vector.extract_strided_slice %97 {offsets = [8, 0], sizes = [8, 256], strides = [1, 1]} : vector<72x256xf32> to vector<8x256xf32>
    %cst_30 = arith.constant 0.000000e+00 : f32
    %107 = vector.broadcast %cst_30 : f32 to vector<8x16xf32>
    %108 = vector.extract_strided_slice %106 {offsets = [0, 0], sizes = [8, 240], strides = [1, 1]} : vector<8x256xf32> to vector<8x240xf32>
    %109 = tpu.concatenate %107, %108 in 1 : vector<8x16xf32>, vector<8x240xf32> -> vector<8x256xf32>
    %110 = arith.addf %105, %109 : vector<8x256xf32>
    %111 = vector.extract_strided_slice %97 {offsets = [16, 0], sizes = [8, 256], strides = [1, 1]} : vector<72x256xf32> to vector<8x256xf32>
    %cst_31 = arith.constant 0.000000e+00 : f32
    %112 = vector.broadcast %cst_31 : f32 to vector<8x15xf32>
    %113 = vector.extract_strided_slice %111 {offsets = [0, 0], sizes = [8, 241], strides = [1, 1]} : vector<8x256xf32> to vector<8x241xf32>
    %114 = tpu.concatenate %112, %113 in 1 : vector<8x15xf32>, vector<8x241xf32> -> vector<8x256xf32>
    %cst_32 = arith.constant 0.000000e+00 : f32
    %115 = vector.shape_cast %22 : vector<1x256xi1> to vector<1x256xi1>
    %116 = vector.broadcast %115 : vector<1x256xi1> to vector<8x256xi1>
    %117 = vector.broadcast %cst_32 : f32 to vector<8x256xf32>
    %118 = arith.select %116, %114, %117 : vector<8x256xi1>, vector<8x256xf32>
    %119 = arith.addf %110, %118 : vector<8x256xf32>
    %120 = vector.extract_strided_slice %97 {offsets = [24, 0], sizes = [8, 256], strides = [1, 1]} : vector<72x256xf32> to vector<8x256xf32>
    %cst_33 = arith.constant 0.000000e+00 : f32
    %121 = vector.broadcast %cst_33 : f32 to vector<8x1xf32>
    %122 = vector.extract_strided_slice %120 {offsets = [0, 0], sizes = [8, 255], strides = [1, 1]} : vector<8x256xf32> to vector<8x255xf32>
    %123 = tpu.concatenate %121, %122 in 1 : vector<8x1xf32>, vector<8x255xf32> -> vector<8x256xf32>
    %cst_34 = arith.constant 0.000000e+00 : f32
    %124 = vector.shape_cast %20 : vector<1x256xi1> to vector<1x256xi1>
    %125 = vector.broadcast %124 : vector<1x256xi1> to vector<8x256xi1>
    %126 = vector.broadcast %cst_34 : f32 to vector<8x256xf32>
    %127 = arith.select %125, %123, %126 : vector<8x256xi1>, vector<8x256xf32>
    %128 = arith.addf %119, %127 : vector<8x256xf32>
    %129 = vector.extract_strided_slice %97 {offsets = [32, 0], sizes = [8, 256], strides = [1, 1]} : vector<72x256xf32> to vector<8x256xf32>
    %130 = arith.addf %128, %129 : vector<8x256xf32>
    %131 = vector.extract_strided_slice %97 {offsets = [40, 0], sizes = [8, 256], strides = [1, 1]} : vector<72x256xf32> to vector<8x256xf32>
    %cst_35 = arith.constant 0.000000e+00 : f32
    %132 = vector.broadcast %cst_35 : f32 to vector<8x1xf32>
    %133 = vector.extract_strided_slice %131 {offsets = [0, 1], sizes = [8, 255], strides = [1, 1]} : vector<8x256xf32> to vector<8x255xf32>
    %134 = tpu.concatenate %133, %132 in 1 : vector<8x255xf32>, vector<8x1xf32> -> vector<8x256xf32>
    %cst_36 = arith.constant 0.000000e+00 : f32
    %135 = vector.shape_cast %22 : vector<1x256xi1> to vector<1x256xi1>
    %136 = vector.broadcast %135 : vector<1x256xi1> to vector<8x256xi1>
    %137 = vector.broadcast %cst_36 : f32 to vector<8x256xf32>
    %138 = arith.select %136, %134, %137 : vector<8x256xi1>, vector<8x256xf32>
    %139 = arith.addf %130, %138 : vector<8x256xf32>
    %140 = vector.extract_strided_slice %97 {offsets = [48, 0], sizes = [8, 256], strides = [1, 1]} : vector<72x256xf32> to vector<8x256xf32>
    %cst_37 = arith.constant 0.000000e+00 : f32
    %141 = vector.broadcast %cst_37 : f32 to vector<8x15xf32>
    %142 = vector.extract_strided_slice %140 {offsets = [0, 15], sizes = [8, 241], strides = [1, 1]} : vector<8x256xf32> to vector<8x241xf32>
    %143 = tpu.concatenate %142, %141 in 1 : vector<8x241xf32>, vector<8x15xf32> -> vector<8x256xf32>
    %cst_38 = arith.constant 0.000000e+00 : f32
    %144 = vector.shape_cast %20 : vector<1x256xi1> to vector<1x256xi1>
    %145 = vector.broadcast %144 : vector<1x256xi1> to vector<8x256xi1>
    %146 = vector.broadcast %cst_38 : f32 to vector<8x256xf32>
    %147 = arith.select %145, %143, %146 : vector<8x256xi1>, vector<8x256xf32>
    %148 = arith.addf %139, %147 : vector<8x256xf32>
    %149 = vector.extract_strided_slice %97 {offsets = [56, 0], sizes = [8, 256], strides = [1, 1]} : vector<72x256xf32> to vector<8x256xf32>
    %cst_39 = arith.constant 0.000000e+00 : f32
    %150 = vector.broadcast %cst_39 : f32 to vector<8x16xf32>
    %151 = vector.extract_strided_slice %149 {offsets = [0, 16], sizes = [8, 240], strides = [1, 1]} : vector<8x256xf32> to vector<8x240xf32>
    %152 = tpu.concatenate %151, %150 in 1 : vector<8x240xf32>, vector<8x16xf32> -> vector<8x256xf32>
    %153 = arith.addf %148, %152 : vector<8x256xf32>
    %154 = vector.extract_strided_slice %97 {offsets = [64, 0], sizes = [8, 256], strides = [1, 1]} : vector<72x256xf32> to vector<8x256xf32>
    %cst_40 = arith.constant 0.000000e+00 : f32
    %155 = vector.broadcast %cst_40 : f32 to vector<8x17xf32>
    %156 = vector.extract_strided_slice %154 {offsets = [0, 17], sizes = [8, 239], strides = [1, 1]} : vector<8x256xf32> to vector<8x239xf32>
    %157 = tpu.concatenate %156, %155 in 1 : vector<8x239xf32>, vector<8x17xf32> -> vector<8x256xf32>
    %cst_41 = arith.constant 0.000000e+00 : f32
    %158 = vector.shape_cast %22 : vector<1x256xi1> to vector<1x256xi1>
    %159 = vector.broadcast %158 : vector<1x256xi1> to vector<8x256xi1>
    %160 = vector.broadcast %cst_41 : f32 to vector<8x256xf32>
    %161 = arith.select %159, %157, %160 : vector<8x256xi1>, vector<8x256xf32>
    %162 = arith.addf %153, %161 : vector<8x256xf32>
    %c0_42 = arith.constant 0 : index
    %c0_43 = arith.constant 0 : index
    %163 = vector.load %arg9[%c0_42, %c0_43] : memref<8x1xf32, #tpu.memory_space<vmem>>, vector<8x1xf32>
    %164 = vector.broadcast %163 : vector<8x1xf32> to vector<8x256xf32>
    %165 = arith.addf %162, %164 : vector<8x256xf32>
    %cst_44 = arith.constant 0.000000e+00 : f32
    %166 = vector.broadcast %cst_44 : f32 to vector<8x256xf32>
    %167 = arith.maximumf %165, %166 : vector<8x256xf32>
    %168 = arith.truncf %167 : vector<8x256xf32> to vector<8x256xbf16>
    %169 = arith.extf %168 : vector<8x256xbf16> to vector<8x256xf32>
    %cst_45 = arith.constant 0.000000e+00 : f32
    %170 = vector.broadcast %cst_45 : f32 to vector<8x1xf32>
    %171 = vector.extract_strided_slice %169 {offsets = [0, 1], sizes = [8, 255], strides = [1, 1]} : vector<8x256xf32> to vector<8x255xf32>
    %172 = tpu.concatenate %171, %170 in 1 : vector<8x255xf32>, vector<8x1xf32> -> vector<8x256xf32>
    %173 = arith.maximumf %169, %172 : vector<8x256xf32>
    %cst_46 = arith.constant 0.000000e+00 : f32
    %174 = vector.broadcast %cst_46 : f32 to vector<8x16xf32>
    %175 = vector.extract_strided_slice %169 {offsets = [0, 16], sizes = [8, 240], strides = [1, 1]} : vector<8x256xf32> to vector<8x240xf32>
    %176 = tpu.concatenate %175, %174 in 1 : vector<8x240xf32>, vector<8x16xf32> -> vector<8x256xf32>
    %cst_47 = arith.constant 0.000000e+00 : f32
    %177 = vector.broadcast %cst_47 : f32 to vector<8x17xf32>
    %178 = vector.extract_strided_slice %169 {offsets = [0, 17], sizes = [8, 239], strides = [1, 1]} : vector<8x256xf32> to vector<8x239xf32>
    %179 = tpu.concatenate %178, %177 in 1 : vector<8x239xf32>, vector<8x17xf32> -> vector<8x256xf32>
    %180 = arith.maximumf %176, %179 : vector<8x256xf32>
    %181 = arith.maximumf %173, %180 : vector<8x256xf32>
    %182 = arith.truncf %181 : vector<8x256xf32> to vector<8x256xbf16>
    %c0_48 = arith.constant 0 : index
    %c0_49 = arith.constant 0 : index
    %183 = vector.load %arg3[%c0_48, %c0_49] : memref<256x64xbf16, #tpu.memory_space<vmem>>, vector<256x64xbf16>
    %cst_50 = arith.constant dense<0.000000e+00> : vector<8x64xf32>
    %184 = tpu.matmul %182, %183, %cst_50 {dimension_numbers = #tpu.dot_dimension_numbers<[1], [0], [0], [1], [0, 0, 1, 1], [], []>} : vector<8x256xbf16>, vector<256x64xbf16>, vector<8x64xf32> -> vector<8x64xf32>
    %185 = arith.truncf %184 : vector<8x64xf32> to vector<8x64xbf16>
    %186 = tpu.iota {dimensions = array<i32: 1>} : vector<1x64xi32>
    %c8_i32 = arith.constant 8 : i32
    %c0_i32_51 = arith.constant 0 : i32
    %187 = arith.cmpi eq, %c8_i32, %c0_i32_51 : i32
    %c1_i32_52 = arith.constant 1 : i32
    %188 = arith.select %187, %c1_i32_52, %c8_i32 : i32
    %189 = vector.broadcast %188 : i32 to vector<1x64xi32>
    %190 = arith.remsi %186, %189 : vector<1x64xi32>
    %c0_i32_53 = arith.constant 0 : i32
    %191 = vector.broadcast %c0_i32_53 : i32 to vector<1x64xi32>
    %192 = arith.cmpi ne, %190, %191 : vector<1x64xi32>
    %c0_i32_54 = arith.constant 0 : i32
    %193 = vector.broadcast %c0_i32_54 : i32 to vector<1x64xi32>
    %194 = arith.cmpi slt, %190, %193 : vector<1x64xi32>
    %c0_i32_55 = arith.constant 0 : i32
    %195 = arith.cmpi slt, %188, %c0_i32_55 : i32
    %196 = vector.broadcast %195 : i1 to vector<1x64xi1>
    %197 = vector.broadcast %196 : vector<1x64xi1> to vector<1x64xi1>
    %198 = arith.xori %194, %197 : vector<1x64xi1>
    %199 = arith.andi %198, %192 : vector<1x64xi1>
    %200 = vector.broadcast %188 : i32 to vector<1x64xi32>
    %201 = arith.addi %190, %200 : vector<1x64xi32>
    %202 = arith.select %199, %201, %190 : vector<1x64xi1>, vector<1x64xi32>
    %c0_i32_56 = arith.constant 0 : i32
    %203 = vector.broadcast %c0_i32_56 : i32 to vector<1x64xi32>
    %204 = arith.cmpi ne, %202, %203 : vector<1x64xi32>
    %c7_i32 = arith.constant 7 : i32
    %205 = vector.broadcast %c7_i32 : i32 to vector<1x64xi32>
    %206 = arith.cmpi ne, %202, %205 : vector<1x64xi32>
    %c0_57 = arith.constant 0 : index
    %c0_58 = arith.constant 0 : index
    %207 = vector.load %arg6[%c0_57, %c0_58] : memref<144x8xbf16, #tpu.memory_space<vmem>>, vector<144x8xbf16>
    %cst_59 = arith.constant dense<0.000000e+00> : vector<144x64xf32>
    %208 = tpu.matmul %207, %185, %cst_59 {dimension_numbers = #tpu.dot_dimension_numbers<[1], [0], [0], [1], [0, 0, 1, 1], [], []>} : vector<144x8xbf16>, vector<8x64xbf16>, vector<144x64xf32> -> vector<144x64xf32>
    %209 = vector.extract_strided_slice %208 {offsets = [0, 0], sizes = [16, 64], strides = [1, 1]} : vector<144x64xf32> to vector<16x64xf32>
    %cst_60 = arith.constant 0.000000e+00 : f32
    %210 = vector.broadcast %cst_60 : f32 to vector<16x9xf32>
    %211 = vector.extract_strided_slice %209 {offsets = [0, 0], sizes = [16, 55], strides = [1, 1]} : vector<16x64xf32> to vector<16x55xf32>
    %212 = tpu.concatenate %210, %211 in 1 : vector<16x9xf32>, vector<16x55xf32> -> vector<16x64xf32>
    %cst_61 = arith.constant 0.000000e+00 : f32
    %213 = vector.shape_cast %204 : vector<1x64xi1> to vector<1x64xi1>
    %214 = vector.broadcast %213 : vector<1x64xi1> to vector<16x64xi1>
    %215 = vector.broadcast %cst_61 : f32 to vector<16x64xf32>
    %216 = arith.select %214, %212, %215 : vector<16x64xi1>, vector<16x64xf32>
    %217 = vector.extract_strided_slice %208 {offsets = [16, 0], sizes = [16, 64], strides = [1, 1]} : vector<144x64xf32> to vector<16x64xf32>
    %cst_62 = arith.constant 0.000000e+00 : f32
    %218 = vector.broadcast %cst_62 : f32 to vector<16x8xf32>
    %219 = vector.extract_strided_slice %217 {offsets = [0, 0], sizes = [16, 56], strides = [1, 1]} : vector<16x64xf32> to vector<16x56xf32>
    %220 = tpu.concatenate %218, %219 in 1 : vector<16x8xf32>, vector<16x56xf32> -> vector<16x64xf32>
    %221 = arith.addf %216, %220 : vector<16x64xf32>
    %222 = vector.extract_strided_slice %208 {offsets = [32, 0], sizes = [16, 64], strides = [1, 1]} : vector<144x64xf32> to vector<16x64xf32>
    %cst_63 = arith.constant 0.000000e+00 : f32
    %223 = vector.broadcast %cst_63 : f32 to vector<16x7xf32>
    %224 = vector.extract_strided_slice %222 {offsets = [0, 0], sizes = [16, 57], strides = [1, 1]} : vector<16x64xf32> to vector<16x57xf32>
    %225 = tpu.concatenate %223, %224 in 1 : vector<16x7xf32>, vector<16x57xf32> -> vector<16x64xf32>
    %cst_64 = arith.constant 0.000000e+00 : f32
    %226 = vector.shape_cast %206 : vector<1x64xi1> to vector<1x64xi1>
    %227 = vector.broadcast %226 : vector<1x64xi1> to vector<16x64xi1>
    %228 = vector.broadcast %cst_64 : f32 to vector<16x64xf32>
    %229 = arith.select %227, %225, %228 : vector<16x64xi1>, vector<16x64xf32>
    %230 = arith.addf %221, %229 : vector<16x64xf32>
    %231 = vector.extract_strided_slice %208 {offsets = [48, 0], sizes = [16, 64], strides = [1, 1]} : vector<144x64xf32> to vector<16x64xf32>
    %cst_65 = arith.constant 0.000000e+00 : f32
    %232 = vector.broadcast %cst_65 : f32 to vector<16x1xf32>
    %233 = vector.extract_strided_slice %231 {offsets = [0, 0], sizes = [16, 63], strides = [1, 1]} : vector<16x64xf32> to vector<16x63xf32>
    %234 = tpu.concatenate %232, %233 in 1 : vector<16x1xf32>, vector<16x63xf32> -> vector<16x64xf32>
    %cst_66 = arith.constant 0.000000e+00 : f32
    %235 = vector.shape_cast %204 : vector<1x64xi1> to vector<1x64xi1>
    %236 = vector.broadcast %235 : vector<1x64xi1> to vector<16x64xi1>
    %237 = vector.broadcast %cst_66 : f32 to vector<16x64xf32>
    %238 = arith.select %236, %234, %237 : vector<16x64xi1>, vector<16x64xf32>
    %239 = arith.addf %230, %238 : vector<16x64xf32>
    %240 = vector.extract_strided_slice %208 {offsets = [64, 0], sizes = [16, 64], strides = [1, 1]} : vector<144x64xf32> to vector<16x64xf32>
    %241 = arith.addf %239, %240 : vector<16x64xf32>
    %242 = vector.extract_strided_slice %208 {offsets = [80, 0], sizes = [16, 64], strides = [1, 1]} : vector<144x64xf32> to vector<16x64xf32>
    %cst_67 = arith.constant 0.000000e+00 : f32
    %243 = vector.broadcast %cst_67 : f32 to vector<16x1xf32>
    %244 = vector.extract_strided_slice %242 {offsets = [0, 1], sizes = [16, 63], strides = [1, 1]} : vector<16x64xf32> to vector<16x63xf32>
    %245 = tpu.concatenate %244, %243 in 1 : vector<16x63xf32>, vector<16x1xf32> -> vector<16x64xf32>
    %cst_68 = arith.constant 0.000000e+00 : f32
    %246 = vector.shape_cast %206 : vector<1x64xi1> to vector<1x64xi1>
    %247 = vector.broadcast %246 : vector<1x64xi1> to vector<16x64xi1>
    %248 = vector.broadcast %cst_68 : f32 to vector<16x64xf32>
    %249 = arith.select %247, %245, %248 : vector<16x64xi1>, vector<16x64xf32>
    %250 = arith.addf %241, %249 : vector<16x64xf32>
    %251 = vector.extract_strided_slice %208 {offsets = [96, 0], sizes = [16, 64], strides = [1, 1]} : vector<144x64xf32> to vector<16x64xf32>
    %cst_69 = arith.constant 0.000000e+00 : f32
    %252 = vector.broadcast %cst_69 : f32 to vector<16x7xf32>
    %253 = vector.extract_strided_slice %251 {offsets = [0, 7], sizes = [16, 57], strides = [1, 1]} : vector<16x64xf32> to vector<16x57xf32>
    %254 = tpu.concatenate %253, %252 in 1 : vector<16x57xf32>, vector<16x7xf32> -> vector<16x64xf32>
    %cst_70 = arith.constant 0.000000e+00 : f32
    %255 = vector.shape_cast %204 : vector<1x64xi1> to vector<1x64xi1>
    %256 = vector.broadcast %255 : vector<1x64xi1> to vector<16x64xi1>
    %257 = vector.broadcast %cst_70 : f32 to vector<16x64xf32>
    %258 = arith.select %256, %254, %257 : vector<16x64xi1>, vector<16x64xf32>
    %259 = arith.addf %250, %258 : vector<16x64xf32>
    %260 = vector.extract_strided_slice %208 {offsets = [112, 0], sizes = [16, 64], strides = [1, 1]} : vector<144x64xf32> to vector<16x64xf32>
    %cst_71 = arith.constant 0.000000e+00 : f32
    %261 = vector.broadcast %cst_71 : f32 to vector<16x8xf32>
    %262 = vector.extract_strided_slice %260 {offsets = [0, 8], sizes = [16, 56], strides = [1, 1]} : vector<16x64xf32> to vector<16x56xf32>
    %263 = tpu.concatenate %262, %261 in 1 : vector<16x56xf32>, vector<16x8xf32> -> vector<16x64xf32>
    %264 = arith.addf %259, %263 : vector<16x64xf32>
    %265 = vector.extract_strided_slice %208 {offsets = [128, 0], sizes = [16, 64], strides = [1, 1]} : vector<144x64xf32> to vector<16x64xf32>
    %cst_72 = arith.constant 0.000000e+00 : f32
    %266 = vector.broadcast %cst_72 : f32 to vector<16x9xf32>
    %267 = vector.extract_strided_slice %265 {offsets = [0, 9], sizes = [16, 55], strides = [1, 1]} : vector<16x64xf32> to vector<16x55xf32>
    %268 = tpu.concatenate %267, %266 in 1 : vector<16x55xf32>, vector<16x9xf32> -> vector<16x64xf32>
    %cst_73 = arith.constant 0.000000e+00 : f32
    %269 = vector.shape_cast %206 : vector<1x64xi1> to vector<1x64xi1>
    %270 = vector.broadcast %269 : vector<1x64xi1> to vector<16x64xi1>
    %271 = vector.broadcast %cst_73 : f32 to vector<16x64xf32>
    %272 = arith.select %270, %268, %271 : vector<16x64xi1>, vector<16x64xf32>
    %273 = arith.addf %264, %272 : vector<16x64xf32>
    %c0_74 = arith.constant 0 : index
    %c0_75 = arith.constant 0 : index
    %274 = vector.load %arg4[%c0_74, %c0_75] : memref<16x1xf32, #tpu.memory_space<vmem>>, vector<16x1xf32>
    %275 = vector.broadcast %274 : vector<16x1xf32> to vector<16x64xf32>
    %276 = arith.addf %273, %275 : vector<16x64xf32>
    %cst_76 = arith.constant 0.000000e+00 : f32
    %277 = vector.broadcast %cst_76 : f32 to vector<16x64xf32>
    %278 = arith.maximumf %276, %277 : vector<16x64xf32>
    %279 = arith.truncf %278 : vector<16x64xf32> to vector<16x64xbf16>
    %c0_77 = arith.constant 0 : index
    %c0_78 = arith.constant 0 : index
    %280 = vector.load %arg7[%c0_77, %c0_78] : memref<144x16xbf16, #tpu.memory_space<vmem>>, vector<144x16xbf16>
    %cst_79 = arith.constant dense<0.000000e+00> : vector<144x64xf32>
    %281 = tpu.matmul %280, %279, %cst_79 {dimension_numbers = #tpu.dot_dimension_numbers<[1], [0], [0], [1], [0, 0, 1, 1], [], []>} : vector<144x16xbf16>, vector<16x64xbf16>, vector<144x64xf32> -> vector<144x64xf32>
    %282 = vector.extract_strided_slice %281 {offsets = [0, 0], sizes = [16, 64], strides = [1, 1]} : vector<144x64xf32> to vector<16x64xf32>
    %cst_80 = arith.constant 0.000000e+00 : f32
    %283 = vector.broadcast %cst_80 : f32 to vector<16x9xf32>
    %284 = vector.extract_strided_slice %282 {offsets = [0, 0], sizes = [16, 55], strides = [1, 1]} : vector<16x64xf32> to vector<16x55xf32>
    %285 = tpu.concatenate %283, %284 in 1 : vector<16x9xf32>, vector<16x55xf32> -> vector<16x64xf32>
    %cst_81 = arith.constant 0.000000e+00 : f32
    %286 = vector.shape_cast %204 : vector<1x64xi1> to vector<1x64xi1>
    %287 = vector.broadcast %286 : vector<1x64xi1> to vector<16x64xi1>
    %288 = vector.broadcast %cst_81 : f32 to vector<16x64xf32>
    %289 = arith.select %287, %285, %288 : vector<16x64xi1>, vector<16x64xf32>
    %290 = vector.extract_strided_slice %281 {offsets = [16, 0], sizes = [16, 64], strides = [1, 1]} : vector<144x64xf32> to vector<16x64xf32>
    %cst_82 = arith.constant 0.000000e+00 : f32
    %291 = vector.broadcast %cst_82 : f32 to vector<16x8xf32>
    %292 = vector.extract_strided_slice %290 {offsets = [0, 0], sizes = [16, 56], strides = [1, 1]} : vector<16x64xf32> to vector<16x56xf32>
    %293 = tpu.concatenate %291, %292 in 1 : vector<16x8xf32>, vector<16x56xf32> -> vector<16x64xf32>
    %294 = arith.addf %289, %293 : vector<16x64xf32>
    %295 = vector.extract_strided_slice %281 {offsets = [32, 0], sizes = [16, 64], strides = [1, 1]} : vector<144x64xf32> to vector<16x64xf32>
    %cst_83 = arith.constant 0.000000e+00 : f32
    %296 = vector.broadcast %cst_83 : f32 to vector<16x7xf32>
    %297 = vector.extract_strided_slice %295 {offsets = [0, 0], sizes = [16, 57], strides = [1, 1]} : vector<16x64xf32> to vector<16x57xf32>
    %298 = tpu.concatenate %296, %297 in 1 : vector<16x7xf32>, vector<16x57xf32> -> vector<16x64xf32>
    %cst_84 = arith.constant 0.000000e+00 : f32
    %299 = vector.shape_cast %206 : vector<1x64xi1> to vector<1x64xi1>
    %300 = vector.broadcast %299 : vector<1x64xi1> to vector<16x64xi1>
    %301 = vector.broadcast %cst_84 : f32 to vector<16x64xf32>
    %302 = arith.select %300, %298, %301 : vector<16x64xi1>, vector<16x64xf32>
    %303 = arith.addf %294, %302 : vector<16x64xf32>
    %304 = vector.extract_strided_slice %281 {offsets = [48, 0], sizes = [16, 64], strides = [1, 1]} : vector<144x64xf32> to vector<16x64xf32>
    %cst_85 = arith.constant 0.000000e+00 : f32
    %305 = vector.broadcast %cst_85 : f32 to vector<16x1xf32>
    %306 = vector.extract_strided_slice %304 {offsets = [0, 0], sizes = [16, 63], strides = [1, 1]} : vector<16x64xf32> to vector<16x63xf32>
    %307 = tpu.concatenate %305, %306 in 1 : vector<16x1xf32>, vector<16x63xf32> -> vector<16x64xf32>
    %cst_86 = arith.constant 0.000000e+00 : f32
    %308 = vector.shape_cast %204 : vector<1x64xi1> to vector<1x64xi1>
    %309 = vector.broadcast %308 : vector<1x64xi1> to vector<16x64xi1>
    %310 = vector.broadcast %cst_86 : f32 to vector<16x64xf32>
    %311 = arith.select %309, %307, %310 : vector<16x64xi1>, vector<16x64xf32>
    %312 = arith.addf %303, %311 : vector<16x64xf32>
    %313 = vector.extract_strided_slice %281 {offsets = [64, 0], sizes = [16, 64], strides = [1, 1]} : vector<144x64xf32> to vector<16x64xf32>
    %314 = arith.addf %312, %313 : vector<16x64xf32>
    %315 = vector.extract_strided_slice %281 {offsets = [80, 0], sizes = [16, 64], strides = [1, 1]} : vector<144x64xf32> to vector<16x64xf32>
    %cst_87 = arith.constant 0.000000e+00 : f32
    %316 = vector.broadcast %cst_87 : f32 to vector<16x1xf32>
    %317 = vector.extract_strided_slice %315 {offsets = [0, 1], sizes = [16, 63], strides = [1, 1]} : vector<16x64xf32> to vector<16x63xf32>
    %318 = tpu.concatenate %317, %316 in 1 : vector<16x63xf32>, vector<16x1xf32> -> vector<16x64xf32>
    %cst_88 = arith.constant 0.000000e+00 : f32
    %319 = vector.shape_cast %206 : vector<1x64xi1> to vector<1x64xi1>
    %320 = vector.broadcast %319 : vector<1x64xi1> to vector<16x64xi1>
    %321 = vector.broadcast %cst_88 : f32 to vector<16x64xf32>
    %322 = arith.select %320, %318, %321 : vector<16x64xi1>, vector<16x64xf32>
    %323 = arith.addf %314, %322 : vector<16x64xf32>
    %324 = vector.extract_strided_slice %281 {offsets = [96, 0], sizes = [16, 64], strides = [1, 1]} : vector<144x64xf32> to vector<16x64xf32>
    %cst_89 = arith.constant 0.000000e+00 : f32
    %325 = vector.broadcast %cst_89 : f32 to vector<16x7xf32>
    %326 = vector.extract_strided_slice %324 {offsets = [0, 7], sizes = [16, 57], strides = [1, 1]} : vector<16x64xf32> to vector<16x57xf32>
    %327 = tpu.concatenate %326, %325 in 1 : vector<16x57xf32>, vector<16x7xf32> -> vector<16x64xf32>
    %cst_90 = arith.constant 0.000000e+00 : f32
    %328 = vector.shape_cast %204 : vector<1x64xi1> to vector<1x64xi1>
    %329 = vector.broadcast %328 : vector<1x64xi1> to vector<16x64xi1>
    %330 = vector.broadcast %cst_90 : f32 to vector<16x64xf32>
    %331 = arith.select %329, %327, %330 : vector<16x64xi1>, vector<16x64xf32>
    %332 = arith.addf %323, %331 : vector<16x64xf32>
    %333 = vector.extract_strided_slice %281 {offsets = [112, 0], sizes = [16, 64], strides = [1, 1]} : vector<144x64xf32> to vector<16x64xf32>
    %cst_91 = arith.constant 0.000000e+00 : f32
    %334 = vector.broadcast %cst_91 : f32 to vector<16x8xf32>
    %335 = vector.extract_strided_slice %333 {offsets = [0, 8], sizes = [16, 56], strides = [1, 1]} : vector<16x64xf32> to vector<16x56xf32>
    %336 = tpu.concatenate %335, %334 in 1 : vector<16x56xf32>, vector<16x8xf32> -> vector<16x64xf32>
    %337 = arith.addf %332, %336 : vector<16x64xf32>
    %338 = vector.extract_strided_slice %281 {offsets = [128, 0], sizes = [16, 64], strides = [1, 1]} : vector<144x64xf32> to vector<16x64xf32>
    %cst_92 = arith.constant 0.000000e+00 : f32
    %339 = vector.broadcast %cst_92 : f32 to vector<16x9xf32>
    %340 = vector.extract_strided_slice %338 {offsets = [0, 9], sizes = [16, 55], strides = [1, 1]} : vector<16x64xf32> to vector<16x55xf32>
    %341 = tpu.concatenate %340, %339 in 1 : vector<16x55xf32>, vector<16x9xf32> -> vector<16x64xf32>
    %cst_93 = arith.constant 0.000000e+00 : f32
    %342 = vector.shape_cast %206 : vector<1x64xi1> to vector<1x64xi1>
    %343 = vector.broadcast %342 : vector<1x64xi1> to vector<16x64xi1>
    %344 = vector.broadcast %cst_93 : f32 to vector<16x64xf32>
    %345 = arith.select %343, %341, %344 : vector<16x64xi1>, vector<16x64xf32>
    %346 = arith.addf %337, %345 : vector<16x64xf32>
    %c0_94 = arith.constant 0 : index
    %c0_95 = arith.constant 0 : index
    %347 = vector.load %arg5[%c0_94, %c0_95] : memref<16x1xf32, #tpu.memory_space<vmem>>, vector<16x1xf32>
    %348 = vector.broadcast %347 : vector<16x1xf32> to vector<16x64xf32>
    %349 = arith.addf %346, %348 : vector<16x64xf32>
    %cst_96 = arith.constant 0.000000e+00 : f32
    %350 = vector.broadcast %cst_96 : f32 to vector<16x64xf32>
    %351 = arith.maximumf %349, %350 : vector<16x64xf32>
    %352 = arith.truncf %351 : vector<16x64xf32> to vector<16x64xbf16>
    %c0_97 = arith.constant 0 : index
    %c0_98 = arith.constant 0 : index
    %353 = vector.load %arg2[%c0_97, %c0_98] : memref<64x256xbf16, #tpu.memory_space<vmem>>, vector<64x256xbf16>
    %cst_99 = arith.constant dense<0.000000e+00> : vector<16x256xf32>
    %354 = tpu.matmul %352, %353, %cst_99 {dimension_numbers = #tpu.dot_dimension_numbers<[1], [0], [0], [1], [0, 0, 1, 1], [], []>} : vector<16x64xbf16>, vector<64x256xbf16>, vector<16x256xf32> -> vector<16x256xf32>
    %355 = arith.truncf %354 : vector<16x256xf32> to vector<16x256xbf16>
    %c0_100 = arith.constant 0 : index
    %c0_101 = arith.constant 0 : index
    %356 = vector.load %arg16[%c0_100, %c0_101] : memref<72x8xbf16, #tpu.memory_space<vmem>>, vector<72x8xbf16>
    %cst_102 = arith.constant dense<0.000000e+00> : vector<72x256xf32>
    %357 = tpu.matmul %356, %168, %cst_102 {dimension_numbers = #tpu.dot_dimension_numbers<[1], [0], [0], [1], [0, 0, 1, 1], [], []>} : vector<72x8xbf16>, vector<8x256xbf16>, vector<72x256xf32> -> vector<72x256xf32>
    %c0_103 = arith.constant 0 : index
    %c0_104 = arith.constant 0 : index
    %358 = vector.load %arg17[%c0_103, %c0_104] : memref<72x16xbf16, #tpu.memory_space<vmem>>, vector<72x16xbf16>
    %cst_105 = arith.constant dense<0.000000e+00> : vector<72x256xf32>
    %359 = tpu.matmul %358, %355, %cst_105 {dimension_numbers = #tpu.dot_dimension_numbers<[1], [0], [0], [1], [0, 0, 1, 1], [], []>} : vector<72x16xbf16>, vector<16x256xbf16>, vector<72x256xf32> -> vector<72x256xf32>
    %360 = arith.addf %357, %359 : vector<72x256xf32>
    %361 = vector.extract_strided_slice %360 {offsets = [0, 0], sizes = [8, 256], strides = [1, 1]} : vector<72x256xf32> to vector<8x256xf32>
    %cst_106 = arith.constant 0.000000e+00 : f32
    %362 = vector.broadcast %cst_106 : f32 to vector<8x17xf32>
    %363 = vector.extract_strided_slice %361 {offsets = [0, 0], sizes = [8, 239], strides = [1, 1]} : vector<8x256xf32> to vector<8x239xf32>
    %364 = tpu.concatenate %362, %363 in 1 : vector<8x17xf32>, vector<8x239xf32> -> vector<8x256xf32>
    %cst_107 = arith.constant 0.000000e+00 : f32
    %365 = vector.shape_cast %20 : vector<1x256xi1> to vector<1x256xi1>
    %366 = vector.broadcast %365 : vector<1x256xi1> to vector<8x256xi1>
    %367 = vector.broadcast %cst_107 : f32 to vector<8x256xf32>
    %368 = arith.select %366, %364, %367 : vector<8x256xi1>, vector<8x256xf32>
    %369 = vector.extract_strided_slice %360 {offsets = [8, 0], sizes = [8, 256], strides = [1, 1]} : vector<72x256xf32> to vector<8x256xf32>
    %cst_108 = arith.constant 0.000000e+00 : f32
    %370 = vector.broadcast %cst_108 : f32 to vector<8x16xf32>
    %371 = vector.extract_strided_slice %369 {offsets = [0, 0], sizes = [8, 240], strides = [1, 1]} : vector<8x256xf32> to vector<8x240xf32>
    %372 = tpu.concatenate %370, %371 in 1 : vector<8x16xf32>, vector<8x240xf32> -> vector<8x256xf32>
    %373 = arith.addf %368, %372 : vector<8x256xf32>
    %374 = vector.extract_strided_slice %360 {offsets = [16, 0], sizes = [8, 256], strides = [1, 1]} : vector<72x256xf32> to vector<8x256xf32>
    %cst_109 = arith.constant 0.000000e+00 : f32
    %375 = vector.broadcast %cst_109 : f32 to vector<8x15xf32>
    %376 = vector.extract_strided_slice %374 {offsets = [0, 0], sizes = [8, 241], strides = [1, 1]} : vector<8x256xf32> to vector<8x241xf32>
    %377 = tpu.concatenate %375, %376 in 1 : vector<8x15xf32>, vector<8x241xf32> -> vector<8x256xf32>
    %cst_110 = arith.constant 0.000000e+00 : f32
    %378 = vector.shape_cast %22 : vector<1x256xi1> to vector<1x256xi1>
    %379 = vector.broadcast %378 : vector<1x256xi1> to vector<8x256xi1>
    %380 = vector.broadcast %cst_110 : f32 to vector<8x256xf32>
    %381 = arith.select %379, %377, %380 : vector<8x256xi1>, vector<8x256xf32>
    %382 = arith.addf %373, %381 : vector<8x256xf32>
    %383 = vector.extract_strided_slice %360 {offsets = [24, 0], sizes = [8, 256], strides = [1, 1]} : vector<72x256xf32> to vector<8x256xf32>
    %cst_111 = arith.constant 0.000000e+00 : f32
    %384 = vector.broadcast %cst_111 : f32 to vector<8x1xf32>
    %385 = vector.extract_strided_slice %383 {offsets = [0, 0], sizes = [8, 255], strides = [1, 1]} : vector<8x256xf32> to vector<8x255xf32>
    %386 = tpu.concatenate %384, %385 in 1 : vector<8x1xf32>, vector<8x255xf32> -> vector<8x256xf32>
    %cst_112 = arith.constant 0.000000e+00 : f32
    %387 = vector.shape_cast %20 : vector<1x256xi1> to vector<1x256xi1>
    %388 = vector.broadcast %387 : vector<1x256xi1> to vector<8x256xi1>
    %389 = vector.broadcast %cst_112 : f32 to vector<8x256xf32>
    %390 = arith.select %388, %386, %389 : vector<8x256xi1>, vector<8x256xf32>
    %391 = arith.addf %382, %390 : vector<8x256xf32>
    %392 = vector.extract_strided_slice %360 {offsets = [32, 0], sizes = [8, 256], strides = [1, 1]} : vector<72x256xf32> to vector<8x256xf32>
    %393 = arith.addf %391, %392 : vector<8x256xf32>
    %394 = vector.extract_strided_slice %360 {offsets = [40, 0], sizes = [8, 256], strides = [1, 1]} : vector<72x256xf32> to vector<8x256xf32>
    %cst_113 = arith.constant 0.000000e+00 : f32
    %395 = vector.broadcast %cst_113 : f32 to vector<8x1xf32>
    %396 = vector.extract_strided_slice %394 {offsets = [0, 1], sizes = [8, 255], strides = [1, 1]} : vector<8x256xf32> to vector<8x255xf32>
    %397 = tpu.concatenate %396, %395 in 1 : vector<8x255xf32>, vector<8x1xf32> -> vector<8x256xf32>
    %cst_114 = arith.constant 0.000000e+00 : f32
    %398 = vector.shape_cast %22 : vector<1x256xi1> to vector<1x256xi1>
    %399 = vector.broadcast %398 : vector<1x256xi1> to vector<8x256xi1>
    %400 = vector.broadcast %cst_114 : f32 to vector<8x256xf32>
    %401 = arith.select %399, %397, %400 : vector<8x256xi1>, vector<8x256xf32>
    %402 = arith.addf %393, %401 : vector<8x256xf32>
    %403 = vector.extract_strided_slice %360 {offsets = [48, 0], sizes = [8, 256], strides = [1, 1]} : vector<72x256xf32> to vector<8x256xf32>
    %cst_115 = arith.constant 0.000000e+00 : f32
    %404 = vector.broadcast %cst_115 : f32 to vector<8x15xf32>
    %405 = vector.extract_strided_slice %403 {offsets = [0, 15], sizes = [8, 241], strides = [1, 1]} : vector<8x256xf32> to vector<8x241xf32>
    %406 = tpu.concatenate %405, %404 in 1 : vector<8x241xf32>, vector<8x15xf32> -> vector<8x256xf32>
    %cst_116 = arith.constant 0.000000e+00 : f32
    %407 = vector.shape_cast %20 : vector<1x256xi1> to vector<1x256xi1>
    %408 = vector.broadcast %407 : vector<1x256xi1> to vector<8x256xi1>
    %409 = vector.broadcast %cst_116 : f32 to vector<8x256xf32>
    %410 = arith.select %408, %406, %409 : vector<8x256xi1>, vector<8x256xf32>
    %411 = arith.addf %402, %410 : vector<8x256xf32>
    %412 = vector.extract_strided_slice %360 {offsets = [56, 0], sizes = [8, 256], strides = [1, 1]} : vector<72x256xf32> to vector<8x256xf32>
    %cst_117 = arith.constant 0.000000e+00 : f32
    %413 = vector.broadcast %cst_117 : f32 to vector<8x16xf32>
    %414 = vector.extract_strided_slice %412 {offsets = [0, 16], sizes = [8, 240], strides = [1, 1]} : vector<8x256xf32> to vector<8x240xf32>
    %415 = tpu.concatenate %414, %413 in 1 : vector<8x240xf32>, vector<8x16xf32> -> vector<8x256xf32>
    %416 = arith.addf %411, %415 : vector<8x256xf32>
    %417 = vector.extract_strided_slice %360 {offsets = [64, 0], sizes = [8, 256], strides = [1, 1]} : vector<72x256xf32> to vector<8x256xf32>
    %cst_118 = arith.constant 0.000000e+00 : f32
    %418 = vector.broadcast %cst_118 : f32 to vector<8x17xf32>
    %419 = vector.extract_strided_slice %417 {offsets = [0, 17], sizes = [8, 239], strides = [1, 1]} : vector<8x256xf32> to vector<8x239xf32>
    %420 = tpu.concatenate %419, %418 in 1 : vector<8x239xf32>, vector<8x17xf32> -> vector<8x256xf32>
    %cst_119 = arith.constant 0.000000e+00 : f32
    %421 = vector.shape_cast %22 : vector<1x256xi1> to vector<1x256xi1>
    %422 = vector.broadcast %421 : vector<1x256xi1> to vector<8x256xi1>
    %423 = vector.broadcast %cst_119 : f32 to vector<8x256xf32>
    %424 = arith.select %422, %420, %423 : vector<8x256xi1>, vector<8x256xf32>
    %425 = arith.addf %416, %424 : vector<8x256xf32>
    %c0_120 = arith.constant 0 : index
    %c0_121 = arith.constant 0 : index
    %426 = vector.load %arg14[%c0_120, %c0_121] : memref<8x1xf32, #tpu.memory_space<vmem>>, vector<8x1xf32>
    %427 = vector.broadcast %426 : vector<8x1xf32> to vector<8x256xf32>
    %428 = arith.addf %425, %427 : vector<8x256xf32>
    %cst_122 = arith.constant 0.000000e+00 : f32
    %429 = vector.broadcast %cst_122 : f32 to vector<8x256xf32>
    %430 = arith.maximumf %428, %429 : vector<8x256xf32>
    %431 = arith.truncf %430 : vector<8x256xf32> to vector<8x256xbf16>
    %c0_123 = arith.constant 0 : index
    %c0_124 = arith.constant 0 : index
    %432 = vector.load %arg18[%c0_123, %c0_124] : memref<72x8xbf16, #tpu.memory_space<vmem>>, vector<72x8xbf16>
    %cst_125 = arith.constant dense<0.000000e+00> : vector<72x256xf32>
    %433 = tpu.matmul %432, %431, %cst_125 {dimension_numbers = #tpu.dot_dimension_numbers<[1], [0], [0], [1], [0, 0, 1, 1], [], []>} : vector<72x8xbf16>, vector<8x256xbf16>, vector<72x256xf32> -> vector<72x256xf32>
    %434 = vector.extract_strided_slice %433 {offsets = [0, 0], sizes = [8, 256], strides = [1, 1]} : vector<72x256xf32> to vector<8x256xf32>
    %cst_126 = arith.constant 0.000000e+00 : f32
    %435 = vector.broadcast %cst_126 : f32 to vector<8x17xf32>
    %436 = vector.extract_strided_slice %434 {offsets = [0, 0], sizes = [8, 239], strides = [1, 1]} : vector<8x256xf32> to vector<8x239xf32>
    %437 = tpu.concatenate %435, %436 in 1 : vector<8x17xf32>, vector<8x239xf32> -> vector<8x256xf32>
    %cst_127 = arith.constant 0.000000e+00 : f32
    %438 = vector.shape_cast %20 : vector<1x256xi1> to vector<1x256xi1>
    %439 = vector.broadcast %438 : vector<1x256xi1> to vector<8x256xi1>
    %440 = vector.broadcast %cst_127 : f32 to vector<8x256xf32>
    %441 = arith.select %439, %437, %440 : vector<8x256xi1>, vector<8x256xf32>
    %442 = vector.extract_strided_slice %433 {offsets = [8, 0], sizes = [8, 256], strides = [1, 1]} : vector<72x256xf32> to vector<8x256xf32>
    %cst_128 = arith.constant 0.000000e+00 : f32
    %443 = vector.broadcast %cst_128 : f32 to vector<8x16xf32>
    %444 = vector.extract_strided_slice %442 {offsets = [0, 0], sizes = [8, 240], strides = [1, 1]} : vector<8x256xf32> to vector<8x240xf32>
    %445 = tpu.concatenate %443, %444 in 1 : vector<8x16xf32>, vector<8x240xf32> -> vector<8x256xf32>
    %446 = arith.addf %441, %445 : vector<8x256xf32>
    %447 = vector.extract_strided_slice %433 {offsets = [16, 0], sizes = [8, 256], strides = [1, 1]} : vector<72x256xf32> to vector<8x256xf32>
    %cst_129 = arith.constant 0.000000e+00 : f32
    %448 = vector.broadcast %cst_129 : f32 to vector<8x15xf32>
    %449 = vector.extract_strided_slice %447 {offsets = [0, 0], sizes = [8, 241], strides = [1, 1]} : vector<8x256xf32> to vector<8x241xf32>
    %450 = tpu.concatenate %448, %449 in 1 : vector<8x15xf32>, vector<8x241xf32> -> vector<8x256xf32>
    %cst_130 = arith.constant 0.000000e+00 : f32
    %451 = vector.shape_cast %22 : vector<1x256xi1> to vector<1x256xi1>
    %452 = vector.broadcast %451 : vector<1x256xi1> to vector<8x256xi1>
    %453 = vector.broadcast %cst_130 : f32 to vector<8x256xf32>
    %454 = arith.select %452, %450, %453 : vector<8x256xi1>, vector<8x256xf32>
    %455 = arith.addf %446, %454 : vector<8x256xf32>
    %456 = vector.extract_strided_slice %433 {offsets = [24, 0], sizes = [8, 256], strides = [1, 1]} : vector<72x256xf32> to vector<8x256xf32>
    %cst_131 = arith.constant 0.000000e+00 : f32
    %457 = vector.broadcast %cst_131 : f32 to vector<8x1xf32>
    %458 = vector.extract_strided_slice %456 {offsets = [0, 0], sizes = [8, 255], strides = [1, 1]} : vector<8x256xf32> to vector<8x255xf32>
    %459 = tpu.concatenate %457, %458 in 1 : vector<8x1xf32>, vector<8x255xf32> -> vector<8x256xf32>
    %cst_132 = arith.constant 0.000000e+00 : f32
    %460 = vector.shape_cast %20 : vector<1x256xi1> to vector<1x256xi1>
    %461 = vector.broadcast %460 : vector<1x256xi1> to vector<8x256xi1>
    %462 = vector.broadcast %cst_132 : f32 to vector<8x256xf32>
    %463 = arith.select %461, %459, %462 : vector<8x256xi1>, vector<8x256xf32>
    %464 = arith.addf %455, %463 : vector<8x256xf32>
    %465 = vector.extract_strided_slice %433 {offsets = [32, 0], sizes = [8, 256], strides = [1, 1]} : vector<72x256xf32> to vector<8x256xf32>
    %466 = arith.addf %464, %465 : vector<8x256xf32>
    %467 = vector.extract_strided_slice %433 {offsets = [40, 0], sizes = [8, 256], strides = [1, 1]} : vector<72x256xf32> to vector<8x256xf32>
    %cst_133 = arith.constant 0.000000e+00 : f32
    %468 = vector.broadcast %cst_133 : f32 to vector<8x1xf32>
    %469 = vector.extract_strided_slice %467 {offsets = [0, 1], sizes = [8, 255], strides = [1, 1]} : vector<8x256xf32> to vector<8x255xf32>
    %470 = tpu.concatenate %469, %468 in 1 : vector<8x255xf32>, vector<8x1xf32> -> vector<8x256xf32>
    %cst_134 = arith.constant 0.000000e+00 : f32
    %471 = vector.shape_cast %22 : vector<1x256xi1> to vector<1x256xi1>
    %472 = vector.broadcast %471 : vector<1x256xi1> to vector<8x256xi1>
    %473 = vector.broadcast %cst_134 : f32 to vector<8x256xf32>
    %474 = arith.select %472, %470, %473 : vector<8x256xi1>, vector<8x256xf32>
    %475 = arith.addf %466, %474 : vector<8x256xf32>
    %476 = vector.extract_strided_slice %433 {offsets = [48, 0], sizes = [8, 256], strides = [1, 1]} : vector<72x256xf32> to vector<8x256xf32>
    %cst_135 = arith.constant 0.000000e+00 : f32
    %477 = vector.broadcast %cst_135 : f32 to vector<8x15xf32>
    %478 = vector.extract_strided_slice %476 {offsets = [0, 15], sizes = [8, 241], strides = [1, 1]} : vector<8x256xf32> to vector<8x241xf32>
    %479 = tpu.concatenate %478, %477 in 1 : vector<8x241xf32>, vector<8x15xf32> -> vector<8x256xf32>
    %cst_136 = arith.constant 0.000000e+00 : f32
    %480 = vector.shape_cast %20 : vector<1x256xi1> to vector<1x256xi1>
    %481 = vector.broadcast %480 : vector<1x256xi1> to vector<8x256xi1>
    %482 = vector.broadcast %cst_136 : f32 to vector<8x256xf32>
    %483 = arith.select %481, %479, %482 : vector<8x256xi1>, vector<8x256xf32>
    %484 = arith.addf %475, %483 : vector<8x256xf32>
    %485 = vector.extract_strided_slice %433 {offsets = [56, 0], sizes = [8, 256], strides = [1, 1]} : vector<72x256xf32> to vector<8x256xf32>
    %cst_137 = arith.constant 0.000000e+00 : f32
    %486 = vector.broadcast %cst_137 : f32 to vector<8x16xf32>
    %487 = vector.extract_strided_slice %485 {offsets = [0, 16], sizes = [8, 240], strides = [1, 1]} : vector<8x256xf32> to vector<8x240xf32>
    %488 = tpu.concatenate %487, %486 in 1 : vector<8x240xf32>, vector<8x16xf32> -> vector<8x256xf32>
    %489 = arith.addf %484, %488 : vector<8x256xf32>
    %490 = vector.extract_strided_slice %433 {offsets = [64, 0], sizes = [8, 256], strides = [1, 1]} : vector<72x256xf32> to vector<8x256xf32>
    %cst_138 = arith.constant 0.000000e+00 : f32
    %491 = vector.broadcast %cst_138 : f32 to vector<8x17xf32>
    %492 = vector.extract_strided_slice %490 {offsets = [0, 17], sizes = [8, 239], strides = [1, 1]} : vector<8x256xf32> to vector<8x239xf32>
    %493 = tpu.concatenate %492, %491 in 1 : vector<8x239xf32>, vector<8x17xf32> -> vector<8x256xf32>
    %cst_139 = arith.constant 0.000000e+00 : f32
    %494 = vector.shape_cast %22 : vector<1x256xi1> to vector<1x256xi1>
    %495 = vector.broadcast %494 : vector<1x256xi1> to vector<8x256xi1>
    %496 = vector.broadcast %cst_139 : f32 to vector<8x256xf32>
    %497 = arith.select %495, %493, %496 : vector<8x256xi1>, vector<8x256xf32>
    %498 = arith.addf %489, %497 : vector<8x256xf32>
    %c0_140 = arith.constant 0 : index
    %c0_141 = arith.constant 0 : index
    %499 = vector.load %arg15[%c0_140, %c0_141] : memref<8x1xf32, #tpu.memory_space<vmem>>, vector<8x1xf32>
    %500 = vector.broadcast %499 : vector<8x1xf32> to vector<8x256xf32>
    %501 = arith.addf %498, %500 : vector<8x256xf32>
    %cst_142 = arith.constant 0.000000e+00 : f32
    %502 = vector.broadcast %cst_142 : f32 to vector<8x256xf32>
    %503 = arith.maximumf %501, %502 : vector<8x256xf32>
    %504 = arith.truncf %503 : vector<8x256xf32> to vector<8x256xbf16>
    %c0_143 = arith.constant 0 : index
    %c0_144 = arith.constant 0 : index
    %505 = vector.load %arg13[%c0_143, %c0_144] : memref<8x8xbf16, #tpu.memory_space<vmem>>, vector<8x8xbf16>
    %cst_145 = arith.constant dense<0.000000e+00> : vector<8x256xf32>
    %506 = tpu.matmul %505, %504, %cst_145 {dimension_numbers = #tpu.dot_dimension_numbers<[1], [0], [0], [1], [0, 0, 1, 1], [], []>} : vector<8x8xbf16>, vector<8x256xbf16>, vector<8x256xf32> -> vector<8x256xf32>
    %c0_146 = arith.constant 0 : index
    %c0_147 = arith.constant 0 : index
    %507 = vector.load %arg12[%c0_146, %c0_147] : memref<8x1xf32, #tpu.memory_space<vmem>>, vector<8x1xf32>
    %508 = vector.broadcast %507 : vector<8x1xf32> to vector<8x256xf32>
    %509 = arith.addf %506, %508 : vector<8x256xf32>
    %510 = arith.truncf %509 : vector<8x256xf32> to vector<8x256xbf16>
    %511 = vector.extract_strided_slice %510 {offsets = [0, 0], sizes = [3, 256], strides = [1, 1]} : vector<8x256xbf16> to vector<3x256xbf16>
    %c0_148 = arith.constant 0 : index
    %c0_149 = arith.constant 0 : index
    %c0_150 = arith.constant 0 : index
    %512 = vector.load %arg51[%c0_148, %c0_149, %c0_150] : memref<1x3x256xbf16, #tpu.memory_space<vmem>>, vector<1x3x256xbf16>
    %513 = vector.shape_cast %512 : vector<1x3x256xbf16> to vector<3x256xbf16>
    %514 = vector.shape_cast %511 : vector<3x256xbf16> to vector<1x3x256xbf16>
    tpu.vector_store %arg51[%c0_148, %c0_149, %c0_150], %514 {strides = array<i32>} : memref<1x3x256xbf16, #tpu.memory_space<vmem>>, vector<1x3x256xbf16>,
    %c0_151 = arith.constant 0 : index
    %c0_152 = arith.constant 0 : index
    %515 = vector.load %arg25[%c0_151, %c0_152] : memref<72x8xbf16, #tpu.memory_space<vmem>>, vector<72x8xbf16>
    %cst_153 = arith.constant dense<0.000000e+00> : vector<72x256xf32>
    %516 = tpu.matmul %515, %1, %cst_153 {dimension_numbers = #tpu.dot_dimension_numbers<[1], [0], [0], [1], [0, 0, 1, 1], [], []>} : vector<72x8xbf16>, vector<8x256xbf16>, vector<72x256xf32> -> vector<72x256xf32>
    %c0_154 = arith.constant 0 : index
    %c0_155 = arith.constant 0 : index
    %517 = vector.load %arg26[%c0_154, %c0_155] : memref<72x8xbf16, #tpu.memory_space<vmem>>, vector<72x8xbf16>
    %cst_156 = arith.constant dense<0.000000e+00> : vector<72x256xf32>
    %518 = tpu.matmul %517, %510, %cst_156 {dimension_numbers = #tpu.dot_dimension_numbers<[1], [0], [0], [1], [0, 0, 1, 1], [], []>} : vector<72x8xbf16>, vector<8x256xbf16>, vector<72x256xf32> -> vector<72x256xf32>
    %519 = arith.addf %516, %518 : vector<72x256xf32>
    %520 = vector.extract_strided_slice %519 {offsets = [0, 0], sizes = [8, 256], strides = [1, 1]} : vector<72x256xf32> to vector<8x256xf32>
    %cst_157 = arith.constant 0.000000e+00 : f32
    %521 = vector.broadcast %cst_157 : f32 to vector<8x17xf32>
    %522 = vector.extract_strided_slice %520 {offsets = [0, 0], sizes = [8, 239], strides = [1, 1]} : vector<8x256xf32> to vector<8x239xf32>
    %523 = tpu.concatenate %521, %522 in 1 : vector<8x17xf32>, vector<8x239xf32> -> vector<8x256xf32>
    %cst_158 = arith.constant 0.000000e+00 : f32
    %524 = vector.shape_cast %20 : vector<1x256xi1> to vector<1x256xi1>
    %525 = vector.broadcast %524 : vector<1x256xi1> to vector<8x256xi1>
    %526 = vector.broadcast %cst_158 : f32 to vector<8x256xf32>
    %527 = arith.select %525, %523, %526 : vector<8x256xi1>, vector<8x256xf32>
    %528 = vector.extract_strided_slice %519 {offsets = [8, 0], sizes = [8, 256], strides = [1, 1]} : vector<72x256xf32> to vector<8x256xf32>
    %cst_159 = arith.constant 0.000000e+00 : f32
    %529 = vector.broadcast %cst_159 : f32 to vector<8x16xf32>
    %530 = vector.extract_strided_slice %528 {offsets = [0, 0], sizes = [8, 240], strides = [1, 1]} : vector<8x256xf32> to vector<8x240xf32>
    %531 = tpu.concatenate %529, %530 in 1 : vector<8x16xf32>, vector<8x240xf32> -> vector<8x256xf32>
    %532 = arith.addf %527, %531 : vector<8x256xf32>
    %533 = vector.extract_strided_slice %519 {offsets = [16, 0], sizes = [8, 256], strides = [1, 1]} : vector<72x256xf32> to vector<8x256xf32>
    %cst_160 = arith.constant 0.000000e+00 : f32
    %534 = vector.broadcast %cst_160 : f32 to vector<8x15xf32>
    %535 = vector.extract_strided_slice %533 {offsets = [0, 0], sizes = [8, 241], strides = [1, 1]} : vector<8x256xf32> to vector<8x241xf32>
    %536 = tpu.concatenate %534, %535 in 1 : vector<8x15xf32>, vector<8x241xf32> -> vector<8x256xf32>
    %cst_161 = arith.constant 0.000000e+00 : f32
    %537 = vector.shape_cast %22 : vector<1x256xi1> to vector<1x256xi1>
    %538 = vector.broadcast %537 : vector<1x256xi1> to vector<8x256xi1>
    %539 = vector.broadcast %cst_161 : f32 to vector<8x256xf32>
    %540 = arith.select %538, %536, %539 : vector<8x256xi1>, vector<8x256xf32>
    %541 = arith.addf %532, %540 : vector<8x256xf32>
    %542 = vector.extract_strided_slice %519 {offsets = [24, 0], sizes = [8, 256], strides = [1, 1]} : vector<72x256xf32> to vector<8x256xf32>
    %cst_162 = arith.constant 0.000000e+00 : f32
    %543 = vector.broadcast %cst_162 : f32 to vector<8x1xf32>
    %544 = vector.extract_strided_slice %542 {offsets = [0, 0], sizes = [8, 255], strides = [1, 1]} : vector<8x256xf32> to vector<8x255xf32>
    %545 = tpu.concatenate %543, %544 in 1 : vector<8x1xf32>, vector<8x255xf32> -> vector<8x256xf32>
    %cst_163 = arith.constant 0.000000e+00 : f32
    %546 = vector.shape_cast %20 : vector<1x256xi1> to vector<1x256xi1>
    %547 = vector.broadcast %546 : vector<1x256xi1> to vector<8x256xi1>
    %548 = vector.broadcast %cst_163 : f32 to vector<8x256xf32>
    %549 = arith.select %547, %545, %548 : vector<8x256xi1>, vector<8x256xf32>
    %550 = arith.addf %541, %549 : vector<8x256xf32>
    %551 = vector.extract_strided_slice %519 {offsets = [32, 0], sizes = [8, 256], strides = [1, 1]} : vector<72x256xf32> to vector<8x256xf32>
    %552 = arith.addf %550, %551 : vector<8x256xf32>
    %553 = vector.extract_strided_slice %519 {offsets = [40, 0], sizes = [8, 256], strides = [1, 1]} : vector<72x256xf32> to vector<8x256xf32>
    %cst_164 = arith.constant 0.000000e+00 : f32
    %554 = vector.broadcast %cst_164 : f32 to vector<8x1xf32>
    %555 = vector.extract_strided_slice %553 {offsets = [0, 1], sizes = [8, 255], strides = [1, 1]} : vector<8x256xf32> to vector<8x255xf32>
    %556 = tpu.concatenate %555, %554 in 1 : vector<8x255xf32>, vector<8x1xf32> -> vector<8x256xf32>
    %cst_165 = arith.constant 0.000000e+00 : f32
    %557 = vector.shape_cast %22 : vector<1x256xi1> to vector<1x256xi1>
    %558 = vector.broadcast %557 : vector<1x256xi1> to vector<8x256xi1>
    %559 = vector.broadcast %cst_165 : f32 to vector<8x256xf32>
    %560 = arith.select %558, %556, %559 : vector<8x256xi1>, vector<8x256xf32>
    %561 = arith.addf %552, %560 : vector<8x256xf32>
    %562 = vector.extract_strided_slice %519 {offsets = [48, 0], sizes = [8, 256], strides = [1, 1]} : vector<72x256xf32> to vector<8x256xf32>
    %cst_166 = arith.constant 0.000000e+00 : f32
    %563 = vector.broadcast %cst_166 : f32 to vector<8x15xf32>
    %564 = vector.extract_strided_slice %562 {offsets = [0, 15], sizes = [8, 241], strides = [1, 1]} : vector<8x256xf32> to vector<8x241xf32>
    %565 = tpu.concatenate %564, %563 in 1 : vector<8x241xf32>, vector<8x15xf32> -> vector<8x256xf32>
    %cst_167 = arith.constant 0.000000e+00 : f32
    %566 = vector.shape_cast %20 : vector<1x256xi1> to vector<1x256xi1>
    %567 = vector.broadcast %566 : vector<1x256xi1> to vector<8x256xi1>
    %568 = vector.broadcast %cst_167 : f32 to vector<8x256xf32>
    %569 = arith.select %567, %565, %568 : vector<8x256xi1>, vector<8x256xf32>
    %570 = arith.addf %561, %569 : vector<8x256xf32>
    %571 = vector.extract_strided_slice %519 {offsets = [56, 0], sizes = [8, 256], strides = [1, 1]} : vector<72x256xf32> to vector<8x256xf32>
    %cst_168 = arith.constant 0.000000e+00 : f32
    %572 = vector.broadcast %cst_168 : f32 to vector<8x16xf32>
    %573 = vector.extract_strided_slice %571 {offsets = [0, 16], sizes = [8, 240], strides = [1, 1]} : vector<8x256xf32> to vector<8x240xf32>
    %574 = tpu.concatenate %573, %572 in 1 : vector<8x240xf32>, vector<8x16xf32> -> vector<8x256xf32>
    %575 = arith.addf %570, %574 : vector<8x256xf32>
    %576 = vector.extract_strided_slice %519 {offsets = [64, 0], sizes = [8, 256], strides = [1, 1]} : vector<72x256xf32> to vector<8x256xf32>
    %cst_169 = arith.constant 0.000000e+00 : f32
    %577 = vector.broadcast %cst_169 : f32 to vector<8x17xf32>
    %578 = vector.extract_strided_slice %576 {offsets = [0, 17], sizes = [8, 239], strides = [1, 1]} : vector<8x256xf32> to vector<8x239xf32>
    %579 = tpu.concatenate %578, %577 in 1 : vector<8x239xf32>, vector<8x17xf32> -> vector<8x256xf32>
    %cst_170 = arith.constant 0.000000e+00 : f32
    %580 = vector.shape_cast %22 : vector<1x256xi1> to vector<1x256xi1>
    %581 = vector.broadcast %580 : vector<1x256xi1> to vector<8x256xi1>
    %582 = vector.broadcast %cst_170 : f32 to vector<8x256xf32>
    %583 = arith.select %581, %579, %582 : vector<8x256xi1>, vector<8x256xf32>
    %584 = arith.addf %575, %583 : vector<8x256xf32>
    %c0_171 = arith.constant 0 : index
    %c0_172 = arith.constant 0 : index
    %585 = vector.load %arg23[%c0_171, %c0_172] : memref<8x1xf32, #tpu.memory_space<vmem>>, vector<8x1xf32>
    %586 = vector.broadcast %585 : vector<8x1xf32> to vector<8x256xf32>
    %587 = arith.addf %584, %586 : vector<8x256xf32>
    %cst_173 = arith.constant 0.000000e+00 : f32
    %588 = vector.broadcast %cst_173 : f32 to vector<8x256xf32>
    %589 = arith.maximumf %587, %588 : vector<8x256xf32>
    %590 = arith.truncf %589 : vector<8x256xf32> to vector<8x256xbf16>
    %c0_174 = arith.constant 0 : index
    %c0_175 = arith.constant 0 : index
    %591 = vector.load %arg27[%c0_174, %c0_175] : memref<72x8xbf16, #tpu.memory_space<vmem>>, vector<72x8xbf16>
    %cst_176 = arith.constant dense<0.000000e+00> : vector<72x256xf32>
    %592 = tpu.matmul %591, %590, %cst_176 {dimension_numbers = #tpu.dot_dimension_numbers<[1], [0], [0], [1], [0, 0, 1, 1], [], []>} : vector<72x8xbf16>, vector<8x256xbf16>, vector<72x256xf32> -> vector<72x256xf32>
    %593 = vector.extract_strided_slice %592 {offsets = [0, 0], sizes = [8, 256], strides = [1, 1]} : vector<72x256xf32> to vector<8x256xf32>
    %cst_177 = arith.constant 0.000000e+00 : f32
    %594 = vector.broadcast %cst_177 : f32 to vector<8x17xf32>
    %595 = vector.extract_strided_slice %593 {offsets = [0, 0], sizes = [8, 239], strides = [1, 1]} : vector<8x256xf32> to vector<8x239xf32>
    %596 = tpu.concatenate %594, %595 in 1 : vector<8x17xf32>, vector<8x239xf32> -> vector<8x256xf32>
    %cst_178 = arith.constant 0.000000e+00 : f32
    %597 = vector.shape_cast %20 : vector<1x256xi1> to vector<1x256xi1>
    %598 = vector.broadcast %597 : vector<1x256xi1> to vector<8x256xi1>
    %599 = vector.broadcast %cst_178 : f32 to vector<8x256xf32>
    %600 = arith.select %598, %596, %599 : vector<8x256xi1>, vector<8x256xf32>
    %601 = vector.extract_strided_slice %592 {offsets = [8, 0], sizes = [8, 256], strides = [1, 1]} : vector<72x256xf32> to vector<8x256xf32>
    %cst_179 = arith.constant 0.000000e+00 : f32
    %602 = vector.broadcast %cst_179 : f32 to vector<8x16xf32>
    %603 = vector.extract_strided_slice %601 {offsets = [0, 0], sizes = [8, 240], strides = [1, 1]} : vector<8x256xf32> to vector<8x240xf32>
    %604 = tpu.concatenate %602, %603 in 1 : vector<8x16xf32>, vector<8x240xf32> -> vector<8x256xf32>
    %605 = arith.addf %600, %604 : vector<8x256xf32>
    %606 = vector.extract_strided_slice %592 {offsets = [16, 0], sizes = [8, 256], strides = [1, 1]} : vector<72x256xf32> to vector<8x256xf32>
    %cst_180 = arith.constant 0.000000e+00 : f32
    %607 = vector.broadcast %cst_180 : f32 to vector<8x15xf32>
    %608 = vector.extract_strided_slice %606 {offsets = [0, 0], sizes = [8, 241], strides = [1, 1]} : vector<8x256xf32> to vector<8x241xf32>
    %609 = tpu.concatenate %607, %608 in 1 : vector<8x15xf32>, vector<8x241xf32> -> vector<8x256xf32>
    %cst_181 = arith.constant 0.000000e+00 : f32
    %610 = vector.shape_cast %22 : vector<1x256xi1> to vector<1x256xi1>
    %611 = vector.broadcast %610 : vector<1x256xi1> to vector<8x256xi1>
    %612 = vector.broadcast %cst_181 : f32 to vector<8x256xf32>
    %613 = arith.select %611, %609, %612 : vector<8x256xi1>, vector<8x256xf32>
    %614 = arith.addf %605, %613 : vector<8x256xf32>
    %615 = vector.extract_strided_slice %592 {offsets = [24, 0], sizes = [8, 256], strides = [1, 1]} : vector<72x256xf32> to vector<8x256xf32>
    %cst_182 = arith.constant 0.000000e+00 : f32
    %616 = vector.broadcast %cst_182 : f32 to vector<8x1xf32>
    %617 = vector.extract_strided_slice %615 {offsets = [0, 0], sizes = [8, 255], strides = [1, 1]} : vector<8x256xf32> to vector<8x255xf32>
    %618 = tpu.concatenate %616, %617 in 1 : vector<8x1xf32>, vector<8x255xf32> -> vector<8x256xf32>
    %cst_183 = arith.constant 0.000000e+00 : f32
    %619 = vector.shape_cast %20 : vector<1x256xi1> to vector<1x256xi1>
    %620 = vector.broadcast %619 : vector<1x256xi1> to vector<8x256xi1>
    %621 = vector.broadcast %cst_183 : f32 to vector<8x256xf32>
    %622 = arith.select %620, %618, %621 : vector<8x256xi1>, vector<8x256xf32>
    %623 = arith.addf %614, %622 : vector<8x256xf32>
    %624 = vector.extract_strided_slice %592 {offsets = [32, 0], sizes = [8, 256], strides = [1, 1]} : vector<72x256xf32> to vector<8x256xf32>
    %625 = arith.addf %623, %624 : vector<8x256xf32>
    %626 = vector.extract_strided_slice %592 {offsets = [40, 0], sizes = [8, 256], strides = [1, 1]} : vector<72x256xf32> to vector<8x256xf32>
    %cst_184 = arith.constant 0.000000e+00 : f32
    %627 = vector.broadcast %cst_184 : f32 to vector<8x1xf32>
    %628 = vector.extract_strided_slice %626 {offsets = [0, 1], sizes = [8, 255], strides = [1, 1]} : vector<8x256xf32> to vector<8x255xf32>
    %629 = tpu.concatenate %628, %627 in 1 : vector<8x255xf32>, vector<8x1xf32> -> vector<8x256xf32>
    %cst_185 = arith.constant 0.000000e+00 : f32
    %630 = vector.shape_cast %22 : vector<1x256xi1> to vector<1x256xi1>
    %631 = vector.broadcast %630 : vector<1x256xi1> to vector<8x256xi1>
    %632 = vector.broadcast %cst_185 : f32 to vector<8x256xf32>
    %633 = arith.select %631, %629, %632 : vector<8x256xi1>, vector<8x256xf32>
    %634 = arith.addf %625, %633 : vector<8x256xf32>
    %635 = vector.extract_strided_slice %592 {offsets = [48, 0], sizes = [8, 256], strides = [1, 1]} : vector<72x256xf32> to vector<8x256xf32>
    %cst_186 = arith.constant 0.000000e+00 : f32
    %636 = vector.broadcast %cst_186 : f32 to vector<8x15xf32>
    %637 = vector.extract_strided_slice %635 {offsets = [0, 15], sizes = [8, 241], strides = [1, 1]} : vector<8x256xf32> to vector<8x241xf32>
    %638 = tpu.concatenate %637, %636 in 1 : vector<8x241xf32>, vector<8x15xf32> -> vector<8x256xf32>
    %cst_187 = arith.constant 0.000000e+00 : f32
    %639 = vector.shape_cast %20 : vector<1x256xi1> to vector<1x256xi1>
    %640 = vector.broadcast %639 : vector<1x256xi1> to vector<8x256xi1>
    %641 = vector.broadcast %cst_187 : f32 to vector<8x256xf32>
    %642 = arith.select %640, %638, %641 : vector<8x256xi1>, vector<8x256xf32>
    %643 = arith.addf %634, %642 : vector<8x256xf32>
    %644 = vector.extract_strided_slice %592 {offsets = [56, 0], sizes = [8, 256], strides = [1, 1]} : vector<72x256xf32> to vector<8x256xf32>
    %cst_188 = arith.constant 0.000000e+00 : f32
    %645 = vector.broadcast %cst_188 : f32 to vector<8x16xf32>
    %646 = vector.extract_strided_slice %644 {offsets = [0, 16], sizes = [8, 240], strides = [1, 1]} : vector<8x256xf32> to vector<8x240xf32>
    %647 = tpu.concatenate %646, %645 in 1 : vector<8x240xf32>, vector<8x16xf32> -> vector<8x256xf32>
    %648 = arith.addf %643, %647 : vector<8x256xf32>
    %649 = vector.extract_strided_slice %592 {offsets = [64, 0], sizes = [8, 256], strides = [1, 1]} : vector<72x256xf32> to vector<8x256xf32>
    %cst_189 = arith.constant 0.000000e+00 : f32
    %650 = vector.broadcast %cst_189 : f32 to vector<8x17xf32>
    %651 = vector.extract_strided_slice %649 {offsets = [0, 17], sizes = [8, 239], strides = [1, 1]} : vector<8x256xf32> to vector<8x239xf32>
    %652 = tpu.concatenate %651, %650 in 1 : vector<8x239xf32>, vector<8x17xf32> -> vector<8x256xf32>
    %cst_190 = arith.constant 0.000000e+00 : f32
    %653 = vector.shape_cast %22 : vector<1x256xi1> to vector<1x256xi1>
    %654 = vector.broadcast %653 : vector<1x256xi1> to vector<8x256xi1>
    %655 = vector.broadcast %cst_190 : f32 to vector<8x256xf32>
    %656 = arith.select %654, %652, %655 : vector<8x256xi1>, vector<8x256xf32>
    %657 = arith.addf %648, %656 : vector<8x256xf32>
    %c0_191 = arith.constant 0 : index
    %c0_192 = arith.constant 0 : index
    %658 = vector.load %arg24[%c0_191, %c0_192] : memref<8x1xf32, #tpu.memory_space<vmem>>, vector<8x1xf32>
    %659 = vector.broadcast %658 : vector<8x1xf32> to vector<8x256xf32>
    %660 = arith.addf %657, %659 : vector<8x256xf32>
    %cst_193 = arith.constant 0.000000e+00 : f32
    %661 = vector.broadcast %cst_193 : f32 to vector<8x256xf32>
    %662 = arith.maximumf %660, %661 : vector<8x256xf32>
    %663 = arith.truncf %662 : vector<8x256xf32> to vector<8x256xbf16>
    %664 = arith.extf %663 : vector<8x256xbf16> to vector<8x256xf32>
    %cst_194 = arith.constant 0.000000e+00 : f32
    %665 = vector.broadcast %cst_194 : f32 to vector<8x1xf32>
    %666 = vector.extract_strided_slice %664 {offsets = [0, 1], sizes = [8, 255], strides = [1, 1]} : vector<8x256xf32> to vector<8x255xf32>
    %667 = tpu.concatenate %666, %665 in 1 : vector<8x255xf32>, vector<8x1xf32> -> vector<8x256xf32>
    %668 = arith.maximumf %664, %667 : vector<8x256xf32>
    %cst_195 = arith.constant 0.000000e+00 : f32
    %669 = vector.broadcast %cst_195 : f32 to vector<8x16xf32>
    %670 = vector.extract_strided_slice %664 {offsets = [0, 16], sizes = [8, 240], strides = [1, 1]} : vector<8x256xf32> to vector<8x240xf32>
    %671 = tpu.concatenate %670, %669 in 1 : vector<8x240xf32>, vector<8x16xf32> -> vector<8x256xf32>
    %cst_196 = arith.constant 0.000000e+00 : f32
    %672 = vector.broadcast %cst_196 : f32 to vector<8x17xf32>
    %673 = vector.extract_strided_slice %664 {offsets = [0, 17], sizes = [8, 239], strides = [1, 1]} : vector<8x256xf32> to vector<8x239xf32>
    %674 = tpu.concatenate %673, %672 in 1 : vector<8x239xf32>, vector<8x17xf32> -> vector<8x256xf32>
    %675 = arith.maximumf %671, %674 : vector<8x256xf32>
    %676 = arith.maximumf %668, %675 : vector<8x256xf32>
    %677 = arith.truncf %676 : vector<8x256xf32> to vector<8x256xbf16>
    %c0_197 = arith.constant 0 : index
    %c0_198 = arith.constant 0 : index
    %678 = vector.load %arg3[%c0_197, %c0_198] : memref<256x64xbf16, #tpu.memory_space<vmem>>, vector<256x64xbf16>
    %cst_199 = arith.constant dense<0.000000e+00> : vector<8x64xf32>
    %679 = tpu.matmul %677, %678, %cst_199 {dimension_numbers = #tpu.dot_dimension_numbers<[1], [0], [0], [1], [0, 0, 1, 1], [], []>} : vector<8x256xbf16>, vector<256x64xbf16>, vector<8x64xf32> -> vector<8x64xf32>
    %680 = arith.truncf %679 : vector<8x64xf32> to vector<8x64xbf16>
    %c0_200 = arith.constant 0 : index
    %c0_201 = arith.constant 0 : index
    %681 = vector.load %arg21[%c0_200, %c0_201] : memref<144x8xbf16, #tpu.memory_space<vmem>>, vector<144x8xbf16>
    %cst_202 = arith.constant dense<0.000000e+00> : vector<144x64xf32>
    %682 = tpu.matmul %681, %680, %cst_202 {dimension_numbers = #tpu.dot_dimension_numbers<[1], [0], [0], [1], [0, 0, 1, 1], [], []>} : vector<144x8xbf16>, vector<8x64xbf16>, vector<144x64xf32> -> vector<144x64xf32>
    %683 = vector.extract_strided_slice %682 {offsets = [0, 0], sizes = [16, 64], strides = [1, 1]} : vector<144x64xf32> to vector<16x64xf32>
    %cst_203 = arith.constant 0.000000e+00 : f32
    %684 = vector.broadcast %cst_203 : f32 to vector<16x9xf32>
    %685 = vector.extract_strided_slice %683 {offsets = [0, 0], sizes = [16, 55], strides = [1, 1]} : vector<16x64xf32> to vector<16x55xf32>
    %686 = tpu.concatenate %684, %685 in 1 : vector<16x9xf32>, vector<16x55xf32> -> vector<16x64xf32>
    %cst_204 = arith.constant 0.000000e+00 : f32
    %687 = vector.shape_cast %204 : vector<1x64xi1> to vector<1x64xi1>
    %688 = vector.broadcast %687 : vector<1x64xi1> to vector<16x64xi1>
    %689 = vector.broadcast %cst_204 : f32 to vector<16x64xf32>
    %690 = arith.select %688, %686, %689 : vector<16x64xi1>, vector<16x64xf32>
    %691 = vector.extract_strided_slice %682 {offsets = [16, 0], sizes = [16, 64], strides = [1, 1]} : vector<144x64xf32> to vector<16x64xf32>
    %cst_205 = arith.constant 0.000000e+00 : f32
    %692 = vector.broadcast %cst_205 : f32 to vector<16x8xf32>
    %693 = vector.extract_strided_slice %691 {offsets = [0, 0], sizes = [16, 56], strides = [1, 1]} : vector<16x64xf32> to vector<16x56xf32>
    %694 = tpu.concatenate %692, %693 in 1 : vector<16x8xf32>, vector<16x56xf32> -> vector<16x64xf32>
    %695 = arith.addf %690, %694 : vector<16x64xf32>
    %696 = vector.extract_strided_slice %682 {offsets = [32, 0], sizes = [16, 64], strides = [1, 1]} : vector<144x64xf32> to vector<16x64xf32>
    %cst_206 = arith.constant 0.000000e+00 : f32
    %697 = vector.broadcast %cst_206 : f32 to vector<16x7xf32>
    %698 = vector.extract_strided_slice %696 {offsets = [0, 0], sizes = [16, 57], strides = [1, 1]} : vector<16x64xf32> to vector<16x57xf32>
    %699 = tpu.concatenate %697, %698 in 1 : vector<16x7xf32>, vector<16x57xf32> -> vector<16x64xf32>
    %cst_207 = arith.constant 0.000000e+00 : f32
    %700 = vector.shape_cast %206 : vector<1x64xi1> to vector<1x64xi1>
    %701 = vector.broadcast %700 : vector<1x64xi1> to vector<16x64xi1>
    %702 = vector.broadcast %cst_207 : f32 to vector<16x64xf32>
    %703 = arith.select %701, %699, %702 : vector<16x64xi1>, vector<16x64xf32>
    %704 = arith.addf %695, %703 : vector<16x64xf32>
    %705 = vector.extract_strided_slice %682 {offsets = [48, 0], sizes = [16, 64], strides = [1, 1]} : vector<144x64xf32> to vector<16x64xf32>
    %cst_208 = arith.constant 0.000000e+00 : f32
    %706 = vector.broadcast %cst_208 : f32 to vector<16x1xf32>
    %707 = vector.extract_strided_slice %705 {offsets = [0, 0], sizes = [16, 63], strides = [1, 1]} : vector<16x64xf32> to vector<16x63xf32>
    %708 = tpu.concatenate %706, %707 in 1 : vector<16x1xf32>, vector<16x63xf32> -> vector<16x64xf32>
    %cst_209 = arith.constant 0.000000e+00 : f32
    %709 = vector.shape_cast %204 : vector<1x64xi1> to vector<1x64xi1>
    %710 = vector.broadcast %709 : vector<1x64xi1> to vector<16x64xi1>
    %711 = vector.broadcast %cst_209 : f32 to vector<16x64xf32>
    %712 = arith.select %710, %708, %711 : vector<16x64xi1>, vector<16x64xf32>
    %713 = arith.addf %704, %712 : vector<16x64xf32>
    %714 = vector.extract_strided_slice %682 {offsets = [64, 0], sizes = [16, 64], strides = [1, 1]} : vector<144x64xf32> to vector<16x64xf32>
    %715 = arith.addf %713, %714 : vector<16x64xf32>
    %716 = vector.extract_strided_slice %682 {offsets = [80, 0], sizes = [16, 64], strides = [1, 1]} : vector<144x64xf32> to vector<16x64xf32>
    %cst_210 = arith.constant 0.000000e+00 : f32
    %717 = vector.broadcast %cst_210 : f32 to vector<16x1xf32>
    %718 = vector.extract_strided_slice %716 {offsets = [0, 1], sizes = [16, 63], strides = [1, 1]} : vector<16x64xf32> to vector<16x63xf32>
    %719 = tpu.concatenate %718, %717 in 1 : vector<16x63xf32>, vector<16x1xf32> -> vector<16x64xf32>
    %cst_211 = arith.constant 0.000000e+00 : f32
    %720 = vector.shape_cast %206 : vector<1x64xi1> to vector<1x64xi1>
    %721 = vector.broadcast %720 : vector<1x64xi1> to vector<16x64xi1>
    %722 = vector.broadcast %cst_211 : f32 to vector<16x64xf32>
    %723 = arith.select %721, %719, %722 : vector<16x64xi1>, vector<16x64xf32>
    %724 = arith.addf %715, %723 : vector<16x64xf32>
    %725 = vector.extract_strided_slice %682 {offsets = [96, 0], sizes = [16, 64], strides = [1, 1]} : vector<144x64xf32> to vector<16x64xf32>
    %cst_212 = arith.constant 0.000000e+00 : f32
    %726 = vector.broadcast %cst_212 : f32 to vector<16x7xf32>
    %727 = vector.extract_strided_slice %725 {offsets = [0, 7], sizes = [16, 57], strides = [1, 1]} : vector<16x64xf32> to vector<16x57xf32>
    %728 = tpu.concatenate %727, %726 in 1 : vector<16x57xf32>, vector<16x7xf32> -> vector<16x64xf32>
    %cst_213 = arith.constant 0.000000e+00 : f32
    %729 = vector.shape_cast %204 : vector<1x64xi1> to vector<1x64xi1>
    %730 = vector.broadcast %729 : vector<1x64xi1> to vector<16x64xi1>
    %731 = vector.broadcast %cst_213 : f32 to vector<16x64xf32>
    %732 = arith.select %730, %728, %731 : vector<16x64xi1>, vector<16x64xf32>
    %733 = arith.addf %724, %732 : vector<16x64xf32>
    %734 = vector.extract_strided_slice %682 {offsets = [112, 0], sizes = [16, 64], strides = [1, 1]} : vector<144x64xf32> to vector<16x64xf32>
    %cst_214 = arith.constant 0.000000e+00 : f32
    %735 = vector.broadcast %cst_214 : f32 to vector<16x8xf32>
    %736 = vector.extract_strided_slice %734 {offsets = [0, 8], sizes = [16, 56], strides = [1, 1]} : vector<16x64xf32> to vector<16x56xf32>
    %737 = tpu.concatenate %736, %735 in 1 : vector<16x56xf32>, vector<16x8xf32> -> vector<16x64xf32>
    %738 = arith.addf %733, %737 : vector<16x64xf32>
    %739 = vector.extract_strided_slice %682 {offsets = [128, 0], sizes = [16, 64], strides = [1, 1]} : vector<144x64xf32> to vector<16x64xf32>
    %cst_215 = arith.constant 0.000000e+00 : f32
    %740 = vector.broadcast %cst_215 : f32 to vector<16x9xf32>
    %741 = vector.extract_strided_slice %739 {offsets = [0, 9], sizes = [16, 55], strides = [1, 1]} : vector<16x64xf32> to vector<16x55xf32>
    %742 = tpu.concatenate %741, %740 in 1 : vector<16x55xf32>, vector<16x9xf32> -> vector<16x64xf32>
    %cst_216 = arith.constant 0.000000e+00 : f32
    %743 = vector.shape_cast %206 : vector<1x64xi1> to vector<1x64xi1>
    %744 = vector.broadcast %743 : vector<1x64xi1> to vector<16x64xi1>
    %745 = vector.broadcast %cst_216 : f32 to vector<16x64xf32>
    %746 = arith.select %744, %742, %745 : vector<16x64xi1>, vector<16x64xf32>
    %747 = arith.addf %738, %746 : vector<16x64xf32>
    %c0_217 = arith.constant 0 : index
    %c0_218 = arith.constant 0 : index
    %748 = vector.load %arg19[%c0_217, %c0_218] : memref<16x1xf32, #tpu.memory_space<vmem>>, vector<16x1xf32>
    %749 = vector.broadcast %748 : vector<16x1xf32> to vector<16x64xf32>
    %750 = arith.addf %747, %749 : vector<16x64xf32>
    %cst_219 = arith.constant 0.000000e+00 : f32
    %751 = vector.broadcast %cst_219 : f32 to vector<16x64xf32>
    %752 = arith.maximumf %750, %751 : vector<16x64xf32>
    %753 = arith.truncf %752 : vector<16x64xf32> to vector<16x64xbf16>
    %c0_220 = arith.constant 0 : index
    %c0_221 = arith.constant 0 : index
    %754 = vector.load %arg22[%c0_220, %c0_221] : memref<144x16xbf16, #tpu.memory_space<vmem>>, vector<144x16xbf16>
    %cst_222 = arith.constant dense<0.000000e+00> : vector<144x64xf32>
    %755 = tpu.matmul %754, %753, %cst_222 {dimension_numbers = #tpu.dot_dimension_numbers<[1], [0], [0], [1], [0, 0, 1, 1], [], []>} : vector<144x16xbf16>, vector<16x64xbf16>, vector<144x64xf32> -> vector<144x64xf32>
    %756 = vector.extract_strided_slice %755 {offsets = [0, 0], sizes = [16, 64], strides = [1, 1]} : vector<144x64xf32> to vector<16x64xf32>
    %cst_223 = arith.constant 0.000000e+00 : f32
    %757 = vector.broadcast %cst_223 : f32 to vector<16x9xf32>
    %758 = vector.extract_strided_slice %756 {offsets = [0, 0], sizes = [16, 55], strides = [1, 1]} : vector<16x64xf32> to vector<16x55xf32>
    %759 = tpu.concatenate %757, %758 in 1 : vector<16x9xf32>, vector<16x55xf32> -> vector<16x64xf32>
    %cst_224 = arith.constant 0.000000e+00 : f32
    %760 = vector.shape_cast %204 : vector<1x64xi1> to vector<1x64xi1>
    %761 = vector.broadcast %760 : vector<1x64xi1> to vector<16x64xi1>
    %762 = vector.broadcast %cst_224 : f32 to vector<16x64xf32>
    %763 = arith.select %761, %759, %762 : vector<16x64xi1>, vector<16x64xf32>
    %764 = vector.extract_strided_slice %755 {offsets = [16, 0], sizes = [16, 64], strides = [1, 1]} : vector<144x64xf32> to vector<16x64xf32>
    %cst_225 = arith.constant 0.000000e+00 : f32
    %765 = vector.broadcast %cst_225 : f32 to vector<16x8xf32>
    %766 = vector.extract_strided_slice %764 {offsets = [0, 0], sizes = [16, 56], strides = [1, 1]} : vector<16x64xf32> to vector<16x56xf32>
    %767 = tpu.concatenate %765, %766 in 1 : vector<16x8xf32>, vector<16x56xf32> -> vector<16x64xf32>
    %768 = arith.addf %763, %767 : vector<16x64xf32>
    %769 = vector.extract_strided_slice %755 {offsets = [32, 0], sizes = [16, 64], strides = [1, 1]} : vector<144x64xf32> to vector<16x64xf32>
    %cst_226 = arith.constant 0.000000e+00 : f32
    %770 = vector.broadcast %cst_226 : f32 to vector<16x7xf32>
    %771 = vector.extract_strided_slice %769 {offsets = [0, 0], sizes = [16, 57], strides = [1, 1]} : vector<16x64xf32> to vector<16x57xf32>
    %772 = tpu.concatenate %770, %771 in 1 : vector<16x7xf32>, vector<16x57xf32> -> vector<16x64xf32>
    %cst_227 = arith.constant 0.000000e+00 : f32
    %773 = vector.shape_cast %206 : vector<1x64xi1> to vector<1x64xi1>
    %774 = vector.broadcast %773 : vector<1x64xi1> to vector<16x64xi1>
    %775 = vector.broadcast %cst_227 : f32 to vector<16x64xf32>
    %776 = arith.select %774, %772, %775 : vector<16x64xi1>, vector<16x64xf32>
    %777 = arith.addf %768, %776 : vector<16x64xf32>
    %778 = vector.extract_strided_slice %755 {offsets = [48, 0], sizes = [16, 64], strides = [1, 1]} : vector<144x64xf32> to vector<16x64xf32>
    %cst_228 = arith.constant 0.000000e+00 : f32
    %779 = vector.broadcast %cst_228 : f32 to vector<16x1xf32>
    %780 = vector.extract_strided_slice %778 {offsets = [0, 0], sizes = [16, 63], strides = [1, 1]} : vector<16x64xf32> to vector<16x63xf32>
    %781 = tpu.concatenate %779, %780 in 1 : vector<16x1xf32>, vector<16x63xf32> -> vector<16x64xf32>
    %cst_229 = arith.constant 0.000000e+00 : f32
    %782 = vector.shape_cast %204 : vector<1x64xi1> to vector<1x64xi1>
    %783 = vector.broadcast %782 : vector<1x64xi1> to vector<16x64xi1>
    %784 = vector.broadcast %cst_229 : f32 to vector<16x64xf32>
    %785 = arith.select %783, %781, %784 : vector<16x64xi1>, vector<16x64xf32>
    %786 = arith.addf %777, %785 : vector<16x64xf32>
    %787 = vector.extract_strided_slice %755 {offsets = [64, 0], sizes = [16, 64], strides = [1, 1]} : vector<144x64xf32> to vector<16x64xf32>
    %788 = arith.addf %786, %787 : vector<16x64xf32>
    %789 = vector.extract_strided_slice %755 {offsets = [80, 0], sizes = [16, 64], strides = [1, 1]} : vector<144x64xf32> to vector<16x64xf32>
    %cst_230 = arith.constant 0.000000e+00 : f32
    %790 = vector.broadcast %cst_230 : f32 to vector<16x1xf32>
    %791 = vector.extract_strided_slice %789 {offsets = [0, 1], sizes = [16, 63], strides = [1, 1]} : vector<16x64xf32> to vector<16x63xf32>
    %792 = tpu.concatenate %791, %790 in 1 : vector<16x63xf32>, vector<16x1xf32> -> vector<16x64xf32>
    %cst_231 = arith.constant 0.000000e+00 : f32
    %793 = vector.shape_cast %206 : vector<1x64xi1> to vector<1x64xi1>
    %794 = vector.broadcast %793 : vector<1x64xi1> to vector<16x64xi1>
    %795 = vector.broadcast %cst_231 : f32 to vector<16x64xf32>
    %796 = arith.select %794, %792, %795 : vector<16x64xi1>, vector<16x64xf32>
    %797 = arith.addf %788, %796 : vector<16x64xf32>
    %798 = vector.extract_strided_slice %755 {offsets = [96, 0], sizes = [16, 64], strides = [1, 1]} : vector<144x64xf32> to vector<16x64xf32>
    %cst_232 = arith.constant 0.000000e+00 : f32
    %799 = vector.broadcast %cst_232 : f32 to vector<16x7xf32>
    %800 = vector.extract_strided_slice %798 {offsets = [0, 7], sizes = [16, 57], strides = [1, 1]} : vector<16x64xf32> to vector<16x57xf32>
    %801 = tpu.concatenate %800, %799 in 1 : vector<16x57xf32>, vector<16x7xf32> -> vector<16x64xf32>
    %cst_233 = arith.constant 0.000000e+00 : f32
    %802 = vector.shape_cast %204 : vector<1x64xi1> to vector<1x64xi1>
    %803 = vector.broadcast %802 : vector<1x64xi1> to vector<16x64xi1>
    %804 = vector.broadcast %cst_233 : f32 to vector<16x64xf32>
    %805 = arith.select %803, %801, %804 : vector<16x64xi1>, vector<16x64xf32>
    %806 = arith.addf %797, %805 : vector<16x64xf32>
    %807 = vector.extract_strided_slice %755 {offsets = [112, 0], sizes = [16, 64], strides = [1, 1]} : vector<144x64xf32> to vector<16x64xf32>
    %cst_234 = arith.constant 0.000000e+00 : f32
    %808 = vector.broadcast %cst_234 : f32 to vector<16x8xf32>
    %809 = vector.extract_strided_slice %807 {offsets = [0, 8], sizes = [16, 56], strides = [1, 1]} : vector<16x64xf32> to vector<16x56xf32>
    %810 = tpu.concatenate %809, %808 in 1 : vector<16x56xf32>, vector<16x8xf32> -> vector<16x64xf32>
    %811 = arith.addf %806, %810 : vector<16x64xf32>
    %812 = vector.extract_strided_slice %755 {offsets = [128, 0], sizes = [16, 64], strides = [1, 1]} : vector<144x64xf32> to vector<16x64xf32>
    %cst_235 = arith.constant 0.000000e+00 : f32
    %813 = vector.broadcast %cst_235 : f32 to vector<16x9xf32>
    %814 = vector.extract_strided_slice %812 {offsets = [0, 9], sizes = [16, 55], strides = [1, 1]} : vector<16x64xf32> to vector<16x55xf32>
    %815 = tpu.concatenate %814, %813 in 1 : vector<16x55xf32>, vector<16x9xf32> -> vector<16x64xf32>
    %cst_236 = arith.constant 0.000000e+00 : f32
    %816 = vector.shape_cast %206 : vector<1x64xi1> to vector<1x64xi1>
    %817 = vector.broadcast %816 : vector<1x64xi1> to vector<16x64xi1>
    %818 = vector.broadcast %cst_236 : f32 to vector<16x64xf32>
    %819 = arith.select %817, %815, %818 : vector<16x64xi1>, vector<16x64xf32>
    %820 = arith.addf %811, %819 : vector<16x64xf32>
    %c0_237 = arith.constant 0 : index
    %c0_238 = arith.constant 0 : index
    %821 = vector.load %arg20[%c0_237, %c0_238] : memref<16x1xf32, #tpu.memory_space<vmem>>, vector<16x1xf32>
    %822 = vector.broadcast %821 : vector<16x1xf32> to vector<16x64xf32>
    %823 = arith.addf %820, %822 : vector<16x64xf32>
    %cst_239 = arith.constant 0.000000e+00 : f32
    %824 = vector.broadcast %cst_239 : f32 to vector<16x64xf32>
    %825 = arith.maximumf %823, %824 : vector<16x64xf32>
    %826 = arith.truncf %825 : vector<16x64xf32> to vector<16x64xbf16>
    %c0_240 = arith.constant 0 : index
    %c0_241 = arith.constant 0 : index
    %827 = vector.load %arg2[%c0_240, %c0_241] : memref<64x256xbf16, #tpu.memory_space<vmem>>, vector<64x256xbf16>
    %cst_242 = arith.constant dense<0.000000e+00> : vector<16x256xf32>
    %828 = tpu.matmul %826, %827, %cst_242 {dimension_numbers = #tpu.dot_dimension_numbers<[1], [0], [0], [1], [0, 0, 1, 1], [], []>} : vector<16x64xbf16>, vector<64x256xbf16>, vector<16x256xf32> -> vector<16x256xf32>
    %829 = arith.truncf %828 : vector<16x256xf32> to vector<16x256xbf16>
    %c0_243 = arith.constant 0 : index
    %c0_244 = arith.constant 0 : index
    %830 = vector.load %arg32[%c0_243, %c0_244] : memref<72x8xbf16, #tpu.memory_space<vmem>>, vector<72x8xbf16>
    %cst_245 = arith.constant dense<0.000000e+00> : vector<72x256xf32>
    %831 = tpu.matmul %830, %663, %cst_245 {dimension_numbers = #tpu.dot_dimension_numbers<[1], [0], [0], [1], [0, 0, 1, 1], [], []>} : vector<72x8xbf16>, vector<8x256xbf16>, vector<72x256xf32> -> vector<72x256xf32>
    %c0_246 = arith.constant 0 : index
    %c0_247 = arith.constant 0 : index
    %832 = vector.load %arg33[%c0_246, %c0_247] : memref<72x16xbf16, #tpu.memory_space<vmem>>, vector<72x16xbf16>
    %cst_248 = arith.constant dense<0.000000e+00> : vector<72x256xf32>
    %833 = tpu.matmul %832, %829, %cst_248 {dimension_numbers = #tpu.dot_dimension_numbers<[1], [0], [0], [1], [0, 0, 1, 1], [], []>} : vector<72x16xbf16>, vector<16x256xbf16>, vector<72x256xf32> -> vector<72x256xf32>
    %834 = arith.addf %831, %833 : vector<72x256xf32>
    %835 = vector.extract_strided_slice %834 {offsets = [0, 0], sizes = [8, 256], strides = [1, 1]} : vector<72x256xf32> to vector<8x256xf32>
    %cst_249 = arith.constant 0.000000e+00 : f32
    %836 = vector.broadcast %cst_249 : f32 to vector<8x17xf32>
    %837 = vector.extract_strided_slice %835 {offsets = [0, 0], sizes = [8, 239], strides = [1, 1]} : vector<8x256xf32> to vector<8x239xf32>
    %838 = tpu.concatenate %836, %837 in 1 : vector<8x17xf32>, vector<8x239xf32> -> vector<8x256xf32>
    %cst_250 = arith.constant 0.000000e+00 : f32
    %839 = vector.shape_cast %20 : vector<1x256xi1> to vector<1x256xi1>
    %840 = vector.broadcast %839 : vector<1x256xi1> to vector<8x256xi1>
    %841 = vector.broadcast %cst_250 : f32 to vector<8x256xf32>
    %842 = arith.select %840, %838, %841 : vector<8x256xi1>, vector<8x256xf32>
    %843 = vector.extract_strided_slice %834 {offsets = [8, 0], sizes = [8, 256], strides = [1, 1]} : vector<72x256xf32> to vector<8x256xf32>
    %cst_251 = arith.constant 0.000000e+00 : f32
    %844 = vector.broadcast %cst_251 : f32 to vector<8x16xf32>
    %845 = vector.extract_strided_slice %843 {offsets = [0, 0], sizes = [8, 240], strides = [1, 1]} : vector<8x256xf32> to vector<8x240xf32>
    %846 = tpu.concatenate %844, %845 in 1 : vector<8x16xf32>, vector<8x240xf32> -> vector<8x256xf32>
    %847 = arith.addf %842, %846 : vector<8x256xf32>
    %848 = vector.extract_strided_slice %834 {offsets = [16, 0], sizes = [8, 256], strides = [1, 1]} : vector<72x256xf32> to vector<8x256xf32>
    %cst_252 = arith.constant 0.000000e+00 : f32
    %849 = vector.broadcast %cst_252 : f32 to vector<8x15xf32>
    %850 = vector.extract_strided_slice %848 {offsets = [0, 0], sizes = [8, 241], strides = [1, 1]} : vector<8x256xf32> to vector<8x241xf32>
    %851 = tpu.concatenate %849, %850 in 1 : vector<8x15xf32>, vector<8x241xf32> -> vector<8x256xf32>
    %cst_253 = arith.constant 0.000000e+00 : f32
    %852 = vector.shape_cast %22 : vector<1x256xi1> to vector<1x256xi1>
    %853 = vector.broadcast %852 : vector<1x256xi1> to vector<8x256xi1>
    %854 = vector.broadcast %cst_253 : f32 to vector<8x256xf32>
    %855 = arith.select %853, %851, %854 : vector<8x256xi1>, vector<8x256xf32>
    %856 = arith.addf %847, %855 : vector<8x256xf32>
    %857 = vector.extract_strided_slice %834 {offsets = [24, 0], sizes = [8, 256], strides = [1, 1]} : vector<72x256xf32> to vector<8x256xf32>
    %cst_254 = arith.constant 0.000000e+00 : f32
    %858 = vector.broadcast %cst_254 : f32 to vector<8x1xf32>
    %859 = vector.extract_strided_slice %857 {offsets = [0, 0], sizes = [8, 255], strides = [1, 1]} : vector<8x256xf32> to vector<8x255xf32>
    %860 = tpu.concatenate %858, %859 in 1 : vector<8x1xf32>, vector<8x255xf32> -> vector<8x256xf32>
    %cst_255 = arith.constant 0.000000e+00 : f32
    %861 = vector.shape_cast %20 : vector<1x256xi1> to vector<1x256xi1>
    %862 = vector.broadcast %861 : vector<1x256xi1> to vector<8x256xi1>
    %863 = vector.broadcast %cst_255 : f32 to vector<8x256xf32>
    %864 = arith.select %862, %860, %863 : vector<8x256xi1>, vector<8x256xf32>
    %865 = arith.addf %856, %864 : vector<8x256xf32>
    %866 = vector.extract_strided_slice %834 {offsets = [32, 0], sizes = [8, 256], strides = [1, 1]} : vector<72x256xf32> to vector<8x256xf32>
    %867 = arith.addf %865, %866 : vector<8x256xf32>
    %868 = vector.extract_strided_slice %834 {offsets = [40, 0], sizes = [8, 256], strides = [1, 1]} : vector<72x256xf32> to vector<8x256xf32>
    %cst_256 = arith.constant 0.000000e+00 : f32
    %869 = vector.broadcast %cst_256 : f32 to vector<8x1xf32>
    %870 = vector.extract_strided_slice %868 {offsets = [0, 1], sizes = [8, 255], strides = [1, 1]} : vector<8x256xf32> to vector<8x255xf32>
    %871 = tpu.concatenate %870, %869 in 1 : vector<8x255xf32>, vector<8x1xf32> -> vector<8x256xf32>
    %cst_257 = arith.constant 0.000000e+00 : f32
    %872 = vector.shape_cast %22 : vector<1x256xi1> to vector<1x256xi1>
    %873 = vector.broadcast %872 : vector<1x256xi1> to vector<8x256xi1>
    %874 = vector.broadcast %cst_257 : f32 to vector<8x256xf32>
    %875 = arith.select %873, %871, %874 : vector<8x256xi1>, vector<8x256xf32>
    %876 = arith.addf %867, %875 : vector<8x256xf32>
    %877 = vector.extract_strided_slice %834 {offsets = [48, 0], sizes = [8, 256], strides = [1, 1]} : vector<72x256xf32> to vector<8x256xf32>
    %cst_258 = arith.constant 0.000000e+00 : f32
    %878 = vector.broadcast %cst_258 : f32 to vector<8x15xf32>
    %879 = vector.extract_strided_slice %877 {offsets = [0, 15], sizes = [8, 241], strides = [1, 1]} : vector<8x256xf32> to vector<8x241xf32>
    %880 = tpu.concatenate %879, %878 in 1 : vector<8x241xf32>, vector<8x15xf32> -> vector<8x256xf32>
    %cst_259 = arith.constant 0.000000e+00 : f32
    %881 = vector.shape_cast %20 : vector<1x256xi1> to vector<1x256xi1>
    %882 = vector.broadcast %881 : vector<1x256xi1> to vector<8x256xi1>
    %883 = vector.broadcast %cst_259 : f32 to vector<8x256xf32>
    %884 = arith.select %882, %880, %883 : vector<8x256xi1>, vector<8x256xf32>
    %885 = arith.addf %876, %884 : vector<8x256xf32>
    %886 = vector.extract_strided_slice %834 {offsets = [56, 0], sizes = [8, 256], strides = [1, 1]} : vector<72x256xf32> to vector<8x256xf32>
    %cst_260 = arith.constant 0.000000e+00 : f32
    %887 = vector.broadcast %cst_260 : f32 to vector<8x16xf32>
    %888 = vector.extract_strided_slice %886 {offsets = [0, 16], sizes = [8, 240], strides = [1, 1]} : vector<8x256xf32> to vector<8x240xf32>
    %889 = tpu.concatenate %888, %887 in 1 : vector<8x240xf32>, vector<8x16xf32> -> vector<8x256xf32>
    %890 = arith.addf %885, %889 : vector<8x256xf32>
    %891 = vector.extract_strided_slice %834 {offsets = [64, 0], sizes = [8, 256], strides = [1, 1]} : vector<72x256xf32> to vector<8x256xf32>
    %cst_261 = arith.constant 0.000000e+00 : f32
    %892 = vector.broadcast %cst_261 : f32 to vector<8x17xf32>
    %893 = vector.extract_strided_slice %891 {offsets = [0, 17], sizes = [8, 239], strides = [1, 1]} : vector<8x256xf32> to vector<8x239xf32>
    %894 = tpu.concatenate %893, %892 in 1 : vector<8x239xf32>, vector<8x17xf32> -> vector<8x256xf32>
    %cst_262 = arith.constant 0.000000e+00 : f32
    %895 = vector.shape_cast %22 : vector<1x256xi1> to vector<1x256xi1>
    %896 = vector.broadcast %895 : vector<1x256xi1> to vector<8x256xi1>
    %897 = vector.broadcast %cst_262 : f32 to vector<8x256xf32>
    %898 = arith.select %896, %894, %897 : vector<8x256xi1>, vector<8x256xf32>
    %899 = arith.addf %890, %898 : vector<8x256xf32>
    %c0_263 = arith.constant 0 : index
    %c0_264 = arith.constant 0 : index
    %900 = vector.load %arg30[%c0_263, %c0_264] : memref<8x1xf32, #tpu.memory_space<vmem>>, vector<8x1xf32>
    %901 = vector.broadcast %900 : vector<8x1xf32> to vector<8x256xf32>
    %902 = arith.addf %899, %901 : vector<8x256xf32>
    %cst_265 = arith.constant 0.000000e+00 : f32
    %903 = vector.broadcast %cst_265 : f32 to vector<8x256xf32>
    %904 = arith.maximumf %902, %903 : vector<8x256xf32>
    %905 = arith.truncf %904 : vector<8x256xf32> to vector<8x256xbf16>
    %c0_266 = arith.constant 0 : index
    %c0_267 = arith.constant 0 : index
    %906 = vector.load %arg34[%c0_266, %c0_267] : memref<72x8xbf16, #tpu.memory_space<vmem>>, vector<72x8xbf16>
    %cst_268 = arith.constant dense<0.000000e+00> : vector<72x256xf32>
    %907 = tpu.matmul %906, %905, %cst_268 {dimension_numbers = #tpu.dot_dimension_numbers<[1], [0], [0], [1], [0, 0, 1, 1], [], []>} : vector<72x8xbf16>, vector<8x256xbf16>, vector<72x256xf32> -> vector<72x256xf32>
    %908 = vector.extract_strided_slice %907 {offsets = [0, 0], sizes = [8, 256], strides = [1, 1]} : vector<72x256xf32> to vector<8x256xf32>
    %cst_269 = arith.constant 0.000000e+00 : f32
    %909 = vector.broadcast %cst_269 : f32 to vector<8x17xf32>
    %910 = vector.extract_strided_slice %908 {offsets = [0, 0], sizes = [8, 239], strides = [1, 1]} : vector<8x256xf32> to vector<8x239xf32>
    %911 = tpu.concatenate %909, %910 in 1 : vector<8x17xf32>, vector<8x239xf32> -> vector<8x256xf32>
    %cst_270 = arith.constant 0.000000e+00 : f32
    %912 = vector.shape_cast %20 : vector<1x256xi1> to vector<1x256xi1>
    %913 = vector.broadcast %912 : vector<1x256xi1> to vector<8x256xi1>
    %914 = vector.broadcast %cst_270 : f32 to vector<8x256xf32>
    %915 = arith.select %913, %911, %914 : vector<8x256xi1>, vector<8x256xf32>
    %916 = vector.extract_strided_slice %907 {offsets = [8, 0], sizes = [8, 256], strides = [1, 1]} : vector<72x256xf32> to vector<8x256xf32>
    %cst_271 = arith.constant 0.000000e+00 : f32
    %917 = vector.broadcast %cst_271 : f32 to vector<8x16xf32>
    %918 = vector.extract_strided_slice %916 {offsets = [0, 0], sizes = [8, 240], strides = [1, 1]} : vector<8x256xf32> to vector<8x240xf32>
    %919 = tpu.concatenate %917, %918 in 1 : vector<8x16xf32>, vector<8x240xf32> -> vector<8x256xf32>
    %920 = arith.addf %915, %919 : vector<8x256xf32>
    %921 = vector.extract_strided_slice %907 {offsets = [16, 0], sizes = [8, 256], strides = [1, 1]} : vector<72x256xf32> to vector<8x256xf32>
    %cst_272 = arith.constant 0.000000e+00 : f32
    %922 = vector.broadcast %cst_272 : f32 to vector<8x15xf32>
    %923 = vector.extract_strided_slice %921 {offsets = [0, 0], sizes = [8, 241], strides = [1, 1]} : vector<8x256xf32> to vector<8x241xf32>
    %924 = tpu.concatenate %922, %923 in 1 : vector<8x15xf32>, vector<8x241xf32> -> vector<8x256xf32>
    %cst_273 = arith.constant 0.000000e+00 : f32
    %925 = vector.shape_cast %22 : vector<1x256xi1> to vector<1x256xi1>
    %926 = vector.broadcast %925 : vector<1x256xi1> to vector<8x256xi1>
    %927 = vector.broadcast %cst_273 : f32 to vector<8x256xf32>
    %928 = arith.select %926, %924, %927 : vector<8x256xi1>, vector<8x256xf32>
    %929 = arith.addf %920, %928 : vector<8x256xf32>
    %930 = vector.extract_strided_slice %907 {offsets = [24, 0], sizes = [8, 256], strides = [1, 1]} : vector<72x256xf32> to vector<8x256xf32>
    %cst_274 = arith.constant 0.000000e+00 : f32
    %931 = vector.broadcast %cst_274 : f32 to vector<8x1xf32>
    %932 = vector.extract_strided_slice %930 {offsets = [0, 0], sizes = [8, 255], strides = [1, 1]} : vector<8x256xf32> to vector<8x255xf32>
    %933 = tpu.concatenate %931, %932 in 1 : vector<8x1xf32>, vector<8x255xf32> -> vector<8x256xf32>
    %cst_275 = arith.constant 0.000000e+00 : f32
    %934 = vector.shape_cast %20 : vector<1x256xi1> to vector<1x256xi1>
    %935 = vector.broadcast %934 : vector<1x256xi1> to vector<8x256xi1>
    %936 = vector.broadcast %cst_275 : f32 to vector<8x256xf32>
    %937 = arith.select %935, %933, %936 : vector<8x256xi1>, vector<8x256xf32>
    %938 = arith.addf %929, %937 : vector<8x256xf32>
    %939 = vector.extract_strided_slice %907 {offsets = [32, 0], sizes = [8, 256], strides = [1, 1]} : vector<72x256xf32> to vector<8x256xf32>
    %940 = arith.addf %938, %939 : vector<8x256xf32>
    %941 = vector.extract_strided_slice %907 {offsets = [40, 0], sizes = [8, 256], strides = [1, 1]} : vector<72x256xf32> to vector<8x256xf32>
    %cst_276 = arith.constant 0.000000e+00 : f32
    %942 = vector.broadcast %cst_276 : f32 to vector<8x1xf32>
    %943 = vector.extract_strided_slice %941 {offsets = [0, 1], sizes = [8, 255], strides = [1, 1]} : vector<8x256xf32> to vector<8x255xf32>
    %944 = tpu.concatenate %943, %942 in 1 : vector<8x255xf32>, vector<8x1xf32> -> vector<8x256xf32>
    %cst_277 = arith.constant 0.000000e+00 : f32
    %945 = vector.shape_cast %22 : vector<1x256xi1> to vector<1x256xi1>
    %946 = vector.broadcast %945 : vector<1x256xi1> to vector<8x256xi1>
    %947 = vector.broadcast %cst_277 : f32 to vector<8x256xf32>
    %948 = arith.select %946, %944, %947 : vector<8x256xi1>, vector<8x256xf32>
    %949 = arith.addf %940, %948 : vector<8x256xf32>
    %950 = vector.extract_strided_slice %907 {offsets = [48, 0], sizes = [8, 256], strides = [1, 1]} : vector<72x256xf32> to vector<8x256xf32>
    %cst_278 = arith.constant 0.000000e+00 : f32
    %951 = vector.broadcast %cst_278 : f32 to vector<8x15xf32>
    %952 = vector.extract_strided_slice %950 {offsets = [0, 15], sizes = [8, 241], strides = [1, 1]} : vector<8x256xf32> to vector<8x241xf32>
    %953 = tpu.concatenate %952, %951 in 1 : vector<8x241xf32>, vector<8x15xf32> -> vector<8x256xf32>
    %cst_279 = arith.constant 0.000000e+00 : f32
    %954 = vector.shape_cast %20 : vector<1x256xi1> to vector<1x256xi1>
    %955 = vector.broadcast %954 : vector<1x256xi1> to vector<8x256xi1>
    %956 = vector.broadcast %cst_279 : f32 to vector<8x256xf32>
    %957 = arith.select %955, %953, %956 : vector<8x256xi1>, vector<8x256xf32>
    %958 = arith.addf %949, %957 : vector<8x256xf32>
    %959 = vector.extract_strided_slice %907 {offsets = [56, 0], sizes = [8, 256], strides = [1, 1]} : vector<72x256xf32> to vector<8x256xf32>
    %cst_280 = arith.constant 0.000000e+00 : f32
    %960 = vector.broadcast %cst_280 : f32 to vector<8x16xf32>
    %961 = vector.extract_strided_slice %959 {offsets = [0, 16], sizes = [8, 240], strides = [1, 1]} : vector<8x256xf32> to vector<8x240xf32>
    %962 = tpu.concatenate %961, %960 in 1 : vector<8x240xf32>, vector<8x16xf32> -> vector<8x256xf32>
    %963 = arith.addf %958, %962 : vector<8x256xf32>
    %964 = vector.extract_strided_slice %907 {offsets = [64, 0], sizes = [8, 256], strides = [1, 1]} : vector<72x256xf32> to vector<8x256xf32>
    %cst_281 = arith.constant 0.000000e+00 : f32
    %965 = vector.broadcast %cst_281 : f32 to vector<8x17xf32>
    %966 = vector.extract_strided_slice %964 {offsets = [0, 17], sizes = [8, 239], strides = [1, 1]} : vector<8x256xf32> to vector<8x239xf32>
    %967 = tpu.concatenate %966, %965 in 1 : vector<8x239xf32>, vector<8x17xf32> -> vector<8x256xf32>
    %cst_282 = arith.constant 0.000000e+00 : f32
    %968 = vector.shape_cast %22 : vector<1x256xi1> to vector<1x256xi1>
    %969 = vector.broadcast %968 : vector<1x256xi1> to vector<8x256xi1>
    %970 = vector.broadcast %cst_282 : f32 to vector<8x256xf32>
    %971 = arith.select %969, %967, %970 : vector<8x256xi1>, vector<8x256xf32>
    %972 = arith.addf %963, %971 : vector<8x256xf32>
    %c0_283 = arith.constant 0 : index
    %c0_284 = arith.constant 0 : index
    %973 = vector.load %arg31[%c0_283, %c0_284] : memref<8x1xf32, #tpu.memory_space<vmem>>, vector<8x1xf32>
    %974 = vector.broadcast %973 : vector<8x1xf32> to vector<8x256xf32>
    %975 = arith.addf %972, %974 : vector<8x256xf32>
    %cst_285 = arith.constant 0.000000e+00 : f32
    %976 = vector.broadcast %cst_285 : f32 to vector<8x256xf32>
    %977 = arith.maximumf %975, %976 : vector<8x256xf32>
    %978 = arith.truncf %977 : vector<8x256xf32> to vector<8x256xbf16>
    %c0_286 = arith.constant 0 : index
    %c0_287 = arith.constant 0 : index
    %979 = vector.load %arg29[%c0_286, %c0_287] : memref<8x8xbf16, #tpu.memory_space<vmem>>, vector<8x8xbf16>
    %cst_288 = arith.constant dense<0.000000e+00> : vector<8x256xf32>
    %980 = tpu.matmul %979, %978, %cst_288 {dimension_numbers = #tpu.dot_dimension_numbers<[1], [0], [0], [1], [0, 0, 1, 1], [], []>} : vector<8x8xbf16>, vector<8x256xbf16>, vector<8x256xf32> -> vector<8x256xf32>
    %c0_289 = arith.constant 0 : index
    %c0_290 = arith.constant 0 : index
    %981 = vector.load %arg28[%c0_289, %c0_290] : memref<8x1xf32, #tpu.memory_space<vmem>>, vector<8x1xf32>
    %982 = vector.broadcast %981 : vector<8x1xf32> to vector<8x256xf32>
    %983 = arith.addf %980, %982 : vector<8x256xf32>
    %984 = arith.extf %510 : vector<8x256xbf16> to vector<8x256xf32>
    %985 = arith.addf %983, %984 : vector<8x256xf32>
    %986 = arith.truncf %985 : vector<8x256xf32> to vector<8x256xbf16>
    %987 = vector.extract_strided_slice %986 {offsets = [0, 0], sizes = [3, 256], strides = [1, 1]} : vector<8x256xbf16> to vector<3x256xbf16>
    %c0_291 = arith.constant 0 : index
    %c0_292 = arith.constant 0 : index
    %c0_293 = arith.constant 0 : index
    %988 = vector.load %arg52[%c0_291, %c0_292, %c0_293] : memref<1x3x256xbf16, #tpu.memory_space<vmem>>, vector<1x3x256xbf16>
    %989 = vector.shape_cast %988 : vector<1x3x256xbf16> to vector<3x256xbf16>
    %990 = vector.shape_cast %987 : vector<3x256xbf16> to vector<1x3x256xbf16>
    tpu.vector_store %arg52[%c0_291, %c0_292, %c0_293], %990 {strides = array<i32>} : memref<1x3x256xbf16, #tpu.memory_space<vmem>>, vector<1x3x256xbf16>,
    %c0_294 = arith.constant 0 : index
    %c0_295 = arith.constant 0 : index
    %991 = vector.load %arg41[%c0_294, %c0_295] : memref<72x8xbf16, #tpu.memory_space<vmem>>, vector<72x8xbf16>
    %cst_296 = arith.constant dense<0.000000e+00> : vector<72x256xf32>
    %992 = tpu.matmul %991, %1, %cst_296 {dimension_numbers = #tpu.dot_dimension_numbers<[1], [0], [0], [1], [0, 0, 1, 1], [], []>} : vector<72x8xbf16>, vector<8x256xbf16>, vector<72x256xf32> -> vector<72x256xf32>
    %c0_297 = arith.constant 0 : index
    %c0_298 = arith.constant 0 : index
    %993 = vector.load %arg42[%c0_297, %c0_298] : memref<72x8xbf16, #tpu.memory_space<vmem>>, vector<72x8xbf16>
    %cst_299 = arith.constant dense<0.000000e+00> : vector<72x256xf32>
    %994 = tpu.matmul %993, %986, %cst_299 {dimension_numbers = #tpu.dot_dimension_numbers<[1], [0], [0], [1], [0, 0, 1, 1], [], []>} : vector<72x8xbf16>, vector<8x256xbf16>, vector<72x256xf32> -> vector<72x256xf32>
    %995 = arith.addf %992, %994 : vector<72x256xf32>
    %996 = vector.extract_strided_slice %995 {offsets = [0, 0], sizes = [8, 256], strides = [1, 1]} : vector<72x256xf32> to vector<8x256xf32>
    %cst_300 = arith.constant 0.000000e+00 : f32
    %997 = vector.broadcast %cst_300 : f32 to vector<8x17xf32>
    %998 = vector.extract_strided_slice %996 {offsets = [0, 0], sizes = [8, 239], strides = [1, 1]} : vector<8x256xf32> to vector<8x239xf32>
    %999 = tpu.concatenate %997, %998 in 1 : vector<8x17xf32>, vector<8x239xf32> -> vector<8x256xf32>
    %cst_301 = arith.constant 0.000000e+00 : f32
    %1000 = vector.shape_cast %20 : vector<1x256xi1> to vector<1x256xi1>
    %1001 = vector.broadcast %1000 : vector<1x256xi1> to vector<8x256xi1>
    %1002 = vector.broadcast %cst_301 : f32 to vector<8x256xf32>
    %1003 = arith.select %1001, %999, %1002 : vector<8x256xi1>, vector<8x256xf32>
    %1004 = vector.extract_strided_slice %995 {offsets = [8, 0], sizes = [8, 256], strides = [1, 1]} : vector<72x256xf32> to vector<8x256xf32>
    %cst_302 = arith.constant 0.000000e+00 : f32
    %1005 = vector.broadcast %cst_302 : f32 to vector<8x16xf32>
    %1006 = vector.extract_strided_slice %1004 {offsets = [0, 0], sizes = [8, 240], strides = [1, 1]} : vector<8x256xf32> to vector<8x240xf32>
    %1007 = tpu.concatenate %1005, %1006 in 1 : vector<8x16xf32>, vector<8x240xf32> -> vector<8x256xf32>
    %1008 = arith.addf %1003, %1007 : vector<8x256xf32>
    %1009 = vector.extract_strided_slice %995 {offsets = [16, 0], sizes = [8, 256], strides = [1, 1]} : vector<72x256xf32> to vector<8x256xf32>
    %cst_303 = arith.constant 0.000000e+00 : f32
    %1010 = vector.broadcast %cst_303 : f32 to vector<8x15xf32>
    %1011 = vector.extract_strided_slice %1009 {offsets = [0, 0], sizes = [8, 241], strides = [1, 1]} : vector<8x256xf32> to vector<8x241xf32>
    %1012 = tpu.concatenate %1010, %1011 in 1 : vector<8x15xf32>, vector<8x241xf32> -> vector<8x256xf32>
    %cst_304 = arith.constant 0.000000e+00 : f32
    %1013 = vector.shape_cast %22 : vector<1x256xi1> to vector<1x256xi1>
    %1014 = vector.broadcast %1013 : vector<1x256xi1> to vector<8x256xi1>
    %1015 = vector.broadcast %cst_304 : f32 to vector<8x256xf32>
    %1016 = arith.select %1014, %1012, %1015 : vector<8x256xi1>, vector<8x256xf32>
    %1017 = arith.addf %1008, %1016 : vector<8x256xf32>
    %1018 = vector.extract_strided_slice %995 {offsets = [24, 0], sizes = [8, 256], strides = [1, 1]} : vector<72x256xf32> to vector<8x256xf32>
    %cst_305 = arith.constant 0.000000e+00 : f32
    %1019 = vector.broadcast %cst_305 : f32 to vector<8x1xf32>
    %1020 = vector.extract_strided_slice %1018 {offsets = [0, 0], sizes = [8, 255], strides = [1, 1]} : vector<8x256xf32> to vector<8x255xf32>
    %1021 = tpu.concatenate %1019, %1020 in 1 : vector<8x1xf32>, vector<8x255xf32> -> vector<8x256xf32>
    %cst_306 = arith.constant 0.000000e+00 : f32
    %1022 = vector.shape_cast %20 : vector<1x256xi1> to vector<1x256xi1>
    %1023 = vector.broadcast %1022 : vector<1x256xi1> to vector<8x256xi1>
    %1024 = vector.broadcast %cst_306 : f32 to vector<8x256xf32>
    %1025 = arith.select %1023, %1021, %1024 : vector<8x256xi1>, vector<8x256xf32>
    %1026 = arith.addf %1017, %1025 : vector<8x256xf32>
    %1027 = vector.extract_strided_slice %995 {offsets = [32, 0], sizes = [8, 256], strides = [1, 1]} : vector<72x256xf32> to vector<8x256xf32>
    %1028 = arith.addf %1026, %1027 : vector<8x256xf32>
    %1029 = vector.extract_strided_slice %995 {offsets = [40, 0], sizes = [8, 256], strides = [1, 1]} : vector<72x256xf32> to vector<8x256xf32>
    %cst_307 = arith.constant 0.000000e+00 : f32
    %1030 = vector.broadcast %cst_307 : f32 to vector<8x1xf32>
    %1031 = vector.extract_strided_slice %1029 {offsets = [0, 1], sizes = [8, 255], strides = [1, 1]} : vector<8x256xf32> to vector<8x255xf32>
    %1032 = tpu.concatenate %1031, %1030 in 1 : vector<8x255xf32>, vector<8x1xf32> -> vector<8x256xf32>
    %cst_308 = arith.constant 0.000000e+00 : f32
    %1033 = vector.shape_cast %22 : vector<1x256xi1> to vector<1x256xi1>
    %1034 = vector.broadcast %1033 : vector<1x256xi1> to vector<8x256xi1>
    %1035 = vector.broadcast %cst_308 : f32 to vector<8x256xf32>
    %1036 = arith.select %1034, %1032, %1035 : vector<8x256xi1>, vector<8x256xf32>
    %1037 = arith.addf %1028, %1036 : vector<8x256xf32>
    %1038 = vector.extract_strided_slice %995 {offsets = [48, 0], sizes = [8, 256], strides = [1, 1]} : vector<72x256xf32> to vector<8x256xf32>
    %cst_309 = arith.constant 0.000000e+00 : f32
    %1039 = vector.broadcast %cst_309 : f32 to vector<8x15xf32>
    %1040 = vector.extract_strided_slice %1038 {offsets = [0, 15], sizes = [8, 241], strides = [1, 1]} : vector<8x256xf32> to vector<8x241xf32>
    %1041 = tpu.concatenate %1040, %1039 in 1 : vector<8x241xf32>, vector<8x15xf32> -> vector<8x256xf32>
    %cst_310 = arith.constant 0.000000e+00 : f32
    %1042 = vector.shape_cast %20 : vector<1x256xi1> to vector<1x256xi1>
    %1043 = vector.broadcast %1042 : vector<1x256xi1> to vector<8x256xi1>
    %1044 = vector.broadcast %cst_310 : f32 to vector<8x256xf32>
    %1045 = arith.select %1043, %1041, %1044 : vector<8x256xi1>, vector<8x256xf32>
    %1046 = arith.addf %1037, %1045 : vector<8x256xf32>
    %1047 = vector.extract_strided_slice %995 {offsets = [56, 0], sizes = [8, 256], strides = [1, 1]} : vector<72x256xf32> to vector<8x256xf32>
    %cst_311 = arith.constant 0.000000e+00 : f32
    %1048 = vector.broadcast %cst_311 : f32 to vector<8x16xf32>
    %1049 = vector.extract_strided_slice %1047 {offsets = [0, 16], sizes = [8, 240], strides = [1, 1]} : vector<8x256xf32> to vector<8x240xf32>
    %1050 = tpu.concatenate %1049, %1048 in 1 : vector<8x240xf32>, vector<8x16xf32> -> vector<8x256xf32>
    %1051 = arith.addf %1046, %1050 : vector<8x256xf32>
    %1052 = vector.extract_strided_slice %995 {offsets = [64, 0], sizes = [8, 256], strides = [1, 1]} : vector<72x256xf32> to vector<8x256xf32>
    %cst_312 = arith.constant 0.000000e+00 : f32
    %1053 = vector.broadcast %cst_312 : f32 to vector<8x17xf32>
    %1054 = vector.extract_strided_slice %1052 {offsets = [0, 17], sizes = [8, 239], strides = [1, 1]} : vector<8x256xf32> to vector<8x239xf32>
    %1055 = tpu.concatenate %1054, %1053 in 1 : vector<8x239xf32>, vector<8x17xf32> -> vector<8x256xf32>
    %cst_313 = arith.constant 0.000000e+00 : f32
    %1056 = vector.shape_cast %22 : vector<1x256xi1> to vector<1x256xi1>
    %1057 = vector.broadcast %1056 : vector<1x256xi1> to vector<8x256xi1>
    %1058 = vector.broadcast %cst_313 : f32 to vector<8x256xf32>
    %1059 = arith.select %1057, %1055, %1058 : vector<8x256xi1>, vector<8x256xf32>
    %1060 = arith.addf %1051, %1059 : vector<8x256xf32>
    %c0_314 = arith.constant 0 : index
    %c0_315 = arith.constant 0 : index
    %1061 = vector.load %arg39[%c0_314, %c0_315] : memref<8x1xf32, #tpu.memory_space<vmem>>, vector<8x1xf32>
    %1062 = vector.broadcast %1061 : vector<8x1xf32> to vector<8x256xf32>
    %1063 = arith.addf %1060, %1062 : vector<8x256xf32>
    %cst_316 = arith.constant 0.000000e+00 : f32
    %1064 = vector.broadcast %cst_316 : f32 to vector<8x256xf32>
    %1065 = arith.maximumf %1063, %1064 : vector<8x256xf32>
    %1066 = arith.truncf %1065 : vector<8x256xf32> to vector<8x256xbf16>
    %c0_317 = arith.constant 0 : index
    %c0_318 = arith.constant 0 : index
    %1067 = vector.load %arg43[%c0_317, %c0_318] : memref<72x8xbf16, #tpu.memory_space<vmem>>, vector<72x8xbf16>
    %cst_319 = arith.constant dense<0.000000e+00> : vector<72x256xf32>
    %1068 = tpu.matmul %1067, %1066, %cst_319 {dimension_numbers = #tpu.dot_dimension_numbers<[1], [0], [0], [1], [0, 0, 1, 1], [], []>} : vector<72x8xbf16>, vector<8x256xbf16>, vector<72x256xf32> -> vector<72x256xf32>
    %1069 = vector.extract_strided_slice %1068 {offsets = [0, 0], sizes = [8, 256], strides = [1, 1]} : vector<72x256xf32> to vector<8x256xf32>
    %cst_320 = arith.constant 0.000000e+00 : f32
    %1070 = vector.broadcast %cst_320 : f32 to vector<8x17xf32>
    %1071 = vector.extract_strided_slice %1069 {offsets = [0, 0], sizes = [8, 239], strides = [1, 1]} : vector<8x256xf32> to vector<8x239xf32>
    %1072 = tpu.concatenate %1070, %1071 in 1 : vector<8x17xf32>, vector<8x239xf32> -> vector<8x256xf32>
    %cst_321 = arith.constant 0.000000e+00 : f32
    %1073 = vector.shape_cast %20 : vector<1x256xi1> to vector<1x256xi1>
    %1074 = vector.broadcast %1073 : vector<1x256xi1> to vector<8x256xi1>
    %1075 = vector.broadcast %cst_321 : f32 to vector<8x256xf32>
    %1076 = arith.select %1074, %1072, %1075 : vector<8x256xi1>, vector<8x256xf32>
    %1077 = vector.extract_strided_slice %1068 {offsets = [8, 0], sizes = [8, 256], strides = [1, 1]} : vector<72x256xf32> to vector<8x256xf32>
    %cst_322 = arith.constant 0.000000e+00 : f32
    %1078 = vector.broadcast %cst_322 : f32 to vector<8x16xf32>
    %1079 = vector.extract_strided_slice %1077 {offsets = [0, 0], sizes = [8, 240], strides = [1, 1]} : vector<8x256xf32> to vector<8x240xf32>
    %1080 = tpu.concatenate %1078, %1079 in 1 : vector<8x16xf32>, vector<8x240xf32> -> vector<8x256xf32>
    %1081 = arith.addf %1076, %1080 : vector<8x256xf32>
    %1082 = vector.extract_strided_slice %1068 {offsets = [16, 0], sizes = [8, 256], strides = [1, 1]} : vector<72x256xf32> to vector<8x256xf32>
    %cst_323 = arith.constant 0.000000e+00 : f32
    %1083 = vector.broadcast %cst_323 : f32 to vector<8x15xf32>
    %1084 = vector.extract_strided_slice %1082 {offsets = [0, 0], sizes = [8, 241], strides = [1, 1]} : vector<8x256xf32> to vector<8x241xf32>
    %1085 = tpu.concatenate %1083, %1084 in 1 : vector<8x15xf32>, vector<8x241xf32> -> vector<8x256xf32>
    %cst_324 = arith.constant 0.000000e+00 : f32
    %1086 = vector.shape_cast %22 : vector<1x256xi1> to vector<1x256xi1>
    %1087 = vector.broadcast %1086 : vector<1x256xi1> to vector<8x256xi1>
    %1088 = vector.broadcast %cst_324 : f32 to vector<8x256xf32>
    %1089 = arith.select %1087, %1085, %1088 : vector<8x256xi1>, vector<8x256xf32>
    %1090 = arith.addf %1081, %1089 : vector<8x256xf32>
    %1091 = vector.extract_strided_slice %1068 {offsets = [24, 0], sizes = [8, 256], strides = [1, 1]} : vector<72x256xf32> to vector<8x256xf32>
    %cst_325 = arith.constant 0.000000e+00 : f32
    %1092 = vector.broadcast %cst_325 : f32 to vector<8x1xf32>
    %1093 = vector.extract_strided_slice %1091 {offsets = [0, 0], sizes = [8, 255], strides = [1, 1]} : vector<8x256xf32> to vector<8x255xf32>
    %1094 = tpu.concatenate %1092, %1093 in 1 : vector<8x1xf32>, vector<8x255xf32> -> vector<8x256xf32>
    %cst_326 = arith.constant 0.000000e+00 : f32
    %1095 = vector.shape_cast %20 : vector<1x256xi1> to vector<1x256xi1>
    %1096 = vector.broadcast %1095 : vector<1x256xi1> to vector<8x256xi1>
    %1097 = vector.broadcast %cst_326 : f32 to vector<8x256xf32>
    %1098 = arith.select %1096, %1094, %1097 : vector<8x256xi1>, vector<8x256xf32>
    %1099 = arith.addf %1090, %1098 : vector<8x256xf32>
    %1100 = vector.extract_strided_slice %1068 {offsets = [32, 0], sizes = [8, 256], strides = [1, 1]} : vector<72x256xf32> to vector<8x256xf32>
    %1101 = arith.addf %1099, %1100 : vector<8x256xf32>
    %1102 = vector.extract_strided_slice %1068 {offsets = [40, 0], sizes = [8, 256], strides = [1, 1]} : vector<72x256xf32> to vector<8x256xf32>
    %cst_327 = arith.constant 0.000000e+00 : f32
    %1103 = vector.broadcast %cst_327 : f32 to vector<8x1xf32>
    %1104 = vector.extract_strided_slice %1102 {offsets = [0, 1], sizes = [8, 255], strides = [1, 1]} : vector<8x256xf32> to vector<8x255xf32>
    %1105 = tpu.concatenate %1104, %1103 in 1 : vector<8x255xf32>, vector<8x1xf32> -> vector<8x256xf32>
    %cst_328 = arith.constant 0.000000e+00 : f32
    %1106 = vector.shape_cast %22 : vector<1x256xi1> to vector<1x256xi1>
    %1107 = vector.broadcast %1106 : vector<1x256xi1> to vector<8x256xi1>
    %1108 = vector.broadcast %cst_328 : f32 to vector<8x256xf32>
    %1109 = arith.select %1107, %1105, %1108 : vector<8x256xi1>, vector<8x256xf32>
    %1110 = arith.addf %1101, %1109 : vector<8x256xf32>
    %1111 = vector.extract_strided_slice %1068 {offsets = [48, 0], sizes = [8, 256], strides = [1, 1]} : vector<72x256xf32> to vector<8x256xf32>
    %cst_329 = arith.constant 0.000000e+00 : f32
    %1112 = vector.broadcast %cst_329 : f32 to vector<8x15xf32>
    %1113 = vector.extract_strided_slice %1111 {offsets = [0, 15], sizes = [8, 241], strides = [1, 1]} : vector<8x256xf32> to vector<8x241xf32>
    %1114 = tpu.concatenate %1113, %1112 in 1 : vector<8x241xf32>, vector<8x15xf32> -> vector<8x256xf32>
    %cst_330 = arith.constant 0.000000e+00 : f32
    %1115 = vector.shape_cast %20 : vector<1x256xi1> to vector<1x256xi1>
    %1116 = vector.broadcast %1115 : vector<1x256xi1> to vector<8x256xi1>
    %1117 = vector.broadcast %cst_330 : f32 to vector<8x256xf32>
    %1118 = arith.select %1116, %1114, %1117 : vector<8x256xi1>, vector<8x256xf32>
    %1119 = arith.addf %1110, %1118 : vector<8x256xf32>
    %1120 = vector.extract_strided_slice %1068 {offsets = [56, 0], sizes = [8, 256], strides = [1, 1]} : vector<72x256xf32> to vector<8x256xf32>
    %cst_331 = arith.constant 0.000000e+00 : f32
    %1121 = vector.broadcast %cst_331 : f32 to vector<8x16xf32>
    %1122 = vector.extract_strided_slice %1120 {offsets = [0, 16], sizes = [8, 240], strides = [1, 1]} : vector<8x256xf32> to vector<8x240xf32>
    %1123 = tpu.concatenate %1122, %1121 in 1 : vector<8x240xf32>, vector<8x16xf32> -> vector<8x256xf32>
    %1124 = arith.addf %1119, %1123 : vector<8x256xf32>
    %1125 = vector.extract_strided_slice %1068 {offsets = [64, 0], sizes = [8, 256], strides = [1, 1]} : vector<72x256xf32> to vector<8x256xf32>
    %cst_332 = arith.constant 0.000000e+00 : f32
    %1126 = vector.broadcast %cst_332 : f32 to vector<8x17xf32>
    %1127 = vector.extract_strided_slice %1125 {offsets = [0, 17], sizes = [8, 239], strides = [1, 1]} : vector<8x256xf32> to vector<8x239xf32>
    %1128 = tpu.concatenate %1127, %1126 in 1 : vector<8x239xf32>, vector<8x17xf32> -> vector<8x256xf32>
    %cst_333 = arith.constant 0.000000e+00 : f32
    %1129 = vector.shape_cast %22 : vector<1x256xi1> to vector<1x256xi1>
    %1130 = vector.broadcast %1129 : vector<1x256xi1> to vector<8x256xi1>
    %1131 = vector.broadcast %cst_333 : f32 to vector<8x256xf32>
    %1132 = arith.select %1130, %1128, %1131 : vector<8x256xi1>, vector<8x256xf32>
    %1133 = arith.addf %1124, %1132 : vector<8x256xf32>
    %c0_334 = arith.constant 0 : index
    %c0_335 = arith.constant 0 : index
    %1134 = vector.load %arg40[%c0_334, %c0_335] : memref<8x1xf32, #tpu.memory_space<vmem>>, vector<8x1xf32>
    %1135 = vector.broadcast %1134 : vector<8x1xf32> to vector<8x256xf32>
    %1136 = arith.addf %1133, %1135 : vector<8x256xf32>
    %cst_336 = arith.constant 0.000000e+00 : f32
    %1137 = vector.broadcast %cst_336 : f32 to vector<8x256xf32>
    %1138 = arith.maximumf %1136, %1137 : vector<8x256xf32>
    %1139 = arith.truncf %1138 : vector<8x256xf32> to vector<8x256xbf16>
    %1140 = arith.extf %1139 : vector<8x256xbf16> to vector<8x256xf32>
    %cst_337 = arith.constant 0.000000e+00 : f32
    %1141 = vector.broadcast %cst_337 : f32 to vector<8x1xf32>
    %1142 = vector.extract_strided_slice %1140 {offsets = [0, 1], sizes = [8, 255], strides = [1, 1]} : vector<8x256xf32> to vector<8x255xf32>
    %1143 = tpu.concatenate %1142, %1141 in 1 : vector<8x255xf32>, vector<8x1xf32> -> vector<8x256xf32>
    %1144 = arith.maximumf %1140, %1143 : vector<8x256xf32>
    %cst_338 = arith.constant 0.000000e+00 : f32
    %1145 = vector.broadcast %cst_338 : f32 to vector<8x16xf32>
    %1146 = vector.extract_strided_slice %1140 {offsets = [0, 16], sizes = [8, 240], strides = [1, 1]} : vector<8x256xf32> to vector<8x240xf32>
    %1147 = tpu.concatenate %1146, %1145 in 1 : vector<8x240xf32>, vector<8x16xf32> -> vector<8x256xf32>
    %cst_339 = arith.constant 0.000000e+00 : f32
    %1148 = vector.broadcast %cst_339 : f32 to vector<8x17xf32>
    %1149 = vector.extract_strided_slice %1140 {offsets = [0, 17], sizes = [8, 239], strides = [1, 1]} : vector<8x256xf32> to vector<8x239xf32>
    %1150 = tpu.concatenate %1149, %1148 in 1 : vector<8x239xf32>, vector<8x17xf32> -> vector<8x256xf32>
    %1151 = arith.maximumf %1147, %1150 : vector<8x256xf32>
    %1152 = arith.maximumf %1144, %1151 : vector<8x256xf32>
    %1153 = arith.truncf %1152 : vector<8x256xf32> to vector<8x256xbf16>
    %c0_340 = arith.constant 0 : index
    %c0_341 = arith.constant 0 : index
    %1154 = vector.load %arg3[%c0_340, %c0_341] : memref<256x64xbf16, #tpu.memory_space<vmem>>, vector<256x64xbf16>
    %cst_342 = arith.constant dense<0.000000e+00> : vector<8x64xf32>
    %1155 = tpu.matmul %1153, %1154, %cst_342 {dimension_numbers = #tpu.dot_dimension_numbers<[1], [0], [0], [1], [0, 0, 1, 1], [], []>} : vector<8x256xbf16>, vector<256x64xbf16>, vector<8x64xf32> -> vector<8x64xf32>
    %1156 = arith.truncf %1155 : vector<8x64xf32> to vector<8x64xbf16>
    %c0_343 = arith.constant 0 : index
    %c0_344 = arith.constant 0 : index
    %1157 = vector.load %arg37[%c0_343, %c0_344] : memref<144x8xbf16, #tpu.memory_space<vmem>>, vector<144x8xbf16>
    %cst_345 = arith.constant dense<0.000000e+00> : vector<144x64xf32>
    %1158 = tpu.matmul %1157, %1156, %cst_345 {dimension_numbers = #tpu.dot_dimension_numbers<[1], [0], [0], [1], [0, 0, 1, 1], [], []>} : vector<144x8xbf16>, vector<8x64xbf16>, vector<144x64xf32> -> vector<144x64xf32>
    %1159 = vector.extract_strided_slice %1158 {offsets = [0, 0], sizes = [16, 64], strides = [1, 1]} : vector<144x64xf32> to vector<16x64xf32>
    %cst_346 = arith.constant 0.000000e+00 : f32
    %1160 = vector.broadcast %cst_346 : f32 to vector<16x9xf32>
    %1161 = vector.extract_strided_slice %1159 {offsets = [0, 0], sizes = [16, 55], strides = [1, 1]} : vector<16x64xf32> to vector<16x55xf32>
    %1162 = tpu.concatenate %1160, %1161 in 1 : vector<16x9xf32>, vector<16x55xf32> -> vector<16x64xf32>
    %cst_347 = arith.constant 0.000000e+00 : f32
    %1163 = vector.shape_cast %204 : vector<1x64xi1> to vector<1x64xi1>
    %1164 = vector.broadcast %1163 : vector<1x64xi1> to vector<16x64xi1>
    %1165 = vector.broadcast %cst_347 : f32 to vector<16x64xf32>
    %1166 = arith.select %1164, %1162, %1165 : vector<16x64xi1>, vector<16x64xf32>
    %1167 = vector.extract_strided_slice %1158 {offsets = [16, 0], sizes = [16, 64], strides = [1, 1]} : vector<144x64xf32> to vector<16x64xf32>
    %cst_348 = arith.constant 0.000000e+00 : f32
    %1168 = vector.broadcast %cst_348 : f32 to vector<16x8xf32>
    %1169 = vector.extract_strided_slice %1167 {offsets = [0, 0], sizes = [16, 56], strides = [1, 1]} : vector<16x64xf32> to vector<16x56xf32>
    %1170 = tpu.concatenate %1168, %1169 in 1 : vector<16x8xf32>, vector<16x56xf32> -> vector<16x64xf32>
    %1171 = arith.addf %1166, %1170 : vector<16x64xf32>
    %1172 = vector.extract_strided_slice %1158 {offsets = [32, 0], sizes = [16, 64], strides = [1, 1]} : vector<144x64xf32> to vector<16x64xf32>
    %cst_349 = arith.constant 0.000000e+00 : f32
    %1173 = vector.broadcast %cst_349 : f32 to vector<16x7xf32>
    %1174 = vector.extract_strided_slice %1172 {offsets = [0, 0], sizes = [16, 57], strides = [1, 1]} : vector<16x64xf32> to vector<16x57xf32>
    %1175 = tpu.concatenate %1173, %1174 in 1 : vector<16x7xf32>, vector<16x57xf32> -> vector<16x64xf32>
    %cst_350 = arith.constant 0.000000e+00 : f32
    %1176 = vector.shape_cast %206 : vector<1x64xi1> to vector<1x64xi1>
    %1177 = vector.broadcast %1176 : vector<1x64xi1> to vector<16x64xi1>
    %1178 = vector.broadcast %cst_350 : f32 to vector<16x64xf32>
    %1179 = arith.select %1177, %1175, %1178 : vector<16x64xi1>, vector<16x64xf32>
    %1180 = arith.addf %1171, %1179 : vector<16x64xf32>
    %1181 = vector.extract_strided_slice %1158 {offsets = [48, 0], sizes = [16, 64], strides = [1, 1]} : vector<144x64xf32> to vector<16x64xf32>
    %cst_351 = arith.constant 0.000000e+00 : f32
    %1182 = vector.broadcast %cst_351 : f32 to vector<16x1xf32>
    %1183 = vector.extract_strided_slice %1181 {offsets = [0, 0], sizes = [16, 63], strides = [1, 1]} : vector<16x64xf32> to vector<16x63xf32>
    %1184 = tpu.concatenate %1182, %1183 in 1 : vector<16x1xf32>, vector<16x63xf32> -> vector<16x64xf32>
    %cst_352 = arith.constant 0.000000e+00 : f32
    %1185 = vector.shape_cast %204 : vector<1x64xi1> to vector<1x64xi1>
    %1186 = vector.broadcast %1185 : vector<1x64xi1> to vector<16x64xi1>
    %1187 = vector.broadcast %cst_352 : f32 to vector<16x64xf32>
    %1188 = arith.select %1186, %1184, %1187 : vector<16x64xi1>, vector<16x64xf32>
    %1189 = arith.addf %1180, %1188 : vector<16x64xf32>
    %1190 = vector.extract_strided_slice %1158 {offsets = [64, 0], sizes = [16, 64], strides = [1, 1]} : vector<144x64xf32> to vector<16x64xf32>
    %1191 = arith.addf %1189, %1190 : vector<16x64xf32>
    %1192 = vector.extract_strided_slice %1158 {offsets = [80, 0], sizes = [16, 64], strides = [1, 1]} : vector<144x64xf32> to vector<16x64xf32>
    %cst_353 = arith.constant 0.000000e+00 : f32
    %1193 = vector.broadcast %cst_353 : f32 to vector<16x1xf32>
    %1194 = vector.extract_strided_slice %1192 {offsets = [0, 1], sizes = [16, 63], strides = [1, 1]} : vector<16x64xf32> to vector<16x63xf32>
    %1195 = tpu.concatenate %1194, %1193 in 1 : vector<16x63xf32>, vector<16x1xf32> -> vector<16x64xf32>
    %cst_354 = arith.constant 0.000000e+00 : f32
    %1196 = vector.shape_cast %206 : vector<1x64xi1> to vector<1x64xi1>
    %1197 = vector.broadcast %1196 : vector<1x64xi1> to vector<16x64xi1>
    %1198 = vector.broadcast %cst_354 : f32 to vector<16x64xf32>
    %1199 = arith.select %1197, %1195, %1198 : vector<16x64xi1>, vector<16x64xf32>
    %1200 = arith.addf %1191, %1199 : vector<16x64xf32>
    %1201 = vector.extract_strided_slice %1158 {offsets = [96, 0], sizes = [16, 64], strides = [1, 1]} : vector<144x64xf32> to vector<16x64xf32>
    %cst_355 = arith.constant 0.000000e+00 : f32
    %1202 = vector.broadcast %cst_355 : f32 to vector<16x7xf32>
    %1203 = vector.extract_strided_slice %1201 {offsets = [0, 7], sizes = [16, 57], strides = [1, 1]} : vector<16x64xf32> to vector<16x57xf32>
    %1204 = tpu.concatenate %1203, %1202 in 1 : vector<16x57xf32>, vector<16x7xf32> -> vector<16x64xf32>
    %cst_356 = arith.constant 0.000000e+00 : f32
    %1205 = vector.shape_cast %204 : vector<1x64xi1> to vector<1x64xi1>
    %1206 = vector.broadcast %1205 : vector<1x64xi1> to vector<16x64xi1>
    %1207 = vector.broadcast %cst_356 : f32 to vector<16x64xf32>
    %1208 = arith.select %1206, %1204, %1207 : vector<16x64xi1>, vector<16x64xf32>
    %1209 = arith.addf %1200, %1208 : vector<16x64xf32>
    %1210 = vector.extract_strided_slice %1158 {offsets = [112, 0], sizes = [16, 64], strides = [1, 1]} : vector<144x64xf32> to vector<16x64xf32>
    %cst_357 = arith.constant 0.000000e+00 : f32
    %1211 = vector.broadcast %cst_357 : f32 to vector<16x8xf32>
    %1212 = vector.extract_strided_slice %1210 {offsets = [0, 8], sizes = [16, 56], strides = [1, 1]} : vector<16x64xf32> to vector<16x56xf32>
    %1213 = tpu.concatenate %1212, %1211 in 1 : vector<16x56xf32>, vector<16x8xf32> -> vector<16x64xf32>
    %1214 = arith.addf %1209, %1213 : vector<16x64xf32>
    %1215 = vector.extract_strided_slice %1158 {offsets = [128, 0], sizes = [16, 64], strides = [1, 1]} : vector<144x64xf32> to vector<16x64xf32>
    %cst_358 = arith.constant 0.000000e+00 : f32
    %1216 = vector.broadcast %cst_358 : f32 to vector<16x9xf32>
    %1217 = vector.extract_strided_slice %1215 {offsets = [0, 9], sizes = [16, 55], strides = [1, 1]} : vector<16x64xf32> to vector<16x55xf32>
    %1218 = tpu.concatenate %1217, %1216 in 1 : vector<16x55xf32>, vector<16x9xf32> -> vector<16x64xf32>
    %cst_359 = arith.constant 0.000000e+00 : f32
    %1219 = vector.shape_cast %206 : vector<1x64xi1> to vector<1x64xi1>
    %1220 = vector.broadcast %1219 : vector<1x64xi1> to vector<16x64xi1>
    %1221 = vector.broadcast %cst_359 : f32 to vector<16x64xf32>
    %1222 = arith.select %1220, %1218, %1221 : vector<16x64xi1>, vector<16x64xf32>
    %1223 = arith.addf %1214, %1222 : vector<16x64xf32>
    %c0_360 = arith.constant 0 : index
    %c0_361 = arith.constant 0 : index
    %1224 = vector.load %arg35[%c0_360, %c0_361] : memref<16x1xf32, #tpu.memory_space<vmem>>, vector<16x1xf32>
    %1225 = vector.broadcast %1224 : vector<16x1xf32> to vector<16x64xf32>
    %1226 = arith.addf %1223, %1225 : vector<16x64xf32>
    %cst_362 = arith.constant 0.000000e+00 : f32
    %1227 = vector.broadcast %cst_362 : f32 to vector<16x64xf32>
    %1228 = arith.maximumf %1226, %1227 : vector<16x64xf32>
    %1229 = arith.truncf %1228 : vector<16x64xf32> to vector<16x64xbf16>
    %c0_363 = arith.constant 0 : index
    %c0_364 = arith.constant 0 : index
    %1230 = vector.load %arg38[%c0_363, %c0_364] : memref<144x16xbf16, #tpu.memory_space<vmem>>, vector<144x16xbf16>
    %cst_365 = arith.constant dense<0.000000e+00> : vector<144x64xf32>
    %1231 = tpu.matmul %1230, %1229, %cst_365 {dimension_numbers = #tpu.dot_dimension_numbers<[1], [0], [0], [1], [0, 0, 1, 1], [], []>} : vector<144x16xbf16>, vector<16x64xbf16>, vector<144x64xf32> -> vector<144x64xf32>
    %1232 = vector.extract_strided_slice %1231 {offsets = [0, 0], sizes = [16, 64], strides = [1, 1]} : vector<144x64xf32> to vector<16x64xf32>
    %cst_366 = arith.constant 0.000000e+00 : f32
    %1233 = vector.broadcast %cst_366 : f32 to vector<16x9xf32>
    %1234 = vector.extract_strided_slice %1232 {offsets = [0, 0], sizes = [16, 55], strides = [1, 1]} : vector<16x64xf32> to vector<16x55xf32>
    %1235 = tpu.concatenate %1233, %1234 in 1 : vector<16x9xf32>, vector<16x55xf32> -> vector<16x64xf32>
    %cst_367 = arith.constant 0.000000e+00 : f32
    %1236 = vector.shape_cast %204 : vector<1x64xi1> to vector<1x64xi1>
    %1237 = vector.broadcast %1236 : vector<1x64xi1> to vector<16x64xi1>
    %1238 = vector.broadcast %cst_367 : f32 to vector<16x64xf32>
    %1239 = arith.select %1237, %1235, %1238 : vector<16x64xi1>, vector<16x64xf32>
    %1240 = vector.extract_strided_slice %1231 {offsets = [16, 0], sizes = [16, 64], strides = [1, 1]} : vector<144x64xf32> to vector<16x64xf32>
    %cst_368 = arith.constant 0.000000e+00 : f32
    %1241 = vector.broadcast %cst_368 : f32 to vector<16x8xf32>
    %1242 = vector.extract_strided_slice %1240 {offsets = [0, 0], sizes = [16, 56], strides = [1, 1]} : vector<16x64xf32> to vector<16x56xf32>
    %1243 = tpu.concatenate %1241, %1242 in 1 : vector<16x8xf32>, vector<16x56xf32> -> vector<16x64xf32>
    %1244 = arith.addf %1239, %1243 : vector<16x64xf32>
    %1245 = vector.extract_strided_slice %1231 {offsets = [32, 0], sizes = [16, 64], strides = [1, 1]} : vector<144x64xf32> to vector<16x64xf32>
    %cst_369 = arith.constant 0.000000e+00 : f32
    %1246 = vector.broadcast %cst_369 : f32 to vector<16x7xf32>
    %1247 = vector.extract_strided_slice %1245 {offsets = [0, 0], sizes = [16, 57], strides = [1, 1]} : vector<16x64xf32> to vector<16x57xf32>
    %1248 = tpu.concatenate %1246, %1247 in 1 : vector<16x7xf32>, vector<16x57xf32> -> vector<16x64xf32>
    %cst_370 = arith.constant 0.000000e+00 : f32
    %1249 = vector.shape_cast %206 : vector<1x64xi1> to vector<1x64xi1>
    %1250 = vector.broadcast %1249 : vector<1x64xi1> to vector<16x64xi1>
    %1251 = vector.broadcast %cst_370 : f32 to vector<16x64xf32>
    %1252 = arith.select %1250, %1248, %1251 : vector<16x64xi1>, vector<16x64xf32>
    %1253 = arith.addf %1244, %1252 : vector<16x64xf32>
    %1254 = vector.extract_strided_slice %1231 {offsets = [48, 0], sizes = [16, 64], strides = [1, 1]} : vector<144x64xf32> to vector<16x64xf32>
    %cst_371 = arith.constant 0.000000e+00 : f32
    %1255 = vector.broadcast %cst_371 : f32 to vector<16x1xf32>
    %1256 = vector.extract_strided_slice %1254 {offsets = [0, 0], sizes = [16, 63], strides = [1, 1]} : vector<16x64xf32> to vector<16x63xf32>
    %1257 = tpu.concatenate %1255, %1256 in 1 : vector<16x1xf32>, vector<16x63xf32> -> vector<16x64xf32>
    %cst_372 = arith.constant 0.000000e+00 : f32
    %1258 = vector.shape_cast %204 : vector<1x64xi1> to vector<1x64xi1>
    %1259 = vector.broadcast %1258 : vector<1x64xi1> to vector<16x64xi1>
    %1260 = vector.broadcast %cst_372 : f32 to vector<16x64xf32>
    %1261 = arith.select %1259, %1257, %1260 : vector<16x64xi1>, vector<16x64xf32>
    %1262 = arith.addf %1253, %1261 : vector<16x64xf32>
    %1263 = vector.extract_strided_slice %1231 {offsets = [64, 0], sizes = [16, 64], strides = [1, 1]} : vector<144x64xf32> to vector<16x64xf32>
    %1264 = arith.addf %1262, %1263 : vector<16x64xf32>
    %1265 = vector.extract_strided_slice %1231 {offsets = [80, 0], sizes = [16, 64], strides = [1, 1]} : vector<144x64xf32> to vector<16x64xf32>
    %cst_373 = arith.constant 0.000000e+00 : f32
    %1266 = vector.broadcast %cst_373 : f32 to vector<16x1xf32>
    %1267 = vector.extract_strided_slice %1265 {offsets = [0, 1], sizes = [16, 63], strides = [1, 1]} : vector<16x64xf32> to vector<16x63xf32>
    %1268 = tpu.concatenate %1267, %1266 in 1 : vector<16x63xf32>, vector<16x1xf32> -> vector<16x64xf32>
    %cst_374 = arith.constant 0.000000e+00 : f32
    %1269 = vector.shape_cast %206 : vector<1x64xi1> to vector<1x64xi1>
    %1270 = vector.broadcast %1269 : vector<1x64xi1> to vector<16x64xi1>
    %1271 = vector.broadcast %cst_374 : f32 to vector<16x64xf32>
    %1272 = arith.select %1270, %1268, %1271 : vector<16x64xi1>, vector<16x64xf32>
    %1273 = arith.addf %1264, %1272 : vector<16x64xf32>
    %1274 = vector.extract_strided_slice %1231 {offsets = [96, 0], sizes = [16, 64], strides = [1, 1]} : vector<144x64xf32> to vector<16x64xf32>
    %cst_375 = arith.constant 0.000000e+00 : f32
    %1275 = vector.broadcast %cst_375 : f32 to vector<16x7xf32>
    %1276 = vector.extract_strided_slice %1274 {offsets = [0, 7], sizes = [16, 57], strides = [1, 1]} : vector<16x64xf32> to vector<16x57xf32>
    %1277 = tpu.concatenate %1276, %1275 in 1 : vector<16x57xf32>, vector<16x7xf32> -> vector<16x64xf32>
    %cst_376 = arith.constant 0.000000e+00 : f32
    %1278 = vector.shape_cast %204 : vector<1x64xi1> to vector<1x64xi1>
    %1279 = vector.broadcast %1278 : vector<1x64xi1> to vector<16x64xi1>
    %1280 = vector.broadcast %cst_376 : f32 to vector<16x64xf32>
    %1281 = arith.select %1279, %1277, %1280 : vector<16x64xi1>, vector<16x64xf32>
    %1282 = arith.addf %1273, %1281 : vector<16x64xf32>
    %1283 = vector.extract_strided_slice %1231 {offsets = [112, 0], sizes = [16, 64], strides = [1, 1]} : vector<144x64xf32> to vector<16x64xf32>
    %cst_377 = arith.constant 0.000000e+00 : f32
    %1284 = vector.broadcast %cst_377 : f32 to vector<16x8xf32>
    %1285 = vector.extract_strided_slice %1283 {offsets = [0, 8], sizes = [16, 56], strides = [1, 1]} : vector<16x64xf32> to vector<16x56xf32>
    %1286 = tpu.concatenate %1285, %1284 in 1 : vector<16x56xf32>, vector<16x8xf32> -> vector<16x64xf32>
    %1287 = arith.addf %1282, %1286 : vector<16x64xf32>
    %1288 = vector.extract_strided_slice %1231 {offsets = [128, 0], sizes = [16, 64], strides = [1, 1]} : vector<144x64xf32> to vector<16x64xf32>
    %cst_378 = arith.constant 0.000000e+00 : f32
    %1289 = vector.broadcast %cst_378 : f32 to vector<16x9xf32>
    %1290 = vector.extract_strided_slice %1288 {offsets = [0, 9], sizes = [16, 55], strides = [1, 1]} : vector<16x64xf32> to vector<16x55xf32>
    %1291 = tpu.concatenate %1290, %1289 in 1 : vector<16x55xf32>, vector<16x9xf32> -> vector<16x64xf32>
    %cst_379 = arith.constant 0.000000e+00 : f32
    %1292 = vector.shape_cast %206 : vector<1x64xi1> to vector<1x64xi1>
    %1293 = vector.broadcast %1292 : vector<1x64xi1> to vector<16x64xi1>
    %1294 = vector.broadcast %cst_379 : f32 to vector<16x64xf32>
    %1295 = arith.select %1293, %1291, %1294 : vector<16x64xi1>, vector<16x64xf32>
    %1296 = arith.addf %1287, %1295 : vector<16x64xf32>
    %c0_380 = arith.constant 0 : index
    %c0_381 = arith.constant 0 : index
    %1297 = vector.load %arg36[%c0_380, %c0_381] : memref<16x1xf32, #tpu.memory_space<vmem>>, vector<16x1xf32>
    %1298 = vector.broadcast %1297 : vector<16x1xf32> to vector<16x64xf32>
    %1299 = arith.addf %1296, %1298 : vector<16x64xf32>
    %cst_382 = arith.constant 0.000000e+00 : f32
    %1300 = vector.broadcast %cst_382 : f32 to vector<16x64xf32>
    %1301 = arith.maximumf %1299, %1300 : vector<16x64xf32>
    %1302 = arith.truncf %1301 : vector<16x64xf32> to vector<16x64xbf16>
    %c0_383 = arith.constant 0 : index
    %c0_384 = arith.constant 0 : index
    %1303 = vector.load %arg2[%c0_383, %c0_384] : memref<64x256xbf16, #tpu.memory_space<vmem>>, vector<64x256xbf16>
    %cst_385 = arith.constant dense<0.000000e+00> : vector<16x256xf32>
    %1304 = tpu.matmul %1302, %1303, %cst_385 {dimension_numbers = #tpu.dot_dimension_numbers<[1], [0], [0], [1], [0, 0, 1, 1], [], []>} : vector<16x64xbf16>, vector<64x256xbf16>, vector<16x256xf32> -> vector<16x256xf32>
    %1305 = arith.truncf %1304 : vector<16x256xf32> to vector<16x256xbf16>
    %c0_386 = arith.constant 0 : index
    %c0_387 = arith.constant 0 : index
    %1306 = vector.load %arg48[%c0_386, %c0_387] : memref<72x8xbf16, #tpu.memory_space<vmem>>, vector<72x8xbf16>
    %cst_388 = arith.constant dense<0.000000e+00> : vector<72x256xf32>
    %1307 = tpu.matmul %1306, %1139, %cst_388 {dimension_numbers = #tpu.dot_dimension_numbers<[1], [0], [0], [1], [0, 0, 1, 1], [], []>} : vector<72x8xbf16>, vector<8x256xbf16>, vector<72x256xf32> -> vector<72x256xf32>
    %c0_389 = arith.constant 0 : index
    %c0_390 = arith.constant 0 : index
    %1308 = vector.load %arg49[%c0_389, %c0_390] : memref<72x16xbf16, #tpu.memory_space<vmem>>, vector<72x16xbf16>
    %cst_391 = arith.constant dense<0.000000e+00> : vector<72x256xf32>
    %1309 = tpu.matmul %1308, %1305, %cst_391 {dimension_numbers = #tpu.dot_dimension_numbers<[1], [0], [0], [1], [0, 0, 1, 1], [], []>} : vector<72x16xbf16>, vector<16x256xbf16>, vector<72x256xf32> -> vector<72x256xf32>
    %1310 = arith.addf %1307, %1309 : vector<72x256xf32>
    %1311 = vector.extract_strided_slice %1310 {offsets = [0, 0], sizes = [8, 256], strides = [1, 1]} : vector<72x256xf32> to vector<8x256xf32>
    %cst_392 = arith.constant 0.000000e+00 : f32
    %1312 = vector.broadcast %cst_392 : f32 to vector<8x17xf32>
    %1313 = vector.extract_strided_slice %1311 {offsets = [0, 0], sizes = [8, 239], strides = [1, 1]} : vector<8x256xf32> to vector<8x239xf32>
    %1314 = tpu.concatenate %1312, %1313 in 1 : vector<8x17xf32>, vector<8x239xf32> -> vector<8x256xf32>
    %cst_393 = arith.constant 0.000000e+00 : f32
    %1315 = vector.shape_cast %20 : vector<1x256xi1> to vector<1x256xi1>
    %1316 = vector.broadcast %1315 : vector<1x256xi1> to vector<8x256xi1>
    %1317 = vector.broadcast %cst_393 : f32 to vector<8x256xf32>
    %1318 = arith.select %1316, %1314, %1317 : vector<8x256xi1>, vector<8x256xf32>
    %1319 = vector.extract_strided_slice %1310 {offsets = [8, 0], sizes = [8, 256], strides = [1, 1]} : vector<72x256xf32> to vector<8x256xf32>
    %cst_394 = arith.constant 0.000000e+00 : f32
    %1320 = vector.broadcast %cst_394 : f32 to vector<8x16xf32>
    %1321 = vector.extract_strided_slice %1319 {offsets = [0, 0], sizes = [8, 240], strides = [1, 1]} : vector<8x256xf32> to vector<8x240xf32>
    %1322 = tpu.concatenate %1320, %1321 in 1 : vector<8x16xf32>, vector<8x240xf32> -> vector<8x256xf32>
    %1323 = arith.addf %1318, %1322 : vector<8x256xf32>
    %1324 = vector.extract_strided_slice %1310 {offsets = [16, 0], sizes = [8, 256], strides = [1, 1]} : vector<72x256xf32> to vector<8x256xf32>
    %cst_395 = arith.constant 0.000000e+00 : f32
    %1325 = vector.broadcast %cst_395 : f32 to vector<8x15xf32>
    %1326 = vector.extract_strided_slice %1324 {offsets = [0, 0], sizes = [8, 241], strides = [1, 1]} : vector<8x256xf32> to vector<8x241xf32>
    %1327 = tpu.concatenate %1325, %1326 in 1 : vector<8x15xf32>, vector<8x241xf32> -> vector<8x256xf32>
    %cst_396 = arith.constant 0.000000e+00 : f32
    %1328 = vector.shape_cast %22 : vector<1x256xi1> to vector<1x256xi1>
    %1329 = vector.broadcast %1328 : vector<1x256xi1> to vector<8x256xi1>
    %1330 = vector.broadcast %cst_396 : f32 to vector<8x256xf32>
    %1331 = arith.select %1329, %1327, %1330 : vector<8x256xi1>, vector<8x256xf32>
    %1332 = arith.addf %1323, %1331 : vector<8x256xf32>
    %1333 = vector.extract_strided_slice %1310 {offsets = [24, 0], sizes = [8, 256], strides = [1, 1]} : vector<72x256xf32> to vector<8x256xf32>
    %cst_397 = arith.constant 0.000000e+00 : f32
    %1334 = vector.broadcast %cst_397 : f32 to vector<8x1xf32>
    %1335 = vector.extract_strided_slice %1333 {offsets = [0, 0], sizes = [8, 255], strides = [1, 1]} : vector<8x256xf32> to vector<8x255xf32>
    %1336 = tpu.concatenate %1334, %1335 in 1 : vector<8x1xf32>, vector<8x255xf32> -> vector<8x256xf32>
    %cst_398 = arith.constant 0.000000e+00 : f32
    %1337 = vector.shape_cast %20 : vector<1x256xi1> to vector<1x256xi1>
    %1338 = vector.broadcast %1337 : vector<1x256xi1> to vector<8x256xi1>
    %1339 = vector.broadcast %cst_398 : f32 to vector<8x256xf32>
    %1340 = arith.select %1338, %1336, %1339 : vector<8x256xi1>, vector<8x256xf32>
    %1341 = arith.addf %1332, %1340 : vector<8x256xf32>
    %1342 = vector.extract_strided_slice %1310 {offsets = [32, 0], sizes = [8, 256], strides = [1, 1]} : vector<72x256xf32> to vector<8x256xf32>
    %1343 = arith.addf %1341, %1342 : vector<8x256xf32>
    %1344 = vector.extract_strided_slice %1310 {offsets = [40, 0], sizes = [8, 256], strides = [1, 1]} : vector<72x256xf32> to vector<8x256xf32>
    %cst_399 = arith.constant 0.000000e+00 : f32
    %1345 = vector.broadcast %cst_399 : f32 to vector<8x1xf32>
    %1346 = vector.extract_strided_slice %1344 {offsets = [0, 1], sizes = [8, 255], strides = [1, 1]} : vector<8x256xf32> to vector<8x255xf32>
    %1347 = tpu.concatenate %1346, %1345 in 1 : vector<8x255xf32>, vector<8x1xf32> -> vector<8x256xf32>
    %cst_400 = arith.constant 0.000000e+00 : f32
    %1348 = vector.shape_cast %22 : vector<1x256xi1> to vector<1x256xi1>
    %1349 = vector.broadcast %1348 : vector<1x256xi1> to vector<8x256xi1>
    %1350 = vector.broadcast %cst_400 : f32 to vector<8x256xf32>
    %1351 = arith.select %1349, %1347, %1350 : vector<8x256xi1>, vector<8x256xf32>
    %1352 = arith.addf %1343, %1351 : vector<8x256xf32>
    %1353 = vector.extract_strided_slice %1310 {offsets = [48, 0], sizes = [8, 256], strides = [1, 1]} : vector<72x256xf32> to vector<8x256xf32>
    %cst_401 = arith.constant 0.000000e+00 : f32
    %1354 = vector.broadcast %cst_401 : f32 to vector<8x15xf32>
    %1355 = vector.extract_strided_slice %1353 {offsets = [0, 15], sizes = [8, 241], strides = [1, 1]} : vector<8x256xf32> to vector<8x241xf32>
    %1356 = tpu.concatenate %1355, %1354 in 1 : vector<8x241xf32>, vector<8x15xf32> -> vector<8x256xf32>
    %cst_402 = arith.constant 0.000000e+00 : f32
    %1357 = vector.shape_cast %20 : vector<1x256xi1> to vector<1x256xi1>
    %1358 = vector.broadcast %1357 : vector<1x256xi1> to vector<8x256xi1>
    %1359 = vector.broadcast %cst_402 : f32 to vector<8x256xf32>
    %1360 = arith.select %1358, %1356, %1359 : vector<8x256xi1>, vector<8x256xf32>
    %1361 = arith.addf %1352, %1360 : vector<8x256xf32>
    %1362 = vector.extract_strided_slice %1310 {offsets = [56, 0], sizes = [8, 256], strides = [1, 1]} : vector<72x256xf32> to vector<8x256xf32>
    %cst_403 = arith.constant 0.000000e+00 : f32
    %1363 = vector.broadcast %cst_403 : f32 to vector<8x16xf32>
    %1364 = vector.extract_strided_slice %1362 {offsets = [0, 16], sizes = [8, 240], strides = [1, 1]} : vector<8x256xf32> to vector<8x240xf32>
    %1365 = tpu.concatenate %1364, %1363 in 1 : vector<8x240xf32>, vector<8x16xf32> -> vector<8x256xf32>
    %1366 = arith.addf %1361, %1365 : vector<8x256xf32>
    %1367 = vector.extract_strided_slice %1310 {offsets = [64, 0], sizes = [8, 256], strides = [1, 1]} : vector<72x256xf32> to vector<8x256xf32>
    %cst_404 = arith.constant 0.000000e+00 : f32
    %1368 = vector.broadcast %cst_404 : f32 to vector<8x17xf32>
    %1369 = vector.extract_strided_slice %1367 {offsets = [0, 17], sizes = [8, 239], strides = [1, 1]} : vector<8x256xf32> to vector<8x239xf32>
    %1370 = tpu.concatenate %1369, %1368 in 1 : vector<8x239xf32>, vector<8x17xf32> -> vector<8x256xf32>
    %cst_405 = arith.constant 0.000000e+00 : f32
    %1371 = vector.shape_cast %22 : vector<1x256xi1> to vector<1x256xi1>
    %1372 = vector.broadcast %1371 : vector<1x256xi1> to vector<8x256xi1>
    %1373 = vector.broadcast %cst_405 : f32 to vector<8x256xf32>
    %1374 = arith.select %1372, %1370, %1373 : vector<8x256xi1>, vector<8x256xf32>
    %1375 = arith.addf %1366, %1374 : vector<8x256xf32>
    %c0_406 = arith.constant 0 : index
    %c0_407 = arith.constant 0 : index
    %1376 = vector.load %arg46[%c0_406, %c0_407] : memref<8x1xf32, #tpu.memory_space<vmem>>, vector<8x1xf32>
    %1377 = vector.broadcast %1376 : vector<8x1xf32> to vector<8x256xf32>
    %1378 = arith.addf %1375, %1377 : vector<8x256xf32>
    %cst_408 = arith.constant 0.000000e+00 : f32
    %1379 = vector.broadcast %cst_408 : f32 to vector<8x256xf32>
    %1380 = arith.maximumf %1378, %1379 : vector<8x256xf32>
    %1381 = arith.truncf %1380 : vector<8x256xf32> to vector<8x256xbf16>
    %c0_409 = arith.constant 0 : index
    %c0_410 = arith.constant 0 : index
    %1382 = vector.load %arg50[%c0_409, %c0_410] : memref<72x8xbf16, #tpu.memory_space<vmem>>, vector<72x8xbf16>
    %cst_411 = arith.constant dense<0.000000e+00> : vector<72x256xf32>
    %1383 = tpu.matmul %1382, %1381, %cst_411 {dimension_numbers = #tpu.dot_dimension_numbers<[1], [0], [0], [1], [0, 0, 1, 1], [], []>} : vector<72x8xbf16>, vector<8x256xbf16>, vector<72x256xf32> -> vector<72x256xf32>
    %1384 = vector.extract_strided_slice %1383 {offsets = [0, 0], sizes = [8, 256], strides = [1, 1]} : vector<72x256xf32> to vector<8x256xf32>
    %cst_412 = arith.constant 0.000000e+00 : f32
    %1385 = vector.broadcast %cst_412 : f32 to vector<8x17xf32>
    %1386 = vector.extract_strided_slice %1384 {offsets = [0, 0], sizes = [8, 239], strides = [1, 1]} : vector<8x256xf32> to vector<8x239xf32>
    %1387 = tpu.concatenate %1385, %1386 in 1 : vector<8x17xf32>, vector<8x239xf32> -> vector<8x256xf32>
    %cst_413 = arith.constant 0.000000e+00 : f32
    %1388 = vector.shape_cast %20 : vector<1x256xi1> to vector<1x256xi1>
    %1389 = vector.broadcast %1388 : vector<1x256xi1> to vector<8x256xi1>
    %1390 = vector.broadcast %cst_413 : f32 to vector<8x256xf32>
    %1391 = arith.select %1389, %1387, %1390 : vector<8x256xi1>, vector<8x256xf32>
    %1392 = vector.extract_strided_slice %1383 {offsets = [8, 0], sizes = [8, 256], strides = [1, 1]} : vector<72x256xf32> to vector<8x256xf32>
    %cst_414 = arith.constant 0.000000e+00 : f32
    %1393 = vector.broadcast %cst_414 : f32 to vector<8x16xf32>
    %1394 = vector.extract_strided_slice %1392 {offsets = [0, 0], sizes = [8, 240], strides = [1, 1]} : vector<8x256xf32> to vector<8x240xf32>
    %1395 = tpu.concatenate %1393, %1394 in 1 : vector<8x16xf32>, vector<8x240xf32> -> vector<8x256xf32>
    %1396 = arith.addf %1391, %1395 : vector<8x256xf32>
    %1397 = vector.extract_strided_slice %1383 {offsets = [16, 0], sizes = [8, 256], strides = [1, 1]} : vector<72x256xf32> to vector<8x256xf32>
    %cst_415 = arith.constant 0.000000e+00 : f32
    %1398 = vector.broadcast %cst_415 : f32 to vector<8x15xf32>
    %1399 = vector.extract_strided_slice %1397 {offsets = [0, 0], sizes = [8, 241], strides = [1, 1]} : vector<8x256xf32> to vector<8x241xf32>
    %1400 = tpu.concatenate %1398, %1399 in 1 : vector<8x15xf32>, vector<8x241xf32> -> vector<8x256xf32>
    %cst_416 = arith.constant 0.000000e+00 : f32
    %1401 = vector.shape_cast %22 : vector<1x256xi1> to vector<1x256xi1>
    %1402 = vector.broadcast %1401 : vector<1x256xi1> to vector<8x256xi1>
    %1403 = vector.broadcast %cst_416 : f32 to vector<8x256xf32>
    %1404 = arith.select %1402, %1400, %1403 : vector<8x256xi1>, vector<8x256xf32>
    %1405 = arith.addf %1396, %1404 : vector<8x256xf32>
    %1406 = vector.extract_strided_slice %1383 {offsets = [24, 0], sizes = [8, 256], strides = [1, 1]} : vector<72x256xf32> to vector<8x256xf32>
    %cst_417 = arith.constant 0.000000e+00 : f32
    %1407 = vector.broadcast %cst_417 : f32 to vector<8x1xf32>
    %1408 = vector.extract_strided_slice %1406 {offsets = [0, 0], sizes = [8, 255], strides = [1, 1]} : vector<8x256xf32> to vector<8x255xf32>
    %1409 = tpu.concatenate %1407, %1408 in 1 : vector<8x1xf32>, vector<8x255xf32> -> vector<8x256xf32>
    %cst_418 = arith.constant 0.000000e+00 : f32
    %1410 = vector.shape_cast %20 : vector<1x256xi1> to vector<1x256xi1>
    %1411 = vector.broadcast %1410 : vector<1x256xi1> to vector<8x256xi1>
    %1412 = vector.broadcast %cst_418 : f32 to vector<8x256xf32>
    %1413 = arith.select %1411, %1409, %1412 : vector<8x256xi1>, vector<8x256xf32>
    %1414 = arith.addf %1405, %1413 : vector<8x256xf32>
    %1415 = vector.extract_strided_slice %1383 {offsets = [32, 0], sizes = [8, 256], strides = [1, 1]} : vector<72x256xf32> to vector<8x256xf32>
    %1416 = arith.addf %1414, %1415 : vector<8x256xf32>
    %1417 = vector.extract_strided_slice %1383 {offsets = [40, 0], sizes = [8, 256], strides = [1, 1]} : vector<72x256xf32> to vector<8x256xf32>
    %cst_419 = arith.constant 0.000000e+00 : f32
    %1418 = vector.broadcast %cst_419 : f32 to vector<8x1xf32>
    %1419 = vector.extract_strided_slice %1417 {offsets = [0, 1], sizes = [8, 255], strides = [1, 1]} : vector<8x256xf32> to vector<8x255xf32>
    %1420 = tpu.concatenate %1419, %1418 in 1 : vector<8x255xf32>, vector<8x1xf32> -> vector<8x256xf32>
    %cst_420 = arith.constant 0.000000e+00 : f32
    %1421 = vector.shape_cast %22 : vector<1x256xi1> to vector<1x256xi1>
    %1422 = vector.broadcast %1421 : vector<1x256xi1> to vector<8x256xi1>
    %1423 = vector.broadcast %cst_420 : f32 to vector<8x256xf32>
    %1424 = arith.select %1422, %1420, %1423 : vector<8x256xi1>, vector<8x256xf32>
    %1425 = arith.addf %1416, %1424 : vector<8x256xf32>
    %1426 = vector.extract_strided_slice %1383 {offsets = [48, 0], sizes = [8, 256], strides = [1, 1]} : vector<72x256xf32> to vector<8x256xf32>
    %cst_421 = arith.constant 0.000000e+00 : f32
    %1427 = vector.broadcast %cst_421 : f32 to vector<8x15xf32>
    %1428 = vector.extract_strided_slice %1426 {offsets = [0, 15], sizes = [8, 241], strides = [1, 1]} : vector<8x256xf32> to vector<8x241xf32>
    %1429 = tpu.concatenate %1428, %1427 in 1 : vector<8x241xf32>, vector<8x15xf32> -> vector<8x256xf32>
    %cst_422 = arith.constant 0.000000e+00 : f32
    %1430 = vector.shape_cast %20 : vector<1x256xi1> to vector<1x256xi1>
    %1431 = vector.broadcast %1430 : vector<1x256xi1> to vector<8x256xi1>
    %1432 = vector.broadcast %cst_422 : f32 to vector<8x256xf32>
    %1433 = arith.select %1431, %1429, %1432 : vector<8x256xi1>, vector<8x256xf32>
    %1434 = arith.addf %1425, %1433 : vector<8x256xf32>
    %1435 = vector.extract_strided_slice %1383 {offsets = [56, 0], sizes = [8, 256], strides = [1, 1]} : vector<72x256xf32> to vector<8x256xf32>
    %cst_423 = arith.constant 0.000000e+00 : f32
    %1436 = vector.broadcast %cst_423 : f32 to vector<8x16xf32>
    %1437 = vector.extract_strided_slice %1435 {offsets = [0, 16], sizes = [8, 240], strides = [1, 1]} : vector<8x256xf32> to vector<8x240xf32>
    %1438 = tpu.concatenate %1437, %1436 in 1 : vector<8x240xf32>, vector<8x16xf32> -> vector<8x256xf32>
    %1439 = arith.addf %1434, %1438 : vector<8x256xf32>
    %1440 = vector.extract_strided_slice %1383 {offsets = [64, 0], sizes = [8, 256], strides = [1, 1]} : vector<72x256xf32> to vector<8x256xf32>
    %cst_424 = arith.constant 0.000000e+00 : f32
    %1441 = vector.broadcast %cst_424 : f32 to vector<8x17xf32>
    %1442 = vector.extract_strided_slice %1440 {offsets = [0, 17], sizes = [8, 239], strides = [1, 1]} : vector<8x256xf32> to vector<8x239xf32>
    %1443 = tpu.concatenate %1442, %1441 in 1 : vector<8x239xf32>, vector<8x17xf32> -> vector<8x256xf32>
    %cst_425 = arith.constant 0.000000e+00 : f32
    %1444 = vector.shape_cast %22 : vector<1x256xi1> to vector<1x256xi1>
    %1445 = vector.broadcast %1444 : vector<1x256xi1> to vector<8x256xi1>
    %1446 = vector.broadcast %cst_425 : f32 to vector<8x256xf32>
    %1447 = arith.select %1445, %1443, %1446 : vector<8x256xi1>, vector<8x256xf32>
    %1448 = arith.addf %1439, %1447 : vector<8x256xf32>
    %c0_426 = arith.constant 0 : index
    %c0_427 = arith.constant 0 : index
    %1449 = vector.load %arg47[%c0_426, %c0_427] : memref<8x1xf32, #tpu.memory_space<vmem>>, vector<8x1xf32>
    %1450 = vector.broadcast %1449 : vector<8x1xf32> to vector<8x256xf32>
    %1451 = arith.addf %1448, %1450 : vector<8x256xf32>
    %cst_428 = arith.constant 0.000000e+00 : f32
    %1452 = vector.broadcast %cst_428 : f32 to vector<8x256xf32>
    %1453 = arith.maximumf %1451, %1452 : vector<8x256xf32>
    %1454 = arith.truncf %1453 : vector<8x256xf32> to vector<8x256xbf16>
    %c0_429 = arith.constant 0 : index
    %c0_430 = arith.constant 0 : index
    %1455 = vector.load %arg45[%c0_429, %c0_430] : memref<8x8xbf16, #tpu.memory_space<vmem>>, vector<8x8xbf16>
    %cst_431 = arith.constant dense<0.000000e+00> : vector<8x256xf32>
    %1456 = tpu.matmul %1455, %1454, %cst_431 {dimension_numbers = #tpu.dot_dimension_numbers<[1], [0], [0], [1], [0, 0, 1, 1], [], []>} : vector<8x8xbf16>, vector<8x256xbf16>, vector<8x256xf32> -> vector<8x256xf32>
    %c0_432 = arith.constant 0 : index
    %c0_433 = arith.constant 0 : index
    %1457 = vector.load %arg44[%c0_432, %c0_433] : memref<8x1xf32, #tpu.memory_space<vmem>>, vector<8x1xf32>
    %1458 = vector.broadcast %1457 : vector<8x1xf32> to vector<8x256xf32>
    %1459 = arith.addf %1456, %1458 : vector<8x256xf32>
    %1460 = arith.extf %986 : vector<8x256xbf16> to vector<8x256xf32>
    %1461 = arith.addf %1459, %1460 : vector<8x256xf32>
    %1462 = arith.truncf %1461 : vector<8x256xf32> to vector<8x256xbf16>
    %1463 = vector.extract_strided_slice %1462 {offsets = [0, 0], sizes = [3, 256], strides = [1, 1]} : vector<8x256xbf16> to vector<3x256xbf16>
    %c0_434 = arith.constant 0 : index
    %c0_435 = arith.constant 0 : index
    %c0_436 = arith.constant 0 : index
    %1464 = vector.load %arg53[%c0_434, %c0_435, %c0_436] : memref<1x3x256xbf16, #tpu.memory_space<vmem>>, vector<1x3x256xbf16>
    %1465 = vector.shape_cast %1464 : vector<1x3x256xbf16> to vector<3x256xbf16>
    %1466 = vector.shape_cast %1463 : vector<3x256xbf16> to vector<1x3x256xbf16>
    tpu.vector_store %arg53[%c0_434, %c0_435, %c0_436], %1466 {strides = array<i32>} : memref<1x3x256xbf16, #tpu.memory_space<vmem>>, vector<1x3x256xbf16>,
    return
  }
  func.func @transform_0(%arg0: i32) -> (i32, i32, i32) {
    %c0_i32 = arith.constant 0 : i32
    %c0_i32_0 = arith.constant 0 : i32
    %c0_i32_1 = arith.constant 0 : i32
    return %arg0, %c0_i32, %c0_i32_0 : i32, i32, i32
  }
  func.func @transform_1(%arg0: i32) -> (i32, i32) {
    %c0_i32 = arith.constant 0 : i32
    %c0_i32_0 = arith.constant 0 : i32
    %c0_i32_1 = arith.constant 0 : i32
    return %c0_i32, %c0_i32_0 : i32, i32
  }
  func.func @transform_2(%arg0: i32) -> (i32, i32) {
    %c0_i32 = arith.constant 0 : i32
    %c0_i32_0 = arith.constant 0 : i32
    %c0_i32_1 = arith.constant 0 : i32
    return %c0_i32, %c0_i32_0 : i32, i32
  }
  func.func @transform_3(%arg0: i32) -> (i32, i32) {
    %c0_i32 = arith.constant 0 : i32
    %c0_i32_0 = arith.constant 0 : i32
    %c0_i32_1 = arith.constant 0 : i32
    return %c0_i32, %c0_i32_0 : i32, i32
  }
  func.func @transform_4(%arg0: i32) -> (i32, i32) {
    %c0_i32 = arith.constant 0 : i32
    %c0_i32_0 = arith.constant 0 : i32
    %c0_i32_1 = arith.constant 0 : i32
    return %c0_i32, %c0_i32_0 : i32, i32
  }
  func.func @transform_5(%arg0: i32) -> (i32, i32) {
    %c0_i32 = arith.constant 0 : i32
    %c0_i32_0 = arith.constant 0 : i32
    %c0_i32_1 = arith.constant 0 : i32
    return %c0_i32, %c0_i32_0 : i32, i32
  }
  func.func @transform_6(%arg0: i32) -> (i32, i32) {
    %c0_i32 = arith.constant 0 : i32
    %c0_i32_0 = arith.constant 0 : i32
    %c0_i32_1 = arith.constant 0 : i32
    return %c0_i32, %c0_i32_0 : i32, i32
  }
  func.func @transform_7(%arg0: i32) -> (i32, i32) {
    %c0_i32 = arith.constant 0 : i32
    %c0_i32_0 = arith.constant 0 : i32
    %c0_i32_1 = arith.constant 0 : i32
    return %c0_i32, %c0_i32_0 : i32, i32
  }
  func.func @transform_8(%arg0: i32) -> (i32, i32) {
    %c0_i32 = arith.constant 0 : i32
    %c0_i32_0 = arith.constant 0 : i32
    %c0_i32_1 = arith.constant 0 : i32
    return %c0_i32, %c0_i32_0 : i32, i32
  }
  func.func @transform_9(%arg0: i32) -> (i32, i32) {
    %c0_i32 = arith.constant 0 : i32
    %c0_i32_0 = arith.constant 0 : i32
    %c0_i32_1 = arith.constant 0 : i32
    return %c0_i32, %c0_i32_0 : i32, i32
  }
  func.func @transform_10(%arg0: i32) -> (i32, i32) {
    %c0_i32 = arith.constant 0 : i32
    %c0_i32_0 = arith.constant 0 : i32
    %c0_i32_1 = arith.constant 0 : i32
    return %c0_i32, %c0_i32_0 : i32, i32
  }
  func.func @transform_11(%arg0: i32) -> (i32, i32) {
    %c0_i32 = arith.constant 0 : i32
    %c0_i32_0 = arith.constant 0 : i32
    %c0_i32_1 = arith.constant 0 : i32
    return %c0_i32, %c0_i32_0 : i32, i32
  }
  func.func @transform_12(%arg0: i32) -> (i32, i32) {
    %c0_i32 = arith.constant 0 : i32
    %c0_i32_0 = arith.constant 0 : i32
    %c0_i32_1 = arith.constant 0 : i32
    return %c0_i32, %c0_i32_0 : i32, i32
  }
  func.func @transform_13(%arg0: i32) -> (i32, i32) {
    %c0_i32 = arith.constant 0 : i32
    %c0_i32_0 = arith.constant 0 : i32
    %c0_i32_1 = arith.constant 0 : i32
    return %c0_i32, %c0_i32_0 : i32, i32
  }
  func.func @transform_14(%arg0: i32) -> (i32, i32) {
    %c0_i32 = arith.constant 0 : i32
    %c0_i32_0 = arith.constant 0 : i32
    %c0_i32_1 = arith.constant 0 : i32
    return %c0_i32, %c0_i32_0 : i32, i32
  }
  func.func @transform_15(%arg0: i32) -> (i32, i32) {
    %c0_i32 = arith.constant 0 : i32
    %c0_i32_0 = arith.constant 0 : i32
    %c0_i32_1 = arith.constant 0 : i32
    return %c0_i32, %c0_i32_0 : i32, i32
  }
  func.func @transform_16(%arg0: i32) -> (i32, i32) {
    %c0_i32 = arith.constant 0 : i32
    %c0_i32_0 = arith.constant 0 : i32
    %c0_i32_1 = arith.constant 0 : i32
    return %c0_i32, %c0_i32_0 : i32, i32
  }
  func.func @transform_17(%arg0: i32) -> (i32, i32) {
    %c0_i32 = arith.constant 0 : i32
    %c0_i32_0 = arith.constant 0 : i32
    %c0_i32_1 = arith.constant 0 : i32
    return %c0_i32, %c0_i32_0 : i32, i32
  }
  func.func @transform_18(%arg0: i32) -> (i32, i32) {
    %c0_i32 = arith.constant 0 : i32
    %c0_i32_0 = arith.constant 0 : i32
    %c0_i32_1 = arith.constant 0 : i32
    return %c0_i32, %c0_i32_0 : i32, i32
  }
  func.func @transform_19(%arg0: i32) -> (i32, i32) {
    %c0_i32 = arith.constant 0 : i32
    %c0_i32_0 = arith.constant 0 : i32
    %c0_i32_1 = arith.constant 0 : i32
    return %c0_i32, %c0_i32_0 : i32, i32
  }
  func.func @transform_20(%arg0: i32) -> (i32, i32) {
    %c0_i32 = arith.constant 0 : i32
    %c0_i32_0 = arith.constant 0 : i32
    %c0_i32_1 = arith.constant 0 : i32
    return %c0_i32, %c0_i32_0 : i32, i32
  }
  func.func @transform_21(%arg0: i32) -> (i32, i32) {
    %c0_i32 = arith.constant 0 : i32
    %c0_i32_0 = arith.constant 0 : i32
    %c0_i32_1 = arith.constant 0 : i32
    return %c0_i32, %c0_i32_0 : i32, i32
  }
  func.func @transform_22(%arg0: i32) -> (i32, i32) {
    %c0_i32 = arith.constant 0 : i32
    %c0_i32_0 = arith.constant 0 : i32
    %c0_i32_1 = arith.constant 0 : i32
    return %c0_i32, %c0_i32_0 : i32, i32
  }
  func.func @transform_23(%arg0: i32) -> (i32, i32) {
    %c0_i32 = arith.constant 0 : i32
    %c0_i32_0 = arith.constant 0 : i32
    %c0_i32_1 = arith.constant 0 : i32
    return %c0_i32, %c0_i32_0 : i32, i32
  }
  func.func @transform_24(%arg0: i32) -> (i32, i32) {
    %c0_i32 = arith.constant 0 : i32
    %c0_i32_0 = arith.constant 0 : i32
    %c0_i32_1 = arith.constant 0 : i32
    return %c0_i32, %c0_i32_0 : i32, i32
  }
  func.func @transform_25(%arg0: i32) -> (i32, i32) {
    %c0_i32 = arith.constant 0 : i32
    %c0_i32_0 = arith.constant 0 : i32
    %c0_i32_1 = arith.constant 0 : i32
    return %c0_i32, %c0_i32_0 : i32, i32
  }
  func.func @transform_26(%arg0: i32) -> (i32, i32) {
    %c0_i32 = arith.constant 0 : i32
    %c0_i32_0 = arith.constant 0 : i32
    %c0_i32_1 = arith.constant 0 : i32
    return %c0_i32, %c0_i32_0 : i32, i32
  }
  func.func @transform_27(%arg0: i32) -> (i32, i32) {
    %c0_i32 = arith.constant 0 : i32
    %c0_i32_0 = arith.constant 0 : i32
    %c0_i32_1 = arith.constant 0 : i32
    return %c0_i32, %c0_i32_0 : i32, i32
  }
  func.func @transform_28(%arg0: i32) -> (i32, i32) {
    %c0_i32 = arith.constant 0 : i32
    %c0_i32_0 = arith.constant 0 : i32
    %c0_i32_1 = arith.constant 0 : i32
    return %c0_i32, %c0_i32_0 : i32, i32
  }
  func.func @transform_29(%arg0: i32) -> (i32, i32) {
    %c0_i32 = arith.constant 0 : i32
    %c0_i32_0 = arith.constant 0 : i32
    %c0_i32_1 = arith.constant 0 : i32
    return %c0_i32, %c0_i32_0 : i32, i32
  }
  func.func @transform_30(%arg0: i32) -> (i32, i32) {
    %c0_i32 = arith.constant 0 : i32
    %c0_i32_0 = arith.constant 0 : i32
    %c0_i32_1 = arith.constant 0 : i32
    return %c0_i32, %c0_i32_0 : i32, i32
  }
  func.func @transform_31(%arg0: i32) -> (i32, i32) {
    %c0_i32 = arith.constant 0 : i32
    %c0_i32_0 = arith.constant 0 : i32
    %c0_i32_1 = arith.constant 0 : i32
    return %c0_i32, %c0_i32_0 : i32, i32
  }
  func.func @transform_32(%arg0: i32) -> (i32, i32) {
    %c0_i32 = arith.constant 0 : i32
    %c0_i32_0 = arith.constant 0 : i32
    %c0_i32_1 = arith.constant 0 : i32
    return %c0_i32, %c0_i32_0 : i32, i32
  }
  func.func @transform_33(%arg0: i32) -> (i32, i32) {
    %c0_i32 = arith.constant 0 : i32
    %c0_i32_0 = arith.constant 0 : i32
    %c0_i32_1 = arith.constant 0 : i32
    return %c0_i32, %c0_i32_0 : i32, i32
  }
  func.func @transform_34(%arg0: i32) -> (i32, i32) {
    %c0_i32 = arith.constant 0 : i32
    %c0_i32_0 = arith.constant 0 : i32
    %c0_i32_1 = arith.constant 0 : i32
    return %c0_i32, %c0_i32_0 : i32, i32
  }
  func.func @transform_35(%arg0: i32) -> (i32, i32) {
    %c0_i32 = arith.constant 0 : i32
    %c0_i32_0 = arith.constant 0 : i32
    %c0_i32_1 = arith.constant 0 : i32
    return %c0_i32, %c0_i32_0 : i32, i32
  }
  func.func @transform_36(%arg0: i32) -> (i32, i32) {
    %c0_i32 = arith.constant 0 : i32
    %c0_i32_0 = arith.constant 0 : i32
    %c0_i32_1 = arith.constant 0 : i32
    return %c0_i32, %c0_i32_0 : i32, i32
  }
  func.func @transform_37(%arg0: i32) -> (i32, i32) {
    %c0_i32 = arith.constant 0 : i32
    %c0_i32_0 = arith.constant 0 : i32
    %c0_i32_1 = arith.constant 0 : i32
    return %c0_i32, %c0_i32_0 : i32, i32
  }
  func.func @transform_38(%arg0: i32) -> (i32, i32) {
    %c0_i32 = arith.constant 0 : i32
    %c0_i32_0 = arith.constant 0 : i32
    %c0_i32_1 = arith.constant 0 : i32
    return %c0_i32, %c0_i32_0 : i32, i32
  }
  func.func @transform_39(%arg0: i32) -> (i32, i32) {
    %c0_i32 = arith.constant 0 : i32
    %c0_i32_0 = arith.constant 0 : i32
    %c0_i32_1 = arith.constant 0 : i32
    return %c0_i32, %c0_i32_0 : i32, i32
  }
  func.func @transform_40(%arg0: i32) -> (i32, i32) {
    %c0_i32 = arith.constant 0 : i32
    %c0_i32_0 = arith.constant 0 : i32
    %c0_i32_1 = arith.constant 0 : i32
    return %c0_i32, %c0_i32_0 : i32, i32
  }
  func.func @transform_41(%arg0: i32) -> (i32, i32) {
    %c0_i32 = arith.constant 0 : i32
    %c0_i32_0 = arith.constant 0 : i32
    %c0_i32_1 = arith.constant 0 : i32
    return %c0_i32, %c0_i32_0 : i32, i32
  }
  func.func @transform_42(%arg0: i32) -> (i32, i32) {
    %c0_i32 = arith.constant 0 : i32
    %c0_i32_0 = arith.constant 0 : i32
    %c0_i32_1 = arith.constant 0 : i32
    return %c0_i32, %c0_i32_0 : i32, i32
  }
  func.func @transform_43(%arg0: i32) -> (i32, i32) {
    %c0_i32 = arith.constant 0 : i32
    %c0_i32_0 = arith.constant 0 : i32
    %c0_i32_1 = arith.constant 0 : i32
    return %c0_i32, %c0_i32_0 : i32, i32
  }
  func.func @transform_44(%arg0: i32) -> (i32, i32) {
    %c0_i32 = arith.constant 0 : i32
    %c0_i32_0 = arith.constant 0 : i32
    %c0_i32_1 = arith.constant 0 : i32
    return %c0_i32, %c0_i32_0 : i32, i32
  }
  func.func @transform_45(%arg0: i32) -> (i32, i32) {
    %c0_i32 = arith.constant 0 : i32
    %c0_i32_0 = arith.constant 0 : i32
    %c0_i32_1 = arith.constant 0 : i32
    return %c0_i32, %c0_i32_0 : i32, i32
  }
  func.func @transform_46(%arg0: i32) -> (i32, i32) {
    %c0_i32 = arith.constant 0 : i32
    %c0_i32_0 = arith.constant 0 : i32
    %c0_i32_1 = arith.constant 0 : i32
    return %c0_i32, %c0_i32_0 : i32, i32
  }
  func.func @transform_47(%arg0: i32) -> (i32, i32) {
    %c0_i32 = arith.constant 0 : i32
    %c0_i32_0 = arith.constant 0 : i32
    %c0_i32_1 = arith.constant 0 : i32
    return %c0_i32, %c0_i32_0 : i32, i32
  }
  func.func @transform_48(%arg0: i32) -> (i32, i32) {
    %c0_i32 = arith.constant 0 : i32
    %c0_i32_0 = arith.constant 0 : i32
    %c0_i32_1 = arith.constant 0 : i32
    return %c0_i32, %c0_i32_0 : i32, i32
  }
  func.func @transform_49(%arg0: i32) -> (i32, i32) {
    %c0_i32 = arith.constant 0 : i32
    %c0_i32_0 = arith.constant 0 : i32
    %c0_i32_1 = arith.constant 0 : i32
    return %c0_i32, %c0_i32_0 : i32, i32
  }
  func.func @transform_50(%arg0: i32) -> (i32, i32, i32) {
    %c0_i32 = arith.constant 0 : i32
    %c0_i32_0 = arith.constant 0 : i32
    %c0_i32_1 = arith.constant 0 : i32
    return %arg0, %c0_i32, %c0_i32_0 : i32, i32, i32
  }
  func.func @transform_51(%arg0: i32) -> (i32, i32, i32) {
    %c0_i32 = arith.constant 0 : i32
    %c0_i32_0 = arith.constant 0 : i32
    %c0_i32_1 = arith.constant 0 : i32
    return %arg0, %c0_i32, %c0_i32_0 : i32, i32, i32
  }
  func.func @transform_52(%arg0: i32) -> (i32, i32, i32) {
    %c0_i32 = arith.constant 0 : i32
    %c0_i32_0 = arith.constant 0 : i32
    %c0_i32_1 = arith.constant 0 : i32
    return %arg0, %c0_i32, %c0_i32_0 : i32, i32, i32
  }
}

</mosaic_0001>

<bundles_post_ra>
// kernel: score_residue_u_inspection_forward.1
= control target key start
LH: loop header
LB: loop body
LE: loop exit
PB: predicated region body
PF: predicated region fallthrough
CT: control target
= control target key end

     0   :  { %s9691_s6 = smov 1   ;;  %s9692_s10 = smov 2   ;;  %s11997_s0 = inlined_call_operand.smem [shape: u32[53], index: -1, kind: input, shape index: {}] }
   0x1   :  { %s9769_s5 = sld [smem:[%s11997_s0]]   ;;  %s9693_s14 = smov 3  }
   0x2   :  { %s9774_s9 = sld [smem:[%s11997_s0 + %s9691_s6]]   ;;  %s9694_s18 = smov 4  }
   0x3   :  { %s9779_s13 = sld [smem:[%s11997_s0 + %s9692_s10]]   ;;  %s9695_s22 = smov 5  }
   0x4   :  { %s9784_s17 = sld [smem:[%s11997_s0 + %s9693_s14]]   ;;  %s9696_s26 = smov 6  }
   0x5   :  { %s9789_s21 = sld [smem:[%s11997_s0 + %s9694_s18]]   ;;  %s9697_s30 = smov 7  }
   0x6   :  { %s9794_s25 = sld [smem:[%s11997_s0 + %s9695_s22]]   ;;  %s9698_s4 = smov 8  }
   0x7   :  { %12082 = sst [smem:[#allocation2_spill]] %s9769_s5  ;;  %s9699_s10 = smov 9  }
   0x8   :  { %12083 = sst [smem:[#allocation3_spill]] %s9774_s9  ;;  %s9700_s15 = smov 10  }
   0x9   :  { %12084 = sst [smem:[#allocation4_spill]] %s9779_s13  ;;  %s9701_s20 = smov 11  }
   0xa   :  { %12085 = sst [smem:[#allocation5_spill]] %s9784_s17  ;;  %s9703_s1 = smov 13  }
   0xb   :  { %s9799_s29 = sld [smem:[%s11997_s0 + %s9696_s26]]   ;;  %s9702_s26 = smov 12  }
   0xc   :  { %s9804_s3 = sld [smem:[%s11997_s0 + %s9697_s30]]   ;;  %s9704_s7 = smov 14  }
   0xd   :  { %s9809_s8 = sld [smem:[%s11997_s0 + %s9698_s4]]   ;;  %s9706_s22 = smov 16  }
   0xe   :  { %s9814_s14 = sld [smem:[%s11997_s0 + %s9699_s10]]   ;;  %s9707_s28 = smov 17  }
   0xf   :  { %s9819_s19 = sld [smem:[%s11997_s0 + %s9700_s15]]   ;;  %s9705_s15 = smov 15  }
  0x10   :  { %s9824_s24 = sld [smem:[%s11997_s0 + %s9701_s20]]  }
  0x11   :  { %s9829_s30 = sld [smem:[%s11997_s0 + %s9702_s26]]  }
  0x12   :  { %12086 = sst [smem:[#allocation6_spill]] %s9804_s3 }
  0x13   :  { %12087 = sst [smem:[#allocation7_spill]] %s9809_s8 }
  0x14   :  { %12088 = sst [smem:[#allocation8_spill]] %s9814_s14 }
  0x15   :  { %12089 = sst [smem:[#allocation9_spill]] %s9819_s19 }
  0x16   :  { %12090 = sst [smem:[#allocation10_spill]] %s9824_s24 }
  0x17   :  { %12091 = sst [smem:[#allocation11_spill]] %s9829_s30 }
  0x18   :  { %s9834_s6 = sld [smem:[%s11997_s0 + %s9703_s1]]  }
  0x19   :  { %s9839_s12 = sld [smem:[%s11997_s0 + %s9704_s7]]   ;;  %s9708_s7 = smov 18  }
  0x1a   :  { %s9844_s20 = sld [smem:[%s11997_s0 + %s9705_s15]]   ;;  %s9709_s15 = smov 19  }
  0x1b   :  { %s9849_s27 = sld [smem:[%s11997_s0 + %s9706_s22]]   ;;  %s9710_s22 = smov 20  }
  0x1c   :  { %s9854_s4 = sld [smem:[%s11997_s0 + %s9707_s28]]   ;;  %s9711_s28 = smov 21  }
  0x1d   :  { %s9859_s30 = sld [smem:[%s11997_s0 + %s9708_s7]]   ;;  %s9712_s7 = smov 22  }
  0x1e   :  { %12092 = sst [smem:[#allocation12_spill]] %s9834_s6 }
  0x1f   :  { %12093 = sst [smem:[#allocation13_spill]] %s9839_s12 }
  0x20   :  { %s9864_s24 = sld [smem:[%s11997_s0 + %s9709_s15]]   ;;  %s9713_s15 = smov 23  }
  0x21   :  { %s9869_s12 = sld [smem:[%s11997_s0 + %s9710_s22]]   ;;  %s9714_s22 = smov 24  }
  0x22   :  { %12094 = sst [smem:[#allocation14_spill]] %s9854_s4 }
  0x23   :  { %12095 = sst [smem:[#allocation15_spill]] %s9859_s30 }
  0x24   :  { %s9874_s4 = sld [smem:[%s11997_s0 + %s9711_s28]]   ;;  %s9715_s28 = smov 25  }
  0x25   :  { %s9879_s30 = sld [smem:[%s11997_s0 + %s9712_s7]]   ;;  %s9716_s7 = smov 26  }
  0x26   :  { %12096 = sst [smem:[#allocation16_spill]] %s9864_s24 }
  0x27   :  { %12097 = sst [smem:[#allocation17_spill]] %s9869_s12 }
  0x28   :  { %s9884_s24 = sld [smem:[%s11997_s0 + %s9713_s15]]   ;;  %s9717_s15 = smov 27  }
  0x29   :  { %s9889_s12 = sld [smem:[%s11997_s0 + %s9714_s22]]   ;;  %s9718_s22 = smov 28  }
  0x2a   :  { %12098 = sst [smem:[#allocation18_spill]] %s9874_s4 }
  0x2b   :  { %12099 = sst [smem:[#allocation19_spill]] %s9879_s30 }
  0x2c   :  { %s9894_s4 = sld [smem:[%s11997_s0 + %s9715_s28]]   ;;  %s9719_s28 = smov 29  }
  0x2d   :  { %s9899_s30 = sld [smem:[%s11997_s0 + %s9716_s7]]   ;;  %s9720_s7 = smov 30  }
  0x2e   :  { %12100 = sst [smem:[#allocation20_spill]] %s9884_s24 }
  0x2f   :  { %12101 = sst [smem:[#allocation21_spill]] %s9889_s12 }
  0x30   :  { %s9904_s24 = sld [smem:[%s11997_s0 + %s9717_s15]]   ;;  %s9721_s15 = smov 31  }
  0x31   :  { %s9909_s12 = sld [smem:[%s11997_s0 + %s9718_s22]]   ;;  %s9722_s22 = smov 32  }
  0x32   :  { %12102 = sst [smem:[#allocation22_spill]] %s9894_s4 }
  0x33   :  { %12103 = sst [smem:[#allocation23_spill]] %s9899_s30 }
  0x34   :  { %s9914_s4 = sld [smem:[%s11997_s0 + %s9719_s28]]   ;;  %s9723_s28 = smov 33  }
  0x35   :  { %s9919_s30 = sld [smem:[%s11997_s0 + %s9720_s7]]   ;;  %s9724_s7 = smov 34  }
  0x36   :  { %12104 = sst [smem:[#allocation24_spill]] %s9904_s24 }
  0x37   :  { %12105 = sst [smem:[#allocation25_spill]] %s9909_s12 }
  0x38   :  { %s9924_s24 = sld [smem:[%s11997_s0 + %s9721_s15]]   ;;  %s9725_s15 = smov 35  }
  0x39   :  { %s9929_s12 = sld [smem:[%s11997_s0 + %s9722_s22]]   ;;  %s9726_s22 = smov 36  }
  0x3a   :  { %12106 = sst [smem:[#allocation26_spill]] %s9914_s4 }
  0x3b   :  { %12107 = sst [smem:[#allocation27_spill]] %s9919_s30 }
  0x3c   :  { %s9934_s4 = sld [smem:[%s11997_s0 + %s9723_s28]]   ;;  %s9727_s28 = smov 37  }
  0x3d   :  { %s9939_s30 = sld [smem:[%s11997_s0 + %s9724_s7]]   ;;  %s9728_s7 = smov 38  }
  0x3e   :  { %12108 = sst [smem:[#allocation28_spill]] %s9924_s24 }
  0x3f   :  { %12109 = sst [smem:[#allocation29_spill]] %s9929_s12 }
  0x40   :  { %s9944_s24 = sld [smem:[%s11997_s0 + %s9725_s15]]   ;;  %s9729_s15 = smov 39  }
  0x41   :  { %s9949_s12 = sld [smem:[%s11997_s0 + %s9726_s22]]   ;;  %s9730_s22 = smov 40  }
  0x42   :  { %12110 = sst [smem:[#allocation30_spill]] %s9934_s4 }
  0x43   :  { %12111 = sst [smem:[#allocation31_spill]] %s9939_s30 }
  0x44   :  { %s9954_s4 = sld [smem:[%s11997_s0 + %s9727_s28]]   ;;  %s9731_s28 = smov 41  }
  0x45   :  { %s9959_s30 = sld [smem:[%s11997_s0 + %s9728_s7]]   ;;  %s9732_s7 = smov 42  }
  0x46   :  { %12112 = sst [smem:[#allocation32_spill]] %s9944_s24 }
  0x47   :  { %12113 = sst [smem:[#allocation33_spill]] %s9949_s12 }
  0x48   :  { %s9964_s24 = sld [smem:[%s11997_s0 + %s9729_s15]]   ;;  %s9733_s15 = smov 43  }
  0x49   :  { %s9969_s12 = sld [smem:[%s11997_s0 + %s9730_s22]]   ;;  %s9734_s22 = smov 44  }
  0x4a   :  { %12114 = sst [smem:[#allocation34_spill]] %s9954_s4 }
  0x4b   :  { %12115 = sst [smem:[#allocation35_spill]] %s9959_s30 }
  0x4c   :  { %s9974_s4 = sld [smem:[%s11997_s0 + %s9731_s28]]   ;;  %s9735_s28 = smov 45  }
  0x4d   :  { %s9979_s30 = sld [smem:[%s11997_s0 + %s9732_s7]]   ;;  %s9736_s7 = smov 46  }
  0x4e   :  { %12116 = sst [smem:[#allocation36_spill]] %s9964_s24 }
  0x4f   :  { %12117 = sst [smem:[#allocation37_spill]] %s9969_s12 }
  0x50   :  { %s9984_s24 = sld [smem:[%s11997_s0 + %s9733_s15]]   ;;  %s9737_s15 = smov 47  }
  0x51   :  { %s9989_s12 = sld [smem:[%s11997_s0 + %s9734_s22]]   ;;  %s9738_s22 = smov 48  }
  0x52   :  { %12118 = sst [smem:[#allocation38_spill]] %s9974_s4 }
  0x53   :  { %12119 = sst [smem:[#allocation39_spill]] %s9979_s30 }
  0x54   :  { %s9994_s4 = sld [smem:[%s11997_s0 + %s9735_s28]]   ;;  %s9739_s28 = smov 49  }
  0x55   :  { %s9999_s30 = sld [smem:[%s11997_s0 + %s9736_s7]]   ;;  %s9740_s7 = smov 50  }
  0x56   :  { %12120 = sst [smem:[#allocation40_spill]] %s9984_s24 }
  0x57   :  { %12121 = sst [smem:[#allocation41_spill]] %s9989_s12 }
  0x58   :  { %s10004_s24 = sld [smem:[%s11997_s0 + %s9737_s15]]   ;;  %s9741_s15 = smov 51  }
  0x59   :  { %s10009_s12 = sld [smem:[%s11997_s0 + %s9738_s22]]   ;;  %s9742_s22 = smov 52  }
  0x5a   :  { %12122 = sst [smem:[#allocation42_spill]] %s9994_s4 }
  0x5b   :  { %12123 = sst [smem:[#allocation43_spill]] %s9999_s30 }
  0x5c   :  { %s10014_s4 = sld [smem:[%s11997_s0 + %s9739_s28]]   ;;  %s10031_s28 = smov 0  }
  0x5d   :  { %s10019_s30 = sld [smem:[%s11997_s0 + %s9740_s7]]  }
  0x5e   :  { %12124 = sst [smem:[#allocation44_spill]] %s10004_s24 }
  0x5f   :  { %12125 = sst [smem:[#allocation45_spill]] %s10009_s12 }
  0x60   :  { %s10024_s24 = sld [smem:[%s11997_s0 + %s9741_s15]]  }
  0x61   :  { %s10029_s12 = sld [smem:[%s11997_s0 + %s9742_s22]]  }
  0x62 LB: > { %s12126_s9 = sld [smem:[#allocation3_spill]]  ;;  %s8580_s1 = sadd.s32 4294967295, %s9689_s28   ;;  %s9689_s28 = sphi %s10031_s28, %s116_s28  }
  0x63   : > { %s12127_s13 = sld [smem:[#allocation4_spill]]  ;;  %p8584_p0 = scmp.ge.s32.totalorder %s9689_s28, 1 }
  0x64   : > { %s12128_s19 = sld [smem:[#allocation9_spill]]  ;;  %p1420_p1 = scmp.lt.s32.totalorder %s9689_s28, 3 }
  0x65   : > { %s12129_s17 = sld [smem:[#allocation5_spill]] }
  0x66   : > { %s12130_s14 = sld [smem:[#allocation8_spill]]  ;;  %p1421_p2 = pnand %p8584_p0, %p1420_p1 }
  0x67   : > { %p1552_p3 = scmp.lt.s32.totalorder (!%p1421_p2), %s8580_s1, 1  ;;  %s12131_s5 = sld [smem:[#allocation2_spill]] (!%p1421_p2) }
  0x68   : > { %1424 = sbr.rel (%p1421_p2) target bundleno = 8942 (0x22ee), region = 220  ;;  %s12062_s7 = smov (!%p1421_p2), 17  }
  0x69   : > { %s12059_s10 = smov (!%p1421_p2), 16   ;;  %s12056_s11 = smov (!%p1421_p2), 15  }
  0x6a   : > { %s12053_s15 = smov (!%p1421_p2), 1   ;;  %s12132_s3 = sld [smem:[#allocation6_spill]] (!%p1421_p2) }
  0x6b   : > { %s12051_s16 = smov (!%p1421_p2), 127   ;;  %s12022_s18 = smov (!%p1421_p2), 113  }
  0x6c   : > { %s12133_s8 = sld [smem:[#allocation7_spill]] (!%p1421_p2)  ;;  %s12020_s22 = smov (!%p1421_p2), 112  }
  0x6d   : > { %v9743_v0 = vmov 0   ;;  %s12505_s1 = smov (!%p1552_p3, %s8580_s1), 1  ;;  %vm12074_vm0 = vcmask 1043456   ;;  %v9460_v4 = vld [vmem:[%s12130_s14] sm:$0xff]   ;;  %vm12073_vm1 = vcmask 64512   ;;  %v9461_v6 = vld [vmem:[%s12130_s14 + $0x8] sm:$0xff]   ;;  %v1574_v33 = vlaneseq }
  0x6e   : > { %1697 = vmatprep.mubr.bf16.mxu0 %v9743_v0  ;;  %9411 = vset.pattern.permute.xlu0 %v9743_v0  ;;  %s8973_s0 = sshll.u32 %s12505_s1, 3  ;;  %v9462_v7 = vld [vmem:[%s12130_s14 + $0x10] sm:$0xff]   ;;  %v9463_v8 = vld [vmem:[%s12130_s14 + $0x18] sm:$0xff]   ;;  %v9464_v9 = vld [vmem:[%s12130_s14 + $0x20] ss:$0 sps:$4 sm:$0xff]   ;;  %s12018_s23 = smov 111  }
  0x6f   : > { %1967 = vmatprep.mubr.bf16.mxu1 %v9743_v0  ;;  %9412 = vset.pattern.permute.xlu1 %v9743_v0  ;;  %s1556_s2 = scalar_lea.vmem %s12131_s5, %s8973_s0  ;;  %v10092_v36 = vand.u32 127, %v1574_v33  ;;  %vm12029_vm2 = vcmask 138240   ;;  %vm12028_vm3 = vcmask 121856   ;;  %vm12061_vm5 = vcmask 130048   ;;  %s12049_s26 = smov 9  }
  0x70   : > { %v1573_v1 = vld [vmem:[%s1556_s2] sm:$0xff]  ;;  %vm12030_vm9 = vcmask 7168   ;;  %vm12027_vm10 = vcmask 1039360   ;;  %vm12026_vm11 = vcmask 924672   ;;  %vm12025_vm12 = vcmask 916480   ;;  %s12047_s0 = smov 8  }
  0x71   : > { %v10047_v2 = vcombine.high %v1573_v1, %v1573_v1  ;;  %v8598_v3 = vcombine.low %v1573_v1, %v1573_v1  ;;  %v1870_v26 = vld [vmem:[%s12132_s3] sm:$0xff]  ;;  %v1576_v38 = vadd.s32 128, %v10092_v36  ;;  %v1581_v41 = vand.u32 15, %v10092_v36  ;;  %s12039_s2 = smov 7   ;;  %s12146_s6 = sld [smem:[#allocation12_spill]] }
  0x72   : > { %v2124_v31 = vld [vmem:[%s12133_s8] sm:$0xff]  ;;  %vm12024_vm13 = vcmask 908288   ;;  %vm12031_vm14 = vmmov 0   ;;  %vm12055_vm15 = vcmask 72704   ;;  %s12229_s3 = smov 9   ;;  %s12230_s5 = smov 8  }
  0x73   : > { %8600 = vmatprep.subr.msk.bf16.mxu0 %vm12074_vm0, %v10047_v2  ;;  %v10053_v5 = vsel %vm12074_vm0, %v8598_v3, 0  ;;  %v1588_v42 = vand.u32 15, %v1576_v38  ;;  %vm10096_vm4 = vcmp.ne.s32.totalorder %v1581_v41, 0  ;;  %vm10104_vm7 = vcmp.ne.s32.totalorder %v1581_v41, 15  ;;  %s12233_s8 = smov 121   ;;  %s12276_s14 = sld [smem:[#allocation29_spill]] }
  0x74   : > { %1680 = vmatpush1.bf16.msra.mxu0 %v10053_v5 }
  0x75   : > { %vm10100_vm6 = vcmp.ne.s32.totalorder %v1588_v42, 0  ;;  %vm10108_vm8 = vcmp.ne.s32.totalorder %v1588_v42, 15 }
  0x77   : > { %8601 = vmatmul.mubr.msk.bf16.vlgmr.msra.gmra.mxu0 %vm12073_vm1, %v9460_v4 }
  0x78   : > { %1707 = vmatprep.mubr.bf16.mxu0 %v9743_v0 }
  0x7f   : > { %8602 = vmatmul.mubr.msk.bf16.gmra.mxu0 %vm12073_vm1, %v9461_v6 }
  0x80   : > { %1717 = vmatprep.mubr.bf16.mxu0 %v9743_v0 }
  0x87   : > { %8603 = vmatmul.mubr.msk.bf16.gmra.mxu0 %vm12073_vm1, %v9462_v7 }
  0x88   : > { %1727 = vmatprep.mubr.bf16.mxu0 %v9743_v0 }
  0x8f   : > { %8604 = vmatmul.mubr.msk.bf16.gmra.mxu0 %vm12073_vm1, %v9463_v8 }
  0x90   : > { %1737 = vmatprep.mubr.bf16.mxu0 %v9743_v0 }
  0x97   : > { %8605 = vmatmul.mubr.msk.bf16.gmra.mxu0 %vm12073_vm1, %v9464_v9 }
 0x137   : > { %v1699_v10 = vpop.f32.mrf.mxu0 }
 0x138   : > { %1748 = vrot.lane.b32.xlu0 %v1699_v10, %s12062_s7 }
 0x139   : > { %v1701_v11 = vpop.f32.mrf.mxu0 }
 0x13b   : > { %v1703_v12 = vpop.f32.mrf.mxu0 }
 0x13c   : > { %1750 = vrot.lane.b32.xlu0 %v1701_v11, %s12062_s7  ;;  %1765 = vrot.lane.b32.xlu1 %v1703_v12, %s12059_s10 }
 0x13d   : > { %v1705_v13 = vpop.f32.mrf.mxu0 }
 0x13f   : > { %v1709_v14 = vpop.f32.mrf.mxu0 }
 0x140   : > { %1767 = vrot.lane.b32.xlu1 %v1705_v13, %s12059_s10  ;;  %1778 = vrot.lane.b32.xlu0 %v1709_v14, %s12056_s11 }
 0x141   : > { %v1711_v15 = vpop.f32.mrf.mxu0 }
 0x143   : > { %v1713_v16 = vpop.f32.mrf.mxu0 }
 0x144   : > { %1780 = vrot.lane.b32.xlu1 %v1711_v15, %s12056_s11  ;;  %1797 = vrot.lane.b32.xlu0 %v1713_v16, %s12053_s15 }
 0x145   : > { %v1715_v17 = vpop.f32.mrf.mxu0 }
 0x147   : > { %v10076_v18 = vpop.f32.mrf.mxu0 }
 0x148   : > { %1799 = vrot.lane.b32.xlu1 %v1715_v17, %s12053_s15 }
 0x149   : > { %v10079_v19 = vpop.f32.mrf.mxu0 }
 0x14b   : > { %v1723_v20 = vpop.f32.mrf.mxu0 }
 0x14c   : > { %1814 = vrot.lane.b32.xlu0 %v1723_v20, %s12051_s16 }
 0x14d   : > { %v1725_v21 = vpop.f32.mrf.mxu0 }
 0x14e   : > { %1816 = vrot.lane.b32.xlu1 %v1725_v21, %s12051_s16 }
 0x14f   : > { %v1729_v22 = vpop.f32.mrf.mxu0 }
 0x150   : > { %1829 = vrot.lane.b32.xlu0 %v1729_v22, %s12022_s18 }
 0x151   : > { %v1731_v23 = vpop.f32.mrf.mxu0 }
 0x152   : > { %1831 = vrot.lane.b32.xlu1 %v1731_v23, %s12022_s18 }
 0x153   : > { %v1733_v24 = vpop.f32.mrf.mxu0 }
 0x154   : > { %1844 = vrot.lane.b32.xlu0 %v1733_v24, %s12020_s22 }
 0x155   : > { %v1735_v25 = vpop.f32.mrf.mxu0 }
 0x156   : > { %1846 = vrot.lane.b32.xlu1 %v1735_v25, %s12020_s22 }
 0x157   : > { %v1739_v27 = vpop.f32.mrf.mxu0 }
 0x158   : > { %1873 = vperm.xlu0 %9411, %v1870_v26  }
 0x159   : > { %v1741_v28 = vpop.f32.mrf.mxu0 }
 0x15a   : > { %1857 = vrot.lane.b32.xlu1 %v1739_v27, %s12018_s23 }
 0x15b   : > { %v1743_v29 = vpop.f32.mrf.mxu0 }
 0x15d   : > { %v1744_v30 = vpop.f32.mrf.mxu0 }
 0x15e   : > { %1859 = vrot.lane.b32.xlu1 %v1741_v28, %s12018_s23 }
 0x162   : > { %2127 = vperm.xlu1 %9412, %v2124_v31  }
 0x1aa   : > { %v1749_v32 = vpop.permute.xlu0 %1748 }
 0x1ab   : > { %v1756_v49 = vsel %vm12029_vm2, 0.0, %v1749_v32 }
 0x1ac   : > { %v1761_v57 = vsel %vm10096_vm4, %v1756_v49, 0.0 }
 0x1ae   : > { %v1766_v34 = vpop.permute.xlu1 %1765  ;;  %v1751_v35 = vpop.permute.xlu0 %1750 }
 0x1af   : > { %v1753_v50 = vsel %vm12029_vm2, %v1749_v32, %v1751_v35  ;;  %v1773_v53 = vsel %vm12061_vm5, 0.0, %v1766_v34 }
 0x1b0   : > { %v1762_v58 = vsel %vm10100_vm6, %v1753_v50, 0.0  ;;  %v1774_v63 = vadd.f32 %v1773_v53, %v1761_v57  ;;  %v9468_v57 = vld [vmem:[%s12128_s19 + $0x18] sm:$0xff]  }
 0x1b2   : > { %v1768_v37 = vpop.permute.xlu1 %1767  ;;  %v1779_v39 = vpop.permute.xlu0 %1778 }
 0x1b3   : > { %v1786_v51 = vsel %vm12028_vm3, 0.0, %v1779_v39  ;;  %v1770_v54 = vsel %vm12061_vm5, %v1766_v34, %v1768_v37 }
 0x1b4   : > { %v1791_v59 = vsel %vm10104_vm7, %v1786_v51, 0.0  ;;  %v1775_v1 = vadd.f32 %v1770_v54, %v1762_v58  ;;  %v9465_v54 = vld [vmem:[%s12128_s19] sm:$0xff]  }
 0x1b5   : > { %v1793_v6 = vadd.f32 %v1791_v59, %v1774_v63  ;;  %v9469_v58 = vld [vmem:[%s12128_s19 + $0x20] ss:$0 sps:$4 sm:$0xff]  }
 0x1b6   : > { %v1781_v40 = vpop.permute.xlu1 %1780  ;;  %v1798_v47 = vpop.permute.xlu0 %1797 }
 0x1b7   : > { %v1783_v52 = vsel %vm12028_vm3, %v1779_v39, %v1781_v40  ;;  %v1805_v55 = vsel %vm12030_vm9, 0.0, %v1798_v47 }
 0x1b8   : > { %v1792_v60 = vsel %vm10108_vm8, %v1783_v52, 0.0  ;;  %v1806_v3 = vsel %vm10096_vm4, %v1805_v55, 0.0  ;;  %v9466_v55 = vld [vmem:[%s12128_s19 + $0x8] sm:$0xff]  }
 0x1b9   : > { %v1794_v7 = vadd.f32 %v1792_v60, %v1775_v1  ;;  %v1808_v9 = vadd.f32 %v1806_v3, %v1793_v6 }
 0x1ba   : > { %v1800_v48 = vpop.permute.xlu1 %1799 }
 0x1bb   : > { %v1802_v56 = vsel %vm12030_vm9, %v1798_v47, %v1800_v48  ;;  %v1810_v22 = vadd.f32 %v1808_v9, %v10076_v18 }
 0x1bc   : > { %v1807_v4 = vsel %vm10100_vm6, %v1802_v56, 0.0  ;;  %v9467_v56 = vld [vmem:[%s12128_s19 + $0x10] sm:$0xff]  }
 0x1bd   : > { %v1809_v10 = vadd.f32 %v1807_v4, %v1794_v7 }
 0x1be   : > { %v1815_v61 = vpop.permute.xlu0 %1814 }
 0x1bf   : > { %v1811_v21 = vadd.f32 %v1809_v10, %v10079_v19 }
 0x1c0   : > { %v1817_v62 = vpop.permute.xlu1 %1816 }
 0x1c1   : > { %v1819_v11 = vsel %vm12027_vm10, %v1815_v61, %v1817_v62  ;;  %v1822_v12 = vsel %vm12027_vm10, %v1817_v62, 0.0 }
 0x1c2   : > { %v1830_v13 = vpop.permute.xlu0 %1829  ;;  %v1823_v16 = vsel %vm10104_vm7, %v1819_v11, 0.0  ;;  %v1824_v17 = vsel %vm10108_vm8, %v1822_v12, 0.0 }
 0x1c3   : > { %v1825_v25 = vadd.f32 %v1823_v16, %v1810_v22  ;;  %v1826_v26 = vadd.f32 %v1824_v17, %v1811_v21  ;;  %v9471_v21 = vld [vmem:[%s12127_s13 + $0x38] sm:$0xff]   ;;  %v9472_v22 = vld [vmem:[%s12127_s13 + $0x70] sm:$0xff]  }
 0x1c4   : > { %v1832_v8 = vpop.permute.xlu1 %1831 }
 0x1c5   : > { %v1834_v14 = vsel %vm12026_vm11, %v1830_v13, %v1832_v8  ;;  %v1837_v15 = vsel %vm12026_vm11, %v1832_v8, 0.0 }
 0x1c6   : > { %v1838_v23 = vsel %vm10096_vm4, %v1834_v14, 0.0  ;;  %v1839_v24 = vsel %vm10100_vm6, %v1837_v15, 0.0  ;;  %v1845_v30 = vpop.permute.xlu0 %1844 }
 0x1c7   : > { %v1840_v28 = vadd.f32 %v1838_v23, %v1825_v25  ;;  %v1841_v29 = vadd.f32 %v1839_v24, %v1826_v26  ;;  %v9473_v23 = vld [vmem:[%s12127_s13 + $0x30] sm:$0xff]   ;;  %v9474_v24 = vld [vmem:[%s12127_s13 + $0x68] sm:$0xff]   ;;  %v9476_v26 = vld [vmem:[%s12127_s13 + $0x60] sm:$0xff]  }
 0x1c8   : > { %v1847_v20 = vpop.permute.xlu1 %1846  ;;  %v9475_v25 = vld [vmem:[%s12127_s13 + $0x28] sm:$0xff]  }
 0x1c9   : > { %v1849_v31 = vsel %vm12025_vm12, %v1845_v30, %v1847_v20  ;;  %v1852_v32 = vsel %vm12025_vm12, %v1847_v20, 0.0  ;;  %v9470_v20 = vld [vmem:[%s12127_s13 + $0x78] sm:$0xff]  }
 0x1ca   : > { %v1853_v18 = vadd.f32 %v1849_v31, %v1840_v28  ;;  %v1854_v34 = vadd.f32 %v1852_v32, %v1841_v29  ;;  %8977 = vmatprep.subr.bf16.mxu0 %v9470_v20  ;;  %v9478_v28 = vld [vmem:[%s12127_s13 + $0x58] sm:$0xff]  }
 0x1cb   : > { %8978 = vmatpush3.bf16.msra.mxu0 %v9471_v21  ;;  %v9479_v29 = vld [vmem:[%s12127_s13 + $0x18] sm:$0xff]  }
 0x1cc   : > { %v1858_v27 = vpop.permute.xlu1 %1857  ;;  %8979 = vmatprep.subr.bf16.mxu0 %v9472_v22 }
 0x1cf   : > { %8980 = vmatpush3.bf16.msra.mxu0 %v9473_v23 }
 0x1d0   : > { %v1860_v19 = vpop.permute.xlu1 %1859  ;;  %8981 = vmatprep.subr.bf16.mxu0 %v9474_v24 }
 0x1d1   : > { %v1862_v35 = vsel %vm12024_vm13, %v1858_v27, %v1860_v19  ;;  %v1865_v37 = vsel %vm12024_vm13, %v1860_v19, 0.0  ;;  %v9477_v27 = vld [vmem:[%s12127_s13 + $0x20] sm:$0xff]  }
 0x1d2   : > { %v1866_v38 = vsel %vm10104_vm7, %v1862_v35, 0.0  ;;  %v1867_v39 = vsel %vm10108_vm8, %v1865_v37, 0.0 }
 0x1d3   : > { %v1874_v40 = vpop.permute.xlu0 %1873  ;;  %v1869_v41 = vadd.f32 %v1867_v39, %v1854_v34  ;;  %v1868_v42 = vadd.f32 %v1866_v38, %v1853_v18  ;;  %8982 = vmatpush3.bf16.msra.mxu0 %v9475_v25 }
 0x1d4   : > { %8983 = vmatprep.subr.bf16.mxu0 %v9476_v26 }
 0x1d5   : > { %v1877_v47 = vadd.f32 %v1874_v40, %v1869_v41  ;;  %v1876_v48 = vadd.f32 %v1874_v40, %v1868_v42 }
 0x1d7   : > { %v1879_v49 = vmax.f32 %v1877_v47, 0.0  ;;  %v1878_v50 = vmax.f32 %v1876_v48, 0.0  ;;  %8984 = vmatpush3.bf16.msra.mxu0 %v9477_v27 }
 0x1d8   : > { %8985 = vmatprep.subr.bf16.mxu0 %v9478_v28 }
 0x1d9   : > { %v1881_v51 = vpack.c.bf16 %v1879_v49, %v1879_v49  ;;  %v1880_v52 = vpack.c.bf16 %v1878_v50, %v1878_v50 }
 0x1db   : > { %8611 = vmatprep.subr.msk.bf16.mxu1 %vm12074_vm0, %v1881_v51  ;;  %v1930_v53 = vsel %vm12074_vm0, %v1880_v52, 0  ;;  %8986 = vmatpush3.bf16.msra.mxu0 %v9479_v29 }
 0x1dc   : > { %1950 = vmatpush1.bf16.msra.mxu1 %v1930_v53 }
 0x1dd   : > { %v10200_v30 = vpop.permute.xlu1 %2127 }
 0x1df   : > { %8612 = vmatmul.mubr.msk.bf16.vlgmr.msra.gmra.mxu1 %vm12073_vm1, %v9465_v54 }
 0x1e0   : > { %1977 = vmatprep.mubr.bf16.mxu1 %v9743_v0 }
 0x1e7   : > { %8613 = vmatmul.mubr.msk.bf16.gmra.mxu1 %vm12073_vm1, %v9466_v55 }
 0x1e8   : > { %1987 = vmatprep.mubr.bf16.mxu1 %v9743_v0 }
 0x1ef   : > { %8614 = vmatmul.mubr.msk.bf16.gmra.mxu1 %vm12073_vm1, %v9467_v56 }
 0x1f0   : > { %1997 = vmatprep.mubr.bf16.mxu1 %v9743_v0 }
 0x1f7   : > { %8615 = vmatmul.mubr.msk.bf16.gmra.mxu1 %vm12073_vm1, %v9468_v57 }
 0x1f8   : > { %2007 = vmatprep.mubr.bf16.mxu1 %v9743_v0 }
 0x1ff   : > { %8616 = vmatmul.mubr.msk.bf16.gmra.mxu1 %vm12073_vm1, %v9469_v58 }
 0x29f   : > { %v1969_v59 = vpop.f32.mrf.mxu1 }
 0x2a0   : > { %2018 = vrot.lane.b32.xlu0 %v1969_v59, %s12062_s7 }
 0x2a1   : > { %v1971_v60 = vpop.f32.mrf.mxu1 }
 0x2a2   : > { %2020 = vrot.lane.b32.xlu1 %v1971_v60, %s12062_s7 }
 0x2a3   : > { %v1973_v61 = vpop.f32.mrf.mxu1 }
 0x2a4   : > { %2030 = vrot.lane.b32.xlu0 %v1973_v61, %s12059_s10 }
 0x2a5   : > { %v1975_v62 = vpop.f32.mrf.mxu1 }
 0x2a6   : > { %2032 = vrot.lane.b32.xlu1 %v1975_v62, %s12059_s10 }
 0x2a7   : > { %v1979_v63 = vpop.f32.mrf.mxu1 }
 0x2a8   : > { %2042 = vrot.lane.b32.xlu0 %v1979_v63, %s12056_s11 }
 0x2a9   : > { %v1981_v1 = vpop.f32.mrf.mxu1 }
 0x2aa   : > { %2044 = vrot.lane.b32.xlu1 %v1981_v1, %s12056_s11 }
 0x2ab   : > { %v1983_v3 = vpop.f32.mrf.mxu1 }
 0x2ac   : > { %2056 = vrot.lane.b32.xlu0 %v1983_v3, %s12053_s15 }
 0x2ad   : > { %v1985_v4 = vpop.f32.mrf.mxu1 }
 0x2ae   : > { %2058 = vrot.lane.b32.xlu1 %v1985_v4, %s12053_s15 }
 0x2af   : > { %v10178_v6 = vpop.f32.mrf.mxu1 }
 0x2b1   : > { %v10180_v7 = vpop.f32.mrf.mxu1 }
 0x2b3   : > { %v1993_v8 = vpop.f32.mrf.mxu1 }
 0x2b4   : > { %2072 = vrot.lane.b32.xlu1 %v1993_v8, %s12051_s16 }
 0x2b5   : > { %v1995_v9 = vpop.f32.mrf.mxu1 }
 0x2b6   : > { %2074 = vrot.lane.b32.xlu0 %v1995_v9, %s12051_s16 }
 0x2b7   : > { %v1999_v10 = vpop.f32.mrf.mxu1 }
 0x2b8   : > { %2086 = vrot.lane.b32.xlu1 %v1999_v10, %s12022_s18 }
 0x2b9   : > { %v2001_v11 = vpop.f32.mrf.mxu1 }
 0x2ba   : > { %2088 = vrot.lane.b32.xlu0 %v2001_v11, %s12022_s18  ;;  %s12033_s18 = smov 119  }
 0x2bb   : > { %v2003_v12 = vpop.f32.mrf.mxu1 }
 0x2bd   : > { %v2005_v13 = vpop.f32.mrf.mxu1 }
 0x2be   : > { %2100 = vrot.lane.b32.xlu0 %v2003_v12, %s12020_s22 }
 0x2bf   : > { %v2009_v14 = vpop.f32.mrf.mxu1 }
 0x2c1   : > { %v2011_v15 = vpop.f32.mrf.mxu1 }
 0x2c2   : > { %2102 = vrot.lane.b32.xlu0 %v2005_v13, %s12020_s22  ;;  %2114 = vrot.lane.b32.xlu1 %v2011_v15, %s12018_s23 }
 0x2c3   : > { %v2013_v16 = vpop.f32.mrf.mxu1 }
 0x2c5   : > { %v2014_v17 = vpop.f32.mrf.mxu1 }
 0x2c6   : > { %2112 = vrot.lane.b32.xlu0 %v2009_v14, %s12018_s23 }
 0x312   : > { %v2019_v31 = vpop.permute.xlu0 %2018 }
 0x313   : > { %v2025_v47 = vsel %vm12029_vm2, 0.0, %v2019_v31 }
 0x314   : > { %v2021_v32 = vpop.permute.xlu1 %2020  ;;  %v2026_v56 = vsel %vm10096_vm4, %v2025_v47, 0.0 }
 0x315   : > { %v2022_v38 = vsel %vm12029_vm2, %v2019_v31, %v2021_v32  ;;  %vm12043_vm2 = vcmask 457728  }
 0x316   : > { %v2031_v19 = vpop.permute.xlu0 %2030  ;;  %v2027_v48 = vsel %vm10100_vm6, %v2022_v38, 0.0 }
 0x317   : > { %v2037_v51 = vsel %vm12061_vm5, 0.0, %v2031_v19 }
 0x318   : > { %v2033_v18 = vpop.permute.xlu1 %2032  ;;  %v2038_v60 = vadd.f32 %v2037_v51, %v2026_v56  ;;  %v9484_v51 = vld [vmem:[%s12127_s13 + $0x40] sm:$0xff]  }
 0x319   : > { %v2034_v41 = vsel %vm12061_vm5, %v2031_v19, %v2033_v18 }
 0x31a   : > { %v2043_v35 = vpop.permute.xlu0 %2042  ;;  %v2039_v52 = vadd.f32 %v2034_v41, %v2027_v48 }
 0x31b   : > { %v2049_v49 = vsel %vm12028_vm3, 0.0, %v2043_v35 }
 0x31c   : > { %v2045_v34 = vpop.permute.xlu1 %2044  ;;  %v2050_v57 = vsel %vm10104_vm7, %v2049_v49, 0.0  ;;  %v9483_v49 = vld [vmem:[%s12127_s13 + $0x8] sm:$0xff]  }
 0x31d   : > { %v2046_v39 = vsel %vm12028_vm3, %v2043_v35, %v2045_v34  ;;  %v2052_v3 = vadd.f32 %v2050_v57, %v2038_v60  ;;  %vm12044_vm3 = vcmask 465920  }
 0x31e   : > { %v2057_v40 = vpop.permute.xlu0 %2056  ;;  %v2051_v50 = vsel %vm10108_vm8, %v2046_v39, 0.0  ;;  %v9481_v39 = vld [vmem:[%s12127_s13 + $0x10] sm:$0xff]  }
 0x31f   : > { %v2063_v54 = vsel %vm12030_vm9, 0.0, %v2057_v40  ;;  %v2053_v58 = vadd.f32 %v2051_v50, %v2039_v52  ;;  %v9485_v52 = vld [vmem:[%s12127_s13] sm:$0xff]  }
 0x320   : > { %v2059_v37 = vpop.permute.xlu1 %2058  ;;  %v2064_v61 = vsel %vm10096_vm4, %v2063_v54, 0.0  ;;  %v2672_v54 = vld [vmem:[%s12129_s17 + $0x8] sm:$0xff] }
 0x321   : > { %v2060_v42 = vsel %vm12030_vm9, %v2057_v40, %v2059_v37  ;;  %v2066_v8 = vadd.f32 %v2064_v61, %v2052_v3  ;;  %v9480_v37 = vld [vmem:[%s12127_s13 + $0x50] sm:$0xff]  }
 0x322   : > { %v2065_v55 = vsel %vm10100_vm6, %v2060_v42, 0.0  ;;  %8987 = vmatprep.subr.bf16.mxu0 %v9480_v37  ;;  %v9482_v42 = vld [vmem:[%s12127_s13 + $0x48] sm:$0xff]  }
 0x323   : > { %v2067_v62 = vadd.f32 %v2065_v55, %v2053_v58  ;;  %v2068_v20 = vadd.f32 %v2066_v8, %v10178_v6  ;;  %8988 = vmatpush3.bf16.msra.mxu0 %v9481_v39 }
 0x324   : > { %8989 = vmatprep.subr.bf16.mxu0 %v9482_v42 }
 0x325   : > { %v2069_v11 = vadd.f32 %v2067_v62, %v10180_v7 }
 0x326   : > { %v2073_v59 = vpop.permute.xlu1 %2072 }
 0x327   : > { %8990 = vmatpush3.bf16.msra.mxu0 %v9483_v49 }
 0x328   : > { %v2075_v53 = vpop.permute.xlu0 %2074  ;;  %8991 = vmatprep.subr.bf16.mxu0 %v9484_v51 }
 0x329   : > { %v2079_v63 = vsel %vm12027_vm10, %v2075_v53, 0.0  ;;  %v2076_v9 = vsel %vm12027_vm10, %v2073_v59, %v2075_v53  ;;  %v2671_v53 = vld [vmem:[%s12129_s17] sm:$0xff]  ;;  %s12310_s17 = sld [smem:[#allocation35_spill]] }
 0x32a   : > { %v2081_v10 = vsel %vm10108_vm8, %v2079_v63, 0.0  ;;  %v2087_v12 = vpop.permute.xlu1 %2086  ;;  %v2080_v16 = vsel %vm10104_vm7, %v2076_v9, 0.0 }
 0x32b   : > { %v2083_v17 = vadd.f32 %v2081_v10, %v2069_v11  ;;  %v2082_v24 = vadd.f32 %v2080_v16, %v2068_v20  ;;  %8992 = vmatpush3.bf16.msra.mxu0 %v9485_v52 }
 0x32c   : > { %v2089_v1 = vpop.permute.xlu0 %2088 }
 0x32d   : > { %v2093_v4 = vsel %vm12026_vm11, %v2089_v1, 0.0  ;;  %v2090_v14 = vsel %vm12026_vm11, %v2087_v12, %v2089_v1 }
 0x32e   : > { %v2095_v15 = vsel %vm10100_vm6, %v2093_v4, 0.0  ;;  %v2094_v21 = vsel %vm10096_vm4, %v2090_v14, 0.0 }
 0x32f   : > { %v2097_v22 = vadd.f32 %v2095_v15, %v2083_v17  ;;  %v2096_v29 = vadd.f32 %v2094_v21, %v2082_v24  ;;  %v9752_v21 = vmov 0.0  }
 0x330   : > { %v2101_v13 = vpop.permute.xlu0 %2100  ;;  %9103 = vmatprep.subr.bf16.mxu1 %v9752_v21  ;;  %9141 = vmatprep.subr.bf16.mxu0 %v9752_v21 }
 0x331   : > { %9105 = vmatprep.mubr.msk.bf16.mxu1 %vm12031_vm14, %v9752_v21 }
 0x334   : > { %v2103_v23 = vpop.permute.xlu0 %2102  ;;  %v2115_v7 = vpop.permute.xlu1 %2114 }
 0x335   : > { %v2107_v25 = vsel %vm12025_vm12, %v2103_v23, 0.0  ;;  %v2119_v26 = vsel %vm12024_vm13, %v2115_v7, 0.0  ;;  %v2104_v27 = vsel %vm12025_vm12, %v2101_v13, %v2103_v23 }
 0x336   : > { %v2109_v28 = vadd.f32 %v2107_v25, %v2097_v22  ;;  %v2121_v6 = vsel %vm10108_vm8, %v2119_v26, 0.0  ;;  %v2108_v19 = vadd.f32 %v2104_v27, %v2096_v29  ;;  %v9488_v29 = vld [vmem:[%s9794_s25 + $0x10] sm:$0xff]  }
 0x338   : > { %v2123_v31 = vadd.f32 %v2121_v6, %v2109_v28  ;;  %v2113_v32 = vpop.permute.xlu0 %2112  ;;  %v9486_v28 = vld [vmem:[%s9794_s25] sm:$0xff]   ;;  %v9487_v6 = vld [vmem:[%s9794_s25 + $0x8] sm:$0xff]  }
 0x339   : > { %v2116_v18 = vsel %vm12024_vm13, %v2113_v32, %v2115_v7  ;;  %v9490_v32 = vld [vmem:[%s9794_s25 + $0x20] sm:$0xff]  }
 0x33a   : > { %v2131_v34 = vadd.f32 %v10200_v30, %v2123_v31  ;;  %v2120_v35 = vsel %vm10104_vm7, %v2116_v18, 0.0  ;;  %v9489_v31 = vld [vmem:[%s9794_s25 + $0x18] sm:$0xff]   ;;  %v9492_v18 = vld [vmem:[%s9794_s25 + $0x30] sm:$0xff]  }
 0x33b   : > { %v2122_v38 = vadd.f32 %v2120_v35, %v2108_v19  ;;  %v9491_v19 = vld [vmem:[%s9794_s25 + $0x28] sm:$0xff]   ;;  %v9494_v35 = vld [vmem:[%s9794_s25 + $0x40] sm:$0xff]  }
 0x33c   : > { %v10247_v40 = vmax.f32 %v2131_v34, 0.0  ;;  %v9493_v34 = vld [vmem:[%s9794_s25 + $0x38] sm:$0xff]  }
 0x33d   : > { %v2130_v41 = vadd.f32 %v10200_v30, %v2122_v38 }
 0x33e   : > { %v2135_v47 = vpack.c.bf16 %v10247_v40, %v10247_v40 }
 0x33f   : > { %v10253_v48 = vmax.f32 %v2130_v41, 0.0 }
 0x341   : > { %v2134_v50 = vpack.c.bf16 %v10253_v48, %v10253_v48  ;;  %v9418_v30 = vpack.i.bf16 %v10253_v48, %v10247_v40 }
 0x343   : > { %9419 = vrot.lane.b32.xlu0 %v9418_v30, %s12020_s22  ;;  %9414 = vrot.lane.b32.xlu1 %v9418_v30, %s12051_s16  ;;  %s12035_s22 = smov 120  }
 0x347   : > { %2675 = vperm.xlu0 %9411, %v2671_v53   ;;  %9424 = vrot.lane.b32.xlu1 %v9418_v30, %s12018_s23  ;;  %s12037_s23 = smov 121  }
 0x34b   : > { %2680 = vperm.xlu1 %9412, %v2672_v54  }
 0x3b5   : > { %v9420_v55 = vpop.permute.xlu0 %9419  ;;  %v9415_v56 = vpop.permute.xlu1 %9414 }
 0x3b6   : > { %v9417_v57 = vunpack.i.h.bf16 %v9415_v56  ;;  %v9416_v58 = vunpack.i.l.bf16 %v9415_v56  ;;  %v9422_v59 = vunpack.i.h.bf16 %v9420_v55  ;;  %v9421_v60 = vunpack.i.l.bf16 %v9420_v55 }
 0x3b8   : > { %v2144_v62 = vsel %vm12027_vm10, %v9417_v57, %v9416_v58  ;;  %v2147_v63 = vsel %vm12027_vm10, %v9416_v58, 0.0  ;;  %v2154_v4 = vsel %vm12025_vm12, %v9422_v59, %v9421_v60  ;;  %v2157_v8 = vsel %vm12025_vm12, %v9421_v60, 0.0 }
 0x3b9   : > { %v9425_v61 = vpop.permute.xlu1 %9424  ;;  %v2148_v11 = vmax.f32 %v10253_v48, %v2144_v62  ;;  %v2149_v13 = vmax.f32 %v10247_v40, %v2147_v63  ;;  %vm12045_vm10 = vcmask 515072   ;;  %v9513_v40 = vld [vmem:[%s9799_s29 + $0x28] sm:$0xff]   ;;  %v9522_v48 = vld [vmem:[%s9844_s20 + $0x18] sm:$0xff]  }
 0x3ba   : > { %v9427_v1 = vunpack.i.h.bf16 %v9425_v61  ;;  %v9426_v3 = vunpack.i.l.bf16 %v9425_v61 }
 0x3bc   : > { %v2162_v9 = vsel %vm12024_vm13, %v9427_v1, %v9426_v3  ;;  %v2165_v10 = vsel %vm12024_vm13, %v9426_v3, 0.0  ;;  %vm12046_vm13 = vcmask 56320  }
 0x3bd   : > { %v2166_v12 = vmax.f32 %v2154_v4, %v2162_v9  ;;  %v2167_v14 = vmax.f32 %v2157_v8, %v2165_v10 }
 0x3bf   : > { %v2168_v15 = vmax.f32 %v2148_v11, %v2166_v12  ;;  %v2169_v16 = vmax.f32 %v2149_v13, %v2167_v14 }
 0x3c1   : > { %v2170_v17 = vpack.c.bf16 %v2168_v15, %v2168_v15  ;;  %v2171_v20 = vpack.c.bf16 %v2169_v16, %v2169_v16 }
 0x3c3   : > { %2332 = vmatprep.mubr.bf16.mxu0 %v2171_v20 }
 0x3c4   : > { %2333 = vmatmul.mubr.bf16.vlgmr.msra.gmra.mxu0 %v2170_v17 }
 0x3c5   : > { %9143 = vmatprep.mubr.msk.bf16.mxu0 %vm12031_vm14, %v9752_v21 }
 0x484   : > { %v8993_v22 = vpop.f32.mrf.mxu0 }
 0x486   : > { %v8994_v23 = vpop.f32.mrf.mxu0 }
 0x487   : > { %v8995_v7 = vadd.f32 %v8994_v23, %v8993_v22  ;;  %v2991_v22 = vld [vmem:[%s9789_s21] sm:$0xff] }
 0x488   : > { %v8996_v24 = vpop.f32.mrf.mxu0 }
 0x489   : > { %v2340_v25 = vpack.c.bf16 %v8995_v7, %v8995_v7  ;;  %v2992_v24 = vld [vmem:[%s9789_s21 + $0x8] sm:$0xff] }
 0x48a   : > { %v8997_v26 = vpop.f32.mrf.mxu0 }
 0x48b   : > { %v2446_v27 = vsel %vm12074_vm0, %v2340_v25, 0  ;;  %v10341_v25 = vpop.permute.xlu0 %2675  ;;  %v10343_v26 = vpop.permute.xlu1 %2680 }
 0x48c   : > { %9104 = vmatpush3.bf16.msra.mxu1 %v2446_v27 }
 0x48d   : > { %9331 = vmatprep.subr.bf16.mxu1 %v9752_v21 }
 0x48f   : > { %9106 = vmatmul.mubr.msk.bf16.vlgmr.msra.gmra.mxu1 %vm12073_vm1, %v9486_v28 }
 0x490   : > { %9109 = vmatprep.mubr.msk.bf16.mxu1 %vm12031_vm14, %v9752_v21 }
 0x497   : > { %9110 = vmatmul.mubr.msk.bf16.gmra.mxu1 %vm12073_vm1, %v9487_v6 }
 0x498   : > { %9113 = vmatprep.mubr.msk.bf16.mxu1 %vm12031_vm14, %v9752_v21 }
 0x49f   : > { %9114 = vmatmul.mubr.msk.bf16.gmra.mxu1 %vm12073_vm1, %v9488_v29 }
 0x4a0   : > { %9117 = vmatprep.mubr.msk.bf16.mxu1 %vm12031_vm14, %v9752_v21 }
 0x4a7   : > { %9118 = vmatmul.mubr.msk.bf16.gmra.mxu1 %vm12073_vm1, %v9489_v31 }
 0x4a8   : > { %9121 = vmatprep.mubr.msk.bf16.mxu1 %vm12031_vm14, %v9752_v21 }
 0x4af   : > { %9122 = vmatmul.mubr.msk.bf16.gmra.mxu1 %vm12073_vm1, %v9490_v32  ;;  %v2345_v32 = vand.u32 7, %v10092_v36 }
 0x4b0   : > { %9125 = vmatprep.mubr.msk.bf16.mxu1 %vm12031_vm14, %v9752_v21 }
 0x4b1   : > { %vm10346_vm12 = vcmp.ne.s32.totalorder %v2345_v32, 0  ;;  %vm10351_vm11 = vcmp.ne.s32.totalorder %v2345_v32, 7 }
 0x4b7   : > { %9126 = vmatmul.mubr.msk.bf16.gmra.mxu1 %vm12073_vm1, %v9491_v19 }
 0x4b8   : > { %9129 = vmatprep.mubr.msk.bf16.mxu1 %vm12031_vm14, %v9752_v21 }
 0x4bf   : > { %9130 = vmatmul.mubr.msk.bf16.gmra.mxu1 %vm12073_vm1, %v9492_v18 }
 0x4c0   : > { %9133 = vmatprep.mubr.msk.bf16.mxu1 %vm12031_vm14, %v9752_v21 }
 0x4c7   : > { %9134 = vmatmul.mubr.msk.bf16.gmra.mxu1 %vm12073_vm1, %v9493_v34 }
 0x4c8   : > { %9137 = vmatprep.mubr.msk.bf16.mxu1 %vm12031_vm14, %v9752_v21 }
 0x4cf   : > { %9138 = vmatmul.mubr.msk.bf16.gmra.mxu1 %vm12073_vm1, %v9494_v35 }
 0x4d0   : > { %9171 = vmatprep.mubr.msk.bf16.mxu1 %vm12031_vm14, %v9752_v21 }
 0x54f   : > { %v2482_v37 = vpop.f32.mrf.mxu1 }
 0x550   : > { %2555 = vrot.lane.b32.xlu0 %v2482_v37, %s12049_s26 }
 0x551   : > { %v9107_v38 = vpop.f32.mrf.mxu1 }
 0x553   : > { %v2485_v39 = vpop.f32.mrf.mxu1 }
 0x554   : > { %2557 = vrot.lane.b32.xlu1 %v2485_v39, %s12049_s26 }
 0x555   : > { %v9108_v41 = vpop.f32.mrf.mxu1 }
 0x557   : > { %v2490_v42 = vpop.f32.mrf.mxu1 }
 0x558   : > { %2570 = vrot.lane.b32.xlu0 %v2490_v42, %s12047_s0 }
 0x559   : > { %v9111_v49 = vpop.f32.mrf.mxu1 }
 0x55b   : > { %v2493_v51 = vpop.f32.mrf.mxu1 }
 0x55c   : > { %2572 = vrot.lane.b32.xlu1 %v2493_v51, %s12047_s0 }
 0x55d   : > { %v9112_v52 = vpop.f32.mrf.mxu1 }
 0x55f   : > { %v2498_v30 = vpop.f32.mrf.mxu1 }
 0x560   : > { %2582 = vrot.lane.b32.xlu0 %v2498_v30, %s12039_s2 }
 0x561   : > { %v9115_v53 = vpop.f32.mrf.mxu1 }
 0x563   : > { %v2501_v54 = vpop.f32.mrf.mxu1 }
 0x564   : > { %2584 = vrot.lane.b32.xlu1 %v2501_v54, %s12039_s2 }
 0x565   : > { %v9116_v55 = vpop.f32.mrf.mxu1 }
 0x567   : > { %v2506_v56 = vpop.f32.mrf.mxu1 }
 0x568   : > { %2599 = vrot.lane.b32.xlu0 %v2506_v56, %s12053_s15 }
 0x569   : > { %v9119_v57 = vpop.f32.mrf.mxu1 }
 0x56b   : > { %v2509_v58 = vpop.f32.mrf.mxu1 }
 0x56c   : > { %2601 = vrot.lane.b32.xlu1 %v2509_v58, %s12053_s15 }
 0x56d   : > { %v9120_v59 = vpop.f32.mrf.mxu1 }
 0x56f   : > { %v10327_v60 = vpop.f32.mrf.mxu1 }
 0x571   : > { %v9123_v61 = vpop.f32.mrf.mxu1 }
 0x573   : > { %v10329_v62 = vpop.f32.mrf.mxu1 }
 0x575   : > { %v9124_v63 = vpop.f32.mrf.mxu1 }
 0x577   : > { %v2522_v1 = vpop.f32.mrf.mxu1 }
 0x578   : > { %2615 = vrot.lane.b32.xlu0 %v2522_v1, %s12051_s16 }
 0x579   : > { %v9127_v3 = vpop.f32.mrf.mxu1 }
 0x57b   : > { %v2525_v4 = vpop.f32.mrf.mxu1 }
 0x57c   : > { %2617 = vrot.lane.b32.xlu1 %v2525_v4, %s12051_s16 }
 0x57d   : > { %v9128_v8 = vpop.f32.mrf.mxu1 }
 0x57f   : > { %v2530_v9 = vpop.f32.mrf.mxu1 }
 0x580   : > { %2630 = vrot.lane.b32.xlu0 %v2530_v9, %s12037_s23 }
 0x581   : > { %v9131_v10 = vpop.f32.mrf.mxu1 }
 0x583   : > { %v2533_v11 = vpop.f32.mrf.mxu1 }
 0x584   : > { %2632 = vrot.lane.b32.xlu1 %v2533_v11, %s12037_s23 }
 0x585   : > { %v9132_v12 = vpop.f32.mrf.mxu1 }
 0x587   : > { %v2538_v13 = vpop.f32.mrf.mxu1 }
 0x588   : > { %2645 = vrot.lane.b32.xlu0 %v2538_v13, %s12035_s22 }
 0x589   : > { %v9135_v14 = vpop.f32.mrf.mxu1 }
 0x58b   : > { %v2541_v15 = vpop.f32.mrf.mxu1 }
 0x58c   : > { %2647 = vrot.lane.b32.xlu1 %v2541_v15, %s12035_s22 }
 0x58d   : > { %v9136_v16 = vpop.f32.mrf.mxu1 }
 0x58f   : > { %v2546_v17 = vpop.f32.mrf.mxu1 }
 0x590   : > { %2658 = vrot.lane.b32.xlu0 %v2546_v17, %s12033_s18 }
 0x591   : > { %v9139_v20 = vpop.f32.mrf.mxu1 }
 0x593   : > { %v2549_v23 = vpop.f32.mrf.mxu1 }
 0x594   : > { %2995 = vperm.xlu0 %9411, %v2991_v22   ;;  %2660 = vrot.lane.b32.xlu1 %v2549_v23, %s12033_s18 }
 0x595   : > { %v9140_v7 = vpop.f32.mrf.mxu1 }
 0x598   : > { %3000 = vperm.xlu1 %9412, %v2992_v24  }
 0x5c2   : > { %v2556_v27 = vpop.permute.xlu0 %2555 }
 0x5c3   : > { %v2562_v35 = vsel %vm12055_vm15, 0.0, %v2556_v27 }
 0x5c4   : > { %v2566_v41 = vsel %vm10346_vm12, %v2562_v35, 0.0 }
 0x5c6   : > { %v2558_v28 = vpop.permute.xlu1 %2557 }
 0x5c7   : > { %v2563_v52 = vsel %vm12055_vm15, 0.0, %v2558_v28 }
 0x5c8   : > { %v2567_v58 = vsel %vm10346_vm12, %v2563_v52, 0.0 }
 0x5ca   : > { %v2571_v6 = vpop.permute.xlu0 %2570 }
 0x5cb   : > { %v2576_v39 = vsel %vm12073_vm1, 0.0, %v2571_v6 }
 0x5cc   : > { %v2578_v30 = vadd.f32 %v2576_v39, %v2566_v41 }
 0x5ce   : > { %v2573_v29 = vpop.permute.xlu1 %2572 }
 0x5cf   : > { %v2577_v54 = vsel %vm12073_vm1, 0.0, %v2573_v29 }
 0x5d0   : > { %v2579_v1 = vadd.f32 %v2577_v54, %v2567_v58  ;;  %v9506_v58 = vld [vmem:[%s12126_s9 + $0x14] ss:$8 sps:$4 sm:$0xff]  }
 0x5d2   : > { %v2583_v31 = vpop.permute.xlu0 %2582 }
 0x5d3   : > { %v2589_v38 = vsel %vm12046_vm13, 0.0, %v2583_v31 }
 0x5d4   : > { %v2593_v42 = vsel %vm10351_vm11, %v2589_v38, 0.0 }
 0x5d5   : > { %v2595_v56 = vadd.f32 %v2593_v42, %v2578_v30 }
 0x5d6   : > { %v2585_v19 = vpop.permute.xlu1 %2584 }
 0x5d7   : > { %v2590_v53 = vsel %vm12046_vm13, 0.0, %v2585_v19 }
 0x5d8   : > { %v2594_v59 = vsel %vm10351_vm11, %v2590_v53, 0.0  ;;  %v9498_v53 = vld [vmem:[%s12126_s9 + $0x34] ss:$8 sps:$4 sm:$0xff]  }
 0x5d9   : > { %v2596_v9 = vadd.f32 %v2594_v59, %v2579_v1  ;;  %v9503_v59 = vld [vmem:[%s9799_s29 + $0x8] sm:$0xff]  }
 0x5da   : > { %v2600_v18 = vpop.permute.xlu0 %2599  ;;  %v9509_v1 = vld [vmem:[%s12126_s9 + $0x4] ss:$8 sps:$4 sm:$0xff]  }
 0x5db   : > { %v2605_v36 = vsel %vm12030_vm9, 0.0, %v2600_v18 }
 0x5dc   : > { %v2607_v55 = vsel %vm10346_vm12, %v2605_v36, 0.0 }
 0x5dd   : > { %v2609_v3 = vadd.f32 %v2607_v55, %v2595_v56  ;;  %v9495_v55 = vld [vmem:[%s9799_s29] sm:$0xff]   ;;  %v9499_v56 = vld [vmem:[%s9799_s29 + $0x38] sm:$0xff]  }
 0x5de   : > { %v2602_v49 = vpop.permute.xlu1 %2601 }
 0x5df   : > { %v2606_v57 = vsel %vm12030_vm9, 0.0, %v2602_v49  ;;  %v2611_v14 = vadd.f32 %v2609_v3, %v10327_v60  ;;  %vm12042_vm9 = vcmask 449536   ;;  %v9507_v3 = vld [vmem:[%s12126_s9] ss:$8 sps:$4 sm:$0xff]  }
 0x5e0   : > { %v2608_v8 = vsel %vm10346_vm12, %v2606_v57, 0.0  ;;  %v9496_v57 = vld [vmem:[%s12126_s9 + $0x30] ss:$8 sps:$4 sm:$0xff]  }
 0x5e1   : > { %v2610_v13 = vadd.f32 %v2608_v8, %v2596_v9  ;;  %v9511_v8 = vld [vmem:[%s9799_s29 + $0x18] sm:$0xff]   ;;  %v9512_v9 = vld [vmem:[%s9799_s29 + $0x20] sm:$0xff]  }
 0x5e3   : > { %v2612_v24 = vadd.f32 %v2610_v13, %v10329_v62 }
 0x5ea   : > { %v2616_v51 = vpop.permute.xlu0 %2615 }
 0x5eb   : > { %v2622_v4 = vsel %vm12045_vm10, %v2616_v51, 0.0 }
 0x5ec   : > { %v2624_v11 = vsel %vm10351_vm11, %v2622_v4, 0.0  ;;  %v9510_v4 = vld [vmem:[%s9799_s29 + $0x10] sm:$0xff]  }
 0x5ed   : > { %v2626_v20 = vadd.f32 %v2624_v11, %v2611_v14 }
 0x5ee   : > { %v2618_v61 = vpop.permute.xlu1 %2617 }
 0x5ef   : > { %v2623_v15 = vsel %vm12045_vm10, %v2618_v61, 0.0  ;;  %v9514_v61 = vld [vmem:[%s9799_s29 + $0x40] sm:$0xff]  }
 0x5f0   : > { %v2625_v23 = vsel %vm10351_vm11, %v2623_v15, 0.0 }
 0x5f1   : > { %v2627_v29 = vadd.f32 %v2625_v23, %v2612_v24 }
 0x5f2   : > { %v2631_v63 = vpop.permute.xlu0 %2630 }
 0x5f3   : > { %v2637_v10 = vsel %vm12044_vm3, %v2631_v63, 0.0  ;;  %v9504_v63 = vld [vmem:[%s12126_s9 + $0x10] ss:$8 sps:$4 sm:$0xff]  }
 0x5f4   : > { %v2639_v17 = vsel %vm10346_vm12, %v2637_v10, 0.0 }
 0x5f5   : > { %v2641_v27 = vadd.f32 %v2639_v17, %v2626_v20 }
 0x5f6   : > { %v2633_v12 = vpop.permute.xlu1 %2632 }
 0x5f7   : > { %v2638_v22 = vsel %vm12044_vm3, %v2633_v12, 0.0 }
 0x5f8   : > { %v2640_v28 = vsel %vm10346_vm12, %v2638_v22, 0.0 }
 0x5f9   : > { %v2642_v35 = vadd.f32 %v2640_v28, %v2627_v29 }
 0x5fa   : > { %v2646_v16 = vpop.permute.xlu0 %2645 }
 0x5fb   : > { %v2652_v7 = vsel %vm12043_vm2, %v2646_v16, 0.0 }
 0x5fc   : > { %v2654_v31 = vadd.f32 %v2652_v7, %v2641_v27 }
 0x5fe   : > { %v2648_v60 = vpop.permute.xlu1 %2647 }
 0x5ff   : > { %v2653_v19 = vsel %vm12043_vm2, %v2648_v60, 0.0 }
 0x600   : > { %v2655_v39 = vadd.f32 %v2653_v19, %v2642_v35 }
 0x602   : > { %v2659_v6 = vpop.permute.xlu0 %2658 }
 0x603   : > { %v2665_v32 = vsel %vm12042_vm9, %v2659_v6, 0.0 }
 0x604   : > { %v2667_v18 = vsel %vm10351_vm11, %v2665_v32, 0.0 }
 0x605   : > { %v2669_v62 = vadd.f32 %v2667_v18, %v2654_v31 }
 0x606   : > { %v2661_v38 = vpop.permute.xlu1 %2660 }
 0x607   : > { %v2666_v36 = vsel %vm12042_vm9, %v2661_v38, 0.0  ;;  %v2683_v42 = vadd.f32 %v10341_v25, %v2669_v62  ;;  %v9502_v25 = vld [vmem:[%s12126_s9 + $0x24] ss:$8 sps:$4 sm:$0xff]  }
 0x608   : > { %v2668_v41 = vsel %vm10351_vm11, %v2666_v36, 0.0 }
 0x609   : > { %v2670_v49 = vadd.f32 %v2668_v41, %v2655_v39  ;;  %v2685_v52 = vmax.f32 %v2683_v42, 0.0 }
 0x60b   : > { %v2684_v51 = vadd.f32 %v10343_v26, %v2670_v49  ;;  %v9500_v26 = vld [vmem:[%s12126_s9 + $0x20] ss:$8 sps:$4 sm:$0xff]  }
 0x60d   : > { %v2686_v30 = vmax.f32 %v2684_v51, 0.0 }
 0x60f   : > { %v2687_v54 = vpack.c.bf16 %v2686_v30, %v2685_v52 }
 0x611   : > { %9142 = vmatpush3.bf16.msra.mxu0 %v2687_v54  ;;  %9332 = vmatpush3.bf16.msra.mxu1 %v2687_v54 }
 0x612   : > { %3068 = vmatprep.subr.bf16.mxu1 %v9498_v53 }
 0x614   : > { %9144 = vmatmul.mubr.msk.bf16.vlgmr.msra.gmra.mxu0 %vm12061_vm5, %v9495_v55  ;;  %9172 = vmatmul.mubr.msk.bf16.vlgmr.msra.gmra.mxu1 %vm12061_vm5, %v9499_v56  ;;  %v3475_v56 = vld [vmem:[%s12146_s6] sm:$0xff]  ;;  %s12231_s6 = smov 7  }
 0x615   : > { %3069 = vmatpush1.bf16.msra.mxu1 %v9496_v57  ;;  %9147 = vmatprep.mubr.msk.bf16.mxu0 %vm12031_vm14, %v9752_v21  ;;  %v2996_v57 = vpop.permute.xlu0 %2995 }
 0x616   : > { %3070 = vmatprep.subr.bf16.mxu1 %v9502_v25  ;;  %9175 = vmatprep.mubr.msk.bf16.mxu1 %vm12031_vm14, %v9752_v21  ;;  %v3001_v25 = vpop.permute.xlu1 %3000 }
 0x619   : > { %3071 = vmatpush1.bf16.msra.mxu1 %v9500_v26 }
 0x61a   : > { %3072 = vmatprep.subr.bf16.mxu1 %v9506_v58 }
 0x61c   : > { %9148 = vmatmul.mubr.msk.bf16.gmra.mxu0 %vm12061_vm5, %v9503_v59  ;;  %9176 = vmatmul.mubr.msk.bf16.gmra.mxu1 %vm12061_vm5, %v9514_v61 }
 0x61d   : > { %3073 = vmatpush1.bf16.msra.mxu1 %v9504_v63  ;;  %9151 = vmatprep.mubr.msk.bf16.mxu0 %vm12031_vm14, %v9752_v21 }
 0x61e   : > { %3074 = vmatprep.subr.bf16.mxu1 %v9509_v1  ;;  %3092 = vmatprep.mubr.bf16.mxu1 %v9743_v0 }
 0x621   : > { %3075 = vmatpush1.bf16.msra.mxu1 %v9507_v3 }
 0x622   : > { %8693 = vmatprep.subr.msk.bf16.mxu1 %vm12074_vm0, %v2135_v47  ;;  %v9515_v47 = vld [vmem:[%s9799_s29 + $0x30] sm:$0xff]  }
 0x624   : > { %9152 = vmatmul.mubr.msk.bf16.gmra.mxu0 %vm12061_vm5, %v9510_v4 }
 0x625   : > { %9155 = vmatprep.mubr.msk.bf16.mxu0 %vm12031_vm14, %v9752_v21 }
 0x62c   : > { %9156 = vmatmul.mubr.msk.bf16.gmra.mxu0 %vm12061_vm5, %v9511_v8 }
 0x62d   : > { %9159 = vmatprep.mubr.msk.bf16.mxu0 %vm12031_vm14, %v9752_v21 }
 0x634   : > { %9160 = vmatmul.mubr.msk.bf16.gmra.mxu0 %vm12061_vm5, %v9512_v9 }
 0x635   : > { %9163 = vmatprep.mubr.msk.bf16.mxu0 %vm12031_vm14, %v9752_v21 }
 0x63c   : > { %9164 = vmatmul.mubr.msk.bf16.gmra.mxu0 %vm12061_vm5, %v9513_v40 }
 0x63d   : > { %9167 = vmatprep.mubr.msk.bf16.mxu0 %vm12031_vm14, %v9752_v21  ;;  %vm12147_vm14 = vcmask 7168  }
 0x644   : > { %9168 = vmatmul.mubr.msk.bf16.gmra.mxu0 %vm12061_vm5, %v9515_v47 }
 0x645   : > { %3193 = vmatprep.mubr.bf16.mxu0 %v9743_v0 }
 0x6d4   : > { %v2812_v10 = vpop.f32.mrf.mxu0  ;;  %v2868_v11 = vpop.f32.mrf.mxu1 }
 0x6d5   : > { %2885 = vrot.lane.b32.xlu0 %v2812_v10, %s12049_s26 }
 0x6d6   : > { %v9145_v12 = vpop.f32.mrf.mxu0  ;;  %v9173_v13 = vpop.f32.mrf.mxu1 }
 0x6d8   : > { %v2815_v14 = vpop.f32.mrf.mxu0  ;;  %v2871_v15 = vpop.f32.mrf.mxu1 }
 0x6d9   : > { %2887 = vrot.lane.b32.xlu1 %v2815_v14, %s12049_s26  ;;  %2967 = vrot.lane.b32.xlu0 %v2868_v11, %s12035_s22  ;;  %s12168_s26 = sld [smem:[#allocation19_spill]] }
 0x6da   : > { %v9146_v16 = vpop.f32.mrf.mxu0  ;;  %v9174_v17 = vpop.f32.mrf.mxu1 }
 0x6dc   : > { %v2820_v20 = vpop.f32.mrf.mxu0  ;;  %v2876_v22 = vpop.f32.mrf.mxu1 }
 0x6dd   : > { %2897 = vrot.lane.b32.xlu0 %v2820_v20, %s12047_s0  ;;  %2969 = vrot.lane.b32.xlu1 %v2871_v15, %s12035_s22  ;;  %s12149_s22 = sld [smem:[#allocation13_spill]] }
 0x6de   : > { %v9149_v23 = vpop.f32.mrf.mxu0  ;;  %v9177_v7 = vpop.f32.mrf.mxu1 }
 0x6e0   : > { %v2823_v24 = vpop.f32.mrf.mxu0  ;;  %v2879_v27 = vpop.f32.mrf.mxu1 }
 0x6e1   : > { %2899 = vrot.lane.b32.xlu1 %v2823_v24, %s12047_s0  ;;  %s12167_s0 = sld [smem:[#allocation10_spill]] }
 0x6e2   : > { %v9150_v60 = vpop.f32.mrf.mxu0  ;;  %v9178_v28 = vpop.f32.mrf.mxu1 }
 0x6e4   : > { %v2828_v6 = vpop.f32.mrf.mxu0 }
 0x6e5   : > { %2909 = vrot.lane.b32.xlu0 %v2828_v6, %s12039_s2 }
 0x6e6   : > { %v9153_v29 = vpop.f32.mrf.mxu0 }
 0x6e8   : > { %v2831_v31 = vpop.f32.mrf.mxu0 }
 0x6e9   : > { %2911 = vrot.lane.b32.xlu1 %v2831_v31, %s12039_s2  ;;  %s12151_s2 = smov 111  }
 0x6ea   : > { %v9154_v32 = vpop.f32.mrf.mxu0 }
 0x6ec   : > { %v2836_v19 = vpop.f32.mrf.mxu0 }
 0x6ed   : > { %2923 = vrot.lane.b32.xlu0 %v2836_v19, %s12053_s15 }
 0x6ee   : > { %v9157_v18 = vpop.f32.mrf.mxu0 }
 0x6f0   : > { %v2839_v35 = vpop.f32.mrf.mxu0 }
 0x6f1   : > { %2925 = vrot.lane.b32.xlu1 %v2839_v35, %s12053_s15 }
 0x6f2   : > { %v9158_v62 = vpop.f32.mrf.mxu0 }
 0x6f4   : > { %v2844_v38 = vpop.f32.mrf.mxu0 }
 0x6f6   : > { %v9161_v39 = vpop.f32.mrf.mxu0 }
 0x6f8   : > { %v2847_v36 = vpop.f32.mrf.mxu0 }
 0x6fa   : > { %v9162_v41 = vpop.f32.mrf.mxu0 }
 0x6fc   : > { %v2852_v42 = vpop.f32.mrf.mxu0 }
 0x6fd   : > { %2939 = vrot.lane.b32.xlu0 %v2852_v42, %s12051_s16 }
 0x6fe   : > { %v9165_v49 = vpop.f32.mrf.mxu0 }
 0x700   : > { %v2855_v51 = vpop.f32.mrf.mxu0 }
 0x701   : > { %2941 = vrot.lane.b32.xlu1 %v2855_v51, %s12051_s16 }
 0x702   : > { %v9166_v52 = vpop.f32.mrf.mxu0 }
 0x704   : > { %v2860_v30 = vpop.f32.mrf.mxu0 }
 0x705   : > { %2953 = vrot.lane.b32.xlu0 %v2860_v30, %s12037_s23 }
 0x706   : > { %v9169_v53 = vpop.f32.mrf.mxu0 }
 0x708   : > { %v2863_v54 = vpop.f32.mrf.mxu0 }
 0x709   : > { %2955 = vrot.lane.b32.xlu1 %v2863_v54, %s12037_s23  ;;  %2979 = vrot.lane.b32.xlu0 %v2876_v22, %s12033_s18  ;;  %s12150_s23 = smov 112  }
 0x70a   : > { %v9170_v55 = vpop.f32.mrf.mxu0 }
 0x70d   : > { %3478 = vperm.xlu0 %9411, %v3475_v56   ;;  %2981 = vrot.lane.b32.xlu1 %v2879_v27, %s12033_s18  ;;  %s12148_s18 = smov 113  }
 0x747   : > { %v2886_v26 = vpop.permute.xlu0 %2885 }
 0x748   : > { %v2891_v9 = vsel %vm12055_vm15, 0.0, %v2886_v26 }
 0x749   : > { %v2893_v11 = vsel %vm10346_vm12, %v2891_v9, 0.0 }
 0x74b   : > { %v2888_v58 = vpop.permute.xlu1 %2887  ;;  %v2968_v59 = vpop.permute.xlu0 %2967 }
 0x74c   : > { %v2892_v14 = vsel %vm12055_vm15, 0.0, %v2888_v58  ;;  %v2973_v53 = vsel %vm12043_vm2, %v2968_v59, 0.0 }
 0x74d   : > { %v2894_v24 = vsel %vm10346_vm12, %v2892_v14, 0.0 }
 0x74f   : > { %v2970_v61 = vpop.permute.xlu1 %2969  ;;  %v2898_v63 = vpop.permute.xlu0 %2897 }
 0x750   : > { %v2903_v47 = vsel %vm12073_vm1, 0.0, %v2898_v63 }
 0x751   : > { %v2905_v15 = vadd.f32 %v2903_v47, %v2893_v11 }
 0x753   : > { %v2900_v1 = vpop.permute.xlu1 %2899 }
 0x754   : > { %v2904_v17 = vsel %vm12073_vm1, 0.0, %v2900_v1 }
 0x755   : > { %v2906_v60 = vadd.f32 %v2904_v17, %v2894_v24  ;;  %v9517_v24 = vld [vmem:[%s9849_s27] sm:$0xff]  }
 0x757   : > { %v2910_v3 = vpop.permute.xlu0 %2909 }
 0x758   : > { %v2915_v40 = vsel %vm12046_vm13, 0.0, %v2910_v3 }
 0x759   : > { %v2917_v12 = vsel %vm10351_vm11, %v2915_v40, 0.0 }
 0x75a   : > { %v2919_v23 = vadd.f32 %v2917_v12, %v2905_v15  ;;  %v9520_v15 = vld [vmem:[%s9844_s20 + $0x10] sm:$0xff]  }
 0x75b   : > { %v2912_v4 = vpop.permute.xlu1 %2911 }
 0x75c   : > { %v2916_v16 = vsel %vm12046_vm13, 0.0, %v2912_v4 }
 0x75d   : > { %v2918_v27 = vsel %vm10351_vm11, %v2916_v16, 0.0 }
 0x75e   : > { %v2920_v32 = vadd.f32 %v2918_v27, %v2906_v60  ;;  %v9519_v27 = vld [vmem:[%s9849_s27 + $0x8] sm:$0xff]   ;;  %v9521_v60 = vld [vmem:[%s9849_s27 + $0x10] sm:$0xff]  }
 0x75f   : > { %v2924_v8 = vpop.permute.xlu0 %2923 }
 0x760   : > { %v2929_v10 = vsel %vm12147_vm14, 0.0, %v2924_v8 }
 0x761   : > { %v2931_v20 = vsel %vm10346_vm12, %v2929_v10, 0.0 }
 0x762   : > { %v2933_v28 = vadd.f32 %v2931_v20, %v2919_v23 }
 0x763   : > { %v2926_v13 = vpop.permute.xlu1 %2925 }
 0x764   : > { %v2930_v7 = vsel %vm12147_vm14, 0.0, %v2926_v13  ;;  %v2935_v35 = vadd.f32 %v2933_v28, %v2844_v38  ;;  %vm12041_vm14 = vcmask 523264   ;;  %v9523_v28 = vld [vmem:[%s9849_s27 + $0x18] sm:$0xff]  }
 0x765   : > { %v2932_v29 = vsel %vm10346_vm12, %v2930_v7, 0.0 }
 0x766   : > { %v2934_v18 = vadd.f32 %v2932_v29, %v2920_v32 }
 0x768   : > { %v2936_v52 = vadd.f32 %v2934_v18, %v2847_v36  ;;  %v2974_v36 = vsel %vm12043_vm2, %v2970_v61, 0.0  ;;  %v3281_v61 = vsel %vm12074_vm0, %v2134_v50, 0  ;;  %v9524_v50 = vld [vmem:[%s9844_s20 + $0x20] ss:$0 sps:$4 sm:$0xff]   ;;  %vm12154_vm2 = vcmask 121856  }
 0x76f   : > { %v2940_v22 = vpop.permute.xlu0 %2939 }
 0x770   : > { %v2945_v6 = vsel %vm12045_vm10, %v2940_v22, 0.0 }
 0x771   : > { %v2947_v19 = vsel %vm10351_vm11, %v2945_v6, 0.0  ;;  %v9525_v6 = vld [vmem:[%s9849_s27 + $0x20] ss:$0 sps:$4 sm:$0xff]  }
 0x772   : > { %v2949_v41 = vadd.f32 %v2947_v19, %v2935_v35 }
 0x773   : > { %v2942_v31 = vpop.permute.xlu1 %2941 }
 0x774   : > { %v2946_v62 = vsel %vm12045_vm10, %v2942_v31, 0.0  ;;  %vm12156_vm10 = vcmask 7168  }
 0x775   : > { %v2948_v49 = vsel %vm10351_vm11, %v2946_v62, 0.0  ;;  %vm12157_vm13 = vmmov %vm12156_vm10 }
 0x776   : > { %v2950_v56 = vadd.f32 %v2948_v49, %v2936_v52 }
 0x777   : > { %v2954_v39 = vpop.permute.xlu0 %2953 }
 0x778   : > { %v2959_v42 = vsel %vm12044_vm3, %v2954_v39, 0.0 }
 0x779   : > { %v2961_v51 = vsel %vm10346_vm12, %v2959_v42, 0.0 }
 0x77a   : > { %v2963_v30 = vadd.f32 %v2961_v51, %v2949_v41 }
 0x77b   : > { %v2956_v54 = vpop.permute.xlu1 %2955  ;;  %v2980_v55 = vpop.permute.xlu0 %2979 }
 0x77c   : > { %v2960_v38 = vsel %vm12044_vm3, %v2956_v54, 0.0  ;;  %v2975_v26 = vadd.f32 %v2973_v53, %v2963_v30  ;;  %v2985_v58 = vsel %vm12042_vm9, %v2980_v55, 0.0  ;;  %vm12155_vm3 = vmmov %vm12154_vm2 }
 0x77d   : > { %v2962_v63 = vsel %vm10346_vm12, %v2960_v38, 0.0  ;;  %v2987_v1 = vsel %vm10351_vm11, %v2985_v58, 0.0 }
 0x77e   : > { %v2964_v3 = vadd.f32 %v2962_v63, %v2950_v56  ;;  %v2989_v4 = vadd.f32 %v2987_v1, %v2975_v26 }
 0x77f   : > { %v2982_v59 = vpop.permute.xlu1 %2981 }
 0x780   : > { %v2976_v8 = vadd.f32 %v2974_v36, %v2964_v3  ;;  %v2986_v9 = vsel %vm12042_vm9, %v2982_v59, 0.0  ;;  %v3003_v47 = vadd.f32 %v2996_v57, %v2989_v4  ;;  %v9516_v57 = vld [vmem:[%s9844_s20] sm:$0xff]  }
 0x781   : > { %v2988_v40 = vsel %vm10351_vm11, %v2986_v9, 0.0 }
 0x782   : > { %v2990_v10 = vadd.f32 %v2988_v40, %v2976_v8  ;;  %v3005_v12 = vmax.f32 %v3003_v47, 0.0 }
 0x784   : > { %v3004_v11 = vadd.f32 %v3001_v25, %v2990_v10  ;;  %v9518_v25 = vld [vmem:[%s9844_s20 + $0x8] sm:$0xff]  }
 0x786   : > { %v3006_v13 = vmax.f32 %v3004_v11, 0.0 }
 0x788   : > { %v3007_v14 = vpack.c.bf16 %v3006_v13, %v3005_v12 }
 0x78a   : > { %8677 = vmatmul.mubr.msk.bf16.vlgmr.msra.gmra.mxu1 %vm12041_vm14, %v3007_v14  ;;  %vm12152_vm14 = vcmask 138240  }
 0x78b   : > { %3301 = vmatpush1.bf16.msra.mxu1 %v3281_v61  ;;  %3318 = vmatprep.mubr.bf16.mxu1 %v9743_v0  ;;  %vm12153_vm9 = vmmov %vm12152_vm14 }
 0x792   : > { %8694 = vmatmul.mubr.msk.bf16.vlgmr.msra.gmra.mxu1 %vm12073_vm1, %v9516_v57 }
 0x793   : > { %3328 = vmatprep.mubr.bf16.mxu1 %v9743_v0 }
 0x79a   : > { %8695 = vmatmul.mubr.msk.bf16.gmra.mxu1 %vm12073_vm1, %v9518_v25 }
 0x79b   : > { %3338 = vmatprep.mubr.bf16.mxu1 %v9743_v0 }
 0x7a2   : > { %8696 = vmatmul.mubr.msk.bf16.gmra.mxu1 %vm12073_vm1, %v9520_v15 }
 0x7a3   : > { %3348 = vmatprep.mubr.bf16.mxu1 %v9743_v0 }
 0x7aa   : > { %8697 = vmatmul.mubr.msk.bf16.gmra.mxu1 %vm12073_vm1, %v9522_v48 }
 0x7ab   : > { %3358 = vmatprep.mubr.bf16.mxu1 %v9743_v0 }
 0x7b2   : > { %8698 = vmatmul.mubr.msk.bf16.gmra.mxu1 %vm12073_vm1, %v9524_v50 }
 0x7b3   : > { %3789 = vmatprep.mubr.bf16.mxu1 %v9743_v0 }
 0x84a   : > { %v3094_v16 = vpop.f32.mrf.mxu1 }
 0x84c   : > { %v3096_v17 = vpop.f32.mrf.mxu1 }
 0x84e   : > { %v3098_v20 = vpop.f32.mrf.mxu1 }
 0x84f   : > { %v3103_v7 = vpack.c.bf16 %v3098_v20, %v3094_v16 }
 0x850   : > { %v3100_v22 = vpop.f32.mrf.mxu1 }
 0x851   : > { %v3104_v23 = vpack.c.bf16 %v3100_v22, %v3096_v17 }
 0x852   : > { %v3320_v29 = vpop.f32.mrf.mxu1 }
 0x853   : > { %3175 = vmatprep.subr.bf16.mxu0 %v3104_v23 }
 0x854   : > { %3176 = vmatpush1.bf16.msra.mxu0 %v3103_v7  ;;  %v3322_v31 = vpop.f32.mrf.mxu1 }
 0x856   : > { %v3324_v32 = vpop.f32.mrf.mxu1 }
 0x857   : > { %8683 = vmatmul.mubr.msk.bf16.vlgmr.msra.gmra.mxu0 %vm12061_vm5, %v9517_v24 }
 0x858   : > { %3203 = vmatprep.mubr.bf16.mxu0 %v9743_v0  ;;  %v3326_v19 = vpop.f32.mrf.mxu1 }
 0x85a   : > { %v3330_v18 = vpop.f32.mrf.mxu1 }
 0x85c   : > { %v3332_v35 = vpop.f32.mrf.mxu1 }
 0x85e   : > { %v3334_v62 = vpop.f32.mrf.mxu1 }
 0x85f   : > { %8684 = vmatmul.mubr.msk.bf16.gmra.mxu0 %vm12061_vm5, %v9519_v27 }
 0x860   : > { %3213 = vmatprep.mubr.bf16.mxu0 %v9743_v0  ;;  %v3336_v39 = vpop.f32.mrf.mxu1 }
 0x862   : > { %v10537_v41 = vpop.f32.mrf.mxu1 }
 0x864   : > { %v10539_v42 = vpop.f32.mrf.mxu1 }
 0x866   : > { %v3344_v49 = vpop.f32.mrf.mxu1 }
 0x867   : > { %8685 = vmatmul.mubr.msk.bf16.gmra.mxu0 %vm12061_vm5, %v9521_v60 }
 0x868   : > { %3223 = vmatprep.mubr.bf16.mxu0 %v9743_v0  ;;  %v3346_v51 = vpop.f32.mrf.mxu1 }
 0x86a   : > { %v3350_v52 = vpop.f32.mrf.mxu1 }
 0x86c   : > { %v3352_v30 = vpop.f32.mrf.mxu1 }
 0x86e   : > { %v3354_v53 = vpop.f32.mrf.mxu1 }
 0x86f   : > { %8686 = vmatmul.mubr.msk.bf16.gmra.mxu0 %vm12061_vm5, %v9523_v28 }
 0x870   : > { %3233 = vmatprep.mubr.bf16.mxu0 %v9743_v0  ;;  %v3356_v54 = vpop.f32.mrf.mxu1 }
 0x872   : > { %v3360_v55 = vpop.f32.mrf.mxu1 }
 0x874   : > { %v3362_v56 = vpop.f32.mrf.mxu1 }
 0x876   : > { %v3364_v38 = vpop.f32.mrf.mxu1 }
 0x877   : > { %8687 = vmatmul.mubr.msk.bf16.gmra.mxu0 %vm12061_vm5, %v9525_v6 }
 0x878   : > { %3572 = vmatprep.mubr.bf16.mxu0 %v9743_v0  ;;  %v3365_v26 = vpop.f32.mrf.mxu1 }
 0x917   : > { %v3195_v58 = vpop.f32.mrf.mxu0 }
 0x918   : > { %v3321_v63 = vadd.f32 %v3320_v29, %v3195_v58 }
 0x919   : > { %v3197_v1 = vpop.f32.mrf.mxu0 }
 0x91a   : > { %v3323_v3 = vadd.f32 %v3322_v31, %v3197_v1  ;;  %3369 = vrot.lane.b32.xlu0 %v3321_v63, %s12062_s7 }
 0x91b   : > { %v3199_v4 = vpop.f32.mrf.mxu0 }
 0x91c   : > { %v3325_v36 = vadd.f32 %v3324_v32, %v3199_v4  ;;  %3371 = vrot.lane.b32.xlu1 %v3323_v3, %s12062_s7 }
 0x91d   : > { %v3201_v59 = vpop.f32.mrf.mxu0 }
 0x91e   : > { %v3327_v8 = vadd.f32 %v3326_v19, %v3201_v59  ;;  %3381 = vrot.lane.b32.xlu0 %v3325_v36, %s12059_s10  ;;  %v3729_v19 = vld [vmem:[%s12149_s22] sm:$0xff]  ;;  %s12164_s22 = sld [smem:[#allocation14_spill]] }
 0x91f   : > { %v3205_v9 = vpop.f32.mrf.mxu0 }
 0x920   : > { %v3331_v40 = vadd.f32 %v3330_v18, %v3205_v9  ;;  %3383 = vrot.lane.b32.xlu1 %v3327_v8, %s12059_s10  ;;  %v10562_v18 = vpop.permute.xlu0 %3478 }
 0x921   : > { %v3207_v47 = vpop.f32.mrf.mxu0 }
 0x922   : > { %v3333_v10 = vadd.f32 %v3332_v35, %v3207_v47  ;;  %3393 = vrot.lane.b32.xlu0 %v3331_v40, %s12056_s11 }
 0x923   : > { %v3209_v11 = vpop.f32.mrf.mxu0 }
 0x924   : > { %v3335_v12 = vadd.f32 %v3334_v62, %v3209_v11  ;;  %3395 = vrot.lane.b32.xlu1 %v3333_v10, %s12056_s11 }
 0x925   : > { %v3211_v13 = vpop.f32.mrf.mxu0 }
 0x926   : > { %v3337_v14 = vadd.f32 %v3336_v39, %v3211_v13  ;;  %3407 = vrot.lane.b32.xlu0 %v3335_v12, %s12053_s15 }
 0x927   : > { %v10548_v61 = vpop.f32.mrf.mxu0 }
 0x928   : > { %3409 = vrot.lane.b32.xlu1 %v3337_v14, %s12053_s15 }
 0x929   : > { %v10551_v57 = vpop.f32.mrf.mxu0 }
 0x92b   : > { %v3219_v25 = vpop.f32.mrf.mxu0 }
 0x92c   : > { %v3345_v15 = vadd.f32 %v3344_v49, %v3219_v25 }
 0x92d   : > { %v3221_v48 = vpop.f32.mrf.mxu0 }
 0x92e   : > { %v3347_v50 = vadd.f32 %v3346_v51, %v3221_v48  ;;  %3423 = vrot.lane.b32.xlu0 %v3345_v15, %s12051_s16 }
 0x92f   : > { %v3225_v16 = vpop.f32.mrf.mxu0 }
 0x930   : > { %v3351_v17 = vadd.f32 %v3350_v52, %v3225_v16  ;;  %3425 = vrot.lane.b32.xlu1 %v3347_v50, %s12051_s16  ;;  %v3341_v16 = vadd.f32 %v10537_v41, %v10548_v61 }
 0x931   : > { %v3227_v20 = vpop.f32.mrf.mxu0 }
 0x932   : > { %v3353_v22 = vadd.f32 %v3352_v30, %v3227_v20  ;;  %3437 = vrot.lane.b32.xlu0 %v3351_v17, %s12148_s18  ;;  %v3343_v17 = vadd.f32 %v10539_v42, %v10551_v57 }
 0x933   : > { %v3229_v23 = vpop.f32.mrf.mxu0 }
 0x934   : > { %v3355_v7 = vadd.f32 %v3354_v53, %v3229_v23  ;;  %3439 = vrot.lane.b32.xlu1 %v3353_v22, %s12148_s18 }
 0x935   : > { %v3231_v24 = vpop.f32.mrf.mxu0 }
 0x936   : > { %v3357_v27 = vadd.f32 %v3356_v54, %v3231_v24  ;;  %3451 = vrot.lane.b32.xlu0 %v3355_v7, %s12150_s23 }
 0x937   : > { %v3235_v60 = vpop.f32.mrf.mxu0 }
 0x938   : > { %3453 = vrot.lane.b32.xlu1 %v3357_v27, %s12150_s23  ;;  %v3361_v6 = vadd.f32 %v3360_v55, %v3235_v60 }
 0x939   : > { %v3237_v28 = vpop.f32.mrf.mxu0 }
 0x93a   : > { %v3363_v29 = vadd.f32 %v3362_v56, %v3237_v28 }
 0x93b   : > { %v3239_v31 = vpop.f32.mrf.mxu0 }
 0x93c   : > { %3463 = vrot.lane.b32.xlu1 %v3361_v6, %s12151_s2  ;;  %3465 = vrot.lane.b32.xlu0 %v3363_v29, %s12151_s2 }
 0x93d   : > { %v3240_v32 = vpop.f32.mrf.mxu0 }
 0x940   : > { %3732 = vperm.xlu1 %9412, %v3729_v19  }
 0x98c   : > { %v3370_v35 = vpop.permute.xlu0 %3369 }
 0x98d   : > { %v3376_v54 = vsel %vm12152_vm14, 0.0, %v3370_v35 }
 0x98e   : > { %v3372_v62 = vpop.permute.xlu1 %3371  ;;  %v3377_v3 = vsel %vm10096_vm4, %v3376_v54, 0.0 }
 0x98f   : > { %v3373_v55 = vsel %vm12153_vm9, %v3370_v35, %v3372_v62  ;;  %vm12160_vm9 = vcmask 924672  }
 0x990   : > { %v3382_v39 = vpop.permute.xlu0 %3381  ;;  %v3378_v4 = vsel %vm10100_vm6, %v3373_v55, 0.0 }
 0x991   : > { %v3388_v26 = vsel %vm12061_vm5, 0.0, %v3382_v39 }
 0x992   : > { %v3384_v49 = vpop.permute.xlu1 %3383  ;;  %v3389_v8 = vadd.f32 %v3388_v26, %v3377_v3 }
 0x993   : > { %v3385_v58 = vsel %vm12061_vm5, %v3382_v39, %v3384_v49 }
 0x994   : > { %v3394_v51 = vpop.permute.xlu0 %3393  ;;  %v3390_v9 = vadd.f32 %v3385_v58, %v3378_v4  ;;  %v9526_v4 = vld [vmem:[%s12164_s22] sm:$0xff]  }
 0x995   : > { %v3400_v56 = vsel %vm12154_vm2, 0.0, %v3394_v51  ;;  %vm12158_vm2 = vcmask 1039360  }
 0x996   : > { %v3396_v52 = vpop.permute.xlu1 %3395  ;;  %v3401_v36 = vsel %vm10104_vm7, %v3400_v56, 0.0 }
 0x997   : > { %v3397_v38 = vsel %vm12155_vm3, %v3394_v51, %v3396_v52  ;;  %v3403_v11 = vadd.f32 %v3401_v36, %v3389_v8  ;;  %vm12159_vm3 = vmmov %vm12158_vm2  ;;  %v9528_v36 = vld [vmem:[%s12164_s22 + $0x10] sm:$0xff]   ;;  %v9530_v8 = vld [vmem:[%s12164_s22 + $0x20] ss:$0 sps:$4 sm:$0xff]  }
 0x998   : > { %v3408_v30 = vpop.permute.xlu0 %3407  ;;  %v3402_v59 = vsel %vm10108_vm8, %v3397_v38, 0.0 }
 0x999   : > { %v3414_v63 = vsel %vm12156_vm10, 0.0, %v3408_v30  ;;  %v3404_v12 = vadd.f32 %v3402_v59, %v3390_v9  ;;  %vm12161_vm10 = vmmov %vm12160_vm9  ;;  %v9529_v59 = vld [vmem:[%s12164_s22 + $0x18] sm:$0xff]  }
 0x99a   : > { %v3410_v53 = vpop.permute.xlu1 %3409  ;;  %v3415_v40 = vsel %vm10096_vm4, %v3414_v63, 0.0 }
 0x99b   : > { %v3411_v1 = vsel %vm12157_vm13, %v3408_v30, %v3410_v53  ;;  %v3417_v14 = vadd.f32 %v3415_v40, %v3403_v11  ;;  %vm12162_vm13 = vcmask 916480  }
 0x99c   : > { %v3416_v47 = vsel %vm10100_vm6, %v3411_v1, 0.0  ;;  %vm12163_vm14 = vmmov %vm12162_vm13 }
 0x99d   : > { %v3418_v25 = vadd.f32 %v3416_v47, %v3404_v12  ;;  %v3419_v24 = vadd.f32 %v3417_v14, %v3341_v16 }
 0x99f   : > { %v3420_v7 = vadd.f32 %v3418_v25, %v3343_v17 }
 0x9a0   : > { %v3424_v10 = vpop.permute.xlu0 %3423 }
 0x9a2   : > { %v3426_v13 = vpop.permute.xlu1 %3425 }
 0x9a3   : > { %v3427_v15 = vsel %vm12158_vm2, %v3424_v10, %v3426_v13  ;;  %v3430_v48 = vsel %vm12159_vm3, %v3426_v13, 0.0  ;;  %vm12165_vm2 = vcmask 908288  }
 0x9a4   : > { %v3438_v50 = vpop.permute.xlu0 %3437  ;;  %v3431_v20 = vsel %vm10104_vm7, %v3427_v15, 0.0  ;;  %v3432_v22 = vsel %vm10108_vm8, %v3430_v48, 0.0  ;;  %vm12166_vm3 = vmmov %vm12165_vm2 }
 0x9a5   : > { %v3433_v42 = vadd.f32 %v3431_v20, %v3419_v24  ;;  %v3434_v61 = vadd.f32 %v3432_v22, %v3420_v7 }
 0x9a6   : > { %v3440_v23 = vpop.permute.xlu1 %3439 }
 0x9a7   : > { %v3441_v27 = vsel %vm12160_vm9, %v3438_v50, %v3440_v23  ;;  %v3444_v60 = vsel %vm12161_vm10, %v3440_v23, 0.0  ;;  %vm12169_vm9 = vcmask 138240  }
 0x9a8   : > { %v3445_v28 = vsel %vm10096_vm4, %v3441_v27, 0.0  ;;  %v3446_v41 = vsel %vm10100_vm6, %v3444_v60, 0.0  ;;  %v3452_v57 = vpop.permute.xlu0 %3451  ;;  %v3742_v27 = vld [vmem:[%s12167_s0] sm:$0xff]  ;;  %vm12170_vm10 = vmmov %vm12169_vm9  ;;  %s12184_s0 = sld [smem:[#allocation21_spill]] }
 0x9a9   : > { %v3447_v29 = vadd.f32 %v3445_v28, %v3433_v42  ;;  %v3448_v31 = vadd.f32 %v3446_v41, %v3434_v61  ;;  %v4191_v60 = vld [vmem:[%s12168_s26] sm:$0xff]  ;;  %s12182_s26 = sld [smem:[#allocation11_spill]] }
 0x9aa   : > { %v3454_v6 = vpop.permute.xlu1 %3453 }
 0x9ab   : > { %v3455_v32 = vsel %vm12162_vm13, %v3452_v57, %v3454_v6  ;;  %v3458_v19 = vsel %vm12163_vm14, %v3454_v6, 0.0  ;;  %vm12171_vm13 = vcmask 121856  }
 0x9ac   : > { %v3459_v39 = vadd.f32 %v3455_v32, %v3447_v29  ;;  %v3460_v49 = vadd.f32 %v3458_v19, %v3448_v31  ;;  %vm12172_vm14 = vmmov %vm12171_vm13 }
 0x9ae   : > { %v3464_v35 = vpop.permute.xlu1 %3463  ;;  %v3466_v62 = vpop.permute.xlu0 %3465 }
 0x9af   : > { %v3467_v51 = vsel %vm12165_vm2, %v3464_v35, %v3466_v62  ;;  %v3470_v52 = vsel %vm12166_vm3, %v3466_v62, 0.0  ;;  %vm12173_vm2 = vcmask 7168  }
 0x9b0   : > { %v3471_v30 = vsel %vm10104_vm7, %v3467_v51, 0.0  ;;  %v3472_v53 = vsel %vm10108_vm8, %v3470_v52, 0.0  ;;  %vm12174_vm3 = vmmov %vm12173_vm2 }
 0x9b1   : > { %v3473_v54 = vadd.f32 %v3471_v30, %v3459_v39  ;;  %v3474_v55 = vadd.f32 %v3472_v53, %v3460_v49 }
 0x9b3   : > { %v3482_v56 = vadd.f32 %v10562_v18, %v3474_v55  ;;  %v3481_v38 = vadd.f32 %v10562_v18, %v3473_v54  ;;  %v9527_v18 = vld [vmem:[%s12164_s22 + $0x8] sm:$0xff]  }
 0x9b5   : > { %v3484_v26 = vmax.f32 %v3482_v56, 0.0  ;;  %v3483_v58 = vmax.f32 %v3481_v38, 0.0 }
 0x9b7   : > { %v3486_v63 = vpack.c.bf16 %v3484_v26, %v3484_v26  ;;  %v3485_v1 = vpack.c.bf16 %v3483_v58, %v3483_v58 }
 0x9b9   : > { %8704 = vmatprep.subr.msk.bf16.mxu0 %vm12074_vm0, %v3486_v63  ;;  %v3535_v3 = vsel %vm12074_vm0, %v3485_v1, 0 }
 0x9ba   : > { %3555 = vmatpush1.bf16.msra.mxu0 %v3535_v3 }
 0x9bb   : > { %8729 = vmatprep.subr.msk.bf16.mxu0 %vm12074_vm0, %v10047_v2  ;;  %v3733_v41 = vpop.permute.xlu1 %3732 }
 0x9bd   : > { %8705 = vmatmul.mubr.msk.bf16.vlgmr.msra.gmra.mxu0 %vm12073_vm1, %v9526_v4 }
 0x9be   : > { %3582 = vmatprep.mubr.bf16.mxu0 %v9743_v0  ;;  %4017 = vmatpush1.bf16.msra.mxu0 %v10053_v5 }
 0x9c5   : > { %8706 = vmatmul.mubr.msk.bf16.gmra.mxu0 %vm12073_vm1, %v9527_v18 }
 0x9c6   : > { %3592 = vmatprep.mubr.bf16.mxu0 %v9743_v0 }
 0x9cd   : > { %8707 = vmatmul.mubr.msk.bf16.gmra.mxu0 %vm12073_vm1, %v9528_v36 }
 0x9ce   : > { %3602 = vmatprep.mubr.bf16.mxu0 %v9743_v0 }
 0x9d5   : > { %8708 = vmatmul.mubr.msk.bf16.gmra.mxu0 %vm12073_vm1, %v9529_v59 }
 0x9d6   : > { %3612 = vmatprep.mubr.bf16.mxu0 %v9743_v0 }
 0x9dd   : > { %8709 = vmatmul.mubr.msk.bf16.gmra.mxu0 %vm12073_vm1, %v9530_v8 }
 0x9de   : > { %4034 = vmatprep.mubr.bf16.mxu0 %v9743_v0 }
 0xa7d   : > { %v3574_v9 = vpop.f32.mrf.mxu0 }
 0xa7e   : > { %3623 = vrot.lane.b32.xlu1 %v3574_v9, %s12062_s7 }
 0xa7f   : > { %v3576_v40 = vpop.f32.mrf.mxu0 }
 0xa80   : > { %3625 = vrot.lane.b32.xlu0 %v3576_v40, %s12062_s7 }
 0xa81   : > { %v3578_v47 = vpop.f32.mrf.mxu0 }
 0xa82   : > { %3635 = vrot.lane.b32.xlu1 %v3578_v47, %s12059_s10 }
 0xa83   : > { %v3580_v10 = vpop.f32.mrf.mxu0 }
 0xa84   : > { %3637 = vrot.lane.b32.xlu0 %v3580_v10, %s12059_s10 }
 0xa85   : > { %v3584_v11 = vpop.f32.mrf.mxu0 }
 0xa86   : > { %3647 = vrot.lane.b32.xlu1 %v3584_v11, %s12056_s11 }
 0xa87   : > { %v3586_v12 = vpop.f32.mrf.mxu0 }
 0xa88   : > { %3649 = vrot.lane.b32.xlu0 %v3586_v12, %s12056_s11 }
 0xa89   : > { %v3588_v13 = vpop.f32.mrf.mxu0 }
 0xa8a   : > { %3661 = vrot.lane.b32.xlu1 %v3588_v13, %s12053_s15 }
 0xa8b   : > { %v3590_v14 = vpop.f32.mrf.mxu0 }
 0xa8c   : > { %3663 = vrot.lane.b32.xlu0 %v3590_v14, %s12053_s15 }
 0xa8d   : > { %v3594_v25 = vpop.f32.mrf.mxu0 }
 0xa8f   : > { %v3596_v15 = vpop.f32.mrf.mxu0 }
 0xa91   : > { %v3598_v48 = vpop.f32.mrf.mxu0 }
 0xa92   : > { %3677 = vrot.lane.b32.xlu1 %v3598_v48, %s12051_s16 }
 0xa93   : > { %v3600_v50 = vpop.f32.mrf.mxu0 }
 0xa94   : > { %3679 = vrot.lane.b32.xlu0 %v3600_v50, %s12051_s16  ;;  %s12185_s16 = sld [smem:[#allocation22_spill]] }
 0xa95   : > { %v3604_v16 = vpop.f32.mrf.mxu0 }
 0xa96   : > { %3691 = vrot.lane.b32.xlu1 %v3604_v16, %s12148_s18 }
 0xa97   : > { %v3606_v17 = vpop.f32.mrf.mxu0 }
 0xa98   : > { %3693 = vrot.lane.b32.xlu0 %v3606_v17, %s12148_s18 }
 0xa99   : > { %v3608_v20 = vpop.f32.mrf.mxu0 }
 0xa9a   : > { %3705 = vrot.lane.b32.xlu1 %v3608_v20, %s12150_s23 }
 0xa9b   : > { %v3610_v22 = vpop.f32.mrf.mxu0 }
 0xa9c   : > { %3707 = vrot.lane.b32.xlu0 %v3610_v22, %s12150_s23 }
 0xa9d   : > { %v3614_v23 = vpop.f32.mrf.mxu0 }
 0xa9f   : > { %v3616_v7 = vpop.f32.mrf.mxu0 }
 0xaa0   : > { %3717 = vrot.lane.b32.xlu0 %v3614_v23, %s12151_s2  ;;  %3719 = vrot.lane.b32.xlu1 %v3616_v7, %s12151_s2 }
 0xaa1   : > { %v3618_v24 = vpop.f32.mrf.mxu0 }
 0xaa3   : > { %v3619_v28 = vpop.f32.mrf.mxu0 }
 0xaa4   : > { %3745 = vperm.xlu0 %9411, %v3742_v27   ;;  %4194 = vperm.xlu1 %9412, %v4191_v60  }
 0xaf0   : > { %v3624_v42 = vpop.permute.xlu1 %3623 }
 0xaf1   : > { %v3630_v35 = vsel %vm12169_vm9, 0.0, %v3624_v42  ;;  %vm12175_vm9 = vcmask 1039360  }
 0xaf2   : > { %v3626_v61 = vpop.permute.xlu0 %3625  ;;  %v3631_v54 = vsel %vm10096_vm4, %v3630_v35, 0.0 }
 0xaf3   : > { %v3627_v62 = vsel %vm12170_vm10, %v3624_v42, %v3626_v61  ;;  %vm12176_vm10 = vmmov %vm12175_vm9 }
 0xaf4   : > { %v3636_v57 = vpop.permute.xlu1 %3635  ;;  %v3632_v55 = vsel %vm10100_vm6, %v3627_v62, 0.0 }
 0xaf5   : > { %v3642_v51 = vsel %vm12061_vm5, 0.0, %v3636_v57 }
 0xaf6   : > { %v3638_v6 = vpop.permute.xlu0 %3637  ;;  %v3643_v26 = vadd.f32 %v3642_v51, %v3631_v54  ;;  %v9531_v54 = vld [vmem:[%s12184_s0] sm:$0xff]  }
 0xaf7   : > { %v3639_v52 = vsel %vm12061_vm5, %v3636_v57, %v3638_v6  ;;  %8730 = vmatmul.mubr.msk.bf16.vlgmr.msra.gmra.mxu0 %vm12073_vm1, %v9531_v54 }
 0xaf8   : > { %v3648_v29 = vpop.permute.xlu1 %3647  ;;  %v3644_v58 = vadd.f32 %v3639_v52, %v3632_v55  ;;  %4044 = vmatprep.mubr.bf16.mxu0 %v9743_v0  ;;  %v9535_v55 = vld [vmem:[%s12184_s0 + $0x10] sm:$0xff]  }
 0xaf9   : > { %v3654_v39 = vsel %vm12171_vm13, 0.0, %v3648_v29  ;;  %vm12177_vm13 = vcmask 924672  }
 0xafa   : > { %v3650_v31 = vpop.permute.xlu0 %3649  ;;  %v3655_v56 = vsel %vm10104_vm7, %v3654_v39, 0.0 }
 0xafb   : > { %v3651_v49 = vsel %vm12172_vm14, %v3648_v29, %v3650_v31  ;;  %v3657_v4 = vadd.f32 %v3655_v56, %v3643_v26  ;;  %vm12178_vm14 = vmmov %vm12177_vm13  ;;  %v9537_v56 = vld [vmem:[%s12184_s0 + $0x18] sm:$0xff]   ;;  %v9760_v26 = vmov 1983009808  }
 0xafc   : > { %v3662_v32 = vpop.permute.xlu1 %3661  ;;  %v3656_v38 = vsel %vm10108_vm8, %v3651_v49, 0.0 }
 0xafd   : > { %v3668_v30 = vsel %vm12173_vm2, 0.0, %v3662_v32  ;;  %v3658_v18 = vadd.f32 %v3656_v38, %v3644_v58  ;;  %vm12179_vm2 = vcmask 916480   ;;  %v9539_v38 = vld [vmem:[%s12184_s0 + $0x20] ss:$0 sps:$4 sm:$0xff]   ;;  %v3804_v58 = vunpack.c.l.s4 %v9760_v26 }
 0xafe   : > { %v3664_v19 = vpop.permute.xlu0 %3663  ;;  %v3669_v63 = vsel %vm10096_vm4, %v3668_v30, 0.0 }
 0xaff   : > { %v3665_v53 = vsel %vm12174_vm3, %v3662_v32, %v3664_v19  ;;  %v3671_v59 = vadd.f32 %v3669_v63, %v3657_v4  ;;  %vm12180_vm3 = vmmov %vm12179_vm2  ;;  %v3805_v63 = vunpack.c.0.s8 %v3804_v58 }
 0xb00   : > { %v3670_v1 = vsel %vm10100_vm6, %v3665_v53, 0.0  ;;  %v3741_v53 = vld [vmem:[%s12182_s26] sm:$0xf]  ;;  %s10709_s26 = sshll.u32 %s12505_s1, 2  ;;  %s12188_s1 = smov 1  }
 0xb01   : > { %v3672_v8 = vadd.f32 %v3670_v1, %v3658_v18  ;;  %v3673_v14 = vadd.f32 %v3671_v59, %v3594_v25  ;;  %v3807_v1 = vshrl.u32 %v1574_v33, 7  ;;  %s1561_s15 = scalar_lea.vmem %s10019_s30, %s10709_s26  ;;  %s1566_s19 = scalar_lea.vmem %s10024_s24, %s10709_s26 }
 0xb03   : > { %v3674_v13 = vadd.f32 %v3672_v8, %v3596_v15 }
 0xb04   : > { %v3678_v3 = vpop.permute.xlu1 %3677 }
 0xb06   : > { %v3680_v36 = vpop.permute.xlu0 %3679 }
 0xb07   : > { %v3681_v9 = vsel %vm12175_vm9, %v3678_v3, %v3680_v36  ;;  %v3684_v40 = vsel %vm12176_vm10, %v3680_v36, 0.0  ;;  %vm12181_vm9 = vcmask 908288  }
 0xb08   : > { %v3692_v47 = vpop.permute.xlu1 %3691  ;;  %v3685_v10 = vsel %vm10104_vm7, %v3681_v9, 0.0  ;;  %v3686_v11 = vsel %vm10108_vm8, %v3684_v40, 0.0  ;;  %vm12183_vm10 = vmmov %vm12181_vm9  ;;  %v10715_v9 = vsub.s32 %v3805_v63, %v3807_v1 }
 0xb09   : > { %v3687_v20 = vadd.f32 %v3685_v10, %v3673_v14  ;;  %v3688_v22 = vadd.f32 %v3686_v11, %v3674_v13  ;;  %v3818_v11 = vld [vmem:[%s1561_s15] sm:$0xf] }
 0xb0a   : > { %v3694_v12 = vpop.permute.xlu0 %3693 }
 0xb0b   : > { %v3695_v48 = vsel %vm12177_vm13, %v3692_v47, %v3694_v12  ;;  %v3698_v50 = vsel %vm12178_vm14, %v3694_v12, 0.0  ;;  %vm3811_vm13 = vcmask 1041408   ;;  %vm3812_vm14 = vsmask.f32 1280 }
 0xb0c   : > { %v3699_v16 = vsel %vm10096_vm4, %v3695_v48, 0.0  ;;  %v3700_v17 = vsel %vm10100_vm6, %v3698_v50, 0.0  ;;  %v3706_v23 = vpop.permute.xlu1 %3705  ;;  %v9532_v48 = vld [vmem:[%s12185_s16] sm:$0xff]  }
 0xb0d   : > { %v3701_v24 = vadd.f32 %v3699_v16, %v3687_v20  ;;  %v3702_v27 = vadd.f32 %v3700_v17, %v3688_v22  ;;  %v9534_v16 = vld [vmem:[%s12185_s16 + $0x8] sm:$0xff]   ;;  %v9536_v17 = vld [vmem:[%s12185_s16 + $0x10] sm:$0xff]   ;;  %v9538_v20 = vld [vmem:[%s12185_s16 + $0x18] sm:$0xff]  }
 0xb0e   : > { %v3708_v7 = vpop.permute.xlu0 %3707  ;;  %v9540_v22 = vld [vmem:[%s12185_s16 + $0x20] ss:$0 sps:$4 sm:$0xff]   ;;  %s12284_s16 = sld [smem:[#allocation27_spill]] }
 0xb0f   : > { %v3709_v60 = vsel %vm12179_vm2, %v3706_v23, %v3708_v7  ;;  %v3712_v25 = vsel %vm12180_vm3, %v3708_v7, 0.0  ;;  %vm3814_vm2 = vcmask 1043458   ;;  %vm3815_vm3 = vsmask.f32 3328 }
 0xb10   : > { %v3713_v42 = vadd.f32 %v3709_v60, %v3701_v24  ;;  %v3714_v61 = vadd.f32 %v3712_v25, %v3702_v27 }
 0xb12   : > { %v3718_v15 = vpop.permute.xlu0 %3717  ;;  %v3720_v28 = vpop.permute.xlu1 %3719 }
 0xb13   : > { %v3721_v57 = vsel %vm12181_vm9, %v3718_v15, %v3720_v28  ;;  %v3724_v6 = vsel %vm12183_vm10, %v3720_v28, 0.0  ;;  %vm3813_vm9 = vmand %vm3811_vm13, %vm3812_vm14  ;;  %vm12191_vm13 = vcmask 138240  }
 0xb14   : > { %v3725_v29 = vsel %vm10104_vm7, %v3721_v57, 0.0  ;;  %v3726_v31 = vsel %vm10108_vm8, %v3724_v6, 0.0  ;;  %vm3816_vm10 = vmand %vm3814_vm2, %vm3815_vm3  ;;  %vm12193_vm2 = vcmask 121856  }
 0xb15   : > { %v3727_v32 = vadd.f32 %v3725_v29, %v3713_v42  ;;  %v3728_v19 = vadd.f32 %v3726_v31, %v3714_v61  ;;  %vm10719_vm15 = vmor %vm3816_vm10, %vm3813_vm9  ;;  %vm12195_vm9 = vcmask 7168  }
 0xb16   : > { %vm12192_vm14 = vmmov %vm12191_vm13 }
 0xb17   : > { %v3736_v35 = vadd.f32 %v3733_v41, %v3728_v19  ;;  %v3735_v62 = vadd.f32 %v3733_v41, %v3727_v32  ;;  %v9533_v41 = vld [vmem:[%s12184_s0 + $0x8] sm:$0xff]   ;;  %vm12194_vm3 = vmmov %vm12193_vm2  ;;  %s12207_s0 = smov 15  }
 0xb18   : > { %8731 = vmatmul.mubr.msk.bf16.gmra.mxu0 %vm12073_vm1, %v9533_v41  ;;  %vm12196_vm10 = vmmov %vm12195_vm9 }
 0xb19   : > { %v3738_v39 = vmax.f32 %v3736_v35, 0.0  ;;  %v3737_v49 = vmax.f32 %v3735_v62, 0.0  ;;  %4054 = vmatprep.mubr.bf16.mxu0 %v9743_v0 }
 0xb1b   : > { %v3740_v51 = vpack.c.bf16 %v3738_v39, %v3738_v39  ;;  %v3739_v52 = vpack.c.bf16 %v3737_v49, %v3737_v49 }
 0xb1d   : > { %8710 = vmatprep.subr.msk.bf16.mxu1 %vm12074_vm0, %v3740_v51  ;;  %v3752_v30 = vsel %vm12074_vm0, %v3739_v52, 0 }
 0xb1e   : > { %3772 = vmatpush1.bf16.msra.mxu1 %v3752_v30 }
 0xb1f   : > { %v3746_v3 = vpop.permute.xlu0 %3745 }
 0xb20   : > { %8732 = vmatmul.mubr.msk.bf16.gmra.mxu0 %vm12073_vm1, %v9535_v55 }
 0xb21   : > { %8711 = vmatmul.mubr.msk.bf16.vlgmr.msra.gmra.mxu1 %vm12073_vm1, %v3741_v53  ;;  %4064 = vmatprep.mubr.bf16.mxu0 %v9743_v0 }
 0xb22   : > { %3915 = vmatprep.mubr.bf16.mxu1 %v9743_v0 }
 0xb28   : > { %8733 = vmatmul.mubr.msk.bf16.gmra.mxu0 %vm12073_vm1, %v9537_v56 }
 0xb29   : > { %4074 = vmatprep.mubr.bf16.mxu0 %v9743_v0 }
 0xb30   : > { %8734 = vmatmul.mubr.msk.bf16.gmra.mxu0 %vm12073_vm1, %v9539_v38 }
 0xbb7   : > { %v4036_v23 = vpop.f32.mrf.mxu0 }
 0xbb9   : > { %v4038_v7 = vpop.f32.mrf.mxu0 }
 0xbbb   : > { %v4040_v24 = vpop.f32.mrf.mxu0 }
 0xbbd   : > { %v4042_v27 = vpop.f32.mrf.mxu0 }
 0xbd8   : > { %v4046_v60 = vpop.f32.mrf.mxu0 }
 0xbda   : > { %v4048_v25 = vpop.f32.mrf.mxu0 }
 0xbdc   : > { %v4050_v15 = vpop.f32.mrf.mxu0 }
 0xbde   : > { %v4052_v28 = vpop.f32.mrf.mxu0 }
 0xbe0   : > { %v10745_v42 = vpop.f32.mrf.mxu0 }
 0xbe1   : > { %v3791_v4 = vpop.f32.mrf.mxu1 }
 0xbe2   : > { %v3792_v18 = vadd.f32 %v3791_v4, %v3746_v3  ;;  %v10747_v61 = vpop.f32.mrf.mxu0 }
 0xbe3   : > { %v3793_v36 = vpop.f32.mrf.mxu1 }
 0xbe4   : > { %v10713_v59 = vpack.c.bf16 %v3792_v18, %v3792_v18  ;;  %v3794_v8 = vadd.f32 %v3793_v36, %v3746_v3  ;;  %v4060_v57 = vpop.f32.mrf.mxu0 }
 0xbe5   : > { %v3795_v33 = vpop.f32.mrf.mxu1 }
 0xbe6   : > { %v10717_v40 = vpack.c.bf16 %v3794_v8, %v3794_v8  ;;  %v8712_v47 = vpack.c.bf16 %v3794_v8, %v3792_v18  ;;  %v3878_v14 = vsel %vm12074_vm0, %v10713_v59, 0  ;;  %v4062_v6 = vpop.f32.mrf.mxu0 }
 0xbe7   : > { %v3796_v12 = vpop.f32.mrf.mxu1 }
 0xbe8   : > { %v3809_v13 = vrot.slane %v8712_v47, %v10715_v9  ;;  %8718 = vmatprep.subr.msk.bf16.mxu1 %vm12074_vm0, %v10717_v40  ;;  %v4066_v29 = vpop.f32.mrf.mxu0 }
 0xbe9   : > { %3898 = vmatpush1.bf16.msra.mxu1 %v3878_v14 }
 0xbea   : > { %v3819_v50 = vsel %vm10719_vm15, %v3809_v13, %v3818_v11  ;;  %v4068_v31 = vpop.f32.mrf.mxu0 }
 0xbeb   : > { %3820 = vst [vmem:[%s1561_s15] sm:$0xf] %v3819_v50  ;;  %s12189_s15 = smov 127  }
 0xbec   : > { %8719 = vmatmul.mubr.msk.bf16.vlgmr.msra.gmra.mxu1 %vm12073_vm1, %v9532_v48  ;;  %v4070_v32 = vpop.f32.mrf.mxu0 }
 0xbed   : > { %3925 = vmatprep.mubr.bf16.mxu1 %v9743_v0 }
 0xbee   : > { %v4072_v19 = vpop.f32.mrf.mxu0 }
 0xbf0   : > { %v4076_v35 = vpop.f32.mrf.mxu0 }
 0xbf2   : > { %v4078_v62 = vpop.f32.mrf.mxu0 }
 0xbf4   : > { %8720 = vmatmul.mubr.msk.bf16.gmra.mxu1 %vm12073_vm1, %v9534_v16  ;;  %v4080_v39 = vpop.f32.mrf.mxu0 }
 0xbf5   : > { %3935 = vmatprep.mubr.bf16.mxu1 %v9743_v0 }
 0xbf6   : > { %v4081_v49 = vpop.f32.mrf.mxu0 }
 0xbfc   : > { %8721 = vmatmul.mubr.msk.bf16.gmra.mxu1 %vm12073_vm1, %v9536_v17 }
 0xbfd   : > { %3945 = vmatprep.mubr.bf16.mxu1 %v9743_v0 }
 0xc04   : > { %8722 = vmatmul.mubr.msk.bf16.gmra.mxu1 %vm12073_vm1, %v9538_v20 }
 0xc05   : > { %3955 = vmatprep.mubr.bf16.mxu1 %v9743_v0 }
 0xc0c   : > { %8723 = vmatmul.mubr.msk.bf16.gmra.mxu1 %vm12073_vm1, %v9540_v22 }
 0xc0d   : > { %4288 = vmatprep.mubr.bf16.mxu1 %v9743_v0 }
 0xcac   : > { %v3917_v51 = vpop.f32.mrf.mxu1 }
 0xcad   : > { %v4037_v52 = vadd.f32 %v4036_v23, %v3917_v51 }
 0xcae   : > { %v3919_v30 = vpop.f32.mrf.mxu1 }
 0xcaf   : > { %v4039_v53 = vadd.f32 %v4038_v7, %v3919_v30  ;;  %4085 = vrot.lane.b32.xlu1 %v4037_v52, %s12062_s7 }
 0xcb0   : > { %v3921_v54 = vpop.f32.mrf.mxu1 }
 0xcb1   : > { %v4041_v41 = vadd.f32 %v4040_v24, %v3921_v54  ;;  %4087 = vrot.lane.b32.xlu0 %v4039_v53, %s12062_s7 }
 0xcb2   : > { %v3923_v55 = vpop.f32.mrf.mxu1 }
 0xcb3   : > { %v4043_v56 = vadd.f32 %v4042_v27, %v3923_v55  ;;  %4097 = vrot.lane.b32.xlu1 %v4041_v41, %s12059_s10 }
 0xcb4   : > { %v3927_v38 = vpop.f32.mrf.mxu1 }
 0xcb5   : > { %v4047_v26 = vadd.f32 %v4046_v60, %v3927_v38  ;;  %4099 = vrot.lane.b32.xlu0 %v4043_v56, %s12059_s10 }
 0xcb6   : > { %v3929_v58 = vpop.f32.mrf.mxu1 }
 0xcb7   : > { %v4049_v63 = vadd.f32 %v4048_v25, %v3929_v58  ;;  %4109 = vrot.lane.b32.xlu1 %v4047_v26, %s12056_s11 }
 0xcb8   : > { %v3931_v1 = vpop.f32.mrf.mxu1 }
 0xcb9   : > { %v4051_v3 = vadd.f32 %v4050_v15, %v3931_v1  ;;  %4111 = vrot.lane.b32.xlu0 %v4049_v63, %s12056_s11  ;;  %s12190_s11 = sld [smem:[#allocation20_spill]] }
 0xcba   : > { %v3933_v4 = vpop.f32.mrf.mxu1 }
 0xcbb   : > { %v4053_v18 = vadd.f32 %v4052_v28, %v3933_v4  ;;  %4123 = vrot.lane.b32.xlu1 %v4051_v3, %s12188_s1  ;;  %v10770_v28 = vpop.permute.xlu1 %4194 }
 0xcbc   : > { %v10756_v36 = vpop.f32.mrf.mxu1 }
 0xcbd   : > { %4125 = vrot.lane.b32.xlu0 %v4053_v18, %s12188_s1 }
 0xcbe   : > { %v10759_v8 = vpop.f32.mrf.mxu1 }
 0xcbf   : > { %v4445_v15 = vld [vmem:[%s12190_s11] sm:$0xff]  ;;  %s12203_s11 = sld [smem:[#allocation23_spill]] }
 0xcc0   : > { %v3941_v33 = vpop.f32.mrf.mxu1 }
 0xcc1   : > { %v4061_v47 = vadd.f32 %v4060_v57, %v3941_v33 }
 0xcc2   : > { %v3943_v11 = vpop.f32.mrf.mxu1 }
 0xcc3   : > { %v4063_v12 = vadd.f32 %v4062_v6, %v3943_v11  ;;  %4139 = vrot.lane.b32.xlu1 %v4061_v47, %s12189_s15 }
 0xcc4   : > { %v3947_v13 = vpop.f32.mrf.mxu1 }
 0xcc5   : > { %v4067_v14 = vadd.f32 %v4066_v29, %v3947_v13  ;;  %4141 = vrot.lane.b32.xlu0 %v4063_v12, %s12189_s15 }
 0xcc6   : > { %v3949_v48 = vpop.f32.mrf.mxu1 }
 0xcc7   : > { %v4069_v50 = vadd.f32 %v4068_v31, %v3949_v48  ;;  %4153 = vrot.lane.b32.xlu1 %v4067_v14, %s12148_s18 }
 0xcc8   : > { %v3951_v16 = vpop.f32.mrf.mxu1 }
 0xcc9   : > { %v4071_v17 = vadd.f32 %v4070_v32, %v3951_v16  ;;  %4155 = vrot.lane.b32.xlu0 %v4069_v50, %s12148_s18  ;;  %v4057_v50 = vadd.f32 %v10745_v42, %v10756_v36  ;;  %v4059_v16 = vadd.f32 %v10747_v61, %v10759_v8 }
 0xcca   : > { %v3953_v20 = vpop.f32.mrf.mxu1 }
 0xccb   : > { %v4073_v22 = vadd.f32 %v4072_v19, %v3953_v20  ;;  %4167 = vrot.lane.b32.xlu1 %v4071_v17, %s12150_s23 }
 0xccc   : > { %v3957_v23 = vpop.f32.mrf.mxu1 }
 0xccd   : > { %4169 = vrot.lane.b32.xlu0 %v4073_v22, %s12150_s23  ;;  %v4077_v24 = vadd.f32 %v4076_v35, %v3957_v23 }
 0xcce   : > { %v3959_v7 = vpop.f32.mrf.mxu1 }
 0xccf   : > { %v4079_v27 = vadd.f32 %v4078_v62, %v3959_v7 }
 0xcd0   : > { %v3961_v60 = vpop.f32.mrf.mxu1 }
 0xcd1   : > { %4179 = vrot.lane.b32.xlu0 %v4077_v24, %s12151_s2  ;;  %4181 = vrot.lane.b32.xlu1 %v4079_v27, %s12151_s2 }
 0xcd2   : > { %v3962_v25 = vpop.f32.mrf.mxu1 }
 0xcd5   : > { %4448 = vperm.xlu1 %9412, %v4445_v15  }
 0xd21   : > { %v4086_v57 = vpop.permute.xlu1 %4085 }
 0xd22   : > { %v4092_v35 = vsel %vm12191_vm13, 0.0, %v4086_v57  ;;  %vm12197_vm13 = vcmask 1039360  }
 0xd23   : > { %v4088_v6 = vpop.permute.xlu0 %4087  ;;  %v4093_v55 = vsel %vm10096_vm4, %v4092_v35, 0.0 }
 0xd24   : > { %v4089_v62 = vsel %vm12192_vm14, %v4086_v57, %v4088_v6  ;;  %vm12198_vm14 = vmmov %vm12197_vm13 }
 0xd25   : > { %v4098_v29 = vpop.permute.xlu1 %4097  ;;  %v4094_v56 = vsel %vm10100_vm6, %v4089_v62, 0.0 }
 0xd26   : > { %v4104_v30 = vsel %vm12061_vm5, 0.0, %v4098_v29 }
 0xd27   : > { %v4100_v31 = vpop.permute.xlu0 %4099  ;;  %v4105_v58 = vadd.f32 %v4104_v30, %v4093_v55 }
 0xd28   : > { %v4101_v53 = vsel %vm12061_vm5, %v4098_v29, %v4100_v31 }
 0xd29   : > { %v4110_v32 = vpop.permute.xlu1 %4109  ;;  %v4106_v63 = vadd.f32 %v4101_v53, %v4094_v56 }
 0xd2a   : > { %v4116_v51 = vsel %vm12193_vm2, 0.0, %v4110_v32  ;;  %vm12199_vm2 = vcmask 924672  }
 0xd2b   : > { %v4112_v19 = vpop.permute.xlu0 %4111  ;;  %v4117_v38 = vsel %vm10104_vm7, %v4116_v51, 0.0 }
 0xd2c   : > { %v4113_v52 = vsel %vm12194_vm3, %v4110_v32, %v4112_v19  ;;  %v4119_v18 = vadd.f32 %v4117_v38, %v4105_v58  ;;  %vm12200_vm3 = vmmov %vm12199_vm2  ;;  %v9541_v58 = vld [vmem:[%s12203_s11] sm:$0xff]  }
 0xd2d   : > { %v4124_v39 = vpop.permute.xlu1 %4123  ;;  %v4118_v26 = vsel %vm10108_vm8, %v4113_v52, 0.0 }
 0xd2e   : > { %v4130_v54 = vsel %vm12195_vm9, 0.0, %v4124_v39  ;;  %v4120_v33 = vadd.f32 %v4118_v26, %v4106_v63  ;;  %vm12201_vm9 = vcmask 916480   ;;  %v9542_v63 = vld [vmem:[%s12203_s11 + $0x8] sm:$0xff]  }
 0xd2f   : > { %v4126_v49 = vpop.permute.xlu0 %4125  ;;  %v4131_v1 = vsel %vm10096_vm4, %v4130_v54, 0.0 }
 0xd30   : > { %v4127_v41 = vsel %vm12196_vm10, %v4124_v39, %v4126_v49  ;;  %v4133_v11 = vadd.f32 %v4131_v1, %v4119_v18  ;;  %vm12202_vm10 = vmmov %vm12201_vm9  ;;  %v9544_v1 = vld [vmem:[%s12203_s11 + $0x18] sm:$0xff]  }
 0xd31   : > { %v4132_v3 = vsel %vm10100_vm6, %v4127_v41, 0.0 }
 0xd32   : > { %v4134_v12 = vadd.f32 %v4132_v3, %v4120_v33  ;;  %v4135_v7 = vadd.f32 %v4133_v11, %v4057_v50  ;;  %v9545_v3 = vld [vmem:[%s12203_s11 + $0x20] ss:$0 sps:$4 sm:$0xff]  }
 0xd34   : > { %v4136_v23 = vadd.f32 %v4134_v12, %v4059_v16 }
 0xd35   : > { %v4140_v4 = vpop.permute.xlu1 %4139 }
 0xd37   : > { %v4142_v47 = vpop.permute.xlu0 %4141 }
 0xd38   : > { %v4143_v13 = vsel %vm12197_vm13, %v4140_v4, %v4142_v47  ;;  %v4146_v14 = vsel %vm12198_vm14, %v4142_v47, 0.0  ;;  %vm12204_vm13 = vcmask 908288  }
 0xd39   : > { %v4154_v48 = vpop.permute.xlu1 %4153  ;;  %v4147_v17 = vsel %vm10104_vm7, %v4143_v13, 0.0  ;;  %v4148_v20 = vsel %vm10108_vm8, %v4146_v14, 0.0  ;;  %vm12205_vm14 = vmmov %vm12204_vm13 }
 0xd3a   : > { %v4149_v61 = vadd.f32 %v4147_v17, %v4135_v7  ;;  %v4150_v36 = vadd.f32 %v4148_v20, %v4136_v23 }
 0xd3b   : > { %v4156_v22 = vpop.permute.xlu0 %4155 }
 0xd3c   : > { %v4157_v24 = vsel %vm12199_vm2, %v4154_v48, %v4156_v22  ;;  %v4160_v27 = vsel %vm12200_vm3, %v4156_v22, 0.0  ;;  %vm12206_vm2 = vmmov 0   ;;  %vm12208_vm3 = vcmask 138240  }
 0xd3d   : > { %v4161_v60 = vsel %vm10096_vm4, %v4157_v24, 0.0  ;;  %v4162_v42 = vsel %vm10100_vm6, %v4160_v27, 0.0  ;;  %v4168_v8 = vpop.permute.xlu1 %4167 }
 0xd3e   : > { %v4163_v15 = vadd.f32 %v4161_v60, %v4149_v61  ;;  %v4164_v57 = vadd.f32 %v4162_v42, %v4150_v36  ;;  %v9546_v61 = vld [vmem:[%s12127_s13 + $0x78] sm:$0xff]  }
 0xd3f   : > { %v4170_v25 = vpop.permute.xlu0 %4169  ;;  %v9547_v36 = vld [vmem:[%s12127_s13 + $0x38] sm:$0xff]   ;;  %9019 = vmatprep.subr.bf16.mxu0 %v9546_v61 }
 0xd40   : > { %v4171_v6 = vsel %vm12201_vm9, %v4168_v8, %v4170_v25  ;;  %v4174_v29 = vsel %vm12202_vm10, %v4170_v25, 0.0  ;;  %v9548_v8 = vld [vmem:[%s12127_s13 + $0x70] sm:$0xff]   ;;  %9020 = vmatpush3.bf16.msra.mxu0 %v9547_v36  ;;  %vm12209_vm9 = vcmask 121856   ;;  %vm12210_vm10 = vcmask 7168  }
 0xd41   : > { %v4175_v19 = vadd.f32 %v4171_v6, %v4163_v15  ;;  %v4176_v39 = vadd.f32 %v4174_v29, %v4164_v57  ;;  %v9549_v25 = vld [vmem:[%s12127_s13 + $0x30] sm:$0xff]   ;;  %9021 = vmatprep.subr.bf16.mxu0 %v9548_v8  ;;  %v9550_v15 = vld [vmem:[%s12127_s13 + $0x68] sm:$0xff]   ;;  %v9552_v6 = vld [vmem:[%s12127_s13 + $0x60] sm:$0xff]  }
 0xd42   : > { %v9551_v57 = vld [vmem:[%s12127_s13 + $0x28] sm:$0xff]   ;;  %v9553_v29 = vld [vmem:[%s12127_s13 + $0x20] sm:$0xff]  }
 0xd43   : > { %v4180_v31 = vpop.permute.xlu0 %4179  ;;  %v4182_v32 = vpop.permute.xlu1 %4181 }
 0xd44   : > { %v4183_v49 = vsel %vm12204_vm13, %v4180_v31, %v4182_v32  ;;  %v4186_v35 = vsel %vm12205_vm14, %v4182_v32, 0.0  ;;  %9022 = vmatpush3.bf16.msra.mxu0 %v9549_v25  ;;  %v9554_v31 = vld [vmem:[%s12127_s13 + $0x58] sm:$0xff]   ;;  %vm12211_vm13 = vmmov %vm12208_vm3 }
 0xd45   : > { %v4187_v62 = vsel %vm10104_vm7, %v4183_v49, 0.0  ;;  %v4188_v51 = vsel %vm10108_vm8, %v4186_v35, 0.0  ;;  %9023 = vmatprep.subr.bf16.mxu0 %v9550_v15  ;;  %v9555_v32 = vld [vmem:[%s12127_s13 + $0x18] sm:$0xff]   ;;  %vm12212_vm14 = vmmov %vm12209_vm9 }
 0xd46   : > { %v4189_v52 = vadd.f32 %v4187_v62, %v4175_v19  ;;  %v4190_v30 = vadd.f32 %v4188_v51, %v4176_v39 }
 0xd48   : > { %v4198_v53 = vadd.f32 %v10770_v28, %v4190_v30  ;;  %v4197_v54 = vadd.f32 %v10770_v28, %v4189_v52  ;;  %v9543_v28 = vld [vmem:[%s12203_s11 + $0x10] sm:$0xff]   ;;  %9024 = vmatpush3.bf16.msra.mxu0 %v9551_v57  ;;  %s12235_s11 = smov 119  }
 0xd49   : > { %9025 = vmatprep.subr.bf16.mxu0 %v9552_v6 }
 0xd4a   : > { %v4200_v41 = vmax.f32 %v4198_v53, 0.0  ;;  %v4199_v55 = vmax.f32 %v4197_v54, 0.0 }
 0xd4c   : > { %v4202_v56 = vpack.c.bf16 %v4200_v41, %v4200_v41  ;;  %v4201_v38 = vpack.c.bf16 %v4199_v55, %v4199_v55  ;;  %9026 = vmatpush3.bf16.msra.mxu0 %v9553_v29 }
 0xd4d   : > { %9027 = vmatprep.subr.bf16.mxu0 %v9554_v31 }
 0xd4e   : > { %8740 = vmatprep.subr.msk.bf16.mxu1 %vm12074_vm0, %v4202_v56  ;;  %v4251_v26 = vsel %vm12074_vm0, %v4201_v38, 0 }
 0xd4f   : > { %4271 = vmatpush1.bf16.msra.mxu1 %v4251_v26 }
 0xd50   : > { %9217 = vmatprep.subr.bf16.mxu1 %v9752_v21  ;;  %9028 = vmatpush3.bf16.msra.mxu0 %v9555_v32  ;;  %v10867_v19 = vpop.permute.xlu1 %4448 }
 0xd52   : > { %8741 = vmatmul.mubr.msk.bf16.vlgmr.msra.gmra.mxu1 %vm12073_vm1, %v9541_v58 }
 0xd53   : > { %4298 = vmatprep.mubr.bf16.mxu1 %v9743_v0 }
 0xd5a   : > { %8742 = vmatmul.mubr.msk.bf16.gmra.mxu1 %vm12073_vm1, %v9542_v63 }
 0xd5b   : > { %4308 = vmatprep.mubr.bf16.mxu1 %v9743_v0 }
 0xd62   : > { %8743 = vmatmul.mubr.msk.bf16.gmra.mxu1 %vm12073_vm1, %v9543_v28 }
 0xd63   : > { %4318 = vmatprep.mubr.bf16.mxu1 %v9743_v0 }
 0xd6a   : > { %8744 = vmatmul.mubr.msk.bf16.gmra.mxu1 %vm12073_vm1, %v9544_v1 }
 0xd6b   : > { %4328 = vmatprep.mubr.bf16.mxu1 %v9743_v0 }
 0xd72   : > { %8745 = vmatmul.mubr.msk.bf16.gmra.mxu1 %vm12073_vm1, %v9545_v3 }
 0xd73   : > { %9219 = vmatprep.mubr.msk.bf16.mxu1 %vm12206_vm2, %v9752_v21 }
 0xe12   : > { %v4290_v4 = vpop.f32.mrf.mxu1 }
 0xe13   : > { %4339 = vrot.lane.b32.xlu0 %v4290_v4, %s12062_s7 }
 0xe14   : > { %v4292_v18 = vpop.f32.mrf.mxu1 }
 0xe15   : > { %4341 = vrot.lane.b32.xlu1 %v4292_v18, %s12062_s7  ;;  %s12228_s7 = sld [smem:[#allocation17_spill]] }
 0xe16   : > { %v4294_v33 = vpop.f32.mrf.mxu1 }
 0xe17   : > { %4351 = vrot.lane.b32.xlu0 %v4294_v33, %s12059_s10 }
 0xe18   : > { %v4296_v47 = vpop.f32.mrf.mxu1 }
 0xe19   : > { %4353 = vrot.lane.b32.xlu1 %v4296_v47, %s12059_s10  ;;  %s12222_s10 = sld [smem:[#allocation15_spill]] }
 0xe1a   : > { %v4300_v11 = vpop.f32.mrf.mxu1 }
 0xe1b   : > { %4363 = vrot.lane.b32.xlu0 %v4300_v11, %s12207_s0 }
 0xe1c   : > { %v4302_v12 = vpop.f32.mrf.mxu1 }
 0xe1d   : > { %4365 = vrot.lane.b32.xlu1 %v4302_v12, %s12207_s0 }
 0xe1e   : > { %v4304_v13 = vpop.f32.mrf.mxu1 }
 0xe1f   : > { %4377 = vrot.lane.b32.xlu0 %v4304_v13, %s12188_s1 }
 0xe20   : > { %v4306_v14 = vpop.f32.mrf.mxu1 }
 0xe21   : > { %4379 = vrot.lane.b32.xlu1 %v4306_v14, %s12188_s1 }
 0xe22   : > { %v10845_v48 = vpop.f32.mrf.mxu1 }
 0xe24   : > { %v10847_v50 = vpop.f32.mrf.mxu1 }
 0xe26   : > { %v4314_v16 = vpop.f32.mrf.mxu1 }
 0xe27   : > { %4393 = vrot.lane.b32.xlu1 %v4314_v16, %s12189_s15 }
 0xe28   : > { %v4316_v17 = vpop.f32.mrf.mxu1 }
 0xe29   : > { %4395 = vrot.lane.b32.xlu0 %v4316_v17, %s12189_s15 }
 0xe2a   : > { %v4320_v20 = vpop.f32.mrf.mxu1 }
 0xe2b   : > { %4407 = vrot.lane.b32.xlu1 %v4320_v20, %s12148_s18 }
 0xe2c   : > { %v4322_v22 = vpop.f32.mrf.mxu1 }
 0xe2d   : > { %4409 = vrot.lane.b32.xlu0 %v4322_v22, %s12148_s18 }
 0xe2e   : > { %v4324_v23 = vpop.f32.mrf.mxu1 }
 0xe30   : > { %v4326_v7 = vpop.f32.mrf.mxu1 }
 0xe31   : > { %4421 = vrot.lane.b32.xlu0 %v4324_v23, %s12150_s23 }
 0xe32   : > { %v4330_v24 = vpop.f32.mrf.mxu1 }
 0xe34   : > { %v4332_v27 = vpop.f32.mrf.mxu1 }
 0xe35   : > { %4423 = vrot.lane.b32.xlu0 %v4326_v7, %s12150_s23  ;;  %4435 = vrot.lane.b32.xlu1 %v4332_v27, %s12151_s2 }
 0xe36   : > { %v4334_v60 = vpop.f32.mrf.mxu1 }
 0xe38   : > { %v4335_v42 = vpop.f32.mrf.mxu1 }
 0xe39   : > { %4433 = vrot.lane.b32.xlu0 %v4330_v24, %s12151_s2 }
 0xe85   : > { %v4340_v39 = vpop.permute.xlu0 %4339 }
 0xe86   : > { %v4346_v38 = vsel %vm12211_vm13, 0.0, %v4340_v39 }
 0xe87   : > { %v4342_v49 = vpop.permute.xlu1 %4341  ;;  %v4347_v33 = vsel %vm10096_vm4, %v4346_v38, 0.0  ;;  %v9556_v38 = vld [vmem:[%s12127_s13 + $0x50] sm:$0xff]  }
 0xe88   : > { %v4343_v53 = vsel %vm12208_vm3, %v4340_v39, %v4342_v49  ;;  %vm12213_vm3 = vmmov %vm12210_vm10  ;;  %9029 = vmatprep.subr.bf16.mxu0 %v9556_v38  ;;  %v9569_v38 = vld [vmem:[%s12228_s7 + $0x8] sm:$0xff]  }
 0xe89   : > { %v4352_v35 = vpop.permute.xlu0 %4351  ;;  %v4348_v26 = vsel %vm10100_vm6, %v4343_v53, 0.0 }
 0xe8a   : > { %v4358_v28 = vsel %vm12061_vm5, 0.0, %v4352_v35 }
 0xe8b   : > { %v4354_v62 = vpop.permute.xlu1 %4353  ;;  %v4359_v13 = vadd.f32 %v4358_v28, %v4347_v33  ;;  %v9560_v33 = vld [vmem:[%s12127_s13 + $0x40] sm:$0xff]  }
 0xe8c   : > { %v4355_v55 = vsel %vm12061_vm5, %v4352_v35, %v4354_v62 }
 0xe8d   : > { %v4364_v52 = vpop.permute.xlu0 %4363  ;;  %v4360_v1 = vadd.f32 %v4355_v55, %v4348_v26 }
 0xe8e   : > { %v4370_v58 = vsel %vm12212_vm14, 0.0, %v4364_v52 }
 0xe8f   : > { %v4366_v51 = vpop.permute.xlu1 %4365  ;;  %v4371_v47 = vsel %vm10104_vm7, %v4370_v58, 0.0  ;;  %v9557_v58 = vld [vmem:[%s12127_s13 + $0x10] sm:$0xff]  }
 0xe90   : > { %v4367_v54 = vsel %vm12209_vm9, %v4364_v52, %v4366_v51  ;;  %vm12214_vm9 = vcmask 1039360   ;;  %v4373_v22 = vadd.f32 %v4371_v47, %v4359_v13  ;;  %9030 = vmatpush3.bf16.msra.mxu0 %v9557_v58  ;;  %v9561_v47 = vld [vmem:[%s12127_s13] sm:$0xff]   ;;  %v9570_v58 = vld [vmem:[%s12126_s9 + $0x10] ss:$8 sps:$4 sm:$0xff]  }
 0xe91   : > { %v4378_v41 = vpop.permute.xlu0 %4377  ;;  %v4372_v63 = vsel %vm10108_vm8, %v4367_v54, 0.0  ;;  %vm12216_vm13 = vmmov %vm12214_vm9 }
 0xe92   : > { %v4384_v4 = vsel %vm12213_vm3, 0.0, %v4378_v41  ;;  %v4374_v11 = vadd.f32 %v4372_v63, %v4360_v1  ;;  %vm12218_vm3 = vcmask 916480  }
 0xe93   : > { %v4380_v30 = vpop.permute.xlu1 %4379  ;;  %v4385_v14 = vsel %vm10096_vm4, %v4384_v4, 0.0  ;;  %v9559_v4 = vld [vmem:[%s12127_s13 + $0x8] sm:$0xff]  }
 0xe94   : > { %v4381_v56 = vsel %vm12210_vm10, %v4378_v41, %v4380_v30  ;;  %vm12215_vm10 = vcmask 924672   ;;  %v4387_v7 = vadd.f32 %v4385_v14, %v4373_v22 }
 0xe95   : > { %v4386_v18 = vsel %vm10100_vm6, %v4381_v56, 0.0  ;;  %vm12217_vm14 = vmmov %vm12215_vm10 }
 0xe96   : > { %v4388_v16 = vadd.f32 %v4386_v18, %v4374_v11  ;;  %v4389_v57 = vadd.f32 %v4387_v7, %v10845_v48  ;;  %v4968_v11 = vld [vmem:[%s12222_s10] sm:$0xff] }
 0xe98   : > { %v4390_v60 = vadd.f32 %v4388_v16, %v10847_v50 }
 0xe99   : > { %v4394_v12 = vpop.permute.xlu1 %4393 }
 0xe9b   : > { %v4396_v3 = vpop.permute.xlu0 %4395 }
 0xe9c   : > { %v4400_v17 = vsel %vm12214_vm9, %v4396_v3, 0.0  ;;  %v4397_v24 = vsel %vm12216_vm13, %v4394_v12, %v4396_v3  ;;  %vm12219_vm9 = vcmask 908288   ;;  %v9558_v3 = vld [vmem:[%s12127_s13 + $0x48] sm:$0xff]  }
 0xe9d   : > { %v4402_v27 = vsel %vm10108_vm8, %v4400_v17, 0.0  ;;  %v4408_v42 = vpop.permute.xlu1 %4407  ;;  %v4401_v25 = vsel %vm10104_vm7, %v4397_v24, 0.0  ;;  %vm12221_vm13 = vmmov %vm12219_vm9  ;;  %9031 = vmatprep.subr.bf16.mxu0 %v9558_v3  ;;  %v4969_v12 = vld [vmem:[%s12222_s10 + $0x8] sm:$0xff]  ;;  %s12234_s10 = smov 120  }
 0xe9e   : > { %v4404_v15 = vadd.f32 %v4402_v27, %v4390_v60  ;;  %v4403_v32 = vadd.f32 %v4401_v25, %v4389_v57  ;;  %9032 = vmatpush3.bf16.msra.mxu0 %v9559_v4  ;;  %vm12227_vm5 = vmmov %vm12221_vm13  ;;  %v9573_v3 = vld [vmem:[%s12126_s9] ss:$8 sps:$4 sm:$0xff]   ;;  %v9576_v4 = vld [vmem:[%s12228_s7 + $0x10] sm:$0xff]  }
 0xe9f   : > { %v4410_v20 = vpop.permute.xlu0 %4409  ;;  %9033 = vmatprep.subr.bf16.mxu0 %v9560_v33  ;;  %v9577_v33 = vld [vmem:[%s12228_s7 + $0x18] sm:$0xff]  }
 0xea0   : > { %v4414_v23 = vsel %vm12215_vm10, %v4410_v20, 0.0  ;;  %v4411_v36 = vsel %vm12217_vm14, %v4408_v42, %v4410_v20  ;;  %vm12220_vm10 = vmmov %vm12218_vm3  ;;  %vm12223_vm14 = vcmask 1039360  }
 0xea1   : > { %v4416_v8 = vsel %vm10100_vm6, %v4414_v23, 0.0  ;;  %v4415_v6 = vsel %vm10096_vm4, %v4411_v36, 0.0 }
 0xea2   : > { %v4418_v29 = vadd.f32 %v4416_v8, %v4404_v15  ;;  %v4417_v48 = vadd.f32 %v4415_v6, %v4403_v32  ;;  %9034 = vmatpush3.bf16.msra.mxu0 %v9561_v47  ;;  %v9578_v47 = vld [vmem:[%s12228_s7 + $0x20] sm:$0xff]  }
 0xea3   : > { %v4422_v61 = vpop.permute.xlu0 %4421  ;;  %9179 = vmatprep.subr.bf16.mxu0 %v9752_v21 }
 0xea7   : > { %v4424_v31 = vpop.permute.xlu0 %4423  ;;  %v4436_v50 = vpop.permute.xlu1 %4435 }
 0xea8   : > { %v4428_v39 = vsel %vm12218_vm3, %v4424_v31, 0.0  ;;  %v4440_v49 = vsel %vm12219_vm9, %v4436_v50, 0.0  ;;  %v4425_v35 = vsel %vm12220_vm10, %v4422_v61, %v4424_v31  ;;  %vm12224_vm3 = vmmov %vm12223_vm14 }
 0xea9   : > { %v4430_v62 = vadd.f32 %v4428_v39, %v4418_v29  ;;  %v4442_v51 = vsel %vm10108_vm8, %v4440_v49, 0.0  ;;  %v4429_v53 = vadd.f32 %v4425_v35, %v4417_v48  ;;  %vm12225_vm9 = vmmov %vm12220_vm10  ;;  %v9565_v48 = vld [vmem:[%s12126_s9 + $0x34] ss:$8 sps:$4 sm:$0xff]  }
 0xeaa   : > { %vm12226_vm10 = vmmov %vm12225_vm9 }
 0xeab   : > { %v4444_v52 = vadd.f32 %v4442_v51, %v4430_v62  ;;  %v4434_v30 = vpop.permute.xlu0 %4433 }
 0xeac   : > { %v4437_v54 = vsel %vm12221_vm13, %v4434_v30, %v4436_v50 }
 0xead   : > { %v4452_v41 = vadd.f32 %v10867_v19, %v4444_v52  ;;  %v4441_v55 = vsel %vm10104_vm7, %v4437_v54, 0.0  ;;  %v9563_v54 = vld [vmem:[%s12126_s9 + $0x30] ss:$8 sps:$4 sm:$0xff]  }
 0xeae   : > { %v4443_v56 = vadd.f32 %v4441_v55, %v4429_v53  ;;  %v9562_v53 = vld [vmem:[%s12228_s7] sm:$0xff]  }
 0xeaf   : > { %v10913_v26 = vmax.f32 %v4452_v41, 0.0  ;;  %v9568_v41 = vld [vmem:[%s12126_s9 + $0x24] ss:$8 sps:$4 sm:$0xff]   ;;  %v9566_v55 = vld [vmem:[%s12126_s9 + $0x20] ss:$8 sps:$4 sm:$0xff]  }
 0xeb0   : > { %v4451_v63 = vadd.f32 %v10867_v19, %v4443_v56  ;;  %v9572_v56 = vld [vmem:[%s12126_s9 + $0x14] ss:$8 sps:$4 sm:$0xff]  }
 0xeb1   : > { %v4456_v28 = vpack.c.bf16 %v10913_v26, %v10913_v26 }
 0xeb2   : > { %v10919_v1 = vmax.f32 %v4451_v63, 0.0  ;;  %v9575_v63 = vld [vmem:[%s12126_s9 + $0x4] ss:$8 sps:$4 sm:$0xff]  }
 0xeb4   : > { %v4455_v18 = vpack.c.bf16 %v10919_v1, %v10919_v1  ;;  %v9433_v19 = vpack.i.bf16 %v10919_v1, %v10913_v26 }
 0xeb6   : > { %9434 = vrot.lane.b32.xlu0 %v9433_v19, %s12150_s23  ;;  %9429 = vrot.lane.b32.xlu1 %v9433_v19, %s12189_s15 }
 0xeba   : > { %4972 = vperm.xlu0 %9411, %v4968_v11   ;;  %9439 = vrot.lane.b32.xlu1 %v9433_v19, %s12151_s2  ;;  %v9581_v19 = vld [vmem:[%s12228_s7 + $0x38] sm:$0xff]   ;;  %v9582_v11 = vld [vmem:[%s12228_s7 + $0x40] sm:$0xff]  }
 0xebe   : > { %4977 = vperm.xlu1 %9412, %v4969_v12  }
 0xf28   : > { %v9435_v13 = vpop.permute.xlu0 %9434  ;;  %v9430_v14 = vpop.permute.xlu1 %9429 }
 0xf29   : > { %v9432_v16 = vunpack.i.h.bf16 %v9430_v14  ;;  %v9431_v17 = vunpack.i.l.bf16 %v9430_v14  ;;  %v9437_v20 = vunpack.i.h.bf16 %v9435_v13  ;;  %v9436_v22 = vunpack.i.l.bf16 %v9435_v13 }
 0xf2b   : > { %v4465_v7 = vsel %vm12223_vm14, %v9432_v16, %v9431_v17  ;;  %v4468_v24 = vsel %vm12224_vm3, %v9431_v17, 0.0  ;;  %v4475_v42 = vsel %vm12225_vm9, %v9437_v20, %v9436_v22  ;;  %v4478_v61 = vsel %vm12226_vm10, %v9436_v22, 0.0 }
 0xf2c   : > { %v9440_v23 = vpop.permute.xlu1 %9439  ;;  %v4469_v25 = vmax.f32 %v10919_v1, %v4465_v7  ;;  %v4470_v57 = vmax.f32 %v10913_v26, %v4468_v24  ;;  %v9579_v26 = vld [vmem:[%s12228_s7 + $0x28] sm:$0xff]   ;;  %vm12237_vm14 = vcmask 56320   ;;  %vm12238_vm3 = vcmask 7168  }
 0xf2d   : > { %v9442_v27 = vunpack.i.h.bf16 %v9440_v23  ;;  %v9441_v60 = vunpack.i.l.bf16 %v9440_v23  ;;  %vm12240_vm10 = vmmov %vm12237_vm14 }
 0xf2f   : > { %v4483_v36 = vsel %vm12221_vm13, %v9442_v27, %v9441_v60  ;;  %v4486_v8 = vsel %vm12227_vm5, %v9441_v60, 0.0  ;;  %vm12236_vm5 = vcmask 72704   ;;  %vm12241_vm13 = vmmov %vm12238_vm3 }
 0xf30   : > { %v4487_v15 = vmax.f32 %v4475_v42, %v4483_v36  ;;  %v4488_v6 = vmax.f32 %v4478_v61, %v4486_v8  ;;  %vm12239_vm9 = vmmov %vm12236_vm5 }
 0xf32   : > { %v4489_v29 = vmax.f32 %v4469_v25, %v4487_v15  ;;  %v4490_v31 = vmax.f32 %v4470_v57, %v4488_v6 }
 0xf34   : > { %v4491_v50 = vpack.c.bf16 %v4489_v29, %v4489_v29  ;;  %v4492_v32 = vpack.c.bf16 %v4490_v31, %v4490_v31 }
 0xf36   : > { %4653 = vmatprep.mubr.bf16.mxu0 %v4492_v32 }
 0xf37   : > { %4654 = vmatmul.mubr.bf16.vlgmr.msra.gmra.mxu0 %v4491_v50 }
 0xf38   : > { %9181 = vmatprep.mubr.msk.bf16.mxu0 %vm12206_vm2, %v9752_v21 }
 0xff7   : > { %v9035_v39 = vpop.f32.mrf.mxu0 }
 0xff9   : > { %v9036_v49 = vpop.f32.mrf.mxu0 }
 0xffa   : > { %v9037_v35 = vadd.f32 %v9036_v49, %v9035_v39 }
 0xffb   : > { %v9038_v62 = vpop.f32.mrf.mxu0 }
 0xffc   : > { %v4661_v51 = vpack.c.bf16 %v9037_v35, %v9037_v35 }
 0xffd   : > { %v9039_v52 = vpop.f32.mrf.mxu0 }
 0xffe   : > { %v4753_v30 = vsel %vm12074_vm0, %v4661_v51, 0 }
 0xfff   : > { %9180 = vmatpush3.bf16.msra.mxu0 %v4753_v30 }
0x1000   : > { %5364 = vmatprep.subr.bf16.mxu0 %v9565_v48 }
0x1002   : > { %9182 = vmatmul.mubr.msk.bf16.vlgmr.msra.gmra.mxu0 %vm12073_vm1, %v9562_v53 }
0x1003   : > { %5365 = vmatpush1.bf16.msra.mxu0 %v9563_v54  ;;  %9185 = vmatprep.mubr.msk.bf16.mxu0 %vm12206_vm2, %v9752_v21 }
0x1004   : > { %5366 = vmatprep.subr.bf16.mxu0 %v9568_v41 }
0x1007   : > { %5367 = vmatpush1.bf16.msra.mxu0 %v9566_v55 }
0x1008   : > { %5368 = vmatprep.subr.bf16.mxu0 %v9572_v56 }
0x100a   : > { %9186 = vmatmul.mubr.msk.bf16.gmra.mxu0 %vm12073_vm1, %v9569_v38 }
0x100b   : > { %5369 = vmatpush1.bf16.msra.mxu0 %v9570_v58  ;;  %9189 = vmatprep.mubr.msk.bf16.mxu0 %vm12206_vm2, %v9752_v21  ;;  %v4973_v58 = vpop.permute.xlu0 %4972 }
0x100c   : > { %5370 = vmatprep.subr.bf16.mxu0 %v9575_v63  ;;  %v4978_v63 = vpop.permute.xlu1 %4977 }
0x100f   : > { %5371 = vmatpush1.bf16.msra.mxu0 %v9573_v3 }
0x1010   : > { %8822 = vmatprep.subr.msk.bf16.mxu0 %vm12074_vm0, %v4456_v28  ;;  %v9580_v28 = vld [vmem:[%s12228_s7 + $0x30] sm:$0xff]   ;;  %s12232_s7 = sld [smem:[#allocation16_spill]] }
0x1012   : > { %9190 = vmatmul.mubr.msk.bf16.gmra.mxu0 %vm12073_vm1, %v9576_v4 }
0x1013   : > { %9193 = vmatprep.mubr.msk.bf16.mxu0 %vm12206_vm2, %v9752_v21 }
0x1016   : > { %v5288_v41 = vld [vmem:[%s12232_s7] sm:$0xff]  ;;  %v5289_v38 = vld [vmem:[%s12232_s7 + $0x8] sm:$0xff]  ;;  %s12248_s7 = sld [smem:[#allocation18_spill]] }
0x101a   : > { %9194 = vmatmul.mubr.msk.bf16.gmra.mxu0 %vm12073_vm1, %v9577_v33 }
0x101b   : > { %9197 = vmatprep.mubr.msk.bf16.mxu0 %vm12206_vm2, %v9752_v21 }
0x1022   : > { %9198 = vmatmul.mubr.msk.bf16.gmra.mxu0 %vm12073_vm1, %v9578_v47 }
0x1023   : > { %9201 = vmatprep.mubr.msk.bf16.mxu0 %vm12206_vm2, %v9752_v21 }
0x102a   : > { %9202 = vmatmul.mubr.msk.bf16.gmra.mxu0 %vm12073_vm1, %v9579_v26 }
0x102b   : > { %9205 = vmatprep.mubr.msk.bf16.mxu0 %vm12206_vm2, %v9752_v21 }
0x1032   : > { %9206 = vmatmul.mubr.msk.bf16.gmra.mxu0 %vm12073_vm1, %v9580_v28 }
0x1033   : > { %9209 = vmatprep.mubr.msk.bf16.mxu0 %vm12206_vm2, %v9752_v21 }
0x103a   : > { %9210 = vmatmul.mubr.msk.bf16.gmra.mxu0 %vm12073_vm1, %v9581_v19 }
0x103b   : > { %9213 = vmatprep.mubr.msk.bf16.mxu0 %vm12206_vm2, %v9752_v21 }
0x1042   : > { %9214 = vmatmul.mubr.msk.bf16.gmra.mxu0 %vm12073_vm1, %v9582_v11 }
0x1043   : > { %5388 = vmatprep.mubr.bf16.mxu0 %v9743_v0 }
0x10c2   : > { %v4789_v12 = vpop.f32.mrf.mxu0 }
0x10c3   : > { %4862 = vrot.lane.b32.xlu0 %v4789_v12, %s12229_s3 }
0x10c4   : > { %v9183_v13 = vpop.f32.mrf.mxu0 }
0x10c6   : > { %v4792_v14 = vpop.f32.mrf.mxu0 }
0x10c7   : > { %4864 = vrot.lane.b32.xlu1 %v4792_v14, %s12229_s3 }
0x10c8   : > { %v9184_v16 = vpop.f32.mrf.mxu0 }
0x10ca   : > { %v4797_v17 = vpop.f32.mrf.mxu0 }
0x10cb   : > { %4874 = vrot.lane.b32.xlu0 %v4797_v17, %s12230_s5 }
0x10cc   : > { %v9187_v20 = vpop.f32.mrf.mxu0 }
0x10ce   : > { %v4800_v22 = vpop.f32.mrf.mxu0 }
0x10cf   : > { %4876 = vrot.lane.b32.xlu1 %v4800_v22, %s12230_s5 }
0x10d0   : > { %v9188_v23 = vpop.f32.mrf.mxu0 }
0x10d2   : > { %v4805_v7 = vpop.f32.mrf.mxu0 }
0x10d3   : > { %4886 = vrot.lane.b32.xlu0 %v4805_v7, %s12231_s6 }
0x10d4   : > { %v9191_v24 = vpop.f32.mrf.mxu0 }
0x10d6   : > { %v4808_v27 = vpop.f32.mrf.mxu0 }
0x10d7   : > { %4888 = vrot.lane.b32.xlu1 %v4808_v27, %s12231_s6 }
0x10d8   : > { %v9192_v60 = vpop.f32.mrf.mxu0 }
0x10da   : > { %v4813_v42 = vpop.f32.mrf.mxu0 }
0x10db   : > { %4900 = vrot.lane.b32.xlu0 %v4813_v42, %s12188_s1 }
0x10dc   : > { %v9195_v61 = vpop.f32.mrf.mxu0 }
0x10de   : > { %v4816_v36 = vpop.f32.mrf.mxu0 }
0x10df   : > { %4902 = vrot.lane.b32.xlu1 %v4816_v36, %s12188_s1 }
0x10e0   : > { %v9196_v8 = vpop.f32.mrf.mxu0 }
0x10e2   : > { %v11001_v25 = vpop.f32.mrf.mxu0 }
0x10e4   : > { %v9199_v15 = vpop.f32.mrf.mxu0 }
0x10e6   : > { %v11003_v57 = vpop.f32.mrf.mxu0 }
0x10e8   : > { %v9200_v6 = vpop.f32.mrf.mxu0 }
0x10ea   : > { %v4829_v29 = vpop.f32.mrf.mxu0 }
0x10eb   : > { %4916 = vrot.lane.b32.xlu0 %v4829_v29, %s12189_s15 }
0x10ec   : > { %v9203_v31 = vpop.f32.mrf.mxu0 }
0x10ee   : > { %v4832_v50 = vpop.f32.mrf.mxu0 }
0x10ef   : > { %4918 = vrot.lane.b32.xlu1 %v4832_v50, %s12189_s15 }
0x10f0   : > { %v9204_v32 = vpop.f32.mrf.mxu0 }
0x10f2   : > { %v4837_v39 = vpop.f32.mrf.mxu0 }
0x10f3   : > { %4930 = vrot.lane.b32.xlu0 %v4837_v39, %s12233_s8 }
0x10f4   : > { %v9207_v49 = vpop.f32.mrf.mxu0 }
0x10f6   : > { %v4840_v35 = vpop.f32.mrf.mxu0 }
0x10f7   : > { %4932 = vrot.lane.b32.xlu1 %v4840_v35, %s12233_s8 }
0x10f8   : > { %v9208_v62 = vpop.f32.mrf.mxu0 }
0x10fa   : > { %v4845_v51 = vpop.f32.mrf.mxu0 }
0x10fb   : > { %4944 = vrot.lane.b32.xlu0 %v4845_v51, %s12234_s10 }
0x10fc   : > { %v9211_v48 = vpop.f32.mrf.mxu0 }
0x10fe   : > { %v4848_v52 = vpop.f32.mrf.mxu0 }
0x10ff   : > { %4946 = vrot.lane.b32.xlu1 %v4848_v52, %s12234_s10 }
0x1100   : > { %v9212_v30 = vpop.f32.mrf.mxu0 }
0x1102   : > { %v4853_v53 = vpop.f32.mrf.mxu0 }
0x1103   : > { %4956 = vrot.lane.b32.xlu0 %v4853_v53, %s12235_s11 }
0x1104   : > { %v9215_v54 = vpop.f32.mrf.mxu0 }
0x1106   : > { %v4856_v55 = vpop.f32.mrf.mxu0 }
0x1107   : > { %5292 = vperm.xlu0 %9411, %v5288_v41   ;;  %4958 = vrot.lane.b32.xlu1 %v4856_v55, %s12235_s11 }
0x1108   : > { %v9216_v56 = vpop.f32.mrf.mxu0 }
0x110b   : > { %5297 = vperm.xlu1 %9412, %v5289_v38  }
0x1135   : > { %v4863_v3 = vpop.permute.xlu0 %4862 }
0x1136   : > { %v4868_v11 = vsel %vm12236_vm5, 0.0, %v4863_v3  ;;  %vm12242_vm5 = vcmask 515072  }
0x1137   : > { %v4870_v16 = vsel %vm10346_vm12, %v4868_v11, 0.0 }
0x1139   : > { %v4865_v4 = vpop.permute.xlu1 %4864 }
0x113a   : > { %v4869_v23 = vsel %vm12239_vm9, 0.0, %v4865_v4 }
0x113b   : > { %v4871_v36 = vsel %vm10346_vm12, %v4869_v23, 0.0 }
0x113d   : > { %v4875_v33 = vpop.permute.xlu0 %4874 }
0x113e   : > { %v4880_v13 = vsel %vm12073_vm1, 0.0, %v4875_v33 }
0x113f   : > { %v4882_v7 = vadd.f32 %v4880_v13, %v4870_v16 }
0x1141   : > { %v4877_v47 = vpop.permute.xlu1 %4876 }
0x1142   : > { %v4881_v27 = vsel %vm12073_vm1, 0.0, %v4877_v47 }
0x1143   : > { %v4883_v29 = vadd.f32 %v4881_v27, %v4871_v36  ;;  %v9588_v36 = vld [vmem:[%s12248_s7 + $0x28] sm:$0xff]  }
0x1145   : > { %v4887_v26 = vpop.permute.xlu0 %4886 }
0x1146   : > { %v4892_v12 = vsel %vm12237_vm14, 0.0, %v4887_v26  ;;  %vm12243_vm14 = vcmask 465920  }
0x1147   : > { %v4894_v17 = vsel %vm10351_vm11, %v4892_v12, 0.0  ;;  %vm12245_vm9 = vmmov %vm12243_vm14 }
0x1148   : > { %v4896_v42 = vadd.f32 %v4894_v17, %v4882_v7 }
0x1149   : > { %v4889_v28 = vpop.permute.xlu1 %4888 }
0x114a   : > { %v4893_v24 = vsel %vm12240_vm10, 0.0, %v4889_v28  ;;  %vm12246_vm10 = vcmask 457728  }
0x114b   : > { %v4895_v8 = vsel %vm10351_vm11, %v4893_v24, 0.0 }
0x114c   : > { %v4897_v39 = vadd.f32 %v4895_v8, %v4883_v29  ;;  %v9589_v8 = vld [vmem:[%s12248_s7 + $0x30] sm:$0xff]  }
0x114d   : > { %v4901_v19 = vpop.permute.xlu0 %4900 }
0x114e   : > { %v4906_v14 = vsel %vm12238_vm3, 0.0, %v4901_v19  ;;  %vm12244_vm3 = vmmov %vm12242_vm5 }
0x114f   : > { %v4908_v60 = vsel %vm10346_vm12, %v4906_v14, 0.0 }
0x1150   : > { %v4910_v31 = vadd.f32 %v4908_v60, %v4896_v42  ;;  %v9583_v60 = vld [vmem:[%s12248_s7] sm:$0xff]   ;;  %v9584_v42 = vld [vmem:[%s12248_s7 + $0x8] sm:$0xff]  }
0x1151   : > { %v4903_v20 = vpop.permute.xlu1 %4902 }
0x1152   : > { %v4907_v61 = vsel %vm12241_vm13, 0.0, %v4903_v20  ;;  %v4912_v48 = vadd.f32 %v4910_v31, %v11001_v25  ;;  %vm12247_vm13 = vcmask 449536  }
0x1153   : > { %v4909_v32 = vsel %vm10346_vm12, %v4907_v61, 0.0  ;;  %v9587_v61 = vld [vmem:[%s12248_s7 + $0x20] sm:$0xff]  }
0x1154   : > { %v4911_v51 = vadd.f32 %v4909_v32, %v4897_v39 }
0x1156   : > { %v4913_v38 = vadd.f32 %v4911_v51, %v11003_v57 }
0x115d   : > { %v4917_v22 = vpop.permute.xlu0 %4916 }
0x115e   : > { %v4922_v50 = vsel %vm12242_vm5, %v4917_v22, 0.0  ;;  %vm12249_vm5 = vmmov %vm12246_vm10 }
0x115f   : > { %v4924_v35 = vsel %vm10351_vm11, %v4922_v50, 0.0 }
0x1160   : > { %v4926_v54 = vadd.f32 %v4924_v35, %v4912_v48 }
0x1161   : > { %v4919_v15 = vpop.permute.xlu1 %4918 }
0x1162   : > { %v4923_v52 = vsel %vm12244_vm3, %v4919_v15, 0.0  ;;  %vm12251_vm3 = vcmask 130048   ;;  %v9590_v15 = vld [vmem:[%s12248_s7 + $0x38] sm:$0xff]  }
0x1163   : > { %v4925_v55 = vsel %vm10351_vm11, %v4923_v52, 0.0 }
0x1164   : > { %v4927_v47 = vadd.f32 %v4925_v55, %v4913_v38 }
0x1165   : > { %v4931_v6 = vpop.permute.xlu0 %4930 }
0x1166   : > { %v4936_v49 = vsel %vm12243_vm14, %v4931_v6, 0.0  ;;  %vm12250_vm14 = vmmov %vm12247_vm13  ;;  %v9591_v6 = vld [vmem:[%s12248_s7 + $0x40] sm:$0xff]  }
0x1167   : > { %v4938_v53 = vsel %vm10346_vm12, %v4936_v49, 0.0 }
0x1168   : > { %v4940_v3 = vadd.f32 %v4938_v53, %v4926_v54 }
0x1169   : > { %v4933_v62 = vpop.permute.xlu1 %4932 }
0x116a   : > { %v4937_v41 = vsel %vm12245_vm9, %v4933_v62, 0.0  ;;  %vm12252_vm9 = vmmov %vm12251_vm3 }
0x116b   : > { %v4939_v25 = vsel %vm10346_vm12, %v4937_v41, 0.0 }
0x116c   : > { %v4941_v12 = vadd.f32 %v4939_v25, %v4927_v47 }
0x116d   : > { %v4945_v30 = vpop.permute.xlu0 %4944 }
0x116e   : > { %v4950_v56 = vsel %vm12246_vm10, %v4945_v30, 0.0  ;;  %vm12253_vm10 = vmmov %vm12251_vm3 }
0x116f   : > { %v4952_v26 = vadd.f32 %v4950_v56, %v4940_v3 }
0x1171   : > { %v4947_v4 = vpop.permute.xlu1 %4946 }
0x1172   : > { %v4951_v19 = vsel %vm12249_vm5, %v4947_v4, 0.0  ;;  %vm12255_vm5 = vmmov %vm12251_vm3 }
0x1173   : > { %v4953_v14 = vadd.f32 %v4951_v19, %v4941_v12 }
0x1175   : > { %v4957_v33 = vpop.permute.xlu0 %4956 }
0x1176   : > { %v4962_v28 = vsel %vm12247_vm13, %v4957_v33, 0.0  ;;  %vm12254_vm13 = vmmov %vm12251_vm3 }
0x1177   : > { %v4964_v11 = vsel %vm10351_vm11, %v4962_v28, 0.0 }
0x1178   : > { %v4966_v13 = vadd.f32 %v4964_v11, %v4952_v26 }
0x1179   : > { %v4959_v57 = vpop.permute.xlu1 %4958 }
0x117a   : > { %v4963_v16 = vsel %vm12250_vm14, %v4959_v57, 0.0  ;;  %v4980_v20 = vadd.f32 %v4973_v58, %v4966_v13  ;;  %v9585_v58 = vld [vmem:[%s12248_s7 + $0x10] sm:$0xff]   ;;  %vm12256_vm14 = vmmov %vm12251_vm3 }
0x117b   : > { %v4965_v17 = vsel %vm10351_vm11, %v4963_v16, 0.0 }
0x117c   : > { %v4967_v22 = vadd.f32 %v4965_v17, %v4953_v14  ;;  %v4982_v7 = vmax.f32 %v4980_v20, 0.0 }
0x117e   : > { %v4981_v23 = vadd.f32 %v4978_v63, %v4967_v22  ;;  %v9586_v63 = vld [vmem:[%s12248_s7 + $0x18] sm:$0xff]   ;;  %s12259_s7 = sld [smem:[#allocation26_spill]] }
0x1180   : > { %v4983_v24 = vmax.f32 %v4981_v23, 0.0 }
0x1182   : > { %v4984_v27 = vpack.c.bf16 %v4983_v24, %v4982_v7  ;;  %v5293_v24 = vpop.permute.xlu0 %5292 }
0x1184   : > { %9218 = vmatpush3.bf16.msra.mxu1 %v4984_v27  ;;  %v5771_v22 = vld [vmem:[%s12259_s7] sm:$0xff]  ;;  %s12273_s7 = sld [smem:[#allocation28_spill]] }
0x1186   : > { %v5298_v27 = vpop.permute.xlu1 %5297 }
0x1187   : > { %9220 = vmatmul.mubr.msk.bf16.vlgmr.msra.gmra.mxu1 %vm12251_vm3, %v9583_v60 }
0x1188   : > { %9223 = vmatprep.mubr.msk.bf16.mxu1 %vm12206_vm2, %v9752_v21 }
0x118a   : > { %v9598_v1 = vld [vmem:[%s12273_s7 + $0x18] sm:$0xff]  }
0x118f   : > { %9224 = vmatmul.mubr.msk.bf16.gmra.mxu1 %vm12252_vm9, %v9584_v42  ;;  %vm12257_vm9 = vmmov %vm12251_vm3 }
0x1190   : > { %9227 = vmatprep.mubr.msk.bf16.mxu1 %vm12206_vm2, %v9752_v21 }
0x1197   : > { %9228 = vmatmul.mubr.msk.bf16.gmra.mxu1 %vm12253_vm10, %v9585_v58  ;;  %vm12258_vm10 = vmmov %vm12251_vm3 }
0x1198   : > { %9231 = vmatprep.mubr.msk.bf16.mxu1 %vm12206_vm2, %v9752_v21 }
0x119f   : > { %9232 = vmatmul.mubr.msk.bf16.gmra.mxu1 %vm12254_vm13, %v9586_v63  ;;  %vm12260_vm13 = vcmask 72704  }
0x11a0   : > { %9235 = vmatprep.mubr.msk.bf16.mxu1 %vm12206_vm2, %v9752_v21 }
0x11a7   : > { %9236 = vmatmul.mubr.msk.bf16.gmra.mxu1 %vm12255_vm5, %v9587_v61  ;;  %vm12261_vm5 = vcmask 56320  }
0x11a8   : > { %9239 = vmatprep.mubr.msk.bf16.mxu1 %vm12206_vm2, %v9752_v21 }
0x11af   : > { %9240 = vmatmul.mubr.msk.bf16.gmra.mxu1 %vm12256_vm14, %v9588_v36  ;;  %vm12262_vm14 = vcmask 7168  }
0x11b0   : > { %9243 = vmatprep.mubr.msk.bf16.mxu1 %vm12206_vm2, %v9752_v21 }
0x11b7   : > { %9244 = vmatmul.mubr.msk.bf16.gmra.mxu1 %vm12251_vm3, %v9589_v8  ;;  %vm12263_vm3 = vmmov %vm12260_vm13 }
0x11b8   : > { %9247 = vmatprep.mubr.msk.bf16.mxu1 %vm12206_vm2, %v9752_v21 }
0x11bf   : > { %9248 = vmatmul.mubr.msk.bf16.gmra.mxu1 %vm12257_vm9, %v9590_v15  ;;  %vm12264_vm9 = vmmov %vm12261_vm5 }
0x11c0   : > { %9251 = vmatprep.mubr.msk.bf16.mxu1 %vm12206_vm2, %v9752_v21 }
0x11c7   : > { %9252 = vmatmul.mubr.msk.bf16.gmra.mxu1 %vm12258_vm10, %v9591_v6  ;;  %vm12265_vm10 = vmmov %vm12262_vm14 }
0x11c8   : > { %5489 = vmatprep.mubr.bf16.mxu1 %v9743_v0 }
0x1247   : > { %v5109_v29 = vpop.f32.mrf.mxu1 }
0x1248   : > { %5182 = vrot.lane.b32.xlu0 %v5109_v29, %s12229_s3 }
0x1249   : > { %v9221_v31 = vpop.f32.mrf.mxu1 }
0x124b   : > { %v5112_v50 = vpop.f32.mrf.mxu1 }
0x124c   : > { %5184 = vrot.lane.b32.xlu1 %v5112_v50, %s12229_s3 }
0x124d   : > { %v9222_v32 = vpop.f32.mrf.mxu1 }
0x124f   : > { %v5117_v39 = vpop.f32.mrf.mxu1 }
0x1250   : > { %5194 = vrot.lane.b32.xlu0 %v5117_v39, %s12230_s5 }
0x1251   : > { %v9225_v49 = vpop.f32.mrf.mxu1 }
0x1253   : > { %v5120_v35 = vpop.f32.mrf.mxu1 }
0x1254   : > { %5196 = vrot.lane.b32.xlu1 %v5120_v35, %s12230_s5 }
0x1255   : > { %v9226_v62 = vpop.f32.mrf.mxu1 }
0x1257   : > { %v5125_v51 = vpop.f32.mrf.mxu1 }
0x1258   : > { %5206 = vrot.lane.b32.xlu0 %v5125_v51, %s12231_s6 }
0x1259   : > { %v9229_v48 = vpop.f32.mrf.mxu1 }
0x125b   : > { %v5128_v52 = vpop.f32.mrf.mxu1 }
0x125c   : > { %5208 = vrot.lane.b32.xlu1 %v5128_v52, %s12231_s6 }
0x125d   : > { %v9230_v30 = vpop.f32.mrf.mxu1 }
0x125f   : > { %v5133_v53 = vpop.f32.mrf.mxu1 }
0x1260   : > { %5220 = vrot.lane.b32.xlu0 %v5133_v53, %s12188_s1 }
0x1261   : > { %v9233_v54 = vpop.f32.mrf.mxu1 }
0x1263   : > { %v5136_v41 = vpop.f32.mrf.mxu1 }
0x1264   : > { %5222 = vrot.lane.b32.xlu1 %v5136_v41, %s12188_s1 }
0x1265   : > { %v9234_v55 = vpop.f32.mrf.mxu1 }
0x1267   : > { %v11100_v56 = vpop.f32.mrf.mxu1 }
0x1269   : > { %v9237_v38 = vpop.f32.mrf.mxu1 }
0x126b   : > { %v11102_v3 = vpop.f32.mrf.mxu1 }
0x126d   : > { %v9238_v4 = vpop.f32.mrf.mxu1 }
0x126f   : > { %v5149_v25 = vpop.f32.mrf.mxu1 }
0x1270   : > { %5236 = vrot.lane.b32.xlu0 %v5149_v25, %s12189_s15 }
0x1271   : > { %v9241_v33 = vpop.f32.mrf.mxu1 }
0x1273   : > { %v5152_v47 = vpop.f32.mrf.mxu1 }
0x1274   : > { %5238 = vrot.lane.b32.xlu1 %v5152_v47, %s12189_s15 }
0x1275   : > { %v9242_v26 = vpop.f32.mrf.mxu1 }
0x1277   : > { %v5157_v28 = vpop.f32.mrf.mxu1 }
0x1278   : > { %5250 = vrot.lane.b32.xlu0 %v5157_v28, %s12233_s8 }
0x1279   : > { %v9245_v19 = vpop.f32.mrf.mxu1 }
0x127b   : > { %v5160_v11 = vpop.f32.mrf.mxu1 }
0x127c   : > { %5252 = vrot.lane.b32.xlu1 %v5160_v11, %s12233_s8 }
0x127d   : > { %v9246_v12 = vpop.f32.mrf.mxu1 }
0x127f   : > { %v5165_v13 = vpop.f32.mrf.mxu1 }
0x1280   : > { %5264 = vrot.lane.b32.xlu0 %v5165_v13, %s12234_s10 }
0x1281   : > { %v9249_v57 = vpop.f32.mrf.mxu1 }
0x1283   : > { %v5168_v14 = vpop.f32.mrf.mxu1 }
0x1284   : > { %5266 = vrot.lane.b32.xlu1 %v5168_v14, %s12234_s10 }
0x1285   : > { %v9250_v16 = vpop.f32.mrf.mxu1 }
0x1287   : > { %v5173_v17 = vpop.f32.mrf.mxu1 }
0x1288   : > { %5276 = vrot.lane.b32.xlu0 %v5173_v17, %s12235_s11 }
0x1289   : > { %v9253_v20 = vpop.f32.mrf.mxu1 }
0x128b   : > { %v5176_v23 = vpop.f32.mrf.mxu1 }
0x128c   : > { %5774 = vperm.xlu0 %9411, %v5771_v22   ;;  %5278 = vrot.lane.b32.xlu1 %v5176_v23, %s12235_s11 }
0x128d   : > { %v9254_v7 = vpop.f32.mrf.mxu1 }
0x12ba   : > { %v5183_v60 = vpop.permute.xlu0 %5182 }
0x12bb   : > { %v5188_v15 = vsel %vm12260_vm13, 0.0, %v5183_v60  ;;  %vm12266_vm13 = vcmask 515072  }
0x12bc   : > { %v5190_v50 = vsel %vm10346_vm12, %v5188_v15, 0.0 }
0x12be   : > { %v5185_v42 = vpop.permute.xlu1 %5184 }
0x12bf   : > { %v5189_v35 = vsel %vm12263_vm3, 0.0, %v5185_v42 }
0x12c0   : > { %v5191_v54 = vsel %vm10346_vm12, %v5189_v35, 0.0 }
0x12c2   : > { %v5195_v58 = vpop.permute.xlu0 %5194 }
0x12c3   : > { %v5200_v29 = vsel %vm12073_vm1, 0.0, %v5195_v58 }
0x12c4   : > { %v5202_v62 = vadd.f32 %v5200_v29, %v5190_v50 }
0x12c6   : > { %v5197_v63 = vpop.permute.xlu1 %5196 }
0x12c7   : > { %v5201_v48 = vsel %vm12073_vm1, 0.0, %v5197_v63 }
0x12c8   : > { %v5203_v4 = vadd.f32 %v5201_v48, %v5191_v54 }
0x12ca   : > { %v5207_v61 = vpop.permute.xlu0 %5206 }
0x12cb   : > { %v5212_v6 = vsel %vm12261_vm5, 0.0, %v5207_v61  ;;  %vm12267_vm5 = vcmask 465920  }
0x12cc   : > { %v5214_v32 = vsel %vm10351_vm11, %v5212_v6, 0.0  ;;  %vm12269_vm3 = vmmov %vm12267_vm5 }
0x12cd   : > { %v5216_v30 = vadd.f32 %v5214_v32, %v5202_v62 }
0x12ce   : > { %v5209_v36 = vpop.permute.xlu1 %5208 }
0x12cf   : > { %v5213_v51 = vsel %vm12264_vm9, 0.0, %v5209_v36  ;;  %vm12270_vm9 = vcmask 457728  }
0x12d0   : > { %v5215_v41 = vsel %vm10351_vm11, %v5213_v51, 0.0 }
0x12d1   : > { %v5217_v26 = vadd.f32 %v5215_v41, %v5203_v4 }
0x12d2   : > { %v5221_v8 = vpop.permute.xlu0 %5220 }
0x12d3   : > { %v5226_v31 = vsel %vm12262_vm14, 0.0, %v5221_v8  ;;  %vm12268_vm14 = vmmov %vm12266_vm13 }
0x12d4   : > { %v5228_v52 = vsel %vm10346_vm12, %v5226_v31, 0.0 }
0x12d5   : > { %v5230_v25 = vadd.f32 %v5228_v52, %v5216_v30  ;;  %v5577_v52 = vsel %vm12074_vm0, %v4455_v18, 0  ;;  %v9592_v30 = vld [vmem:[%s12273_s7] sm:$0xff]  }
0x12d6   : > { %v5223_v39 = vpop.permute.xlu1 %5222  ;;  %v9600_v18 = vld [vmem:[%s12273_s7 + $0x20] ss:$0 sps:$4 sm:$0xff]  }
0x12d7   : > { %v5227_v53 = vsel %vm12265_vm10, 0.0, %v5223_v39  ;;  %v5232_v13 = vadd.f32 %v5230_v25, %v11100_v56  ;;  %vm12271_vm10 = vcmask 449536   ;;  %v9593_v25 = vld [vmem:[%s12276_s14] sm:$0xff]  }
0x12d8   : > { %v5229_v47 = vsel %vm10346_vm12, %v5227_v53, 0.0 }
0x12d9   : > { %v5231_v12 = vadd.f32 %v5229_v47, %v5217_v26  ;;  %v9597_v47 = vld [vmem:[%s12276_s14 + $0x10] sm:$0xff]   ;;  %v9599_v26 = vld [vmem:[%s12276_s14 + $0x18] sm:$0xff]  }
0x12db   : > { %v5233_v7 = vadd.f32 %v5231_v12, %v11102_v3 }
0x12e2   : > { %v5237_v49 = vpop.permute.xlu0 %5236 }
0x12e3   : > { %v5242_v33 = vsel %vm12266_vm13, %v5237_v49, 0.0  ;;  %vm12272_vm13 = vmmov %vm12270_vm9 }
0x12e4   : > { %v5244_v19 = vsel %vm10351_vm11, %v5242_v33, 0.0  ;;  %v9595_v33 = vld [vmem:[%s12276_s14 + $0x8] sm:$0xff]  }
0x12e5   : > { %v5246_v17 = vadd.f32 %v5244_v19, %v5232_v13 }
0x12e6   : > { %v5239_v55 = vpop.permute.xlu1 %5238 }
0x12e7   : > { %v5243_v57 = vsel %vm12268_vm14, %v5239_v55, 0.0  ;;  %vm12275_vm14 = vcmask 523264  }
0x12e8   : > { %v5245_v22 = vsel %vm10351_vm11, %v5243_v57, 0.0 }
0x12e9   : > { %v5247_v63 = vadd.f32 %v5245_v22, %v5233_v7 }
0x12ea   : > { %v5251_v38 = vpop.permute.xlu0 %5250 }
0x12eb   : > { %v5256_v28 = vsel %vm12267_vm5, %v5251_v38, 0.0  ;;  %vm12274_vm5 = vmmov %vm12271_vm10 }
0x12ec   : > { %v5258_v16 = vsel %vm10346_vm12, %v5256_v28, 0.0  ;;  %v9601_v28 = vld [vmem:[%s12276_s14 + $0x20] ss:$0 sps:$4 sm:$0xff]   ;;  %s12283_s14 = smov 16  }
0x12ed   : > { %v5260_v60 = vadd.f32 %v5258_v16, %v5246_v17 }
0x12ee   : > { %v5253_v11 = vpop.permute.xlu1 %5252 }
0x12ef   : > { %v5257_v20 = vsel %vm12269_vm3, %v5253_v11, 0.0  ;;  %vm12277_vm3 = vcmask 130048  }
0x12f0   : > { %v5259_v56 = vsel %vm10346_vm12, %v5257_v20, 0.0 }
0x12f1   : > { %v5261_v6 = vadd.f32 %v5259_v56, %v5247_v63 }
0x12f2   : > { %v5265_v14 = vpop.permute.xlu0 %5264 }
0x12f3   : > { %v5270_v23 = vsel %vm12270_vm9, %v5265_v14, 0.0  ;;  %vm12278_vm9 = vmmov %vm12277_vm3 }
0x12f4   : > { %v5272_v61 = vadd.f32 %v5270_v23, %v5260_v60 }
0x12f6   : > { %v5267_v42 = vpop.permute.xlu1 %5266 }
0x12f7   : > { %v5271_v8 = vsel %vm12272_vm13, %v5267_v42, 0.0  ;;  %vm12280_vm13 = vmmov %vm12277_vm3 }
0x12f8   : > { %v5273_v3 = vadd.f32 %v5271_v8, %v5261_v6 }
0x12fa   : > { %v5277_v58 = vpop.permute.xlu0 %5276 }
0x12fb   : > { %v5282_v36 = vsel %vm12271_vm10, %v5277_v58, 0.0  ;;  %vm12279_vm10 = vmmov %vm12277_vm3 }
0x12fc   : > { %v5284_v15 = vsel %vm10351_vm11, %v5282_v36, 0.0 }
0x12fd   : > { %v5286_v29 = vadd.f32 %v5284_v15, %v5272_v61 }
0x12fe   : > { %v5279_v31 = vpop.permute.xlu1 %5278 }
0x12ff   : > { %v5283_v50 = vsel %vm12274_vm5, %v5279_v31, 0.0  ;;  %v5300_v39 = vadd.f32 %v5293_v24, %v5286_v29  ;;  %v9594_v24 = vld [vmem:[%s12273_s7 + $0x8] sm:$0xff]   ;;  %vm12281_vm5 = vmmov %vm12277_vm3 }
0x1300   : > { %v5285_v32 = vsel %vm10351_vm11, %v5283_v50, 0.0 }
0x1301   : > { %v5287_v49 = vadd.f32 %v5285_v32, %v5273_v3  ;;  %v5302_v62 = vmax.f32 %v5300_v39, 0.0 }
0x1303   : > { %v5301_v35 = vadd.f32 %v5298_v27, %v5287_v49  ;;  %v9596_v27 = vld [vmem:[%s12273_s7 + $0x10] sm:$0xff]   ;;  %s12282_s7 = smov 17  }
0x1305   : > { %v5303_v51 = vmax.f32 %v5301_v35, 0.0 }
0x1307   : > { %v5304_v48 = vpack.c.bf16 %v5303_v51, %v5302_v62 }
0x1309   : > { %8806 = vmatmul.mubr.msk.bf16.vlgmr.msra.gmra.mxu0 %vm12275_vm14, %v5304_v48  ;;  %vm12285_vm14 = vcmask 138240  }
0x130a   : > { %5597 = vmatpush1.bf16.msra.mxu0 %v5577_v52  ;;  %5614 = vmatprep.mubr.bf16.mxu0 %v9743_v0 }
0x1311   : > { %8823 = vmatmul.mubr.msk.bf16.vlgmr.msra.gmra.mxu0 %vm12073_vm1, %v9592_v30 }
0x1312   : > { %5624 = vmatprep.mubr.bf16.mxu0 %v9743_v0 }
0x1319   : > { %8824 = vmatmul.mubr.msk.bf16.gmra.mxu0 %vm12073_vm1, %v9594_v24 }
0x131a   : > { %5634 = vmatprep.mubr.bf16.mxu0 %v9743_v0 }
0x1321   : > { %8825 = vmatmul.mubr.msk.bf16.gmra.mxu0 %vm12073_vm1, %v9596_v27 }
0x1322   : > { %5644 = vmatprep.mubr.bf16.mxu0 %v9743_v0 }
0x1329   : > { %8826 = vmatmul.mubr.msk.bf16.gmra.mxu0 %vm12073_vm1, %v9598_v1 }
0x132a   : > { %5654 = vmatprep.mubr.bf16.mxu0 %v9743_v0 }
0x1331   : > { %8827 = vmatmul.mubr.msk.bf16.gmra.mxu0 %vm12073_vm1, %v9600_v18  ;;  %vm12290_vm1 = vcmask 7168  }
0x1332   : > { %6085 = vmatprep.mubr.bf16.mxu0 %v9743_v0  ;;  %vm12291_vm0 = vmmov %vm12290_vm1 }
0x13c9   : > { %v5390_v53 = vpop.f32.mrf.mxu0 }
0x13cb   : > { %v5392_v54 = vpop.f32.mrf.mxu0 }
0x13cd   : > { %v5394_v41 = vpop.f32.mrf.mxu0 }
0x13ce   : > { %v5399_v4 = vpack.c.bf16 %v5394_v41, %v5390_v53 }
0x13cf   : > { %v5396_v55 = vpop.f32.mrf.mxu0 }
0x13d0   : > { %v5400_v38 = vpack.c.bf16 %v5396_v55, %v5392_v54 }
0x13d1   : > { %v5616_v19 = vpop.f32.mrf.mxu0 }
0x13d2   : > { %5471 = vmatprep.subr.bf16.mxu1 %v5400_v38 }
0x13d3   : > { %5472 = vmatpush1.bf16.msra.mxu1 %v5399_v4  ;;  %v5618_v11 = vpop.f32.mrf.mxu0 }
0x13d5   : > { %v5620_v12 = vpop.f32.mrf.mxu0 }
0x13d6   : > { %8812 = vmatmul.mubr.msk.bf16.vlgmr.msra.gmra.mxu1 %vm12277_vm3, %v9593_v25  ;;  %vm12286_vm3 = vmmov %vm12285_vm14 }
0x13d7   : > { %5499 = vmatprep.mubr.bf16.mxu1 %v9743_v0  ;;  %v5622_v13 = vpop.f32.mrf.mxu0 }
0x13d9   : > { %v5626_v57 = vpop.f32.mrf.mxu0 }
0x13db   : > { %v5628_v14 = vpop.f32.mrf.mxu0 }
0x13dd   : > { %v5630_v16 = vpop.f32.mrf.mxu0 }
0x13de   : > { %8813 = vmatmul.mubr.msk.bf16.gmra.mxu1 %vm12278_vm9, %v9595_v33  ;;  %vm12287_vm9 = vcmask 121856  }
0x13df   : > { %5509 = vmatprep.mubr.bf16.mxu1 %v9743_v0  ;;  %v5632_v17 = vpop.f32.mrf.mxu0 }
0x13e1   : > { %v11191_v20 = vpop.f32.mrf.mxu0 }
0x13e3   : > { %v11193_v22 = vpop.f32.mrf.mxu0 }
0x13e5   : > { %v5640_v23 = vpop.f32.mrf.mxu0 }
0x13e6   : > { %8814 = vmatmul.mubr.msk.bf16.gmra.mxu1 %vm12279_vm10, %v9597_v47  ;;  %vm12288_vm10 = vmmov %vm12287_vm9 }
0x13e7   : > { %5519 = vmatprep.mubr.bf16.mxu1 %v9743_v0  ;;  %v5642_v7 = vpop.f32.mrf.mxu0 }
0x13e9   : > { %v5646_v60 = vpop.f32.mrf.mxu0 }
0x13eb   : > { %v5648_v42 = vpop.f32.mrf.mxu0 }
0x13ed   : > { %v5650_v56 = vpop.f32.mrf.mxu0 }
0x13ee   : > { %8815 = vmatmul.mubr.msk.bf16.gmra.mxu1 %vm12280_vm13, %v9599_v26  ;;  %vm12289_vm13 = vmmov %vm12281_vm5 }
0x13ef   : > { %5529 = vmatprep.mubr.bf16.mxu1 %v9743_v0  ;;  %v5652_v58 = vpop.f32.mrf.mxu0 }
0x13f1   : > { %v5656_v63 = vpop.f32.mrf.mxu0 }
0x13f3   : > { %v5658_v61 = vpop.f32.mrf.mxu0 }
0x13f5   : > { %v5660_v36 = vpop.f32.mrf.mxu0 }
0x13f6   : > { %8816 = vmatmul.mubr.msk.bf16.gmra.mxu1 %vm12281_vm5, %v9601_v28 }
0x13f7   : > { %5868 = vmatprep.mubr.bf16.mxu1 %v9743_v0  ;;  %v5661_v8 = vpop.f32.mrf.mxu0 }
0x1496   : > { %v5491_v15 = vpop.f32.mrf.mxu1 }
0x1497   : > { %v5617_v6 = vadd.f32 %v5616_v19, %v5491_v15 }
0x1498   : > { %v5493_v29 = vpop.f32.mrf.mxu1 }
0x1499   : > { %v5619_v31 = vadd.f32 %v5618_v11, %v5493_v29  ;;  %5665 = vrot.lane.b32.xlu0 %v5617_v6, %s12282_s7 }
0x149a   : > { %v5495_v3 = vpop.f32.mrf.mxu1 }
0x149b   : > { %v5621_v50 = vadd.f32 %v5620_v12, %v5495_v3  ;;  %5667 = vrot.lane.b32.xlu1 %v5619_v31, %s12282_s7 }
0x149c   : > { %v5497_v32 = vpop.f32.mrf.mxu1 }
0x149d   : > { %v5623_v39 = vadd.f32 %v5622_v13, %v5497_v32  ;;  %5677 = vrot.lane.b32.xlu0 %v5621_v50, %s12283_s14 }
0x149e   : > { %v5501_v49 = vpop.f32.mrf.mxu1 }
0x149f   : > { %v5627_v35 = vadd.f32 %v5626_v57, %v5501_v49  ;;  %5679 = vrot.lane.b32.xlu1 %v5623_v39, %s12283_s14 }
0x14a0   : > { %v5503_v62 = vpop.f32.mrf.mxu1 }
0x14a1   : > { %v5629_v51 = vadd.f32 %v5628_v14, %v5503_v62  ;;  %5689 = vrot.lane.b32.xlu0 %v5627_v35, %s12207_s0 }
0x14a2   : > { %v5505_v48 = vpop.f32.mrf.mxu1 }
0x14a3   : > { %v5631_v52 = vadd.f32 %v5630_v16, %v5505_v48  ;;  %5691 = vrot.lane.b32.xlu1 %v5629_v51, %s12207_s0  ;;  %v6025_v16 = vld [vmem:[%s12284_s16] sm:$0xff]  ;;  %s12298_s16 = sld [smem:[#allocation30_spill]] }
0x14a4   : > { %v5507_v30 = vpop.f32.mrf.mxu1 }
0x14a5   : > { %v5633_v24 = vadd.f32 %v5632_v17, %v5507_v30  ;;  %5703 = vrot.lane.b32.xlu0 %v5631_v52, %s12188_s1  ;;  %v11216_v17 = vpop.permute.xlu0 %5774 }
0x14a6   : > { %v11202_v27 = vpop.f32.mrf.mxu1 }
0x14a7   : > { %5705 = vrot.lane.b32.xlu1 %v5633_v24, %s12188_s1 }
0x14a8   : > { %v11205_v1 = vpop.f32.mrf.mxu1 }
0x14aa   : > { %v5515_v18 = vpop.f32.mrf.mxu1 }
0x14ab   : > { %v5641_v53 = vadd.f32 %v5640_v23, %v5515_v18 }
0x14ac   : > { %v5517_v54 = vpop.f32.mrf.mxu1 }
0x14ad   : > { %v5643_v41 = vadd.f32 %v5642_v7, %v5517_v54  ;;  %5719 = vrot.lane.b32.xlu0 %v5641_v53, %s12189_s15 }
0x14ae   : > { %v5521_v55 = vpop.f32.mrf.mxu1 }
0x14af   : > { %v5647_v38 = vadd.f32 %v5646_v60, %v5521_v55  ;;  %5721 = vrot.lane.b32.xlu1 %v5643_v41, %s12189_s15 }
0x14b0   : > { %v5523_v4 = vpop.f32.mrf.mxu1 }
0x14b1   : > { %v5649_v25 = vadd.f32 %v5648_v42, %v5523_v4  ;;  %5733 = vrot.lane.b32.xlu0 %v5647_v38, %s12148_s18 }
0x14b2   : > { %v5525_v33 = vpop.f32.mrf.mxu1 }
0x14b3   : > { %v5651_v47 = vadd.f32 %v5650_v56, %v5525_v33  ;;  %5735 = vrot.lane.b32.xlu1 %v5649_v25, %s12148_s18  ;;  %v5637_v25 = vadd.f32 %v11191_v20, %v11202_v27  ;;  %v5639_v33 = vadd.f32 %v11193_v22, %v11205_v1 }
0x14b4   : > { %v5527_v26 = vpop.f32.mrf.mxu1 }
0x14b5   : > { %v5653_v28 = vadd.f32 %v5652_v58, %v5527_v26  ;;  %5747 = vrot.lane.b32.xlu0 %v5651_v47, %s12150_s23 }
0x14b6   : > { %v5531_v19 = vpop.f32.mrf.mxu1 }
0x14b7   : > { %5749 = vrot.lane.b32.xlu1 %v5653_v28, %s12150_s23  ;;  %v5657_v12 = vadd.f32 %v5656_v63, %v5531_v19 }
0x14b8   : > { %v5533_v11 = vpop.f32.mrf.mxu1 }
0x14b9   : > { %v5659_v13 = vadd.f32 %v5658_v61, %v5533_v11 }
0x14ba   : > { %v5535_v57 = vpop.f32.mrf.mxu1 }
0x14bb   : > { %5759 = vrot.lane.b32.xlu1 %v5657_v12, %s12151_s2  ;;  %5761 = vrot.lane.b32.xlu0 %v5659_v13, %s12151_s2 }
0x14bc   : > { %v5536_v14 = vpop.f32.mrf.mxu1 }
0x14bf   : > { %6028 = vperm.xlu1 %9412, %v6025_v16  }
0x150b   : > { %v5666_v23 = vpop.permute.xlu0 %5665 }
0x150c   : > { %v5672_v63 = vsel %vm12285_vm14, 0.0, %v5666_v23  ;;  %vm12294_vm14 = vcmask 924672  }
0x150d   : > { %v5668_v7 = vpop.permute.xlu1 %5667  ;;  %v5673_v32 = vsel %vm10096_vm4, %v5672_v63, 0.0 }
0x150e   : > { %v5669_v61 = vsel %vm12286_vm3, %v5666_v23, %v5668_v7  ;;  %vm12295_vm3 = vmmov %vm12294_vm14 }
0x150f   : > { %v5678_v60 = vpop.permute.xlu0 %5677  ;;  %v5674_v39 = vsel %vm10100_vm6, %v5669_v61, 0.0 }
0x1510   : > { %v5684_v29 = vsel %vm12289_vm13, 0.0, %v5678_v60  ;;  %vm12299_vm13 = vcmask 908288  }
0x1511   : > { %v5680_v42 = vpop.permute.xlu1 %5679  ;;  %v5685_v62 = vadd.f32 %v5684_v29, %v5673_v32 }
0x1512   : > { %v5681_v31 = vsel %vm12281_vm5, %v5678_v60, %v5680_v42  ;;  %vm12300_vm5 = vmmov %vm12299_vm13 }
0x1513   : > { %v5690_v56 = vpop.permute.xlu0 %5689  ;;  %v5686_v51 = vadd.f32 %v5681_v31, %v5674_v39 }
0x1514   : > { %v5696_v15 = vsel %vm12287_vm9, 0.0, %v5690_v56  ;;  %vm12296_vm9 = vcmask 916480  }
0x1515   : > { %v5692_v58 = vpop.permute.xlu1 %5691  ;;  %v5697_v49 = vsel %vm10104_vm7, %v5696_v15, 0.0 }
0x1516   : > { %v5693_v6 = vsel %vm12288_vm10, %v5690_v56, %v5692_v58  ;;  %v5699_v24 = vadd.f32 %v5697_v49, %v5685_v62  ;;  %vm12297_vm10 = vmmov %vm12296_vm9  ;;  %v9602_v62 = vld [vmem:[%s12298_s16] sm:$0xff]  }
0x1517   : > { %v5704_v36 = vpop.permute.xlu0 %5703  ;;  %v5698_v35 = vsel %vm10108_vm8, %v5693_v6, 0.0 }
0x1518   : > { %v5710_v3 = vsel %vm12290_vm1, 0.0, %v5704_v36  ;;  %v5700_v18 = vadd.f32 %v5698_v35, %v5686_v51  ;;  %v9604_v51 = vld [vmem:[%s12298_s16 + $0x10] sm:$0xff]  }
0x1519   : > { %v5706_v8 = vpop.permute.xlu1 %5705  ;;  %v5711_v48 = vsel %vm10096_vm4, %v5710_v3, 0.0 }
0x151a   : > { %v5707_v50 = vsel %vm12291_vm0, %v5704_v36, %v5706_v8  ;;  %v5713_v54 = vadd.f32 %v5711_v48, %v5699_v24  ;;  %vm12292_vm0 = vcmask 1039360   ;;  %v9605_v48 = vld [vmem:[%s12298_s16 + $0x18] sm:$0xff]  }
0x151b   : > { %v5712_v52 = vsel %vm10100_vm6, %v5707_v50, 0.0  ;;  %vm12293_vm1 = vmmov %vm12292_vm0 }
0x151c   : > { %v5714_v41 = vadd.f32 %v5712_v52, %v5700_v18  ;;  %v5715_v11 = vadd.f32 %v5713_v54, %v5637_v25 }
0x151e   : > { %v5716_v19 = vadd.f32 %v5714_v41, %v5639_v33 }
0x151f   : > { %v5720_v30 = vpop.permute.xlu0 %5719 }
0x1521   : > { %v5722_v53 = vpop.permute.xlu1 %5721 }
0x1522   : > { %v5723_v55 = vsel %vm12292_vm0, %v5720_v30, %v5722_v53  ;;  %v5726_v38 = vsel %vm12293_vm1, %v5722_v53, 0.0  ;;  %vm12301_vm0 = vcmask 1043456  }
0x1523   : > { %v5734_v4 = vpop.permute.xlu0 %5733  ;;  %v5727_v47 = vsel %vm10104_vm7, %v5723_v55, 0.0  ;;  %v5728_v26 = vsel %vm10108_vm8, %v5726_v38, 0.0  ;;  %vm12302_vm1 = vmmov %vm12301_vm0 }
0x1524   : > { %v5729_v22 = vadd.f32 %v5727_v47, %v5715_v11  ;;  %v5730_v27 = vadd.f32 %v5728_v26, %v5716_v19 }
0x1525   : > { %v5736_v28 = vpop.permute.xlu1 %5735 }
0x1526   : > { %v5737_v12 = vsel %vm12294_vm14, %v5734_v4, %v5736_v28  ;;  %v5740_v13 = vsel %vm12295_vm3, %v5736_v28, 0.0  ;;  %vm12303_vm14 = vmmov %vm12301_vm0  ;;  %vm12304_vm3 = vcmask 64512  }
0x1527   : > { %v5741_v57 = vsel %vm10096_vm4, %v5737_v12, 0.0  ;;  %v5742_v20 = vsel %vm10100_vm6, %v5740_v13, 0.0  ;;  %v5748_v1 = vpop.permute.xlu0 %5747 }
0x1528   : > { %v5743_v16 = vadd.f32 %v5741_v57, %v5729_v22  ;;  %v5744_v23 = vadd.f32 %v5742_v20, %v5730_v27  ;;  %v6484_v57 = vld [vmem:[%s12310_s17] sm:$0xff]  ;;  %s12326_s17 = sld [smem:[#allocation25_spill]] }
0x1529   : > { %v5750_v14 = vpop.permute.xlu1 %5749 }
0x152a   : > { %v5751_v7 = vsel %vm12296_vm9, %v5748_v1, %v5750_v14  ;;  %v5754_v60 = vsel %vm12297_vm10, %v5750_v14, 0.0  ;;  %vm12305_vm9 = vmmov %vm12304_vm3 }
0x152b   : > { %v5755_v58 = vadd.f32 %v5751_v7, %v5743_v16  ;;  %v5756_v36 = vadd.f32 %v5754_v60, %v5744_v23  ;;  %vm12306_vm10 = vmmov %vm12304_vm3 }
0x152d   : > { %v5760_v42 = vpop.permute.xlu1 %5759  ;;  %v5762_v56 = vpop.permute.xlu0 %5761 }
0x152e   : > { %v5763_v8 = vsel %vm12299_vm13, %v5760_v42, %v5762_v56  ;;  %v5766_v63 = vsel %vm12300_vm5, %v5762_v56, 0.0  ;;  %vm12307_vm13 = vmmov %vm12304_vm3 }
0x152f   : > { %v5767_v61 = vsel %vm10104_vm7, %v5763_v8, 0.0  ;;  %v5768_v15 = vsel %vm10108_vm8, %v5766_v63, 0.0  ;;  %vm12308_vm5 = vmmov %vm12304_vm3 }
0x1530   : > { %v5769_v6 = vadd.f32 %v5767_v61, %v5755_v58  ;;  %v5770_v29 = vadd.f32 %v5768_v15, %v5756_v36 }
0x1532   : > { %v5778_v31 = vadd.f32 %v11216_v17, %v5770_v29  ;;  %v5777_v3 = vadd.f32 %v11216_v17, %v5769_v6  ;;  %v9603_v17 = vld [vmem:[%s12298_s16 + $0x8] sm:$0xff]  }
0x1534   : > { %v5780_v50 = vmax.f32 %v5778_v31, 0.0  ;;  %v5779_v32 = vmax.f32 %v5777_v3, 0.0 }
0x1536   : > { %v5782_v39 = vpack.c.bf16 %v5780_v50, %v5780_v50  ;;  %v5781_v49 = vpack.c.bf16 %v5779_v32, %v5779_v32 }
0x1538   : > { %8833 = vmatprep.subr.msk.bf16.mxu1 %vm12301_vm0, %v5782_v39  ;;  %v5831_v35 = vsel %vm12302_vm1, %v5781_v49, 0  ;;  %vm12311_vm0 = vcmask 138240  }
0x1539   : > { %5851 = vmatpush1.bf16.msra.mxu1 %v5831_v35  ;;  %vm12312_vm1 = vmmov %vm12311_vm0 }
0x153a   : > { %8858 = vmatprep.subr.msk.bf16.mxu1 %vm12303_vm14, %v10047_v2  ;;  %v9606_v2 = vld [vmem:[%s12298_s16 + $0x20] ss:$0 sps:$4 sm:$0xff]   ;;  %s12309_s16 = sld [smem:[#allocation24_spill]]  ;;  %v6029_v22 = vpop.permute.xlu1 %6028  ;;  %vm12313_vm14 = vcmask 121856  }
0x153c   : > { %8834 = vmatmul.mubr.msk.bf16.vlgmr.msra.gmra.mxu1 %vm12304_vm3, %v9602_v62  ;;  %vm12314_vm3 = vmmov %vm12313_vm14 }
0x153d   : > { %5878 = vmatprep.mubr.bf16.mxu1 %v9743_v0  ;;  %6310 = vmatpush1.bf16.msra.mxu1 %v10053_v5 }
0x1540   : > { %v6038_v13 = vld [vmem:[%s12309_s16] sm:$0xff]  ;;  %s12328_s16 = sld [smem:[#allocation37_spill]] }
0x1544   : > { %8835 = vmatmul.mubr.msk.bf16.gmra.mxu1 %vm12305_vm9, %v9603_v17  ;;  %vm12315_vm9 = vcmask 130048  }
0x1545   : > { %5888 = vmatprep.mubr.bf16.mxu1 %v9743_v0 }
0x154c   : > { %8836 = vmatmul.mubr.msk.bf16.gmra.mxu1 %vm12306_vm10, %v9604_v51  ;;  %vm12316_vm10 = vmmov %vm12315_vm9 }
0x154d   : > { %5898 = vmatprep.mubr.bf16.mxu1 %v9743_v0 }
0x1554   : > { %8837 = vmatmul.mubr.msk.bf16.gmra.mxu1 %vm12307_vm13, %v9605_v48  ;;  %vm12317_vm13 = vcmask 7168  }
0x1555   : > { %5908 = vmatprep.mubr.bf16.mxu1 %v9743_v0 }
0x155c   : > { %8838 = vmatmul.mubr.msk.bf16.gmra.mxu1 %vm12308_vm5, %v9606_v2  ;;  %vm12318_vm5 = vmmov %vm12317_vm13 }
0x155d   : > { %6327 = vmatprep.mubr.bf16.mxu1 %v9743_v0 }
0x15fc   : > { %v5870_v5 = vpop.f32.mrf.mxu1 }
0x15fd   : > { %5919 = vrot.lane.b32.xlu1 %v5870_v5, %s12282_s7 }
0x15fe   : > { %v5872_v52 = vpop.f32.mrf.mxu1 }
0x15ff   : > { %5921 = vrot.lane.b32.xlu0 %v5872_v52, %s12282_s7 }
0x1600   : > { %v5874_v30 = vpop.f32.mrf.mxu1 }
0x1601   : > { %5931 = vrot.lane.b32.xlu1 %v5874_v30, %s12283_s14 }
0x1602   : > { %v5876_v24 = vpop.f32.mrf.mxu1 }
0x1603   : > { %5933 = vrot.lane.b32.xlu0 %v5876_v24, %s12283_s14 }
0x1604   : > { %v5880_v18 = vpop.f32.mrf.mxu1 }
0x1605   : > { %5943 = vrot.lane.b32.xlu1 %v5880_v18, %s12207_s0 }
0x1606   : > { %v5882_v53 = vpop.f32.mrf.mxu1 }
0x1607   : > { %5945 = vrot.lane.b32.xlu0 %v5882_v53, %s12207_s0 }
0x1608   : > { %v5884_v54 = vpop.f32.mrf.mxu1 }
0x1609   : > { %5957 = vrot.lane.b32.xlu1 %v5884_v54, %s12188_s1 }
0x160a   : > { %v5886_v41 = vpop.f32.mrf.mxu1 }
0x160b   : > { %5959 = vrot.lane.b32.xlu0 %v5886_v41, %s12188_s1 }
0x160c   : > { %v5890_v55 = vpop.f32.mrf.mxu1 }
0x160e   : > { %v5892_v38 = vpop.f32.mrf.mxu1 }
0x1610   : > { %v5894_v4 = vpop.f32.mrf.mxu1 }
0x1611   : > { %5973 = vrot.lane.b32.xlu1 %v5894_v4, %s12189_s15 }
0x1612   : > { %v5896_v25 = vpop.f32.mrf.mxu1 }
0x1613   : > { %5975 = vrot.lane.b32.xlu0 %v5896_v25, %s12189_s15 }
0x1614   : > { %v5900_v33 = vpop.f32.mrf.mxu1 }
0x1615   : > { %5987 = vrot.lane.b32.xlu1 %v5900_v33, %s12148_s18 }
0x1616   : > { %v5902_v47 = vpop.f32.mrf.mxu1 }
0x1617   : > { %5989 = vrot.lane.b32.xlu0 %v5902_v47, %s12148_s18 }
0x1618   : > { %v5904_v26 = vpop.f32.mrf.mxu1 }
0x1619   : > { %6001 = vrot.lane.b32.xlu1 %v5904_v26, %s12150_s23 }
0x161a   : > { %v5906_v28 = vpop.f32.mrf.mxu1 }
0x161b   : > { %6003 = vrot.lane.b32.xlu0 %v5906_v28, %s12150_s23 }
0x161c   : > { %v5910_v19 = vpop.f32.mrf.mxu1 }
0x161e   : > { %v5912_v11 = vpop.f32.mrf.mxu1 }
0x161f   : > { %6013 = vrot.lane.b32.xlu0 %v5910_v19, %s12151_s2  ;;  %6015 = vrot.lane.b32.xlu1 %v5912_v11, %s12151_s2 }
0x1620   : > { %v5914_v12 = vpop.f32.mrf.mxu1 }
0x1622   : > { %v5915_v20 = vpop.f32.mrf.mxu1 }
0x1623   : > { %6041 = vperm.xlu0 %9411, %v6038_v13   ;;  %6487 = vperm.xlu1 %9412, %v6484_v57  }
0x166f   : > { %v5920_v27 = vpop.permute.xlu1 %5919 }
0x1670   : > { %v5926_v56 = vsel %vm12311_vm0, 0.0, %v5920_v27  ;;  %vm12319_vm0 = vcmask 1039360  }
0x1671   : > { %v5922_v1 = vpop.permute.xlu0 %5921  ;;  %v5927_v29 = vsel %vm10096_vm4, %v5926_v56, 0.0 }
0x1672   : > { %v5923_v58 = vsel %vm12312_vm1, %v5920_v27, %v5922_v1  ;;  %vm12320_vm1 = vmmov %vm12319_vm0 }
0x1673   : > { %v5932_v14 = vpop.permute.xlu1 %5931  ;;  %v5928_v31 = vsel %vm10100_vm6, %v5923_v58, 0.0 }
0x1674   : > { %v5938_v63 = vsel %vm12315_vm9, 0.0, %v5932_v14  ;;  %vm12323_vm9 = vcmask 916480  }
0x1675   : > { %v5934_v16 = vpop.permute.xlu0 %5933  ;;  %v5939_v32 = vadd.f32 %v5938_v63, %v5927_v29  ;;  %v6037_v29 = vld [vmem:[%s12326_s17] sm:$0xf]  ;;  %s12337_s17 = sld [smem:[#allocation38_spill]] }
0x1676   : > { %v5935_v61 = vsel %vm12316_vm10, %v5932_v14, %v5934_v16  ;;  %vm12324_vm10 = vmmov %vm12323_vm9 }
0x1677   : > { %v5944_v23 = vpop.permute.xlu1 %5943  ;;  %v5940_v39 = vadd.f32 %v5935_v61, %v5928_v31  ;;  %v9607_v31 = vld [vmem:[%s12328_s16] sm:$0xff]  }
0x1678   : > { %v5950_v36 = vsel %vm12313_vm14, 0.0, %v5944_v23  ;;  %vm12321_vm14 = vcmask 924672  }
0x1679   : > { %v5946_v7 = vpop.permute.xlu0 %5945  ;;  %v5951_v3 = vsel %vm10104_vm7, %v5950_v36, 0.0 }
0x167a   : > { %v5947_v8 = vsel %vm12314_vm3, %v5944_v23, %v5946_v7  ;;  %v5953_v17 = vadd.f32 %v5951_v3, %v5939_v32  ;;  %vm12322_vm3 = vmmov %vm12321_vm14  ;;  %v9611_v3 = vld [vmem:[%s12328_s16 + $0x10] sm:$0xff]   ;;  %v9615_v32 = vld [vmem:[%s12328_s16 + $0x20] ss:$0 sps:$4 sm:$0xff]  }
0x167b   : > { %v5958_v60 = vpop.permute.xlu1 %5957  ;;  %v5952_v50 = vsel %vm10108_vm8, %v5947_v8, 0.0 }
0x167c   : > { %v5964_v15 = vsel %vm12317_vm13, 0.0, %v5958_v60  ;;  %v5954_v51 = vadd.f32 %v5952_v50, %v5940_v39  ;;  %vm12325_vm13 = vcmask 908288   ;;  %v9613_v50 = vld [vmem:[%s12328_s16 + $0x18] sm:$0xff]  }
0x167d   : > { %v5960_v42 = vpop.permute.xlu0 %5959  ;;  %v5965_v49 = vsel %vm10096_vm4, %v5964_v15, 0.0 }
0x167e   : > { %v5961_v6 = vsel %vm12318_vm5, %v5958_v60, %v5960_v42  ;;  %v5967_v2 = vadd.f32 %v5965_v49, %v5953_v17  ;;  %vm12327_vm5 = vmmov %vm12325_vm13 }
0x167f   : > { %v5966_v35 = vsel %vm10100_vm6, %v5961_v6, 0.0 }
0x1680   : > { %v5968_v5 = vadd.f32 %v5966_v35, %v5954_v51  ;;  %v5969_v4 = vadd.f32 %v5967_v2, %v5890_v55  ;;  %v6095_v2 = vunpack.c.l.bf16 %v10717_v40 }
0x1682   : > { %v5970_v41 = vadd.f32 %v5968_v5, %v5892_v38 }
0x1683   : > { %v5974_v62 = vpop.permute.xlu1 %5973 }
0x1685   : > { %v5976_v48 = vpop.permute.xlu0 %5975 }
0x1686   : > { %v5977_v52 = vsel %vm12319_vm0, %v5974_v62, %v5976_v48  ;;  %v5980_v30 = vsel %vm12320_vm1, %v5976_v48, 0.0  ;;  %vm12329_vm0 = vcmask 1043456   ;;  %v6094_v62 = vunpack.c.l.bf16 %v10713_v59 }
0x1687   : > { %v5988_v24 = vpop.permute.xlu1 %5987  ;;  %v5981_v18 = vsel %vm10104_vm7, %v5977_v52, 0.0  ;;  %v5982_v53 = vsel %vm10108_vm8, %v5980_v30, 0.0  ;;  %vm12330_vm1 = vmmov %vm12329_vm0 }
0x1688   : > { %v5983_v28 = vadd.f32 %v5981_v18, %v5969_v4  ;;  %v5984_v19 = vadd.f32 %v5982_v53, %v5970_v41  ;;  %v9608_v41 = vld [vmem:[%s12337_s17] sm:$0xff]  }
0x1689   : > { %v5990_v54 = vpop.permute.xlu0 %5989 }
0x168a   : > { %v5991_v25 = vsel %vm12321_vm14, %v5988_v24, %v5990_v54  ;;  %v5994_v33 = vsel %vm12322_vm3, %v5990_v54, 0.0  ;;  %vm12331_vm14 = vcmask 64512   ;;  %v6111_v54 = vld [vmem:[%s1566_s19] sm:$0xf] }
0x168b   : > { %v5995_v47 = vsel %vm10096_vm4, %v5991_v25, 0.0  ;;  %v5996_v26 = vsel %vm10100_vm6, %v5994_v33, 0.0  ;;  %v6002_v11 = vpop.permute.xlu1 %6001  ;;  %vm12332_vm3 = vmmov %vm12331_vm14  ;;  %v9610_v25 = vld [vmem:[%s12337_s17 + $0x8] sm:$0xff]   ;;  %v9612_v33 = vld [vmem:[%s12337_s17 + $0x10] sm:$0xff]  }
0x168c   : > { %v5997_v13 = vadd.f32 %v5995_v47, %v5983_v28  ;;  %v5998_v57 = vadd.f32 %v5996_v26, %v5984_v19  ;;  %8859 = vmatmul.mubr.msk.bf16.vlgmr.msra.gmra.mxu1 %vm12332_vm3, %v9607_v31  ;;  %v9614_v47 = vld [vmem:[%s12337_s17 + $0x18] sm:$0xff]   ;;  %v9616_v26 = vld [vmem:[%s12337_s17 + $0x20] ss:$0 sps:$4 sm:$0xff]  }
0x168d   : > { %v6004_v12 = vpop.permute.xlu0 %6003  ;;  %6337 = vmatprep.mubr.bf16.mxu1 %v9743_v0 }
0x168e   : > { %v6005_v20 = vsel %vm12323_vm9, %v6002_v11, %v6004_v12  ;;  %v6008_v55 = vsel %vm12324_vm10, %v6004_v12, 0.0  ;;  %vm12333_vm9 = vmmov %vm12332_vm3 }
0x168f   : > { %v6009_v1 = vadd.f32 %v6005_v20, %v5997_v13  ;;  %v6010_v14 = vadd.f32 %v6008_v55, %v5998_v57  ;;  %vm12334_vm10 = vmmov %vm12332_vm3 }
0x1691   : > { %v6014_v38 = vpop.permute.xlu0 %6013  ;;  %v6016_v27 = vpop.permute.xlu1 %6015 }
0x1692   : > { %v6017_v16 = vsel %vm12325_vm13, %v6014_v38, %v6016_v27  ;;  %v6020_v23 = vsel %vm12327_vm5, %v6016_v27, 0.0  ;;  %vm12335_vm13 = vmmov %vm12332_vm3 }
0x1693   : > { %v6021_v7 = vsel %vm10104_vm7, %v6017_v16, 0.0  ;;  %v6022_v60 = vsel %vm10108_vm8, %v6020_v23, 0.0  ;;  %vm12336_vm5 = vmmov %vm12332_vm3 }
0x1694   : > { %v6023_v42 = vadd.f32 %v6021_v7, %v6009_v1  ;;  %v6024_v56 = vadd.f32 %v6022_v60, %v6010_v14 }
0x1696   : > { %v6032_v58 = vadd.f32 %v6029_v22, %v6024_v56  ;;  %v6031_v36 = vadd.f32 %v6029_v22, %v6023_v42  ;;  %v9609_v22 = vld [vmem:[%s12328_s16 + $0x8] sm:$0xff]   ;;  %s12384_s16 = sld [smem:[#allocation31_spill]] }
0x1697   : > { %8860 = vmatmul.mubr.msk.bf16.gmra.mxu1 %vm12333_vm9, %v9609_v22  ;;  %vm12340_vm9 = vmmov %vm12332_vm3 }
0x1698   : > { %v6034_v8 = vmax.f32 %v6032_v58, 0.0  ;;  %v6033_v63 = vmax.f32 %v6031_v36, 0.0  ;;  %6347 = vmatprep.mubr.bf16.mxu1 %v9743_v0 }
0x169a   : > { %v6036_v61 = vpack.c.bf16 %v6034_v8, %v6034_v8  ;;  %v6035_v15 = vpack.c.bf16 %v6033_v63, %v6033_v63 }
0x169c   : > { %8839 = vmatprep.subr.msk.bf16.mxu0 %vm12329_vm0, %v6036_v61  ;;  %v6048_v6 = vsel %vm12330_vm1, %v6035_v15, 0  ;;  %vm12338_vm1 = vmmov %vm12329_vm0 }
0x169d   : > { %6068 = vmatpush1.bf16.msra.mxu0 %v6048_v6 }
0x169e   : > { %v6042_v39 = vpop.permute.xlu0 %6041 }
0x169f   : > { %8861 = vmatmul.mubr.msk.bf16.gmra.mxu1 %vm12334_vm10, %v9611_v3  ;;  %vm12341_vm10 = vmmov %vm12332_vm3 }
0x16a0   : > { %8840 = vmatmul.mubr.msk.bf16.vlgmr.msra.gmra.mxu0 %vm12331_vm14, %v6037_v29  ;;  %6357 = vmatprep.mubr.bf16.mxu1 %v9743_v0  ;;  %vm12339_vm14 = vmmov %vm12332_vm3 }
0x16a1   : > { %6208 = vmatprep.mubr.bf16.mxu0 %v9743_v0 }
0x16a7   : > { %8862 = vmatmul.mubr.msk.bf16.gmra.mxu1 %vm12335_vm13, %v9613_v50  ;;  %vm12342_vm13 = vmmov %vm12332_vm3 }
0x16a8   : > { %6367 = vmatprep.mubr.bf16.mxu1 %v9743_v0 }
0x16af   : > { %8863 = vmatmul.mubr.msk.bf16.gmra.mxu1 %vm12336_vm5, %v9615_v32  ;;  %vm12344_vm5 = vcmask 138240  }
0x174c   : > { %v6329_v28 = vpop.f32.mrf.mxu1 }
0x174e   : > { %v6331_v19 = vpop.f32.mrf.mxu1 }
0x1750   : > { %v6333_v11 = vpop.f32.mrf.mxu1 }
0x1752   : > { %v6335_v12 = vpop.f32.mrf.mxu1 }
0x1757   : > { %v6339_v13 = vpop.f32.mrf.mxu1 }
0x1759   : > { %v6341_v57 = vpop.f32.mrf.mxu1 }
0x175b   : > { %v6343_v20 = vpop.f32.mrf.mxu1 }
0x175d   : > { %v6345_v55 = vpop.f32.mrf.mxu1 }
0x175f   : > { %v11391_v38 = vpop.f32.mrf.mxu1 }
0x1760   : > { %v6087_v49 = vpop.f32.mrf.mxu0 }
0x1761   : > { %v6088_v35 = vadd.f32 %v6087_v49, %v6042_v39  ;;  %v11393_v27 = vpop.f32.mrf.mxu1 }
0x1762   : > { %v6089_v17 = vpop.f32.mrf.mxu0 }
0x1763   : > { %v6096_v51 = vadd.f32 %v6094_v62, %v6088_v35  ;;  %v6090_v48 = vadd.f32 %v6089_v17, %v6042_v39  ;;  %v6353_v1 = vpop.f32.mrf.mxu1 }
0x1764   : > { %v6091_v5 = vpop.f32.mrf.mxu0 }
0x1765   : > { %v11365_v52 = vpack.c.bf16 %v6096_v51, %v6096_v51  ;;  %v6097_v30 = vadd.f32 %v6095_v2, %v6090_v48  ;;  %v6355_v14 = vpop.f32.mrf.mxu1 }
0x1766   : > { %v6092_v24 = vpop.f32.mrf.mxu0 }
0x1767   : > { %v11367_v18 = vpack.c.bf16 %v6097_v30, %v6097_v30  ;;  %v8841_v53 = vpack.c.bf16 %v6097_v30, %v6096_v51  ;;  %v6171_v40 = vsel %vm12338_vm1, %v11365_v52, 0  ;;  %v6359_v16 = vpop.f32.mrf.mxu1  ;;  %vm12346_vm1 = vcmask 121856  }
0x1769   : > { %v6109_v59 = vrot.slane %v8841_v53, %v10715_v9  ;;  %8847 = vmatprep.subr.msk.bf16.mxu0 %vm12329_vm0, %v11367_v18  ;;  %v6361_v23 = vpop.f32.mrf.mxu1  ;;  %vm12345_vm0 = vmmov %vm12344_vm5 }
0x176a   : > { %6191 = vmatpush1.bf16.msra.mxu0 %v6171_v40 }
0x176b   : > { %v6112_v4 = vsel %vm10719_vm15, %v6109_v59, %v6111_v54  ;;  %v6363_v7 = vpop.f32.mrf.mxu1 }
0x176c   : > { %6113 = vst [vmem:[%s1566_s19] sm:$0xf] %v6112_v4  ;;  %s12343_s19 = sld [smem:[#allocation36_spill]] }
0x176d   : > { %8848 = vmatmul.mubr.msk.bf16.vlgmr.msra.gmra.mxu0 %vm12339_vm14, %v9608_v41  ;;  %v6365_v60 = vpop.f32.mrf.mxu1  ;;  %vm12347_vm14 = vmmov %vm12346_vm1 }
0x176e   : > { %6218 = vmatprep.mubr.bf16.mxu0 %v9743_v0 }
0x176f   : > { %v6369_v42 = vpop.f32.mrf.mxu1 }
0x1771   : > { %v6371_v56 = vpop.f32.mrf.mxu1 }
0x1773   : > { %v6373_v58 = vpop.f32.mrf.mxu1 }
0x1775   : > { %8849 = vmatmul.mubr.msk.bf16.gmra.mxu0 %vm12332_vm3, %v9610_v25  ;;  %v6374_v36 = vpop.f32.mrf.mxu1  ;;  %vm12348_vm3 = vcmask 130048  }
0x1776   : > { %6228 = vmatprep.mubr.bf16.mxu0 %v9743_v0 }
0x177d   : > { %8850 = vmatmul.mubr.msk.bf16.gmra.mxu0 %vm12340_vm9, %v9612_v33  ;;  %vm12349_vm9 = vmmov %vm12348_vm3 }
0x177e   : > { %6238 = vmatprep.mubr.bf16.mxu0 %v9743_v0 }
0x1785   : > { %8851 = vmatmul.mubr.msk.bf16.gmra.mxu0 %vm12341_vm10, %v9614_v47  ;;  %vm12350_vm10 = vcmask 7168  }
0x1786   : > { %6248 = vmatprep.mubr.bf16.mxu0 %v9743_v0 }
0x178d   : > { %8852 = vmatmul.mubr.msk.bf16.gmra.mxu0 %vm12342_vm13, %v9616_v26  ;;  %vm12351_vm13 = vmmov %vm12350_vm10 }
0x178e   : > { %6581 = vmatprep.mubr.bf16.mxu0 %v9743_v0 }
0x182d   : > { %v6210_v8 = vpop.f32.mrf.mxu0 }
0x182e   : > { %v6330_v63 = vadd.f32 %v6329_v28, %v6210_v8 }
0x182f   : > { %v6212_v61 = vpop.f32.mrf.mxu0 }
0x1830   : > { %v6332_v15 = vadd.f32 %v6331_v19, %v6212_v61  ;;  %6378 = vrot.lane.b32.xlu1 %v6330_v63, %s12282_s7 }
0x1831   : > { %v6214_v6 = vpop.f32.mrf.mxu0 }
0x1832   : > { %v6334_v29 = vadd.f32 %v6333_v11, %v6214_v6  ;;  %6380 = vrot.lane.b32.xlu0 %v6332_v15, %s12282_s7 }
0x1833   : > { %v6216_v31 = vpop.f32.mrf.mxu0 }
0x1834   : > { %v6336_v22 = vadd.f32 %v6335_v12, %v6216_v31  ;;  %6390 = vrot.lane.b32.xlu1 %v6334_v29, %s12283_s14 }
0x1835   : > { %v6220_v3 = vpop.f32.mrf.mxu0 }
0x1836   : > { %v6340_v50 = vadd.f32 %v6339_v13, %v6220_v3  ;;  %6392 = vrot.lane.b32.xlu0 %v6336_v22, %s12283_s14  ;;  %v6738_v13 = vld [vmem:[%s12343_s19] sm:$0xff]  ;;  %s12358_s19 = sld [smem:[#allocation39_spill]] }
0x1837   : > { %v6222_v32 = vpop.f32.mrf.mxu0 }
0x1838   : > { %v6342_v39 = vadd.f32 %v6341_v57, %v6222_v32  ;;  %6402 = vrot.lane.b32.xlu1 %v6340_v50, %s12207_s0  ;;  %v11416_v57 = vpop.permute.xlu1 %6487 }
0x1839   : > { %v6224_v49 = vpop.f32.mrf.mxu0 }
0x183a   : > { %v6344_v35 = vadd.f32 %v6343_v20, %v6224_v49  ;;  %6404 = vrot.lane.b32.xlu0 %v6342_v39, %s12207_s0 }
0x183b   : > { %v6226_v62 = vpop.f32.mrf.mxu0 }
0x183c   : > { %v6346_v17 = vadd.f32 %v6345_v55, %v6226_v62  ;;  %6416 = vrot.lane.b32.xlu1 %v6344_v35, %s12188_s1 }
0x183d   : > { %v11402_v51 = vpop.f32.mrf.mxu0 }
0x183e   : > { %6418 = vrot.lane.b32.xlu0 %v6346_v17, %s12188_s1 }
0x183f   : > { %v11405_v48 = vpop.f32.mrf.mxu0 }
0x1841   : > { %v6234_v2 = vpop.f32.mrf.mxu0 }
0x1842   : > { %v6354_v5 = vadd.f32 %v6353_v1, %v6234_v2 }
0x1843   : > { %v6236_v30 = vpop.f32.mrf.mxu0 }
0x1844   : > { %v6356_v24 = vadd.f32 %v6355_v14, %v6236_v30  ;;  %6432 = vrot.lane.b32.xlu1 %v6354_v5, %s12189_s15 }
0x1845   : > { %v6240_v53 = vpop.f32.mrf.mxu0 }
0x1846   : > { %v6360_v54 = vadd.f32 %v6359_v16, %v6240_v53  ;;  %6434 = vrot.lane.b32.xlu0 %v6356_v24, %s12189_s15 }
0x1847   : > { %v6242_v59 = vpop.f32.mrf.mxu0 }
0x1848   : > { %v6362_v40 = vadd.f32 %v6361_v23, %v6242_v59  ;;  %6446 = vrot.lane.b32.xlu1 %v6360_v54, %s12148_s18  ;;  %v6350_v54 = vadd.f32 %v11391_v38, %v11402_v51  ;;  %v6352_v59 = vadd.f32 %v11393_v27, %v11405_v48 }
0x1849   : > { %v6244_v41 = vpop.f32.mrf.mxu0 }
0x184a   : > { %v6364_v4 = vadd.f32 %v6363_v7, %v6244_v41  ;;  %6448 = vrot.lane.b32.xlu0 %v6362_v40, %s12148_s18 }
0x184b   : > { %v6246_v25 = vpop.f32.mrf.mxu0 }
0x184c   : > { %v6366_v33 = vadd.f32 %v6365_v60, %v6246_v25  ;;  %6460 = vrot.lane.b32.xlu1 %v6364_v4, %s12150_s23 }
0x184d   : > { %v6250_v47 = vpop.f32.mrf.mxu0 }
0x184e   : > { %6462 = vrot.lane.b32.xlu0 %v6366_v33, %s12150_s23  ;;  %v6370_v28 = vadd.f32 %v6369_v42, %v6250_v47 }
0x184f   : > { %v6252_v26 = vpop.f32.mrf.mxu0 }
0x1850   : > { %v6372_v19 = vadd.f32 %v6371_v56, %v6252_v26 }
0x1851   : > { %v6254_v11 = vpop.f32.mrf.mxu0 }
0x1852   : > { %6472 = vrot.lane.b32.xlu0 %v6370_v28, %s12151_s2  ;;  %6474 = vrot.lane.b32.xlu1 %v6372_v19, %s12151_s2 }
0x1853   : > { %v6255_v12 = vpop.f32.mrf.mxu0 }
0x1856   : > { %6741 = vperm.xlu1 %9412, %v6738_v13  }
0x18a2   : > { %v6379_v20 = vpop.permute.xlu1 %6378 }
0x18a3   : > { %v6385_v42 = vsel %vm12344_vm5, 0.0, %v6379_v20  ;;  %vm12352_vm5 = vcmask 1039360  }
0x18a4   : > { %v6381_v55 = vpop.permute.xlu0 %6380  ;;  %v6386_v6 = vsel %vm10096_vm4, %v6385_v42, 0.0 }
0x18a5   : > { %v6382_v56 = vsel %vm12345_vm0, %v6379_v20, %v6381_v55  ;;  %vm12353_vm0 = vmmov %vm12352_vm5 }
0x18a6   : > { %v6391_v1 = vpop.permute.xlu1 %6390  ;;  %v6387_v29 = vsel %vm10100_vm6, %v6382_v56, 0.0 }
0x18a7   : > { %v6397_v8 = vsel %vm12348_vm3, 0.0, %v6391_v1  ;;  %vm12356_vm3 = vcmask 916480  }
0x18a8   : > { %v6393_v14 = vpop.permute.xlu0 %6392  ;;  %v6398_v3 = vadd.f32 %v6397_v8, %v6386_v6 }
0x18a9   : > { %v6394_v63 = vsel %vm12349_vm9, %v6391_v1, %v6393_v14  ;;  %vm12357_vm9 = vmmov %vm12356_vm3 }
0x18aa   : > { %v6403_v16 = vpop.permute.xlu1 %6402  ;;  %v6399_v50 = vadd.f32 %v6394_v63, %v6387_v29 }
0x18ab   : > { %v6409_v58 = vsel %vm12346_vm1, 0.0, %v6403_v16  ;;  %vm12354_vm1 = vcmask 924672  }
0x18ac   : > { %v6405_v23 = vpop.permute.xlu0 %6404  ;;  %v6410_v31 = vsel %vm10104_vm7, %v6409_v58, 0.0 }
0x18ad   : > { %v6406_v36 = vsel %vm12347_vm14, %v6403_v16, %v6405_v23  ;;  %v6412_v35 = vadd.f32 %v6410_v31, %v6398_v3  ;;  %vm12355_vm14 = vmmov %vm12354_vm1  ;;  %v9617_v31 = vld [vmem:[%s12358_s19] sm:$0xff]   ;;  %v9620_v3 = vld [vmem:[%s12358_s19 + $0x18] sm:$0xff]  }
0x18ae   : > { %v6417_v7 = vpop.permute.xlu1 %6416  ;;  %v6411_v22 = vsel %vm10108_vm8, %v6406_v36, 0.0 }
0x18af   : > { %v6423_v61 = vsel %vm12350_vm10, 0.0, %v6417_v7  ;;  %v6413_v62 = vadd.f32 %v6411_v22, %v6399_v50  ;;  %vm12359_vm10 = vcmask 908288   ;;  %v9618_v22 = vld [vmem:[%s12358_s19 + $0x8] sm:$0xff]   ;;  %v9621_v50 = vld [vmem:[%s12358_s19 + $0x20] ss:$0 sps:$4 sm:$0xff]  }
0x18b0   : > { %v6419_v60 = vpop.permute.xlu0 %6418  ;;  %v6424_v32 = vsel %vm10096_vm4, %v6423_v61, 0.0 }
0x18b1   : > { %v6420_v15 = vsel %vm12351_vm13, %v6417_v7, %v6419_v60  ;;  %v6426_v2 = vadd.f32 %v6424_v32, %v6412_v35  ;;  %vm12360_vm13 = vmmov %vm12359_vm10 }
0x18b2   : > { %v6425_v39 = vsel %vm10100_vm6, %v6420_v15, 0.0 }
0x18b3   : > { %v6427_v5 = vadd.f32 %v6425_v39, %v6413_v62  ;;  %v6428_v33 = vadd.f32 %v6426_v2, %v6350_v54 }
0x18b5   : > { %v6429_v25 = vadd.f32 %v6427_v5, %v6352_v59 }
0x18b6   : > { %v6433_v49 = vpop.permute.xlu1 %6432 }
0x18b8   : > { %v6435_v17 = vpop.permute.xlu0 %6434 }
0x18b9   : > { %v6436_v30 = vsel %vm12352_vm5, %v6433_v49, %v6435_v17  ;;  %v6439_v24 = vsel %vm12353_vm0, %v6435_v17, 0.0  ;;  %vm12361_vm5 = vcmask 1043456  }
0x18ba   : > { %v6447_v53 = vpop.permute.xlu1 %6446  ;;  %v6440_v40 = vsel %vm10104_vm7, %v6436_v30, 0.0  ;;  %v6441_v41 = vsel %vm10108_vm8, %v6439_v24, 0.0  ;;  %vm12362_vm0 = vmmov %vm12361_vm5 }
0x18bb   : > { %v6442_v27 = vadd.f32 %v6440_v40, %v6428_v33  ;;  %v6443_v51 = vadd.f32 %v6441_v41, %v6429_v25 }
0x18bc   : > { %v6449_v4 = vpop.permute.xlu0 %6448 }
0x18bd   : > { %v6450_v47 = vsel %vm12354_vm1, %v6447_v53, %v6449_v4  ;;  %v6453_v26 = vsel %vm12355_vm14, %v6449_v4, 0.0  ;;  %vm12363_vm1 = vcmask 64512  }
0x18be   : > { %v6454_v28 = vsel %vm10096_vm4, %v6450_v47, 0.0  ;;  %v6455_v38 = vsel %vm10100_vm6, %v6453_v26, 0.0  ;;  %v6461_v48 = vpop.permute.xlu1 %6460  ;;  %vm12364_vm14 = vmmov %vm12363_vm1 }
0x18bf   : > { %v6456_v11 = vadd.f32 %v6454_v28, %v6442_v27  ;;  %v6457_v12 = vadd.f32 %v6455_v38, %v6443_v51  ;;  %v9622_v28 = vld [vmem:[%s12127_s13 + $0x78] sm:$0xff]   ;;  %v9624_v27 = vld [vmem:[%s12127_s13 + $0x70] sm:$0xff]  }
0x18c0   : > { %v6463_v19 = vpop.permute.xlu0 %6462  ;;  %v9623_v38 = vld [vmem:[%s12127_s13 + $0x38] sm:$0xff]   ;;  %9061 = vmatprep.subr.bf16.mxu1 %v9622_v28  ;;  %v9625_v51 = vld [vmem:[%s12127_s13 + $0x30] sm:$0xff]  }
0x18c1   : > { %v6464_v13 = vsel %vm12356_vm3, %v6461_v48, %v6463_v19  ;;  %v6467_v20 = vsel %vm12357_vm9, %v6463_v19, 0.0  ;;  %vm12365_vm3 = vmmov %vm12363_vm1  ;;  %9062 = vmatpush3.bf16.msra.mxu1 %v9623_v38  ;;  %v9626_v48 = vld [vmem:[%s12127_s13 + $0x68] sm:$0xff]  }
0x18c2   : > { %v6468_v14 = vadd.f32 %v6464_v13, %v6456_v11  ;;  %v6469_v16 = vadd.f32 %v6467_v20, %v6457_v12  ;;  %vm12366_vm9 = vmmov %vm12363_vm1  ;;  %9063 = vmatprep.subr.bf16.mxu1 %v9624_v27  ;;  %v9627_v19 = vld [vmem:[%s12127_s13 + $0x28] sm:$0xff]   ;;  %v9628_v11 = vld [vmem:[%s12127_s13 + $0x60] sm:$0xff]  }
0x18c3   : > { %v9629_v12 = vld [vmem:[%s12127_s13 + $0x20] sm:$0xff]   ;;  %v9630_v13 = vld [vmem:[%s12127_s13 + $0x58] sm:$0xff]  }
0x18c4   : > { %v6473_v55 = vpop.permute.xlu0 %6472  ;;  %v6475_v1 = vpop.permute.xlu1 %6474  ;;  %v9631_v20 = vld [vmem:[%s12127_s13 + $0x18] sm:$0xff]  }
0x18c5   : > { %v6476_v23 = vsel %vm12359_vm10, %v6473_v55, %v6475_v1  ;;  %v6479_v7 = vsel %vm12360_vm13, %v6475_v1, 0.0  ;;  %vm12367_vm10 = vmmov %vm12363_vm1  ;;  %9064 = vmatpush3.bf16.msra.mxu1 %v9625_v51  ;;  %vm12368_vm13 = vcmask 138240  }
0x18c6   : > { %v6480_v60 = vsel %vm10104_vm7, %v6476_v23, 0.0  ;;  %v6481_v42 = vsel %vm10108_vm8, %v6479_v7, 0.0  ;;  %9065 = vmatprep.subr.bf16.mxu1 %v9626_v48 }
0x18c7   : > { %v6482_v56 = vadd.f32 %v6480_v60, %v6468_v14  ;;  %v6483_v58 = vadd.f32 %v6481_v42, %v6469_v16 }
0x18c9   : > { %v6490_v36 = vadd.f32 %v11416_v57, %v6482_v56  ;;  %v6491_v8 = vadd.f32 %v11416_v57, %v6483_v58  ;;  %v9619_v57 = vld [vmem:[%s12358_s19 + $0x10] sm:$0xff]   ;;  %9066 = vmatpush3.bf16.msra.mxu1 %v9627_v19 }
0x18ca   : > { %9067 = vmatprep.subr.bf16.mxu1 %v9628_v11 }
0x18cb   : > { %v6493_v63 = vmax.f32 %v6491_v8, 0.0  ;;  %v6492_v61 = vmax.f32 %v6490_v36, 0.0 }
0x18cd   : > { %v6495_v15 = vpack.c.bf16 %v6493_v63, %v6493_v63  ;;  %v6494_v6 = vpack.c.bf16 %v6492_v61, %v6492_v61  ;;  %9068 = vmatpush3.bf16.msra.mxu1 %v9629_v12 }
0x18ce   : > { %9069 = vmatprep.subr.bf16.mxu1 %v9630_v13 }
0x18cf   : > { %8869 = vmatprep.subr.msk.bf16.mxu0 %vm12361_vm5, %v6495_v15  ;;  %v6544_v29 = vsel %vm12362_vm0, %v6494_v6, 0  ;;  %vm12369_vm5 = vcmask 121856   ;;  %vm12370_vm0 = vcmask 130048  }
0x18d0   : > { %6564 = vmatpush1.bf16.msra.mxu0 %v6544_v29 }
0x18d1   : > { %9293 = vmatprep.subr.bf16.mxu0 %v9752_v21  ;;  %9070 = vmatpush3.bf16.msra.mxu1 %v9631_v20  ;;  %v11513_v55 = vpop.permute.xlu1 %6741 }
0x18d3   : > { %8870 = vmatmul.mubr.msk.bf16.vlgmr.msra.gmra.mxu0 %vm12363_vm1, %v9617_v31  ;;  %vm12371_vm1 = vcmask 7168  }
0x18d4   : > { %6591 = vmatprep.mubr.bf16.mxu0 %v9743_v0 }
0x18db   : > { %8871 = vmatmul.mubr.msk.bf16.gmra.mxu0 %vm12364_vm14, %v9618_v22  ;;  %vm12372_vm14 = vmmov %vm12368_vm13 }
0x18dc   : > { %6601 = vmatprep.mubr.bf16.mxu0 %v9743_v0 }
0x18e3   : > { %8872 = vmatmul.mubr.msk.bf16.gmra.mxu0 %vm12365_vm3, %v9619_v57  ;;  %vm12373_vm3 = vmmov %vm12369_vm5 }
0x18e4   : > { %6611 = vmatprep.mubr.bf16.mxu0 %v9743_v0 }
0x18eb   : > { %8873 = vmatmul.mubr.msk.bf16.gmra.mxu0 %vm12366_vm9, %v9620_v3  ;;  %vm12374_vm9 = vmmov %vm12370_vm0 }
0x18ec   : > { %6621 = vmatprep.mubr.bf16.mxu0 %v9743_v0 }
0x18f3   : > { %8874 = vmatmul.mubr.msk.bf16.gmra.mxu0 %vm12367_vm10, %v9621_v50  ;;  %vm12375_vm10 = vmmov %vm12371_vm1 }
0x18f4   : > { %9295 = vmatprep.mubr.msk.bf16.mxu0 %vm12206_vm2, %v9752_v21 }
0x1993   : > { %v6583_v32 = vpop.f32.mrf.mxu0 }
0x1994   : > { %6632 = vrot.lane.b32.xlu0 %v6583_v32, %s12282_s7 }
0x1995   : > { %v6585_v39 = vpop.f32.mrf.mxu0 }
0x1996   : > { %6634 = vrot.lane.b32.xlu1 %v6585_v39, %s12282_s7 }
0x1997   : > { %v6587_v49 = vpop.f32.mrf.mxu0 }
0x1998   : > { %6644 = vrot.lane.b32.xlu0 %v6587_v49, %s12283_s14 }
0x1999   : > { %v6589_v35 = vpop.f32.mrf.mxu0 }
0x199a   : > { %6646 = vrot.lane.b32.xlu1 %v6589_v35, %s12283_s14 }
0x199b   : > { %v6593_v62 = vpop.f32.mrf.mxu0 }
0x199c   : > { %6656 = vrot.lane.b32.xlu0 %v6593_v62, %s12207_s0 }
0x199d   : > { %v6595_v17 = vpop.f32.mrf.mxu0 }
0x199e   : > { %6658 = vrot.lane.b32.xlu1 %v6595_v17, %s12207_s0 }
0x199f   : > { %v6597_v2 = vpop.f32.mrf.mxu0 }
0x19a0   : > { %6670 = vrot.lane.b32.xlu0 %v6597_v2, %s12188_s1 }
0x19a1   : > { %v6599_v5 = vpop.f32.mrf.mxu0 }
0x19a2   : > { %6672 = vrot.lane.b32.xlu1 %v6599_v5, %s12188_s1 }
0x19a3   : > { %v11491_v30 = vpop.f32.mrf.mxu0 }
0x19a5   : > { %v11493_v24 = vpop.f32.mrf.mxu0 }
0x19a7   : > { %v6607_v53 = vpop.f32.mrf.mxu0 }
0x19a8   : > { %6686 = vrot.lane.b32.xlu1 %v6607_v53, %s12189_s15 }
0x19a9   : > { %v6609_v54 = vpop.f32.mrf.mxu0 }
0x19aa   : > { %6688 = vrot.lane.b32.xlu0 %v6609_v54, %s12189_s15 }
0x19ab   : > { %v6613_v59 = vpop.f32.mrf.mxu0 }
0x19ac   : > { %6700 = vrot.lane.b32.xlu1 %v6613_v59, %s12148_s18 }
0x19ad   : > { %v6615_v40 = vpop.f32.mrf.mxu0 }
0x19ae   : > { %6702 = vrot.lane.b32.xlu0 %v6615_v40, %s12148_s18 }
0x19af   : > { %v6617_v41 = vpop.f32.mrf.mxu0 }
0x19b1   : > { %v6619_v4 = vpop.f32.mrf.mxu0 }
0x19b2   : > { %6714 = vrot.lane.b32.xlu0 %v6617_v41, %s12150_s23 }
0x19b3   : > { %v6623_v25 = vpop.f32.mrf.mxu0 }
0x19b5   : > { %v6625_v33 = vpop.f32.mrf.mxu0 }
0x19b6   : > { %6716 = vrot.lane.b32.xlu0 %v6619_v4, %s12150_s23  ;;  %6728 = vrot.lane.b32.xlu1 %v6625_v33, %s12151_s2 }
0x19b7   : > { %v6627_v47 = vpop.f32.mrf.mxu0 }
0x19b9   : > { %v6628_v26 = vpop.f32.mrf.mxu0 }
0x19ba   : > { %6726 = vrot.lane.b32.xlu0 %v6623_v25, %s12151_s2 }
0x1a06   : > { %v6633_v1 = vpop.permute.xlu0 %6632 }
0x1a07   : > { %v6639_v61 = vsel %vm12372_vm14, 0.0, %v6633_v1  ;;  %vm12380_vm14 = vcmask 916480  }
0x1a08   : > { %v6635_v14 = vpop.permute.xlu1 %6634  ;;  %v6640_v32 = vsel %vm10096_vm4, %v6639_v61, 0.0  ;;  %v9633_v61 = vld [vmem:[%s12127_s13 + $0x10] sm:$0xff]  }
0x1a09   : > { %v6636_v56 = vsel %vm12368_vm13, %v6633_v1, %v6635_v14  ;;  %vm12376_vm13 = vcmask 1039360  }
0x1a0a   : > { %v6645_v16 = vpop.permute.xlu0 %6644  ;;  %v6641_v15 = vsel %vm10100_vm6, %v6636_v56, 0.0 }
0x1a0b   : > { %v6651_v31 = vsel %vm12374_vm9, 0.0, %v6645_v16  ;;  %vm12382_vm9 = vmmov %vm12380_vm14 }
0x1a0c   : > { %v6647_v23 = vpop.permute.xlu1 %6646  ;;  %v6652_v62 = vadd.f32 %v6651_v31, %v6640_v32  ;;  %v9634_v31 = vld [vmem:[%s12127_s13 + $0x48] sm:$0xff]   ;;  %v7261_v32 = vld [vmem:[%s12384_s16] sm:$0xff] }
0x1a0d   : > { %v6648_v8 = vsel %vm12370_vm0, %v6645_v16, %v6647_v23  ;;  %vm12378_vm0 = vmmov %vm12376_vm13 }
0x1a0e   : > { %v6657_v60 = vpop.permute.xlu0 %6656  ;;  %v6653_v22 = vadd.f32 %v6648_v8, %v6641_v15  ;;  %v9632_v8 = vld [vmem:[%s12127_s13 + $0x50] sm:$0xff]  }
0x1a0f   : > { %v6663_v6 = vsel %vm12373_vm3, 0.0, %v6657_v60  ;;  %vm12381_vm3 = vcmask 908288   ;;  %9071 = vmatprep.subr.bf16.mxu1 %v9632_v8  ;;  %v9651_v8 = vld [vmem:[%s12126_s9 + $0x4] ss:$8 sps:$4 sm:$0xff]  }
0x1a10   : > { %v6659_v7 = vpop.permute.xlu1 %6658  ;;  %v6664_v39 = vsel %vm10104_vm7, %v6663_v6, 0.0  ;;  %9072 = vmatpush3.bf16.msra.mxu1 %v9633_v61  ;;  %v9649_v61 = vld [vmem:[%s12126_s9] ss:$8 sps:$4 sm:$0xff]  }
0x1a11   : > { %v6660_v58 = vsel %vm12369_vm5, %v6657_v60, %v6659_v7  ;;  %v6666_v54 = vadd.f32 %v6664_v39, %v6652_v62  ;;  %vm12377_vm5 = vcmask 924672   ;;  %9073 = vmatprep.subr.bf16.mxu1 %v9634_v31  ;;  %v7262_v39 = vld [vmem:[%s12384_s16 + $0x8] sm:$0xff] }
0x1a12   : > { %v6671_v36 = vpop.permute.xlu0 %6670  ;;  %v6665_v29 = vsel %vm10108_vm8, %v6660_v58, 0.0 }
0x1a13   : > { %v6677_v3 = vsel %vm12375_vm10, 0.0, %v6671_v36  ;;  %v6667_v49 = vadd.f32 %v6665_v29, %v6653_v22  ;;  %vm12383_vm10 = vmmov %vm12381_vm3  ;;  %v9635_v22 = vld [vmem:[%s12127_s13 + $0x8] sm:$0xff]  }
0x1a14   : > { %v6673_v42 = vpop.permute.xlu1 %6672  ;;  %v6678_v17 = vsel %vm10096_vm4, %v6677_v3, 0.0  ;;  %9074 = vmatpush3.bf16.msra.mxu1 %v9635_v22  ;;  %v9636_v3 = vld [vmem:[%s12127_s13 + $0x40] sm:$0xff]  }
0x1a15   : > { %v6674_v63 = vsel %vm12371_vm1, %v6671_v36, %v6673_v42  ;;  %v6680_v40 = vadd.f32 %v6678_v17, %v6666_v54  ;;  %vm12379_vm1 = vmmov %vm12377_vm5  ;;  %9075 = vmatprep.subr.bf16.mxu1 %v9636_v3 }
0x1a16   : > { %v6679_v50 = vsel %vm10100_vm6, %v6674_v63, 0.0 }
0x1a17   : > { %v6681_v2 = vadd.f32 %v6679_v50, %v6667_v49  ;;  %v6682_v51 = vadd.f32 %v6680_v40, %v11491_v30  ;;  %v9637_v50 = vld [vmem:[%s12127_s13] sm:$0xff]   ;;  %s12390_s13 = sld [smem:[#allocation33_spill]] }
0x1a18   : > { %9076 = vmatpush3.bf16.msra.mxu1 %v9637_v50 }
0x1a19   : > { %v6683_v25 = vadd.f32 %v6681_v2, %v11493_v24  ;;  %9255 = vmatprep.subr.bf16.mxu1 %v9752_v21 }
0x1a1a   : > { %v6687_v35 = vpop.permute.xlu1 %6686 }
0x1a1c   : > { %v6689_v57 = vpop.permute.xlu0 %6688 }
0x1a1d   : > { %v6693_v5 = vsel %vm12376_vm13, %v6689_v57, 0.0  ;;  %v6690_v41 = vsel %vm12378_vm0, %v6687_v35, %v6689_v57  ;;  %vm12385_vm13 = vmmov %vm12378_vm0  ;;  %v9653_v31 = vld [vmem:[%s12390_s13 + $0x18] sm:$0xff]   ;;  %v9654_v22 = vld [vmem:[%s12390_s13 + $0x20] sm:$0xff]  }
0x1a1e   : > { %v6695_v4 = vsel %vm10108_vm8, %v6693_v5, 0.0  ;;  %v6701_v33 = vpop.permute.xlu1 %6700  ;;  %v6694_v38 = vsel %vm10104_vm7, %v6690_v41, 0.0  ;;  %v9657_v3 = vld [vmem:[%s12390_s13 + $0x38] sm:$0xff]   ;;  %v9658_v50 = vld [vmem:[%s12390_s13 + $0x40] sm:$0xff]  }
0x1a1f   : > { %v6697_v27 = vadd.f32 %v6695_v4, %v6683_v25  ;;  %v6696_v12 = vadd.f32 %v6694_v38, %v6682_v51 }
0x1a20   : > { %v6703_v53 = vpop.permute.xlu0 %6702 }
0x1a21   : > { %v6707_v59 = vsel %vm12377_vm5, %v6703_v53, 0.0  ;;  %v6704_v26 = vsel %vm12379_vm1, %v6701_v33, %v6703_v53  ;;  %vm12386_vm5 = vmmov %vm12378_vm0 }
0x1a22   : > { %v6709_v28 = vsel %vm10100_vm6, %v6707_v59, 0.0  ;;  %v6708_v48 = vsel %vm10096_vm4, %v6704_v26, 0.0  ;;  %vm12387_vm0 = vmmov %vm12382_vm9 }
0x1a23   : > { %v6711_v19 = vadd.f32 %v6709_v28, %v6697_v27  ;;  %v6710_v30 = vadd.f32 %v6708_v48, %v6696_v12  ;;  %vm12388_vm1 = vmmov %vm12387_vm0 }
0x1a24   : > { %v6715_v47 = vpop.permute.xlu0 %6714 }
0x1a28   : > { %v6717_v11 = vpop.permute.xlu0 %6716  ;;  %v6729_v24 = vpop.permute.xlu1 %6728 }
0x1a29   : > { %v6721_v13 = vsel %vm12380_vm14, %v6717_v11, 0.0  ;;  %v6733_v20 = vsel %vm12381_vm3, %v6729_v24, 0.0  ;;  %v6718_v1 = vsel %vm12382_vm9, %v6715_v47, %v6717_v11  ;;  %vm12389_vm14 = vmmov %vm12381_vm3  ;;  %vm12391_vm9 = vcmask 1043456  }
0x1a2a   : > { %v6723_v14 = vadd.f32 %v6721_v13, %v6711_v19  ;;  %v6735_v16 = vsel %vm10108_vm8, %v6733_v20, 0.0  ;;  %v6722_v60 = vadd.f32 %v6718_v1, %v6710_v30 }
0x1a2c   : > { %v6737_v23 = vadd.f32 %v6735_v16, %v6723_v14  ;;  %v6727_v7 = vpop.permute.xlu0 %6726  ;;  %v9641_v14 = vld [vmem:[%s12126_s9 + $0x34] ss:$8 sps:$4 sm:$0xff]  }
0x1a2d   : > { %v6730_v42 = vsel %vm12383_vm10, %v6727_v7, %v6729_v24  ;;  %v9639_v7 = vld [vmem:[%s12126_s9 + $0x30] ss:$8 sps:$4 sm:$0xff]   ;;  %vm12392_vm10 = vcmask 64512  }
0x1a2e   : > { %v6745_v56 = vadd.f32 %v11513_v55, %v6737_v23  ;;  %v6734_v58 = vsel %vm10104_vm7, %v6730_v42, 0.0  ;;  %v9638_v23 = vld [vmem:[%s12390_s13] sm:$0xff]  }
0x1a2f   : > { %v6736_v36 = vadd.f32 %v6734_v58, %v6722_v60  ;;  %v9644_v60 = vld [vmem:[%s12126_s9 + $0x24] ss:$8 sps:$4 sm:$0xff]   ;;  %v9642_v42 = vld [vmem:[%s12126_s9 + $0x20] ss:$8 sps:$4 sm:$0xff]  }
0x1a30   : > { %v11559_v63 = vmax.f32 %v6745_v56, 0.0  ;;  %v9648_v56 = vld [vmem:[%s12126_s9 + $0x14] ss:$8 sps:$4 sm:$0xff]   ;;  %v9645_v58 = vld [vmem:[%s12390_s13 + $0x8] sm:$0xff]  }
0x1a31   : > { %v6744_v15 = vadd.f32 %v11513_v55, %v6736_v36  ;;  %v9646_v36 = vld [vmem:[%s12126_s9 + $0x10] ss:$8 sps:$4 sm:$0xff]   ;;  %s12402_s9 = sld [smem:[#allocation32_spill]] }
0x1a32   : > { %v6749_v6 = vpack.c.bf16 %v11559_v63, %v11559_v63 }
0x1a33   : > { %v11565_v29 = vmax.f32 %v6744_v15, 0.0  ;;  %v9652_v15 = vld [vmem:[%s12390_s13 + $0x10] sm:$0xff]  }
0x1a35   : > { %v6748_v57 = vpack.c.bf16 %v11565_v29, %v11565_v29  ;;  %v9448_v55 = vpack.i.bf16 %v11565_v29, %v11559_v63 }
0x1a37   : > { %9449 = vrot.lane.b32.xlu0 %v9448_v55, %s12150_s23  ;;  %9444 = vrot.lane.b32.xlu1 %v9448_v55, %s12189_s15 }
0x1a3b   : > { %7265 = vperm.xlu0 %9411, %v7261_v32   ;;  %9454 = vrot.lane.b32.xlu1 %v9448_v55, %s12151_s2 }
0x1a3f   : > { %7270 = vperm.xlu1 %9412, %v7262_v39  }
0x1aa9   : > { %v9450_v49 = vpop.permute.xlu0 %9449  ;;  %v9445_v35 = vpop.permute.xlu1 %9444 }
0x1aaa   : > { %v9447_v62 = vunpack.i.h.bf16 %v9445_v35  ;;  %v9446_v17 = vunpack.i.l.bf16 %v9445_v35  ;;  %v9452_v2 = vunpack.i.h.bf16 %v9450_v49  ;;  %v9451_v5 = vunpack.i.l.bf16 %v9450_v49 }
0x1aac   : > { %v6758_v54 = vsel %vm12385_vm13, %v9447_v62, %v9446_v17  ;;  %v6761_v59 = vsel %vm12386_vm5, %v9446_v17, 0.0  ;;  %v6768_v4 = vsel %vm12387_vm0, %v9452_v2, %v9451_v5  ;;  %v6771_v25 = vsel %vm12388_vm1, %v9451_v5, 0.0  ;;  %vm12393_vm13 = vmmov %vm12392_vm10 }
0x1aad   : > { %v9455_v53 = vpop.permute.xlu1 %9454  ;;  %v6762_v26 = vmax.f32 %v11565_v29, %v6758_v54  ;;  %v6763_v28 = vmax.f32 %v11559_v63, %v6761_v59  ;;  %vm12394_vm5 = vmmov %vm12391_vm9  ;;  %v9655_v63 = vld [vmem:[%s12390_s13 + $0x28] sm:$0xff]  }
0x1aae   : > { %v9457_v40 = vunpack.i.h.bf16 %v9455_v53  ;;  %v9456_v41 = vunpack.i.l.bf16 %v9455_v53  ;;  %vm12395_vm0 = vmmov %vm12392_vm10 }
0x1aaf   : > { %vm12396_vm1 = vmmov %vm12395_vm0 }
0x1ab0   : > { %v6776_v33 = vsel %vm12389_vm14, %v9457_v40, %v9456_v41  ;;  %v6779_v47 = vsel %vm12381_vm3, %v9456_v41, 0.0  ;;  %vm12397_vm14 = vmmov %vm12395_vm0 }
0x1ab1   : > { %v6780_v38 = vmax.f32 %v6768_v4, %v6776_v33  ;;  %v6781_v27 = vmax.f32 %v6771_v25, %v6779_v47  ;;  %vm12398_vm3 = vmmov %vm12395_vm0 }
0x1ab3   : > { %v6782_v51 = vmax.f32 %v6762_v26, %v6780_v38  ;;  %v6783_v48 = vmax.f32 %v6763_v28, %v6781_v27 }
0x1ab5   : > { %v6784_v19 = vpack.c.bf16 %v6782_v51, %v6782_v51  ;;  %v6785_v11 = vpack.c.bf16 %v6783_v48, %v6783_v48 }
0x1ab7   : > { %6946 = vmatprep.mubr.bf16.mxu1 %v6785_v11 }
0x1ab8   : > { %6947 = vmatmul.mubr.bf16.vlgmr.msra.gmra.mxu1 %v6784_v19 }
0x1ab9   : > { %9257 = vmatprep.mubr.msk.bf16.mxu1 %vm12206_vm2, %v9752_v21 }
0x1b78   : > { %v9077_v24 = vpop.f32.mrf.mxu1 }
0x1b7a   : > { %v9078_v12 = vpop.f32.mrf.mxu1 }
0x1b7b   : > { %v9079_v13 = vadd.f32 %v9078_v12, %v9077_v24 }
0x1b7c   : > { %v9080_v20 = vpop.f32.mrf.mxu1 }
0x1b7d   : > { %v6954_v1 = vpack.c.bf16 %v9079_v13, %v9079_v13 }
0x1b7e   : > { %v9081_v16 = vpop.f32.mrf.mxu1 }
0x1b7f   : > { %v7046_v30 = vsel %vm12391_vm9, %v6954_v1, 0  ;;  %vm12399_vm9 = vmmov %vm12395_vm0 }
0x1b80   : > { %9256 = vmatpush3.bf16.msra.mxu1 %v7046_v30 }
0x1b81   : > { %7657 = vmatprep.subr.bf16.mxu1 %v9641_v14 }
0x1b83   : > { %9258 = vmatmul.mubr.msk.bf16.vlgmr.msra.gmra.mxu1 %vm12392_vm10, %v9638_v23  ;;  %vm12400_vm10 = vmmov %vm12395_vm0  ;;  %v7581_v23 = vld [vmem:[%s12402_s9] sm:$0xff] }
0x1b84   : > { %7658 = vmatpush1.bf16.msra.mxu1 %v9639_v7  ;;  %9261 = vmatprep.mubr.msk.bf16.mxu1 %vm12206_vm2, %v9752_v21 }
0x1b85   : > { %7659 = vmatprep.subr.bf16.mxu1 %v9644_v60 }
0x1b88   : > { %7660 = vmatpush1.bf16.msra.mxu1 %v9642_v42  ;;  %v7582_v42 = vld [vmem:[%s12402_s9 + $0x8] sm:$0xff]  ;;  %s12416_s9 = sld [smem:[#allocation34_spill]] }
0x1b89   : > { %7661 = vmatprep.subr.bf16.mxu1 %v9648_v56  ;;  %v7266_v56 = vpop.permute.xlu0 %7265 }
0x1b8b   : > { %9262 = vmatmul.mubr.msk.bf16.gmra.mxu1 %vm12393_vm13, %v9645_v58  ;;  %vm12401_vm13 = vmmov %vm12395_vm0  ;;  %v7271_v58 = vpop.permute.xlu1 %7270 }
0x1b8c   : > { %7662 = vmatpush1.bf16.msra.mxu1 %v9646_v36  ;;  %9265 = vmatprep.mubr.msk.bf16.mxu1 %vm12206_vm2, %v9752_v21 }
0x1b8d   : > { %7663 = vmatprep.subr.bf16.mxu1 %v9651_v8 }
0x1b90   : > { %7664 = vmatpush1.bf16.msra.mxu1 %v9649_v61 }
0x1b91   : > { %8951 = vmatprep.subr.msk.bf16.mxu1 %vm12394_vm5, %v6749_v6  ;;  %v9656_v6 = vld [vmem:[%s12390_s13 + $0x30] sm:$0xff]   ;;  %vm12403_vm5 = vcmask 72704  }
0x1b93   : > { %9266 = vmatmul.mubr.msk.bf16.gmra.mxu1 %vm12395_vm0, %v9652_v15  ;;  %vm12404_vm0 = vcmask 56320  }
0x1b94   : > { %9269 = vmatprep.mubr.msk.bf16.mxu1 %vm12206_vm2, %v9752_v21 }
0x1b9b   : > { %9270 = vmatmul.mubr.msk.bf16.gmra.mxu1 %vm12396_vm1, %v9653_v31 }
0x1b9c   : > { %9273 = vmatprep.mubr.msk.bf16.mxu1 %vm12206_vm2, %v9752_v21 }
0x1ba3   : > { %9274 = vmatmul.mubr.msk.bf16.gmra.mxu1 %vm12397_vm14, %v9654_v22  ;;  %vm12405_vm14 = vcmask 7168  }
0x1ba4   : > { %9277 = vmatprep.mubr.msk.bf16.mxu1 %vm12206_vm2, %v9752_v21 }
0x1bab   : > { %9278 = vmatmul.mubr.msk.bf16.gmra.mxu1 %vm12398_vm3, %v9655_v63  ;;  %vm12406_vm3 = vmmov %vm12403_vm5 }
0x1bac   : > { %9281 = vmatprep.mubr.msk.bf16.mxu1 %vm12206_vm2, %v9752_v21 }
0x1bb3   : > { %9282 = vmatmul.mubr.msk.bf16.gmra.mxu1 %vm12399_vm9, %v9656_v6  ;;  %vm12407_vm9 = vmmov %vm12404_vm0 }
0x1bb4   : > { %9285 = vmatprep.mubr.msk.bf16.mxu1 %vm12206_vm2, %v9752_v21 }
0x1bbb   : > { %9286 = vmatmul.mubr.msk.bf16.gmra.mxu1 %vm12400_vm10, %v9657_v3  ;;  %vm12408_vm10 = vmmov %vm12396_vm1 }
0x1bbc   : > { %9289 = vmatprep.mubr.msk.bf16.mxu1 %vm12206_vm2, %v9752_v21 }
0x1bc3   : > { %9290 = vmatmul.mubr.msk.bf16.gmra.mxu1 %vm12401_vm13, %v9658_v50  ;;  %vm12409_vm13 = vmmov %vm12405_vm14 }
0x1bc4   : > { %7681 = vmatprep.mubr.bf16.mxu1 %v9743_v0 }
0x1c43   : > { %v7082_v55 = vpop.f32.mrf.mxu1 }
0x1c44   : > { %7155 = vrot.lane.b32.xlu0 %v7082_v55, %s12229_s3 }
0x1c45   : > { %v9259_v32 = vpop.f32.mrf.mxu1 }
0x1c47   : > { %v7085_v39 = vpop.f32.mrf.mxu1 }
0x1c48   : > { %7157 = vrot.lane.b32.xlu1 %v7085_v39, %s12229_s3 }
0x1c49   : > { %v9260_v49 = vpop.f32.mrf.mxu1 }
0x1c4b   : > { %v7090_v35 = vpop.f32.mrf.mxu1 }
0x1c4c   : > { %7167 = vrot.lane.b32.xlu0 %v7090_v35, %s12230_s5 }
0x1c4d   : > { %v9263_v62 = vpop.f32.mrf.mxu1 }
0x1c4f   : > { %v7093_v17 = vpop.f32.mrf.mxu1 }
0x1c50   : > { %7169 = vrot.lane.b32.xlu1 %v7093_v17, %s12230_s5 }
0x1c51   : > { %v9264_v2 = vpop.f32.mrf.mxu1 }
0x1c53   : > { %v7098_v5 = vpop.f32.mrf.mxu1 }
0x1c54   : > { %7179 = vrot.lane.b32.xlu0 %v7098_v5, %s12231_s6 }
0x1c55   : > { %v9267_v53 = vpop.f32.mrf.mxu1 }
0x1c57   : > { %v7101_v54 = vpop.f32.mrf.mxu1 }
0x1c58   : > { %7181 = vrot.lane.b32.xlu1 %v7101_v54, %s12231_s6 }
0x1c59   : > { %v9268_v59 = vpop.f32.mrf.mxu1 }
0x1c5b   : > { %v7106_v40 = vpop.f32.mrf.mxu1 }
0x1c5c   : > { %7193 = vrot.lane.b32.xlu0 %v7106_v40, %s12188_s1 }
0x1c5d   : > { %v9271_v41 = vpop.f32.mrf.mxu1 }
0x1c5f   : > { %v7109_v4 = vpop.f32.mrf.mxu1 }
0x1c60   : > { %7195 = vrot.lane.b32.xlu1 %v7109_v4, %s12188_s1 }
0x1c61   : > { %v9272_v25 = vpop.f32.mrf.mxu1 }
0x1c63   : > { %v11647_v33 = vpop.f32.mrf.mxu1 }
0x1c65   : > { %v9275_v47 = vpop.f32.mrf.mxu1 }
0x1c67   : > { %v11649_v26 = vpop.f32.mrf.mxu1 }
0x1c69   : > { %v9276_v28 = vpop.f32.mrf.mxu1 }
0x1c6b   : > { %v7122_v38 = vpop.f32.mrf.mxu1 }
0x1c6c   : > { %7209 = vrot.lane.b32.xlu0 %v7122_v38, %s12189_s15 }
0x1c6d   : > { %v9279_v27 = vpop.f32.mrf.mxu1 }
0x1c6f   : > { %v7125_v51 = vpop.f32.mrf.mxu1 }
0x1c70   : > { %7211 = vrot.lane.b32.xlu1 %v7125_v51, %s12189_s15 }
0x1c71   : > { %v9280_v48 = vpop.f32.mrf.mxu1 }
0x1c73   : > { %v7130_v19 = vpop.f32.mrf.mxu1 }
0x1c74   : > { %7223 = vrot.lane.b32.xlu0 %v7130_v19, %s12233_s8 }
0x1c75   : > { %v9283_v11 = vpop.f32.mrf.mxu1 }
0x1c77   : > { %v7133_v24 = vpop.f32.mrf.mxu1 }
0x1c78   : > { %7225 = vrot.lane.b32.xlu1 %v7133_v24, %s12233_s8 }
0x1c79   : > { %v9284_v12 = vpop.f32.mrf.mxu1 }
0x1c7b   : > { %v7138_v13 = vpop.f32.mrf.mxu1 }
0x1c7c   : > { %7237 = vrot.lane.b32.xlu0 %v7138_v13, %s12234_s10 }
0x1c7d   : > { %v9287_v20 = vpop.f32.mrf.mxu1 }
0x1c7f   : > { %v7141_v1 = vpop.f32.mrf.mxu1 }
0x1c80   : > { %7239 = vrot.lane.b32.xlu1 %v7141_v1, %s12234_s10 }
0x1c81   : > { %v9288_v14 = vpop.f32.mrf.mxu1 }
0x1c83   : > { %v7146_v16 = vpop.f32.mrf.mxu1 }
0x1c84   : > { %7249 = vrot.lane.b32.xlu0 %v7146_v16, %s12235_s11 }
0x1c85   : > { %v9291_v30 = vpop.f32.mrf.mxu1 }
0x1c87   : > { %v7149_v7 = vpop.f32.mrf.mxu1 }
0x1c88   : > { %7585 = vperm.xlu0 %9411, %v7581_v23   ;;  %7251 = vrot.lane.b32.xlu1 %v7149_v7, %s12235_s11 }
0x1c89   : > { %v9292_v60 = vpop.f32.mrf.mxu1 }
0x1c8c   : > { %7590 = vperm.xlu1 %9412, %v7582_v42  }
0x1cb6   : > { %v7156_v36 = vpop.permute.xlu0 %7155 }
0x1cb7   : > { %v7161_v6 = vsel %vm12403_vm5, 0.0, %v7156_v36  ;;  %vm12410_vm5 = vcmask 515072  }
0x1cb8   : > { %v7163_v32 = vsel %vm10346_vm12, %v7161_v6, 0.0 }
0x1cba   : > { %v7158_v8 = vpop.permute.xlu1 %7157 }
0x1cbb   : > { %v7162_v62 = vsel %vm12406_vm3, 0.0, %v7158_v8  ;;  %vm12414_vm3 = vcmask 457728  }
0x1cbc   : > { %v7164_v40 = vsel %vm10346_vm12, %v7162_v62, 0.0 }
0x1cbe   : > { %v7168_v61 = vpop.permute.xlu0 %7167 }
0x1cbf   : > { %v7173_v50 = vsel %vm12396_vm1, 0.0, %v7168_v61  ;;  %vm12412_vm1 = vmmov %vm12410_vm5 }
0x1cc0   : > { %v7175_v17 = vadd.f32 %v7173_v50, %v7163_v32 }
0x1cc2   : > { %v7170_v15 = vpop.permute.xlu1 %7169 }
0x1cc3   : > { %v7174_v5 = vsel %vm12408_vm10, 0.0, %v7170_v15  ;;  %vm12417_vm10 = vmmov %vm12414_vm3 }
0x1cc4   : > { %v7176_v47 = vadd.f32 %v7174_v5, %v7164_v40  ;;  %v9660_v5 = vld [vmem:[%s12416_s9 + $0x8] sm:$0xff]   ;;  %v9666_v40 = vld [vmem:[%s12416_s9 + $0x38] sm:$0xff]  }
0x1cc6   : > { %v7180_v31 = vpop.permute.xlu0 %7179 }
0x1cc7   : > { %v7185_v3 = vsel %vm12404_vm0, 0.0, %v7180_v31  ;;  %vm12411_vm0 = vcmask 465920  }
0x1cc8   : > { %v7187_v39 = vsel %vm10351_vm11, %v7185_v3, 0.0 }
0x1cc9   : > { %v7189_v54 = vadd.f32 %v7187_v39, %v7175_v17 }
0x1cca   : > { %v7182_v22 = vpop.permute.xlu1 %7181 }
0x1ccb   : > { %v7186_v2 = vsel %vm12407_vm9, 0.0, %v7182_v22  ;;  %vm12415_vm9 = vcmask 449536  }
0x1ccc   : > { %v7188_v41 = vsel %vm10351_vm11, %v7186_v2, 0.0  ;;  %v9659_v2 = vld [vmem:[%s12416_s9] sm:$0xff]  }
0x1ccd   : > { %v7190_v51 = vadd.f32 %v7188_v41, %v7176_v47  ;;  %v9667_v41 = vld [vmem:[%s12416_s9 + $0x40] sm:$0xff]  }
0x1cce   : > { %v7194_v63 = vpop.permute.xlu0 %7193 }
0x1ccf   : > { %v7199_v55 = vsel %vm12405_vm14, 0.0, %v7194_v63  ;;  %vm12413_vm14 = vmmov %vm12411_vm0 }
0x1cd0   : > { %v7201_v53 = vsel %vm10346_vm12, %v7199_v55, 0.0 }
0x1cd1   : > { %v7203_v28 = vadd.f32 %v7201_v53, %v7189_v54  ;;  %v9663_v53 = vld [vmem:[%s12416_s9 + $0x20] sm:$0xff]   ;;  %v9664_v54 = vld [vmem:[%s12416_s9 + $0x28] sm:$0xff]  }
0x1cd2   : > { %v7196_v49 = vpop.permute.xlu1 %7195 }
0x1cd3   : > { %v7200_v59 = vsel %vm12409_vm13, 0.0, %v7196_v49  ;;  %v7205_v12 = vadd.f32 %v7203_v28, %v11647_v33  ;;  %vm12418_vm13 = vmmov %vm12415_vm9 }
0x1cd4   : > { %v7202_v27 = vsel %vm10346_vm12, %v7200_v59, 0.0  ;;  %v9665_v59 = vld [vmem:[%s12416_s9 + $0x30] sm:$0xff]  }
0x1cd5   : > { %v7204_v24 = vadd.f32 %v7202_v27, %v7190_v51 }
0x1cd7   : > { %v7206_v7 = vadd.f32 %v7204_v24, %v11649_v26 }
0x1cde   : > { %v7210_v35 = vpop.permute.xlu0 %7209 }
0x1cdf   : > { %v7215_v38 = vsel %vm12410_vm5, %v7210_v35, 0.0  ;;  %vm12419_vm5 = vcmask 130048  }
0x1ce0   : > { %v7217_v19 = vsel %vm10351_vm11, %v7215_v38, 0.0 }
0x1ce1   : > { %v7219_v14 = vadd.f32 %v7217_v19, %v7205_v12 }
0x1ce2   : > { %v7212_v4 = vpop.permute.xlu1 %7211 }
0x1ce3   : > { %v7216_v13 = vsel %vm12412_vm1, %v7212_v4, 0.0 }
0x1ce4   : > { %v7218_v30 = vsel %vm10351_vm11, %v7216_v13, 0.0 }
0x1ce5   : > { %v7220_v8 = vadd.f32 %v7218_v30, %v7206_v7 }
0x1ce6   : > { %v7224_v25 = vpop.permute.xlu0 %7223 }
0x1ce7   : > { %v7229_v48 = vsel %vm12411_vm0, %v7224_v25, 0.0  ;;  %vm12420_vm0 = vmmov %vm12419_vm5 }
0x1ce8   : > { %v7231_v1 = vsel %vm10346_vm12, %v7229_v48, 0.0  ;;  %vm12421_vm1 = vmmov %vm12420_vm0 }
0x1ce9   : > { %v7233_v60 = vadd.f32 %v7231_v1, %v7219_v14 }
0x1cea   : > { %v7226_v11 = vpop.permute.xlu1 %7225 }
0x1ceb   : > { %v7230_v16 = vsel %vm12413_vm14, %v7226_v11, 0.0  ;;  %vm12422_vm14 = vmmov %vm12420_vm0 }
0x1cec   : > { %v7232_v33 = vsel %vm10346_vm12, %v7230_v16, 0.0 }
0x1ced   : > { %v7234_v63 = vadd.f32 %v7232_v33, %v7220_v8 }
0x1cee   : > { %v7238_v20 = vpop.permute.xlu0 %7237 }
0x1cef   : > { %v7243_v23 = vsel %vm12414_vm3, %v7238_v20, 0.0  ;;  %vm12423_vm3 = vmmov %vm12420_vm0 }
0x1cf0   : > { %v7245_v61 = vadd.f32 %v7243_v23, %v7233_v60 }
0x1cf2   : > { %v7240_v42 = vpop.permute.xlu1 %7239 }
0x1cf3   : > { %v7244_v31 = vsel %vm12417_vm10, %v7240_v42, 0.0  ;;  %vm12425_vm10 = vmmov %vm12420_vm0 }
0x1cf4   : > { %v7246_v3 = vadd.f32 %v7244_v31, %v7234_v63 }
0x1cf6   : > { %v7250_v36 = vpop.permute.xlu0 %7249 }
0x1cf7   : > { %v7255_v15 = vsel %vm12415_vm9, %v7250_v36, 0.0  ;;  %vm12424_vm9 = vmmov %vm12420_vm0 }
0x1cf8   : > { %v7257_v22 = vsel %vm10351_vm11, %v7255_v15, 0.0 }
0x1cf9   : > { %v7259_v6 = vadd.f32 %v7257_v22, %v7245_v61 }
0x1cfa   : > { %v7252_v26 = vpop.permute.xlu1 %7251 }
0x1cfb   : > { %v7256_v50 = vsel %vm12418_vm13, %v7252_v26, 0.0  ;;  %v7273_v32 = vadd.f32 %v7266_v56, %v7259_v6  ;;  %v9661_v56 = vld [vmem:[%s12416_s9 + $0x10] sm:$0xff]   ;;  %vm12426_vm13 = vmmov %vm12420_vm0 }
0x1cfc   : > { %v7258_v55 = vsel %vm10351_vm11, %v7256_v50, 0.0 }
0x1cfd   : > { %v7260_v39 = vadd.f32 %v7258_v55, %v7246_v3  ;;  %v7275_v35 = vmax.f32 %v7273_v32, 0.0 }
0x1cff   : > { %v7274_v49 = vadd.f32 %v7271_v58, %v7260_v39  ;;  %v9662_v58 = vld [vmem:[%s12416_s9 + $0x18] sm:$0xff]  }
0x1d01   : > { %v7276_v62 = vmax.f32 %v7274_v49, 0.0 }
0x1d03   : > { %v7277_v17 = vpack.c.bf16 %v7276_v62, %v7275_v35  ;;  %v7586_v39 = vpop.permute.xlu0 %7585 }
0x1d05   : > { %9294 = vmatpush3.bf16.msra.mxu0 %v7277_v17 }
0x1d07   : > { %v7591_v49 = vpop.permute.xlu1 %7590 }
0x1d08   : > { %9296 = vmatmul.mubr.msk.bf16.vlgmr.msra.gmra.mxu0 %vm12419_vm5, %v9659_v2  ;;  %vm12427_vm5 = vmmov %vm12420_vm0 }
0x1d09   : > { %9299 = vmatprep.mubr.msk.bf16.mxu0 %vm12206_vm2, %v9752_v21 }
0x1d10   : > { %9300 = vmatmul.mubr.msk.bf16.gmra.mxu0 %vm12420_vm0, %v9660_v5  ;;  %vm12430_vm0 = vcmask 56320  }
0x1d11   : > { %9303 = vmatprep.mubr.msk.bf16.mxu0 %vm12206_vm2, %v9752_v21 }
0x1d18   : > { %9304 = vmatmul.mubr.msk.bf16.gmra.mxu0 %vm12421_vm1, %v9661_v56  ;;  %vm12431_vm1 = vcmask 64512  }
0x1d19   : > { %9307 = vmatprep.mubr.msk.bf16.mxu0 %vm12206_vm2, %v9752_v21 }
0x1d20   : > { %9308 = vmatmul.mubr.msk.bf16.gmra.mxu0 %vm12422_vm14, %v9662_v58  ;;  %vm12432_vm14 = vcmask 7168  }
0x1d21   : > { %9311 = vmatprep.mubr.msk.bf16.mxu0 %vm12206_vm2, %v9752_v21 }
0x1d28   : > { %9312 = vmatmul.mubr.msk.bf16.gmra.mxu0 %vm12423_vm3, %v9663_v53 }
0x1d29   : > { %9315 = vmatprep.mubr.msk.bf16.mxu0 %vm12206_vm2, %v9752_v21 }
0x1d30   : > { %9316 = vmatmul.mubr.msk.bf16.gmra.mxu0 %vm12424_vm9, %v9664_v54  ;;  %vm12434_vm9 = vmmov %vm12430_vm0 }
0x1d31   : > { %9319 = vmatprep.mubr.msk.bf16.mxu0 %vm12206_vm2, %v9752_v21 }
0x1d38   : > { %9320 = vmatmul.mubr.msk.bf16.gmra.mxu0 %vm12425_vm10, %v9665_v59  ;;  %vm12435_vm10 = vmmov %vm12431_vm1 }
0x1d39   : > { %9323 = vmatprep.mubr.msk.bf16.mxu0 %vm12206_vm2, %v9752_v21 }
0x1d40   : > { %9324 = vmatmul.mubr.msk.bf16.gmra.mxu0 %vm12426_vm13, %v9666_v40  ;;  %vm12436_vm13 = vmmov %vm12432_vm14 }
0x1d41   : > { %9327 = vmatprep.mubr.msk.bf16.mxu0 %vm12206_vm2, %v9752_v21  ;;  %vm12429_vm2 = vcmask 72704  }
0x1d42   : > { %vm12433_vm3 = vmmov %vm12429_vm2 }
0x1d48   : > { %9328 = vmatmul.mubr.msk.bf16.gmra.mxu0 %vm12427_vm5, %v9667_v41  ;;  %vm12437_vm5 = vcmask 515072  }
0x1d49   : > { %7782 = vmatprep.mubr.bf16.mxu0 %v9743_v0 }
0x1dc8   : > { %v7402_v4 = vpop.f32.mrf.mxu0 }
0x1dc9   : > { %7475 = vrot.lane.b32.xlu0 %v7402_v4, %s12229_s3 }
0x1dca   : > { %v9297_v25 = vpop.f32.mrf.mxu0 }
0x1dcc   : > { %v7405_v47 = vpop.f32.mrf.mxu0 }
0x1dcd   : > { %7477 = vrot.lane.b32.xlu1 %v7405_v47, %s12229_s3  ;;  %s12444_s3 = sld [smem:[#allocation44_spill]] }
0x1dce   : > { %v9298_v28 = vpop.f32.mrf.mxu0 }
0x1dd0   : > { %v7410_v38 = vpop.f32.mrf.mxu0 }
0x1dd1   : > { %7487 = vrot.lane.b32.xlu0 %v7410_v38, %s12230_s5 }
0x1dd2   : > { %v9301_v27 = vpop.f32.mrf.mxu0 }
0x1dd3   : > { %v9669_v37 = vld [vmem:[%s12444_s3] sm:$0xff]   ;;  %v9675_v29 = vld [vmem:[%s12444_s3 + $0x18] sm:$0xff]  }
0x1dd4   : > { %v7413_v51 = vpop.f32.mrf.mxu0 }
0x1dd5   : > { %7489 = vrot.lane.b32.xlu1 %v7413_v51, %s12230_s5  ;;  %s12428_s5 = sld [smem:[#allocation42_spill]] }
0x1dd6   : > { %v9302_v21 = vpop.f32.mrf.mxu0 }
0x1dd8   : > { %v7418_v48 = vpop.f32.mrf.mxu0 }
0x1dd9   : > { %7499 = vrot.lane.b32.xlu0 %v7418_v48, %s12231_s6 }
0x1dda   : > { %v9305_v19 = vpop.f32.mrf.mxu0 }
0x1ddb   : > { %v8064_v50 = vld [vmem:[%s12428_s5] sm:$0xff] }
0x1ddc   : > { %v7421_v11 = vpop.f32.mrf.mxu0 }
0x1ddd   : > { %7501 = vrot.lane.b32.xlu1 %v7421_v11, %s12231_s6  ;;  %s12459_s6 = sld [smem:[#allocation43_spill]] }
0x1dde   : > { %v9306_v24 = vpop.f32.mrf.mxu0 }
0x1de0   : > { %v7426_v12 = vpop.f32.mrf.mxu0 }
0x1de1   : > { %7513 = vrot.lane.b32.xlu0 %v7426_v12, %s12188_s1 }
0x1de2   : > { %v9309_v13 = vpop.f32.mrf.mxu0 }
0x1de4   : > { %v7429_v20 = vpop.f32.mrf.mxu0 }
0x1de5   : > { %7515 = vrot.lane.b32.xlu1 %v7429_v20, %s12188_s1 }
0x1de6   : > { %v9310_v1 = vpop.f32.mrf.mxu0 }
0x1de8   : > { %v11746_v14 = vpop.f32.mrf.mxu0 }
0x1dea   : > { %v9313_v16 = vpop.f32.mrf.mxu0 }
0x1dec   : > { %v11748_v30 = vpop.f32.mrf.mxu0 }
0x1dee   : > { %v9314_v23 = vpop.f32.mrf.mxu0 }
0x1df0   : > { %v7442_v7 = vpop.f32.mrf.mxu0 }
0x1df1   : > { %7529 = vrot.lane.b32.xlu0 %v7442_v7, %s12189_s15 }
0x1df2   : > { %v9317_v60 = vpop.f32.mrf.mxu0 }
0x1df4   : > { %v7445_v42 = vpop.f32.mrf.mxu0 }
0x1df5   : > { %7531 = vrot.lane.b32.xlu1 %v7445_v42, %s12189_s15 }
0x1df6   : > { %v9318_v33 = vpop.f32.mrf.mxu0 }
0x1df8   : > { %v7450_v36 = vpop.f32.mrf.mxu0 }
0x1df9   : > { %7543 = vrot.lane.b32.xlu0 %v7450_v36, %s12233_s8 }
0x1dfa   : > { %v9321_v8 = vpop.f32.mrf.mxu0 }
0x1dfc   : > { %v7453_v61 = vpop.f32.mrf.mxu0 }
0x1dfd   : > { %7545 = vrot.lane.b32.xlu1 %v7453_v61, %s12233_s8  ;;  %s12451_s8 = sld [smem:[#allocation45_spill]] }
0x1dfe   : > { %v9322_v15 = vpop.f32.mrf.mxu0 }
0x1e00   : > { %v7458_v31 = vpop.f32.mrf.mxu0 }
0x1e01   : > { %7557 = vrot.lane.b32.xlu0 %v7458_v31, %s12234_s10 }
0x1e02   : > { %v9325_v22 = vpop.f32.mrf.mxu0 }
0x1e04   : > { %v7461_v63 = vpop.f32.mrf.mxu0 }
0x1e05   : > { %7559 = vrot.lane.b32.xlu1 %v7461_v63, %s12234_s10  ;;  %s12483_s10 = sld [smem:[#allocation40_spill]] }
0x1e06   : > { %v9326_v6 = vpop.f32.mrf.mxu0 }
0x1e08   : > { %v7466_v26 = vpop.f32.mrf.mxu0 }
0x1e09   : > { %7569 = vrot.lane.b32.xlu0 %v7466_v26, %s12235_s11 }
0x1e0a   : > { %v9329_v3 = vpop.f32.mrf.mxu0 }
0x1e0c   : > { %v7469_v55 = vpop.f32.mrf.mxu0 }
0x1e0d   : > { %8067 = vperm.xlu0 %9411, %v8064_v50   ;;  %7571 = vrot.lane.b32.xlu1 %v7469_v55, %s12235_s11 }
0x1e0e   : > { %v9330_v32 = vpop.f32.mrf.mxu0 }
0x1e3b   : > { %v7476_v35 = vpop.permute.xlu0 %7475 }
0x1e3c   : > { %v7481_v53 = vsel %vm12429_vm2, 0.0, %v7476_v35  ;;  %vm12438_vm2 = vcmask 465920  }
0x1e3d   : > { %v7483_v41 = vsel %vm10346_vm12, %v7481_v53, 0.0 }
0x1e3f   : > { %v7478_v62 = vpop.permute.xlu1 %7477 }
0x1e40   : > { %v7482_v28 = vsel %vm12433_vm3, 0.0, %v7478_v62  ;;  %vm12442_vm3 = vcmask 449536  }
0x1e41   : > { %v7484_v11 = vsel %vm10346_vm12, %v7482_v28, 0.0 }
0x1e43   : > { %v7488_v17 = vpop.permute.xlu0 %7487 }
0x1e44   : > { %v7493_v59 = vsel %vm12431_vm1, 0.0, %v7488_v17  ;;  %vm12440_vm1 = vmmov %vm12438_vm2 }
0x1e45   : > { %v7495_v38 = vadd.f32 %v7493_v59, %v7483_v41 }
0x1e47   : > { %v7490_v2 = vpop.permute.xlu1 %7489 }
0x1e48   : > { %v7494_v51 = vsel %vm12435_vm10, 0.0, %v7490_v2  ;;  %vm12445_vm10 = vmmov %vm12442_vm3 }
0x1e49   : > { %v7496_v20 = vadd.f32 %v7494_v51, %v7484_v11  ;;  %v9668_v11 = vld [vmem:[%s12451_s8] sm:$0xff]  }
0x1e4b   : > { %v7500_v5 = vpop.permute.xlu0 %7499 }
0x1e4c   : > { %v7505_v54 = vsel %vm12430_vm0, 0.0, %v7500_v5  ;;  %vm12439_vm0 = vmmov %vm12437_vm5 }
0x1e4d   : > { %v7507_v4 = vsel %vm10351_vm11, %v7505_v54, 0.0 }
0x1e4e   : > { %v7509_v48 = vadd.f32 %v7507_v4, %v7495_v38 }
0x1e4f   : > { %v7502_v56 = vpop.permute.xlu1 %7501 }
0x1e50   : > { %v7506_v27 = vsel %vm12434_vm9, 0.0, %v7502_v56 }
0x1e51   : > { %v7508_v24 = vsel %vm10351_vm11, %v7506_v27, 0.0 }
0x1e52   : > { %v7510_v7 = vadd.f32 %v7508_v24, %v7496_v20  ;;  %v9670_v24 = vld [vmem:[%s12451_s8 + $0x8] sm:$0xff]   ;;  %v9676_v20 = vld [vmem:[%s12451_s8 + $0x20] ss:$0 sps:$4 sm:$0xff]  }
0x1e53   : > { %v7514_v58 = vpop.permute.xlu0 %7513 }
0x1e54   : > { %v7519_v40 = vsel %vm12432_vm14, 0.0, %v7514_v58  ;;  %vm12441_vm14 = vcmask 457728  }
0x1e55   : > { %v7521_v21 = vsel %vm10346_vm12, %v7519_v40, 0.0  ;;  %vm12443_vm9 = vmmov %vm12441_vm14 }
0x1e56   : > { %v7523_v1 = vadd.f32 %v7521_v21, %v7509_v48 }
0x1e57   : > { %v7516_v25 = vpop.permute.xlu1 %7515 }
0x1e58   : > { %v7520_v19 = vsel %vm12436_vm13, 0.0, %v7516_v25  ;;  %v7525_v8 = vadd.f32 %v7523_v1, %v11746_v14  ;;  %vm12447_vm13 = vcmask 1043456  }
0x1e59   : > { %v7522_v23 = vsel %vm10346_vm12, %v7520_v19, 0.0  ;;  %v7870_v28 = vsel %vm12447_vm13, %v6748_v57, 0  ;;  %v9677_v57 = vld [vmem:[%s12444_s3 + $0x20] ss:$0 sps:$4 sm:$0xff]   ;;  %vm12460_vm13 = vcmask 138240  }
0x1e5a   : > { %v7524_v36 = vadd.f32 %v7522_v23, %v7510_v7 }
0x1e5c   : > { %v7526_v3 = vadd.f32 %v7524_v36, %v11748_v30 }
0x1e63   : > { %v7530_v47 = vpop.permute.xlu0 %7529 }
0x1e64   : > { %v7535_v16 = vsel %vm12437_vm5, %v7530_v47, 0.0 }
0x1e65   : > { %v7537_v42 = vsel %vm10351_vm11, %v7535_v16, 0.0 }
0x1e66   : > { %v7539_v22 = vadd.f32 %v7537_v42, %v7525_v8 }
0x1e67   : > { %v7532_v12 = vpop.permute.xlu1 %7531 }
0x1e68   : > { %v7536_v61 = vsel %vm12439_vm0, %v7532_v12, 0.0  ;;  %v9672_v12 = vld [vmem:[%s12451_s8 + $0x10] sm:$0xff]  }
0x1e69   : > { %v7538_v6 = vsel %vm10351_vm11, %v7536_v61, 0.0 }
0x1e6a   : > { %v7540_v35 = vadd.f32 %v7538_v6, %v7526_v3 }
0x1e6b   : > { %v7544_v13 = vpop.permute.xlu0 %7543 }
0x1e6c   : > { %v7549_v60 = vsel %vm12438_vm2, %v7544_v13, 0.0  ;;  %v9674_v13 = vld [vmem:[%s12451_s8 + $0x18] sm:$0xff]  }
0x1e6d   : > { %v7551_v31 = vsel %vm10346_vm12, %v7549_v60, 0.0 }
0x1e6e   : > { %v7553_v50 = vadd.f32 %v7551_v31, %v7539_v22 }
0x1e6f   : > { %v7546_v33 = vpop.permute.xlu1 %7545 }
0x1e70   : > { %v7550_v63 = vsel %vm12440_vm1, %v7546_v33, 0.0 }
0x1e71   : > { %v7552_v14 = vsel %vm10346_vm12, %v7550_v63, 0.0  ;;  %vm12446_vm12 = vcmask 523264  }
0x1e72   : > { %v7554_v56 = vadd.f32 %v7552_v14, %v7540_v35 }
0x1e73   : > { %v7558_v15 = vpop.permute.xlu0 %7557 }
0x1e74   : > { %v7563_v26 = vsel %vm12441_vm14, %v7558_v15, 0.0  ;;  %vm12454_vm14 = vcmask 130048  }
0x1e75   : > { %v7565_v62 = vadd.f32 %v7563_v26, %v7553_v50 }
0x1e77   : > { %v7560_v55 = vpop.permute.xlu1 %7559 }
0x1e78   : > { %v7564_v2 = vsel %vm12443_vm9, %v7560_v55, 0.0 }
0x1e79   : > { %v7566_v30 = vadd.f32 %v7564_v2, %v7554_v56 }
0x1e7b   : > { %v7570_v32 = vpop.permute.xlu0 %7569 }
0x1e7c   : > { %v7575_v17 = vsel %vm12442_vm3, %v7570_v32, 0.0  ;;  %vm12455_vm3 = vmmov %vm12454_vm14 }
0x1e7d   : > { %v7577_v5 = vsel %vm10351_vm11, %v7575_v17, 0.0  ;;  %vm12456_vm9 = vmmov %vm12455_vm3 }
0x1e7e   : > { %v7579_v58 = vadd.f32 %v7577_v5, %v7565_v62 }
0x1e7f   : > { %v7572_v53 = vpop.permute.xlu1 %7571 }
0x1e80   : > { %v7576_v54 = vsel %vm12445_vm10, %v7572_v53, 0.0  ;;  %v7593_v59 = vadd.f32 %v7586_v39, %v7579_v58  ;;  %v9671_v39 = vld [vmem:[%s12444_s3 + $0x8] sm:$0xff]   ;;  %vm12457_vm10 = vmmov %vm12455_vm3 }
0x1e81   : > { %v7578_v34 = vsel %vm10351_vm11, %v7576_v54, 0.0  ;;  %vm12448_vm11 = vcmask 64512  }
0x1e82   : > { %v7580_v40 = vadd.f32 %v7578_v34, %v7566_v30  ;;  %v7595_v4 = vmax.f32 %v7593_v59, 0.0  ;;  %vm12449_vm5 = vmmov %vm12448_vm11 }
0x1e83   : > { %vm12450_vm2 = vmmov %vm12449_vm5 }
0x1e84   : > { %v7594_v41 = vadd.f32 %v7591_v49, %v7580_v40  ;;  %v9673_v49 = vld [vmem:[%s12444_s3 + $0x10] sm:$0xff]   ;;  %vm12452_vm0 = vmmov %vm12450_vm2 }
0x1e85   : > { %vm12453_vm1 = vmmov %vm12452_vm0 }
0x1e86   : > { %v7596_v25 = vmax.f32 %v7594_v41, 0.0 }
0x1e88   : > { %v7597_v47 = vpack.c.bf16 %v7596_v25, %v7595_v4 }
0x1e8a   : > { %8935 = vmatmul.mubr.msk.bf16.vlgmr.msra.gmra.mxu1 %vm12446_vm12, %v7597_v47  ;;  %vm12458_vm12 = vmmov %vm12455_vm3 }
0x1e8b   : > { %7890 = vmatpush1.bf16.msra.mxu1 %v7870_v28  ;;  %7907 = vmatprep.mubr.bf16.mxu1 %v9743_v0 }
0x1e92   : > { %8952 = vmatmul.mubr.msk.bf16.vlgmr.msra.gmra.mxu1 %vm12448_vm11, %v9669_v37  ;;  %vm12461_vm11 = vmmov %vm12460_vm13 }
0x1e93   : > { %7917 = vmatprep.mubr.bf16.mxu1 %v9743_v0 }
0x1e9a   : > { %8953 = vmatmul.mubr.msk.bf16.gmra.mxu1 %vm12449_vm5, %v9671_v39  ;;  %vm12462_vm5 = vcmask 121856  }
0x1e9b   : > { %7927 = vmatprep.mubr.bf16.mxu1 %v9743_v0 }
0x1ea2   : > { %8954 = vmatmul.mubr.msk.bf16.gmra.mxu1 %vm12450_vm2, %v9673_v49  ;;  %vm12463_vm2 = vmmov %vm12462_vm5 }
0x1ea3   : > { %7937 = vmatprep.mubr.bf16.mxu1 %v9743_v0 }
0x1eaa   : > { %8955 = vmatmul.mubr.msk.bf16.gmra.mxu1 %vm12452_vm0, %v9675_v29  ;;  %vm12464_vm0 = vmmov %vm12455_vm3 }
0x1eab   : > { %7947 = vmatprep.mubr.bf16.mxu1 %v9743_v0 }
0x1eb2   : > { %8956 = vmatmul.mubr.msk.bf16.gmra.mxu1 %vm12453_vm1, %v9677_v57  ;;  %vm12465_vm1 = vmmov %vm12464_vm0 }
0x1eb3   : > { %8378 = vmatprep.mubr.bf16.mxu1 %v9743_v0 }
0x1f4a   : > { %v7683_v38 = vpop.f32.mrf.mxu1 }
0x1f4c   : > { %v7685_v27 = vpop.f32.mrf.mxu1 }
0x1f4e   : > { %v7687_v51 = vpop.f32.mrf.mxu1 }
0x1f4f   : > { %v7692_v19 = vpack.c.bf16 %v7687_v51, %v7683_v38 }
0x1f50   : > { %v7689_v21 = vpop.f32.mrf.mxu1 }
0x1f51   : > { %v7693_v48 = vpack.c.bf16 %v7689_v21, %v7685_v27 }
0x1f52   : > { %v7909_v1 = vpop.f32.mrf.mxu1 }
0x1f53   : > { %7764 = vmatprep.subr.bf16.mxu0 %v7693_v48 }
0x1f54   : > { %7765 = vmatpush1.bf16.msra.mxu0 %v7692_v19  ;;  %v7911_v16 = vpop.f32.mrf.mxu1 }
0x1f56   : > { %v7913_v23 = vpop.f32.mrf.mxu1 }
0x1f57   : > { %8941 = vmatmul.mubr.msk.bf16.vlgmr.msra.gmra.mxu0 %vm12454_vm14, %v9668_v11  ;;  %vm12466_vm14 = vcmask 7168  }
0x1f58   : > { %7792 = vmatprep.mubr.bf16.mxu0 %v9743_v0  ;;  %v7915_v7 = vpop.f32.mrf.mxu1 }
0x1f5a   : > { %v7919_v60 = vpop.f32.mrf.mxu1 }
0x1f5c   : > { %v7921_v42 = vpop.f32.mrf.mxu1 }
0x1f5e   : > { %v7923_v33 = vpop.f32.mrf.mxu1 }
0x1f5f   : > { %8942 = vmatmul.mubr.msk.bf16.gmra.mxu0 %vm12455_vm3, %v9670_v24  ;;  %vm12467_vm3 = vmmov %vm12466_vm14 }
0x1f60   : > { %7802 = vmatprep.mubr.bf16.mxu0 %v9743_v0  ;;  %v7925_v36 = vpop.f32.mrf.mxu1 }
0x1f62   : > { %v11837_v8 = vpop.f32.mrf.mxu1 }
0x1f64   : > { %v11839_v61 = vpop.f32.mrf.mxu1 }
0x1f66   : > { %v7933_v15 = vpop.f32.mrf.mxu1 }
0x1f67   : > { %8943 = vmatmul.mubr.msk.bf16.gmra.mxu0 %vm12456_vm9, %v9672_v12  ;;  %vm12468_vm9 = vcmask 1039360  }
0x1f68   : > { %7812 = vmatprep.mubr.bf16.mxu0 %v9743_v0  ;;  %v7935_v31 = vpop.f32.mrf.mxu1 }
0x1f6a   : > { %v7939_v22 = vpop.f32.mrf.mxu1 }
0x1f6c   : > { %v7941_v63 = vpop.f32.mrf.mxu1 }
0x1f6e   : > { %v7943_v6 = vpop.f32.mrf.mxu1 }
0x1f6f   : > { %8944 = vmatmul.mubr.msk.bf16.gmra.mxu0 %vm12457_vm10, %v9674_v13  ;;  %vm12469_vm10 = vmmov %vm12468_vm9 }
0x1f70   : > { %7822 = vmatprep.mubr.bf16.mxu0 %v9743_v0  ;;  %v7945_v26 = vpop.f32.mrf.mxu1 }
0x1f72   : > { %v7949_v3 = vpop.f32.mrf.mxu1 }
0x1f74   : > { %v7951_v50 = vpop.f32.mrf.mxu1 }
0x1f76   : > { %v7953_v55 = vpop.f32.mrf.mxu1 }
0x1f77   : > { %8945 = vmatmul.mubr.msk.bf16.gmra.mxu0 %vm12458_vm12, %v9676_v20  ;;  %vm12470_vm12 = vcmask 924672  }
0x1f78   : > { %8161 = vmatprep.mubr.bf16.mxu0 %v9743_v0  ;;  %v7954_v14 = vpop.f32.mrf.mxu1 }
0x2017   : > { %v7784_v32 = vpop.f32.mrf.mxu0 }
0x2018   : > { %v7910_v35 = vadd.f32 %v7909_v1, %v7784_v32  ;;  %v8318_v1 = vld [vmem:[%s12459_s6] sm:$0xff] }
0x2019   : > { %v7786_v62 = vpop.f32.mrf.mxu0 }
0x201a   : > { %v7912_v17 = vadd.f32 %v7911_v16, %v7786_v62  ;;  %7958 = vrot.lane.b32.xlu0 %v7910_v35, %s12282_s7 }
0x201b   : > { %v7788_v2 = vpop.f32.mrf.mxu0 }
0x201c   : > { %v7914_v5 = vadd.f32 %v7913_v23, %v7788_v2  ;;  %7960 = vrot.lane.b32.xlu1 %v7912_v17, %s12282_s7  ;;  %v11862_v23 = vpop.permute.xlu0 %8067 }
0x201d   : > { %v7790_v56 = vpop.f32.mrf.mxu0 }
0x201e   : > { %v7916_v58 = vadd.f32 %v7915_v7, %v7790_v56  ;;  %7970 = vrot.lane.b32.xlu0 %v7914_v5, %s12283_s14 }
0x201f   : > { %v7794_v53 = vpop.f32.mrf.mxu0 }
0x2020   : > { %v7920_v30 = vadd.f32 %v7919_v60, %v7794_v53  ;;  %7972 = vrot.lane.b32.xlu1 %v7916_v58, %s12283_s14 }
0x2021   : > { %v7796_v54 = vpop.f32.mrf.mxu0 }
0x2022   : > { %v7922_v34 = vadd.f32 %v7921_v42, %v7796_v54  ;;  %7982 = vrot.lane.b32.xlu0 %v7920_v30, %s12207_s0 }
0x2023   : > { %v7798_v59 = vpop.f32.mrf.mxu0 }
0x2024   : > { %v7924_v40 = vadd.f32 %v7923_v33, %v7798_v59  ;;  %7984 = vrot.lane.b32.xlu1 %v7922_v34, %s12207_s0 }
0x2025   : > { %v7800_v41 = vpop.f32.mrf.mxu0 }
0x2026   : > { %v7926_v4 = vadd.f32 %v7925_v36, %v7800_v41  ;;  %7996 = vrot.lane.b32.xlu0 %v7924_v40, %s12188_s1 }
0x2027   : > { %v11848_v25 = vpop.f32.mrf.mxu0 }
0x2028   : > { %7998 = vrot.lane.b32.xlu1 %v7926_v4, %s12188_s1 }
0x2029   : > { %v11851_v47 = vpop.f32.mrf.mxu0 }
0x202b   : > { %v7808_v28 = vpop.f32.mrf.mxu0 }
0x202c   : > { %v7934_v37 = vadd.f32 %v7933_v15, %v7808_v28 }
0x202d   : > { %v7810_v39 = vpop.f32.mrf.mxu0 }
0x202e   : > { %v7936_v49 = vadd.f32 %v7935_v31, %v7810_v39  ;;  %8012 = vrot.lane.b32.xlu0 %v7934_v37, %s12189_s15  ;;  %v7930_v39 = vadd.f32 %v11837_v8, %v11848_v25 }
0x202f   : > { %v7814_v29 = vpop.f32.mrf.mxu0 }
0x2030   : > { %v7940_v57 = vadd.f32 %v7939_v22, %v7814_v29  ;;  %8014 = vrot.lane.b32.xlu1 %v7936_v49, %s12189_s15  ;;  %v7932_v49 = vadd.f32 %v11839_v61, %v11851_v47 }
0x2031   : > { %v7816_v38 = vpop.f32.mrf.mxu0 }
0x2032   : > { %v7942_v27 = vadd.f32 %v7941_v63, %v7816_v38  ;;  %8026 = vrot.lane.b32.xlu0 %v7940_v57, %s12148_s18 }
0x2033   : > { %v7818_v51 = vpop.f32.mrf.mxu0 }
0x2034   : > { %v7944_v21 = vadd.f32 %v7943_v6, %v7818_v51  ;;  %8028 = vrot.lane.b32.xlu1 %v7942_v27, %s12148_s18 }
0x2035   : > { %v7820_v48 = vpop.f32.mrf.mxu0 }
0x2036   : > { %v7946_v19 = vadd.f32 %v7945_v26, %v7820_v48  ;;  %8040 = vrot.lane.b32.xlu0 %v7944_v21, %s12150_s23 }
0x2037   : > { %v7824_v11 = vpop.f32.mrf.mxu0 }
0x2038   : > { %8042 = vrot.lane.b32.xlu1 %v7946_v19, %s12150_s23  ;;  %v7950_v12 = vadd.f32 %v7949_v3, %v7824_v11 }
0x2039   : > { %v7826_v24 = vpop.f32.mrf.mxu0 }
0x203a   : > { %v7952_v13 = vadd.f32 %v7951_v50, %v7826_v24 }
0x203b   : > { %v7828_v20 = vpop.f32.mrf.mxu0 }
0x203c   : > { %8052 = vrot.lane.b32.xlu1 %v7950_v12, %s12151_s2  ;;  %8054 = vrot.lane.b32.xlu0 %v7952_v13, %s12151_s2 }
0x203d   : > { %v7829_v16 = vpop.f32.mrf.mxu0 }
0x2040   : > { %8321 = vperm.xlu1 %9412, %v8318_v1  }
0x208c   : > { %v7959_v7 = vpop.permute.xlu0 %7958 }
0x208d   : > { %v7965_v63 = vsel %vm12460_vm13, 0.0, %v7959_v7  ;;  %vm12471_vm13 = vmmov %vm12470_vm12 }
0x208e   : > { %v7961_v60 = vpop.permute.xlu1 %7960  ;;  %v7966_v35 = vsel %vm10096_vm4, %v7965_v63, 0.0 }
0x208f   : > { %v7962_v6 = vsel %vm12461_vm11, %v7959_v7, %v7961_v60  ;;  %vm12472_vm11 = vcmask 916480  }
0x2090   : > { %v7971_v42 = vpop.permute.xlu0 %7970  ;;  %v7967_v62 = vsel %vm10100_vm6, %v7962_v6, 0.0 }
0x2091   : > { %v7977_v50 = vsel %vm12464_vm0, 0.0, %v7971_v42 }
0x2092   : > { %v7973_v33 = vpop.permute.xlu1 %7972  ;;  %v7978_v5 = vadd.f32 %v7977_v50, %v7966_v35  ;;  %v9679_v35 = vld [vmem:[%s10014_s4 + $0x8] sm:$0xff]  }
0x2093   : > { %v7974_v55 = vsel %vm12465_vm1, %v7971_v42, %v7973_v33  ;;  %vm12476_vm1 = vcmask 1043456  }
0x2094   : > { %v7983_v36 = vpop.permute.xlu0 %7982  ;;  %v7979_v56 = vadd.f32 %v7974_v55, %v7967_v62  ;;  %v9681_v62 = vld [vmem:[%s10014_s4 + $0x18] sm:$0xff]  }
0x2095   : > { %v7989_v26 = vsel %vm12462_vm5, 0.0, %v7983_v36  ;;  %vm12473_vm5 = vmmov %vm12472_vm11 }
0x2096   : > { %v7985_v15 = vpop.permute.xlu1 %7984  ;;  %v7990_v17 = vsel %vm10104_vm7, %v7989_v26, 0.0 }
0x2097   : > { %v7986_v3 = vsel %vm12463_vm2, %v7983_v36, %v7985_v15  ;;  %v7992_v54 = vadd.f32 %v7990_v17, %v7978_v5  ;;  %vm12474_vm2 = vcmask 908288   ;;  %v9682_v17 = vld [vmem:[%s10014_s4 + $0x20] ss:$0 sps:$4 sm:$0xff]  }
0x2098   : > { %v7997_v31 = vpop.permute.xlu0 %7996  ;;  %v7991_v2 = vsel %vm10108_vm8, %v7986_v3, 0.0  ;;  %vm12475_vm0 = vmmov %vm12474_vm2 }
0x2099   : > { %v8003_v14 = vsel %vm12466_vm14, 0.0, %v7997_v31  ;;  %v7993_v34 = vadd.f32 %v7991_v2, %v7979_v56  ;;  %vm12477_vm14 = vmmov %vm12476_vm1 }
0x209a   : > { %v7999_v22 = vpop.permute.xlu1 %7998  ;;  %v8004_v58 = vsel %vm10096_vm4, %v8003_v14, 0.0 }
0x209b   : > { %v8000_v32 = vsel %vm12467_vm3, %v7997_v31, %v7999_v22  ;;  %v8006_v40 = vadd.f32 %v8004_v58, %v7992_v54  ;;  %vm12478_vm3 = vcmask 64512  }
0x209c   : > { %v8005_v53 = vsel %vm10100_vm6, %v8000_v32, 0.0  ;;  %v9678_v32 = vld [vmem:[%s10014_s4] sm:$0xff]  }
0x209d   : > { %v8007_v41 = vadd.f32 %v8005_v53, %v7993_v34  ;;  %v8008_v27 = vadd.f32 %v8006_v40, %v7930_v39 }
0x209f   : > { %v8009_v51 = vadd.f32 %v8007_v41, %v7932_v49 }
0x20a0   : > { %v8013_v30 = vpop.permute.xlu0 %8012 }
0x20a2   : > { %v8015_v59 = vpop.permute.xlu1 %8014 }
0x20a3   : > { %v8016_v4 = vsel %vm12468_vm9, %v8013_v30, %v8015_v59  ;;  %v8019_v28 = vsel %vm12469_vm10, %v8015_v59, 0.0  ;;  %vm12479_vm9 = vmmov %vm12478_vm3 }
0x20a4   : > { %v8027_v37 = vpop.permute.xlu0 %8026  ;;  %v8020_v29 = vsel %vm10104_vm7, %v8016_v4, 0.0  ;;  %v8021_v57 = vsel %vm10108_vm8, %v8019_v28, 0.0  ;;  %vm12480_vm10 = vmmov %vm12478_vm3 }
0x20a5   : > { %v8022_v61 = vadd.f32 %v8020_v29, %v8008_v27  ;;  %v8023_v25 = vadd.f32 %v8021_v57, %v8009_v51  ;;  %v8331_v57 = vld [vmem:[%s12483_s10] sm:$0xff] }
0x20a6   : > { %v8029_v38 = vpop.permute.xlu1 %8028 }
0x20a7   : > { %v8030_v21 = vsel %vm12470_vm12, %v8027_v37, %v8029_v38  ;;  %v8033_v48 = vsel %vm12471_vm13, %v8029_v38, 0.0  ;;  %vm12481_vm12 = vmmov %vm12478_vm3 }
0x20a8   : > { %v8034_v19 = vsel %vm10096_vm4, %v8030_v21, 0.0  ;;  %v8035_v8 = vsel %vm10100_vm6, %v8033_v48, 0.0  ;;  %v8041_v47 = vpop.permute.xlu0 %8040  ;;  %vm12482_vm13 = vmmov %vm12478_vm3 }
0x20a9   : > { %v8036_v24 = vadd.f32 %v8034_v19, %v8022_v61  ;;  %v8037_v12 = vadd.f32 %v8035_v8, %v8023_v25 }
0x20aa   : > { %v8043_v11 = vpop.permute.xlu1 %8042 }
0x20ab   : > { %v8044_v13 = vsel %vm12472_vm11, %v8041_v47, %v8043_v11  ;;  %v8047_v20 = vsel %vm12473_vm5, %v8043_v11, 0.0  ;;  %vm12484_vm11 = vcmask 138240  }
0x20ac   : > { %v8048_v7 = vadd.f32 %v8044_v13, %v8036_v24  ;;  %v8049_v60 = vadd.f32 %v8047_v20, %v8037_v12  ;;  %vm12485_vm5 = vmmov %vm12484_vm11 }
0x20ae   : > { %v8053_v1 = vpop.permute.xlu1 %8052  ;;  %v8055_v16 = vpop.permute.xlu0 %8054 }
0x20af   : > { %v8056_v42 = vsel %vm12474_vm2, %v8053_v1, %v8055_v16  ;;  %v8059_v33 = vsel %vm12475_vm0, %v8055_v16, 0.0  ;;  %vm12486_vm2 = vcmask 121856  }
0x20b0   : > { %v8060_v36 = vsel %vm10104_vm7, %v8056_v42, 0.0  ;;  %v8061_v15 = vsel %vm10108_vm8, %v8059_v33, 0.0  ;;  %vm12487_vm0 = vmmov %vm12486_vm2 }
0x20b1   : > { %v8062_v31 = vadd.f32 %v8060_v36, %v8048_v7  ;;  %v8063_v22 = vadd.f32 %v8061_v15, %v8049_v60 }
0x20b3   : > { %v8070_v63 = vadd.f32 %v11862_v23, %v8062_v31  ;;  %v8071_v6 = vadd.f32 %v11862_v23, %v8063_v22  ;;  %v9680_v23 = vld [vmem:[%s10014_s4 + $0x10] sm:$0xff]  }
0x20b5   : > { %v8073_v26 = vmax.f32 %v8071_v6, 0.0  ;;  %v8072_v3 = vmax.f32 %v8070_v63, 0.0 }
0x20b7   : > { %v8075_v50 = vpack.c.bf16 %v8073_v26, %v8073_v26  ;;  %v8074_v55 = vpack.c.bf16 %v8072_v3, %v8072_v3 }
0x20b9   : > { %8962 = vmatprep.subr.msk.bf16.mxu0 %vm12476_vm1, %v8075_v50  ;;  %v8124_v14 = vsel %vm12477_vm14, %v8074_v55, 0  ;;  %vm12488_vm1 = vcmask 130048  }
0x20ba   : > { %8144 = vmatpush1.bf16.msra.mxu0 %v8124_v14  ;;  %vm12489_vm14 = vmmov %vm12488_vm1 }
0x20bb   : > { %v8322_v51 = vpop.permute.xlu1 %8321 }
0x20bd   : > { %8963 = vmatmul.mubr.msk.bf16.vlgmr.msra.gmra.mxu0 %vm12478_vm3, %v9678_v32  ;;  %vm12490_vm3 = vcmask 7168  }
0x20be   : > { %8171 = vmatprep.mubr.bf16.mxu0 %v9743_v0 }
0x20c5   : > { %8964 = vmatmul.mubr.msk.bf16.gmra.mxu0 %vm12479_vm9, %v9679_v35  ;;  %vm12491_vm9 = vmmov %vm12490_vm3 }
0x20c6   : > { %8181 = vmatprep.mubr.bf16.mxu0 %v9743_v0 }
0x20cd   : > { %8965 = vmatmul.mubr.msk.bf16.gmra.mxu0 %vm12480_vm10, %v9680_v23  ;;  %vm12492_vm10 = vcmask 1039360  }
0x20ce   : > { %8191 = vmatprep.mubr.bf16.mxu0 %v9743_v0 }
0x20d5   : > { %8966 = vmatmul.mubr.msk.bf16.gmra.mxu0 %vm12481_vm12, %v9681_v62  ;;  %vm12493_vm12 = vmmov %vm12492_vm10 }
0x20d6   : > { %8201 = vmatprep.mubr.bf16.mxu0 %v9743_v0 }
0x20dd   : > { %8967 = vmatmul.mubr.msk.bf16.gmra.mxu0 %vm12482_vm13, %v9682_v17  ;;  %vm12494_vm13 = vcmask 924672  }
0x217d   : > { %v8163_v2 = vpop.f32.mrf.mxu0 }
0x217e   : > { %8212 = vrot.lane.b32.xlu1 %v8163_v2, %s12282_s7 }
0x217f   : > { %v8165_v5 = vpop.f32.mrf.mxu0 }
0x2180   : > { %8214 = vrot.lane.b32.xlu0 %v8165_v5, %s12282_s7 }
0x2181   : > { %v8167_v56 = vpop.f32.mrf.mxu0 }
0x2182   : > { %8224 = vrot.lane.b32.xlu1 %v8167_v56, %s12283_s14 }
0x2183   : > { %v8169_v58 = vpop.f32.mrf.mxu0 }
0x2184   : > { %8226 = vrot.lane.b32.xlu0 %v8169_v58, %s12283_s14  ;;  %s12499_s14 = sld [smem:[#allocation41_spill]] }
0x2185   : > { %v8173_v53 = vpop.f32.mrf.mxu0 }
0x2186   : > { %8236 = vrot.lane.b32.xlu1 %v8173_v53, %s12207_s0 }
0x2187   : > { %v8175_v30 = vpop.f32.mrf.mxu0 }
0x2188   : > { %8238 = vrot.lane.b32.xlu0 %v8175_v30, %s12207_s0 }
0x2189   : > { %v8177_v0 = vpop.f32.mrf.mxu0 }
0x218a   : > { %8250 = vrot.lane.b32.xlu1 %v8177_v0, %s12188_s1  ;;  %v8330_v45 = vld [vmem:[%s12499_s14] sm:$0xf] }
0x218b   : > { %v8179_v54 = vpop.f32.mrf.mxu0 }
0x218c   : > { %8252 = vrot.lane.b32.xlu0 %v8179_v54, %s12188_s1 }
0x218d   : > { %v8183_v34 = vpop.f32.mrf.mxu0 }
0x218f   : > { %v8185_v59 = vpop.f32.mrf.mxu0 }
0x2191   : > { %v8187_v40 = vpop.f32.mrf.mxu0 }
0x2192   : > { %8266 = vrot.lane.b32.xlu1 %v8187_v40, %s12189_s15 }
0x2193   : > { %v8189_v41 = vpop.f32.mrf.mxu0 }
0x2194   : > { %8268 = vrot.lane.b32.xlu0 %v8189_v41, %s12189_s15 }
0x2195   : > { %v8193_v4 = vpop.f32.mrf.mxu0 }
0x2196   : > { %8280 = vrot.lane.b32.xlu1 %v8193_v4, %s12148_s18 }
0x2197   : > { %v8195_v28 = vpop.f32.mrf.mxu0 }
0x2198   : > { %8282 = vrot.lane.b32.xlu0 %v8195_v28, %s12148_s18  ;;  %s1571_s18 = scalar_lea.vmem %s10029_s12, %s10709_s26 }
0x2199   : > { %v8197_v37 = vpop.f32.mrf.mxu0 }
0x219a   : > { %8294 = vrot.lane.b32.xlu1 %v8197_v37, %s12150_s23 }
0x219b   : > { %v8199_v39 = vpop.f32.mrf.mxu0 }
0x219c   : > { %8296 = vrot.lane.b32.xlu0 %v8199_v39, %s12150_s23 }
0x219d   : > { %v8203_v49 = vpop.f32.mrf.mxu0 }
0x219f   : > { %v8205_v29 = vpop.f32.mrf.mxu0 }
0x21a0   : > { %8306 = vrot.lane.b32.xlu0 %v8203_v49, %s12151_s2  ;;  %8308 = vrot.lane.b32.xlu1 %v8205_v29, %s12151_s2 }
0x21a1   : > { %v8207_v38 = vpop.f32.mrf.mxu0 }
0x21a3   : > { %v8208_v27 = vpop.f32.mrf.mxu0 }
0x21a4   : > { %8334 = vperm.xlu0 %9411, %v8331_v57  }
0x21f0   : > { %v8213_v21 = vpop.permute.xlu1 %8212 }
0x21f1   : > { %v8219_v24 = vsel %vm12484_vm11, 0.0, %v8213_v21  ;;  %vm12495_vm11 = vmmov %vm12494_vm13 }
0x21f2   : > { %v8215_v48 = vpop.permute.xlu0 %8214  ;;  %v8220_v42 = vsel %vm10096_vm4, %v8219_v24, 0.0 }
0x21f3   : > { %v8216_v12 = vsel %vm12485_vm5, %v8213_v21, %v8215_v48  ;;  %vm12496_vm5 = vcmask 916480  }
0x21f4   : > { %v8225_v19 = vpop.permute.xlu1 %8224  ;;  %v8221_v33 = vsel %vm10100_vm6, %v8216_v12, 0.0 }
0x21f5   : > { %v8231_v1 = vsel %vm12488_vm1, 0.0, %v8225_v19 }
0x21f6   : > { %v8227_v8 = vpop.permute.xlu0 %8226  ;;  %v8232_v31 = vadd.f32 %v8231_v1, %v8220_v42 }
0x21f7   : > { %v8228_v16 = vsel %vm12489_vm14, %v8225_v19, %v8227_v8 }
0x21f8   : > { %v8237_v61 = vpop.permute.xlu1 %8236  ;;  %v8233_v22 = vadd.f32 %v8228_v16, %v8221_v33 }
0x21f9   : > { %v8243_v13 = vsel %vm12486_vm2, 0.0, %v8237_v61  ;;  %vm12497_vm2 = vmmov %vm12496_vm5 }
0x21fa   : > { %v8239_v25 = vpop.permute.xlu0 %8238  ;;  %v8244_v36 = vsel %vm10104_vm7, %v8243_v13, 0.0 }
0x21fb   : > { %v8240_v20 = vsel %vm12487_vm0, %v8237_v61, %v8239_v25  ;;  %v8246_v3 = vadd.f32 %v8244_v36, %v8232_v31  ;;  %vm12498_vm0 = vcmask 908288   ;;  %v8404_v31 = vld [vmem:[%s1571_s18] sm:$0xf] }
0x21fc   : > { %v8251_v47 = vpop.permute.xlu1 %8250  ;;  %v8245_v15 = vsel %vm10108_vm8, %v8240_v20, 0.0 }
0x21fd   : > { %v8257_v7 = vsel %vm12490_vm3, 0.0, %v8251_v47  ;;  %v8247_v50 = vadd.f32 %v8245_v15, %v8233_v22 }
0x21fe   : > { %v8253_v11 = vpop.permute.xlu0 %8252  ;;  %v8258_v63 = vsel %vm10096_vm4, %v8257_v7, 0.0  ;;  %v8388_v7 = vunpack.c.l.bf16 %v11367_v18 }
0x21ff   : > { %v8254_v60 = vsel %vm12491_vm9, %v8251_v47, %v8253_v11  ;;  %v8260_v14 = vadd.f32 %v8258_v63, %v8246_v3 }
0x2200   : > { %v8259_v6 = vsel %vm10100_vm6, %v8254_v60, 0.0 }
0x2201   : > { %v8261_v32 = vadd.f32 %v8259_v6, %v8247_v50  ;;  %v8262_v56 = vadd.f32 %v8260_v14, %v8183_v34 }
0x2203   : > { %v8263_v58 = vadd.f32 %v8261_v32, %v8185_v59 }
0x2204   : > { %v8267_v26 = vpop.permute.xlu1 %8266 }
0x2206   : > { %v8269_v55 = vpop.permute.xlu0 %8268 }
0x2207   : > { %v8270_v35 = vsel %vm12492_vm10, %v8267_v26, %v8269_v55  ;;  %v8273_v23 = vsel %vm12493_vm12, %v8269_v55, 0.0 }
0x2208   : > { %v8281_v62 = vpop.permute.xlu1 %8280  ;;  %v8274_v17 = vsel %vm10104_vm7, %v8270_v35, 0.0  ;;  %v8275_v2 = vsel %vm10108_vm8, %v8273_v23, 0.0 }
0x2209   : > { %v8276_v40 = vadd.f32 %v8274_v17, %v8262_v56  ;;  %v8277_v41 = vadd.f32 %v8275_v2, %v8263_v58 }
0x220a   : > { %v8283_v5 = vpop.permute.xlu0 %8282 }
0x220b   : > { %v8284_v53 = vsel %vm12494_vm13, %v8281_v62, %v8283_v5  ;;  %v8287_v30 = vsel %vm12495_vm11, %v8283_v5, 0.0 }
0x220c   : > { %v8288_v0 = vsel %vm10096_vm4, %v8284_v53, 0.0  ;;  %v8289_v54 = vsel %vm10100_vm6, %v8287_v30, 0.0  ;;  %v8295_v4 = vpop.permute.xlu1 %8294  ;;  %vm12500_vm4 = vmmov %vm12498_vm0  ;;  %vm12501_vm6 = vcmask 1043456  }
0x220d   : > { %v8290_v37 = vadd.f32 %v8288_v0, %v8276_v40  ;;  %v8291_v39 = vadd.f32 %v8289_v54, %v8277_v41  ;;  %vm12502_vm1 = vmmov %vm12501_vm6 }
0x220e   : > { %v8297_v28 = vpop.permute.xlu0 %8296 }
0x220f   : > { %v8298_v49 = vsel %vm12496_vm5, %v8295_v4, %v8297_v28  ;;  %v8301_v34 = vsel %vm12497_vm2, %v8297_v28, 0.0 }
0x2210   : > { %v8302_v57 = vadd.f32 %v8298_v49, %v8290_v37  ;;  %v8303_v38 = vadd.f32 %v8301_v34, %v8291_v39 }
0x2212   : > { %v8307_v59 = vpop.permute.xlu0 %8306  ;;  %v8309_v29 = vpop.permute.xlu1 %8308 }
0x2213   : > { %v8310_v43 = vsel %vm12498_vm0, %v8307_v59, %v8309_v29  ;;  %v8313_v44 = vsel %vm12500_vm4, %v8309_v29, 0.0 }
0x2214   : > { %v8314_v27 = vsel %vm10104_vm7, %v8310_v43, 0.0  ;;  %v8315_v21 = vsel %vm10108_vm8, %v8313_v44, 0.0  ;;  %vm12503_vm7 = vcmask 64512  }
0x2215   : > { %v8316_v48 = vadd.f32 %v8314_v27, %v8302_v57  ;;  %v8317_v19 = vadd.f32 %v8315_v21, %v8303_v38 }
0x2217   : > { %v8324_v8 = vadd.f32 %v8322_v51, %v8316_v48  ;;  %v8325_v61 = vadd.f32 %v8322_v51, %v8317_v19  ;;  %v8387_v51 = vunpack.c.l.bf16 %v11365_v52 }
0x2219   : > { %v8327_v25 = vmax.f32 %v8325_v61, 0.0  ;;  %v8326_v47 = vmax.f32 %v8324_v8, 0.0 }
0x221b   : > { %v8329_v11 = vpack.c.bf16 %v8327_v25, %v8327_v25  ;;  %v8328_v24 = vpack.c.bf16 %v8326_v47, %v8326_v47 }
0x221d   : > { %8968 = vmatprep.subr.msk.bf16.mxu1 %vm12501_vm6, %v8329_v11  ;;  %v8341_v12 = vsel %vm12502_vm1, %v8328_v24, 0 }
0x221e   : > { %8361 = vmatpush1.bf16.msra.mxu1 %v8341_v12 }
0x221f   : > { %v8335_v46 = vpop.permute.xlu0 %8334 }
0x2221   : > { %8969 = vmatmul.mubr.msk.bf16.vlgmr.msra.gmra.mxu1 %vm12503_vm7, %v8330_v45 }
0x22e1   : > { %v8380_v13 = vpop.f32.mrf.mxu1 }
0x22e2   : > { %v8381_v20 = vadd.f32 %v8380_v13, %v8335_v46 }
0x22e3   : > { %v8382_v1 = vpop.f32.mrf.mxu1 }
0x22e4   : > { %v8383_v16 = vadd.f32 %v8382_v1, %v8335_v46  ;;  %v8389_v42 = vadd.f32 %v8387_v51, %v8381_v20 }
0x22e5   : > { %v8384_v60 = vpop.f32.mrf.mxu1 }
0x22e6   : > { %v8390_v33 = vadd.f32 %v8388_v7, %v8383_v16 }
0x22e7   : > { %v8385_v36 = vpop.f32.mrf.mxu1 }
0x22e8   : > { %v8970_v15 = vpack.c.bf16 %v8390_v33, %v8389_v42 }
0x22ea   : > { %v8402_v22 = vrot.slane %v8970_v15, %v10715_v9 }
0x22ec   : > { %v8405_v63 = vsel %vm10719_vm15, %v8402_v22, %v8404_v31 }
0x22ed   : > { %8406 = vst [vmem:[%s1571_s18] sm:$0xf] %v8405_v63 }
0x22ee PF: > { %s116_s28 = sadd.s32 1, %s9689_s28  }
0x22ef   : > { %p113_p4 = scmp.ge.s32.totalorder %s116_s28, 4  }
0x22f1   :  { %115 = sbr.rel (!%p113_p4) target bundleno = 98 (0x62), region = 326 }

</bundles_post_ra>
